<compile_context>
chip_gen: v6e
topology: v6e:2x2x1
jax: 0.10.0
libtpu: 0.0.40
codegen_flags: <defaults>
</compile_context>

<pallas_src>
import math

import jax
import jax.numpy as jnp
import numpy as np
from jax.experimental import pallas as pl
from jax.experimental.pallas import tpu as pltpu


# ---------------------------------------------------------------------------
# Kernel
# ---------------------------------------------------------------------------
def _mha_kernel(x_ref, wqkv_ref, bqkv_ref, sel_ref, selt_ref, wo_ref, bo_ref,
                o_ref, attn_ref):
    """Multi-head self-attention over the depth axis for a (nbc, D, HW) tile.

    x_ref/o_ref: (nbc, D, HW)          wqkv_ref: (HW, 3*HW)   bqkv_ref: (1, 3*HW)
    sel_ref:     (HW, G)  0/1 group-compaction matrix, G = H * num_heads
    selt_ref:    (G, HW)  its transpose (group -> lane expansion)
    wo_ref:      (HW, HW)              bo_ref:   (1, HW)
    attn_ref:    (nbc, D, HW) f32 VMEM scratch
    """
    nbc, d, hw = x_ref.shape
    n_groups = sel_ref.shape[1]
    mm_dt = wqkv_ref.dtype          # f32 by default; bf16 only if opted in

    x2 = x_ref[...].reshape(nbc * d, hw).astype(jnp.float32)

    # Fused block-diagonal Q/K/V projection: one MXU matmul covers every
    # spatial row h and all three of q, k, v.  q already carries 1/sqrt(dh).
    qkv = jnp.dot(x2.astype(mm_dt), wqkv_ref[...],
                  preferred_element_type=jnp.float32) + bqkv_ref[...]
    q = qkv[:, :hw].reshape(nbc, d, hw)
    k = qkv[:, hw:2 * hw].reshape(nbc, d, hw)
    v = qkv[:, 2 * hw:].reshape(nbc, d, hw)

    # Query-depth blocking (fully unrolled; D is a small static shape).  Each
    # iteration only keeps an (nbc, d, hw) slice live, so nothing spills.
    for i in range(d):
        qi = q[:, i:i + 1, :]                                   # (nbc, 1, hw)
        s_lane = qi * k                                         # (nbc, d, hw)

        # Compact: one score lane per (spatial-row, head) group -> de-replicated
        # softmax (dh-times less exp/max/sum work on the single EUP/XLU).
        s_c = jnp.dot(s_lane.reshape(nbc * d, hw).astype(mm_dt), sel_ref[...],
                      preferred_element_type=jnp.float32
                      ).reshape(nbc, d, n_groups)

        # Numerically-stable softmax over the key-depth axis (axis=1).
        m = jnp.max(s_c, axis=1, keepdims=True)
        p = jnp.exp(s_c - m)
        denom = jnp.sum(p, axis=1, keepdims=True)
        r = pl.reciprocal(denom, approx=True)                   # EUP vrcp
        r = r * (2.0 - denom * r)                               # one Newton step
        p = p * r

        # Re-expand probabilities to head_dim lanes and reduce over key depth.
        p_l = jnp.dot(p.reshape(nbc * d, n_groups).astype(mm_dt), selt_ref[...],
                      preferred_element_type=jnp.float32).reshape(nbc, d, hw)
        attn_ref[:, i, :] = jnp.sum(p_l * v, axis=1)            # (nbc, hw)

    # Fused block-diagonal output projection (one batched MXU matmul).
    out = jnp.dot(attn_ref[...].reshape(nbc * d, hw).astype(mm_dt), wo_ref[...],
                  preferred_element_type=jnp.float32) + bo_ref[...]
    o_ref[...] = out.reshape(nbc, d, hw).astype(o_ref.dtype)


# ---------------------------------------------------------------------------
# Generation-aware budgeting & tiling
# ---------------------------------------------------------------------------
def _tpu_generation():
    """(vmem_capacity_bytes, has_two_tensorcores) with safe fallbacks."""
    cap = None
    try:
        cap = int(getattr(pltpu.get_tpu_info(), "vmem_capacity_bytes"))
    except Exception:
        cap = None
    kind = ""
    try:
        kind = jax.devices()[0].device_kind.lower()
    except Exception:
        pass
    if cap is None or cap <= 0:
        cap = (64 if "7" in kind else 128) * 1024 * 1024
    # v7x / v4 / v5p expose 2 TensorCores worth of grid parallelism; v5e/v6e 1.
    two_tc = ("7" in kind) or ("v4" in kind) or ("v5p" in kind) \
        or (cap <= 64 * 1024 * 1024)
    return cap, two_tc


def _pick_bc_tile(bc, d, hw, n_groups, budget_bytes, prefer_even_grid):
    """Largest divisor of bc whose (headroomed) working set fits the budget.
    Even grid length is only preferred on 2-TensorCore devices."""
    isz = 4  # f32

    fixed = (4 * hw * hw + 2 * hw * n_groups + 4 * hw) * isz   # resident weights

    def footprint(t):
        blocks = 2 * 2 * t * d * hw * isz               # double-buffered in/out
        persist = 8 * t * d * hw * isz                   # x2, qkv, q, k, v, attn
        per_row = (4 * t * d * hw + 3 * t * d * n_groups) * isz  # loop live set
        return int(1.3 * (fixed + blocks + persist + per_row))   # compiler headroom

    divisors = [t for t in range(1, bc + 1) if bc % t == 0]
    fitting = [t for t in divisors if footprint(t) <= budget_bytes] or [1]
    nbc = max(fitting)
    if prefer_even_grid:
        even = [t for t in fitting if (bc // t) % 2 == 0 and 2 * t >= nbc]
        if even:
            return max(even)
    return nbc


# ---------------------------------------------------------------------------
# Weight packing (wrapper side, done once)
# ---------------------------------------------------------------------------
def _pack_params(params, height, num_heads, use_bf16_weights=False):
    """Pack nn.MultiheadAttention weights into lane-dense block-diagonal form.
    height == 1 means E is already lane-dense (no kron packing)."""
    e = params['wq'].shape[0]
    dh = e // num_heads
    scale = 1.0 / math.sqrt(dh)
    eye_h = jnp.eye(height, dtype=jnp.float32)

    w_q = jnp.kron(eye_h, params['wq'].T * scale)           # (H*E, H*E)
    w_k = jnp.kron(eye_h, params['wk'].T)
    w_v = jnp.kron(eye_h, params['wv'].T)
    w_qkv = jnp.concatenate([w_q, w_k, w_v], axis=1)        # (H*E, 3*H*E)
    b_qkv = jnp.concatenate([jnp.tile(params['bq'][0] * scale, height),
                             jnp.tile(params['bk'][0], height),
                             jnp.tile(params['bv'][0], height)])[None, :]

    n_groups = height * num_heads
    sel = jnp.kron(jnp.eye(n_groups, dtype=jnp.float32),
                   jnp.ones((dh, 1), jnp.float32))          # (H*E, H*heads)
    sel_t = sel.T                                           # (H*heads, H*E)

    w_o = jnp.kron(eye_h, params['wo'].T)                   # (H*E, H*E)
    b_o = jnp.tile(params['bo'][0], height)[None, :]        # (1, H*E)

    if use_bf16_weights:
        # Optional v6e/v7x MXU fast path (exceeds the strict 1e-4 check here).
        w_qkv = w_qkv.astype(jnp.bfloat16)
        sel = sel.astype(jnp.bfloat16)       # 0/1 -> exact in bf16
        sel_t = sel_t.astype(jnp.bfloat16)
        w_o = w_o.astype(jnp.bfloat16)
    return w_qkv, b_qkv, sel, sel_t, w_o, b_o


# ---------------------------------------------------------------------------
# pallas_call wrapper
# ---------------------------------------------------------------------------
def multihead_self_attention_rows(x3, w_qkv, b_qkv, sel, sel_t, w_o, b_o):
    """x3: (rows, D, HW); attention over D independently per row (and per head
    group of lanes within HW)."""
    bc, d, hw = x3.shape
    n_groups = sel.shape[1]

    vmem_cap, two_tc = _tpu_generation()
    vmem_limit = min(int(vmem_cap * 3 // 4), 96 * 1024 * 1024)
    nbc = _pick_bc_tile(bc, d, hw, n_groups, vmem_limit, prefer_even_grid=two_tc)
    grid = (bc // nbc,)

    x_spec = pl.BlockSpec((nbc, d, hw), lambda i: (i, 0, 0))

    def full(arr):
        return pl.BlockSpec(arr.shape, lambda i: (0,) * arr.ndim)

    return pl.pallas_call(
        _mha_kernel,
        out_shape=jax.ShapeDtypeStruct((bc, d, hw), x3.dtype),
        grid=grid,
        in_specs=[x_spec,
                  full(w_qkv), full(b_qkv), full(sel), full(sel_t),
                  full(w_o), full(b_o)],
        out_specs=x_spec,
        scratch_shapes=[pltpu.VMEM((nbc, d, hw), jnp.float32)],
        compiler_params=pltpu.CompilerParams(
            dimension_semantics=("parallel",),
            vmem_limit_bytes=vmem_limit),
    )(x3, w_qkv, b_qkv, sel, sel_t, w_o, b_o)


def attention_block_forward(x, params, num_heads, use_bf16_weights=False):
    """Reproduces attention_block.forward for x: (B, C, D, H, W), H == W."""
    b, c, d, h, w = x.shape
    assert h == w, "module's final .view(depth, batch, -1, W, W) requires H == W"
    e = w
    assert e % num_heads == 0

    if e < 128:
        # E is narrow: fold the spatial-row axis into the lane dim (free
        # reshape, no HBM transpose) and use block-diagonal kron weights.
        x3 = x.reshape(b * c, d, h * e)
        packed = _pack_params(params, h, num_heads, use_bf16_weights)
        out3 = multihead_self_attention_rows(x3, *packed)
        return out3.reshape(b, c, d, h, w)

    # Escape hatch: E already lane-dense -> plain weights (no H^2 blow-up, no
    # wasted MACs); one XLA transpose pass outside the kernel brings H before D.
    xt = jnp.transpose(x, (0, 1, 3, 2, 4)).reshape(b * c * h, d, e)
    packed = _pack_params(params, 1, num_heads, use_bf16_weights)
    out3 = multihead_self_attention_rows(xt, *packed)
    return jnp.transpose(out3.reshape(b, c, h, d, e), (0, 1, 3, 2, 4))


# ---------------------------------------------------------------------------
# Plain-JAX reference & test
# ---------------------------------------------------------------------------
def _reference_forward(x, params, num_heads):
    """Plain-JAX reference of the same math (high-precision matmuls)."""
    hp = jax.lax.Precision.HIGHEST
    b, c, d, h, w = x.shape
    e = w
    dh = e // num_heads
    x_lne = jnp.transpose(x, (2, 0, 1, 3, 4)).reshape(d, b * c * h, w)
    xq = jnp.transpose(x_lne, (1, 0, 2))            # (N, L, E)
    q = jnp.einsum('nle,fe->nlf', xq, params['wq'], precision=hp) + params['bq'][0]
    k = jnp.einsum('nle,fe->nlf', xq, params['wk'], precision=hp) + params['bk'][0]
    v = jnp.einsum('nle,fe->nlf', xq, params['wv'], precision=hp) + params['bv'][0]
    n, l, _ = xq.shape
    q = q.reshape(n, l, num_heads, dh)
    k = k.reshape(n, l, num_heads, dh)
    v = v.reshape(n, l, num_heads, dh)
    s = jnp.einsum('nlhd,nmhd->nhlm', q, k, precision=hp) / math.sqrt(dh)
    p = jax.nn.softmax(s, axis=-1)
    o = jnp.einsum('nhlm,nmhd->nlhd', p, v, precision=hp).reshape(n, l, e)
    o = jnp.einsum('nle,fe->nlf', o, params['wo'], precision=hp) + params['bo'][0]
    o = jnp.transpose(o, (1, 0, 2)).reshape(d, b, -1, w, w)
    return jnp.transpose(o, (1, 2, 0, 3, 4))


def init_params(key, embed_dim):
    """Deterministic parameter init (shapes match nn.MultiheadAttention)."""
    e = embed_dim
    ks = jax.random.split(key, 4)
    bound = math.sqrt(6.0 / (e + e))                # xavier-uniform-ish
    wq = jax.random.uniform(ks[0], (e, e), jnp.float32, -bound, bound)
    wk = jax.random.uniform(ks[1], (e, e), jnp.float32, -bound, bound)
    wv = jax.random.uniform(ks[2], (e, e), jnp.float32, -bound, bound)
    wo = jax.random.uniform(ks[3], (e, e), jnp.float32, -bound, bound)
    return dict(
        wq=wq, wk=wk, wv=wv, wo=wo,
        bq=jnp.zeros((1, e), jnp.float32) + 0.01,
        bk=jnp.zeros((1, e), jnp.float32) - 0.02,
        bv=jnp.zeros((1, e), jnp.float32) + 0.03,
        bo=jnp.zeros((1, e), jnp.float32) - 0.01,
    )


if __name__ == "__main__":
    # Small shapes consistent with the module: (B, C, D, H, W), embed_dim = W = H.
    B, C, D, H, W = 2, 3, 8, 16, 16
    embed_dim, num_heads = W, 4

    key = jax.random.PRNGKey(0)
    kx, kp = jax.random.split(key)
    x = jax.random.normal(kx, (B, C, D, H, W), jnp.float32)
    params = init_params(kp, embed_dim)

    out = attention_block_forward(x, params, num_heads)
    out = jax.block_until_ready(out)

    ref = jax.block_until_ready(_reference_forward(x, params, num_heads))
    np.testing.assert_allclose(np.asarray(out), np.asarray(ref),
                               rtol=1e-4, atol=1e-4)
    assert out.shape == (B, C, D, H, W)
    print("KERNEL_OK")
</pallas_src>

<mosaic_0001>
module attributes {stable_mosaic.version = 11 : i64} {
  func.func @_mha_kernel(%arg0: i32, %arg1: memref<6x8x256xf32, #tpu.memory_space<vmem>>, %arg2: memref<256x768xf32, #tpu.memory_space<vmem>>, %arg3: memref<1x768xf32, #tpu.memory_space<vmem>>, %arg4: memref<256x64xf32, #tpu.memory_space<vmem>>, %arg5: memref<64x256xf32, #tpu.memory_space<vmem>>, %arg6: memref<256x256xf32, #tpu.memory_space<vmem>>, %arg7: memref<1x256xf32, #tpu.memory_space<vmem>>, %arg8: memref<6x8x256xf32, #tpu.memory_space<vmem>>, %arg9: memref<6x8x256xf32, #tpu.memory_space<vmem>>) attributes {dimension_semantics = [#tpu.dimension_semantics<parallel>], iteration_bounds = array<i64: 1>, scalar_prefetch = 0 : i64, scratch_operands = 1 : i64, tpu.core_type = #tpu.core_type<tc>, window_params = [{transform_indices = @transform_0, window_bounds = array<i64: 6, 8, 256>}, {pipeline_mode = #tpu.pipeline_mode<synchronous>, transform_indices = @transform_1, window_bounds = array<i64: 256, 768>}, {pipeline_mode = #tpu.pipeline_mode<synchronous>, transform_indices = @transform_2, window_bounds = array<i64: 1, 768>}, {pipeline_mode = #tpu.pipeline_mode<synchronous>, transform_indices = @transform_3, window_bounds = array<i64: 256, 64>}, {pipeline_mode = #tpu.pipeline_mode<synchronous>, transform_indices = @transform_4, window_bounds = array<i64: 64, 256>}, {pipeline_mode = #tpu.pipeline_mode<synchronous>, transform_indices = @transform_5, window_bounds = array<i64: 256, 256>}, {pipeline_mode = #tpu.pipeline_mode<synchronous>, transform_indices = @transform_6, window_bounds = array<i64: 1, 256>}, {transform_indices = @transform_7, window_bounds = array<i64: 6, 8, 256>}]} {
    %c0 = arith.constant 0 : index
    %c0_0 = arith.constant 0 : index
    %c0_1 = arith.constant 0 : index
    %0 = vector.load %arg1[%c0, %c0_0, %c0_1] : memref<6x8x256xf32, #tpu.memory_space<vmem>>, vector<6x8x256xf32>
    %1 = vector.shape_cast %0 : vector<6x8x256xf32> to vector<48x256xf32>
    %c0_2 = arith.constant 0 : index
    %c0_3 = arith.constant 0 : index
    %2 = vector.load %arg2[%c0_2, %c0_3] : memref<256x768xf32, #tpu.memory_space<vmem>>, vector<256x768xf32>
    %cst = arith.constant dense<0.000000e+00> : vector<48x768xf32>
    %3 = tpu.matmul %1, %2, %cst {dimension_numbers = #tpu.dot_dimension_numbers<[1], [0], [0], [1], [0, 0, 1, 1], [], []>} : vector<48x256xf32>, vector<256x768xf32>, vector<48x768xf32> -> vector<48x768xf32>
    %c0_4 = arith.constant 0 : index
    %c0_5 = arith.constant 0 : index
    %4 = vector.load %arg3[%c0_4, %c0_5] : memref<1x768xf32, #tpu.memory_space<vmem>>, vector<1x768xf32>
    %5 = vector.broadcast %4 : vector<1x768xf32> to vector<48x768xf32>
    %6 = arith.addf %3, %5 : vector<48x768xf32>
    %7 = vector.extract_strided_slice %6 {offsets = [0, 0], sizes = [48, 256], strides = [1, 1]} : vector<48x768xf32> to vector<48x256xf32>
    %8 = vector.shape_cast %7 : vector<48x256xf32> to vector<6x8x256xf32>
    %9 = vector.extract_strided_slice %6 {offsets = [0, 256], sizes = [48, 256], strides = [1, 1]} : vector<48x768xf32> to vector<48x256xf32>
    %10 = vector.shape_cast %9 : vector<48x256xf32> to vector<6x8x256xf32>
    %11 = vector.extract_strided_slice %6 {offsets = [0, 512], sizes = [48, 256], strides = [1, 1]} : vector<48x768xf32> to vector<48x256xf32>
    %12 = vector.shape_cast %11 : vector<48x256xf32> to vector<6x8x256xf32>
    %13 = vector.extract_strided_slice %8 {offsets = [0, 0, 0], sizes = [6, 1, 256], strides = [1, 1, 1]} : vector<6x8x256xf32> to vector<6x1x256xf32>
    %14 = vector.broadcast %13 : vector<6x1x256xf32> to vector<6x8x256xf32>
    %15 = arith.mulf %14, %10 : vector<6x8x256xf32>
    %16 = vector.shape_cast %15 : vector<6x8x256xf32> to vector<48x256xf32>
    %c0_6 = arith.constant 0 : index
    %c0_7 = arith.constant 0 : index
    %17 = vector.load %arg4[%c0_6, %c0_7] : memref<256x64xf32, #tpu.memory_space<vmem>>, vector<256x64xf32>
    %cst_8 = arith.constant dense<0.000000e+00> : vector<48x64xf32>
    %18 = tpu.matmul %16, %17, %cst_8 {dimension_numbers = #tpu.dot_dimension_numbers<[1], [0], [0], [1], [0, 0, 1, 1], [], []>} : vector<48x256xf32>, vector<256x64xf32>, vector<48x64xf32> -> vector<48x64xf32>
    %19 = vector.shape_cast %18 : vector<48x64xf32> to vector<6x8x64xf32>
    %cst_9 = arith.constant dense<0xFF800000> : vector<6x64xf32>
    %20 = vector.multi_reduction <maximumf>, %19, %cst_9 [1] : vector<6x8x64xf32> to vector<6x64xf32>
    %21 = vector.shape_cast %20 : vector<6x64xf32> to vector<6x1x64xf32>
    %22 = vector.broadcast %21 : vector<6x1x64xf32> to vector<6x8x64xf32>
    %23 = arith.subf %19, %22 : vector<6x8x64xf32>
    %24 = math.exp %23 : vector<6x8x64xf32>
    %cst_10 = arith.constant dense<0.000000e+00> : vector<6x64xf32>
    %25 = vector.multi_reduction <add>, %24, %cst_10 [1] : vector<6x8x64xf32> to vector<6x64xf32>
    %26 = vector.shape_cast %25 : vector<6x64xf32> to vector<6x1x64xf32>
    %27 = tpu.reciprocal %26 {approx = true} : vector<6x1x64xf32> -> vector<6x1x64xf32>
    %28 = arith.mulf %26, %27 : vector<6x1x64xf32>
    %cst_11 = arith.constant 2.000000e+00 : f32
    %29 = vector.broadcast %cst_11 : f32 to vector<6x1x64xf32>
    %30 = arith.subf %29, %28 : vector<6x1x64xf32>
    %31 = arith.mulf %27, %30 : vector<6x1x64xf32>
    %32 = vector.broadcast %31 : vector<6x1x64xf32> to vector<6x8x64xf32>
    %33 = arith.mulf %24, %32 : vector<6x8x64xf32>
    %34 = vector.shape_cast %33 : vector<6x8x64xf32> to vector<48x64xf32>
    %c0_12 = arith.constant 0 : index
    %c0_13 = arith.constant 0 : index
    %35 = vector.load %arg5[%c0_12, %c0_13] : memref<64x256xf32, #tpu.memory_space<vmem>>, vector<64x256xf32>
    %cst_14 = arith.constant dense<0.000000e+00> : vector<48x256xf32>
    %36 = tpu.matmul %34, %35, %cst_14 {dimension_numbers = #tpu.dot_dimension_numbers<[1], [0], [0], [1], [0, 0, 1, 1], [], []>} : vector<48x64xf32>, vector<64x256xf32>, vector<48x256xf32> -> vector<48x256xf32>
    %37 = vector.shape_cast %36 : vector<48x256xf32> to vector<6x8x256xf32>
    %38 = arith.mulf %37, %12 : vector<6x8x256xf32>
    %cst_15 = arith.constant dense<0.000000e+00> : vector<6x256xf32>
    %39 = vector.multi_reduction <add>, %38, %cst_15 [1] : vector<6x8x256xf32> to vector<6x256xf32>
    %c0_16 = arith.constant 0 : index
    %c0_17 = arith.constant 0 : index
    %c0_18 = arith.constant 0 : index
    %40 = vector.load %arg9[%c0_16, %c0_17, %c0_18] : memref<6x8x256xf32, #tpu.memory_space<vmem>>, vector<6x1x256xf32>
    %41 = vector.shape_cast %40 : vector<6x1x256xf32> to vector<6x256xf32>
    %42 = vector.shape_cast %39 : vector<6x256xf32> to vector<6x1x256xf32>
    tpu.vector_store %arg9[%c0_16, %c0_17, %c0_18], %42 {strides = array<i32>} : memref<6x8x256xf32, #tpu.memory_space<vmem>>, vector<6x1x256xf32>,
    %43 = vector.extract_strided_slice %8 {offsets = [0, 1, 0], sizes = [6, 1, 256], strides = [1, 1, 1]} : vector<6x8x256xf32> to vector<6x1x256xf32>
    %44 = vector.broadcast %43 : vector<6x1x256xf32> to vector<6x8x256xf32>
    %45 = arith.mulf %44, %10 : vector<6x8x256xf32>
    %46 = vector.shape_cast %45 : vector<6x8x256xf32> to vector<48x256xf32>
    %c0_19 = arith.constant 0 : index
    %c0_20 = arith.constant 0 : index
    %47 = vector.load %arg4[%c0_19, %c0_20] : memref<256x64xf32, #tpu.memory_space<vmem>>, vector<256x64xf32>
    %cst_21 = arith.constant dense<0.000000e+00> : vector<48x64xf32>
    %48 = tpu.matmul %46, %47, %cst_21 {dimension_numbers = #tpu.dot_dimension_numbers<[1], [0], [0], [1], [0, 0, 1, 1], [], []>} : vector<48x256xf32>, vector<256x64xf32>, vector<48x64xf32> -> vector<48x64xf32>
    %49 = vector.shape_cast %48 : vector<48x64xf32> to vector<6x8x64xf32>
    %cst_22 = arith.constant dense<0xFF800000> : vector<6x64xf32>
    %50 = vector.multi_reduction <maximumf>, %49, %cst_22 [1] : vector<6x8x64xf32> to vector<6x64xf32>
    %51 = vector.shape_cast %50 : vector<6x64xf32> to vector<6x1x64xf32>
    %52 = vector.broadcast %51 : vector<6x1x64xf32> to vector<6x8x64xf32>
    %53 = arith.subf %49, %52 : vector<6x8x64xf32>
    %54 = math.exp %53 : vector<6x8x64xf32>
    %cst_23 = arith.constant dense<0.000000e+00> : vector<6x64xf32>
    %55 = vector.multi_reduction <add>, %54, %cst_23 [1] : vector<6x8x64xf32> to vector<6x64xf32>
    %56 = vector.shape_cast %55 : vector<6x64xf32> to vector<6x1x64xf32>
    %57 = tpu.reciprocal %56 {approx = true} : vector<6x1x64xf32> -> vector<6x1x64xf32>
    %58 = arith.mulf %56, %57 : vector<6x1x64xf32>
    %cst_24 = arith.constant 2.000000e+00 : f32
    %59 = vector.broadcast %cst_24 : f32 to vector<6x1x64xf32>
    %60 = arith.subf %59, %58 : vector<6x1x64xf32>
    %61 = arith.mulf %57, %60 : vector<6x1x64xf32>
    %62 = vector.broadcast %61 : vector<6x1x64xf32> to vector<6x8x64xf32>
    %63 = arith.mulf %54, %62 : vector<6x8x64xf32>
    %64 = vector.shape_cast %63 : vector<6x8x64xf32> to vector<48x64xf32>
    %c0_25 = arith.constant 0 : index
    %c0_26 = arith.constant 0 : index
    %65 = vector.load %arg5[%c0_25, %c0_26] : memref<64x256xf32, #tpu.memory_space<vmem>>, vector<64x256xf32>
    %cst_27 = arith.constant dense<0.000000e+00> : vector<48x256xf32>
    %66 = tpu.matmul %64, %65, %cst_27 {dimension_numbers = #tpu.dot_dimension_numbers<[1], [0], [0], [1], [0, 0, 1, 1], [], []>} : vector<48x64xf32>, vector<64x256xf32>, vector<48x256xf32> -> vector<48x256xf32>
    %67 = vector.shape_cast %66 : vector<48x256xf32> to vector<6x8x256xf32>
    %68 = arith.mulf %67, %12 : vector<6x8x256xf32>
    %cst_28 = arith.constant dense<0.000000e+00> : vector<6x256xf32>
    %69 = vector.multi_reduction <add>, %68, %cst_28 [1] : vector<6x8x256xf32> to vector<6x256xf32>
    %c0_29 = arith.constant 0 : index
    %c1 = arith.constant 1 : index
    %c0_30 = arith.constant 0 : index
    %70 = vector.load %arg9[%c0_29, %c1, %c0_30] : memref<6x8x256xf32, #tpu.memory_space<vmem>>, vector<6x1x256xf32>
    %71 = vector.shape_cast %70 : vector<6x1x256xf32> to vector<6x256xf32>
    %72 = vector.shape_cast %69 : vector<6x256xf32> to vector<6x1x256xf32>
    tpu.vector_store %arg9[%c0_29, %c1, %c0_30], %72 {strides = array<i32>} : memref<6x8x256xf32, #tpu.memory_space<vmem>>, vector<6x1x256xf32>,
    %73 = vector.extract_strided_slice %8 {offsets = [0, 2, 0], sizes = [6, 1, 256], strides = [1, 1, 1]} : vector<6x8x256xf32> to vector<6x1x256xf32>
    %74 = vector.broadcast %73 : vector<6x1x256xf32> to vector<6x8x256xf32>
    %75 = arith.mulf %74, %10 : vector<6x8x256xf32>
    %76 = vector.shape_cast %75 : vector<6x8x256xf32> to vector<48x256xf32>
    %c0_31 = arith.constant 0 : index
    %c0_32 = arith.constant 0 : index
    %77 = vector.load %arg4[%c0_31, %c0_32] : memref<256x64xf32, #tpu.memory_space<vmem>>, vector<256x64xf32>
    %cst_33 = arith.constant dense<0.000000e+00> : vector<48x64xf32>
    %78 = tpu.matmul %76, %77, %cst_33 {dimension_numbers = #tpu.dot_dimension_numbers<[1], [0], [0], [1], [0, 0, 1, 1], [], []>} : vector<48x256xf32>, vector<256x64xf32>, vector<48x64xf32> -> vector<48x64xf32>
    %79 = vector.shape_cast %78 : vector<48x64xf32> to vector<6x8x64xf32>
    %cst_34 = arith.constant dense<0xFF800000> : vector<6x64xf32>
    %80 = vector.multi_reduction <maximumf>, %79, %cst_34 [1] : vector<6x8x64xf32> to vector<6x64xf32>
    %81 = vector.shape_cast %80 : vector<6x64xf32> to vector<6x1x64xf32>
    %82 = vector.broadcast %81 : vector<6x1x64xf32> to vector<6x8x64xf32>
    %83 = arith.subf %79, %82 : vector<6x8x64xf32>
    %84 = math.exp %83 : vector<6x8x64xf32>
    %cst_35 = arith.constant dense<0.000000e+00> : vector<6x64xf32>
    %85 = vector.multi_reduction <add>, %84, %cst_35 [1] : vector<6x8x64xf32> to vector<6x64xf32>
    %86 = vector.shape_cast %85 : vector<6x64xf32> to vector<6x1x64xf32>
    %87 = tpu.reciprocal %86 {approx = true} : vector<6x1x64xf32> -> vector<6x1x64xf32>
    %88 = arith.mulf %86, %87 : vector<6x1x64xf32>
    %cst_36 = arith.constant 2.000000e+00 : f32
    %89 = vector.broadcast %cst_36 : f32 to vector<6x1x64xf32>
    %90 = arith.subf %89, %88 : vector<6x1x64xf32>
    %91 = arith.mulf %87, %90 : vector<6x1x64xf32>
    %92 = vector.broadcast %91 : vector<6x1x64xf32> to vector<6x8x64xf32>
    %93 = arith.mulf %84, %92 : vector<6x8x64xf32>
    %94 = vector.shape_cast %93 : vector<6x8x64xf32> to vector<48x64xf32>
    %c0_37 = arith.constant 0 : index
    %c0_38 = arith.constant 0 : index
    %95 = vector.load %arg5[%c0_37, %c0_38] : memref<64x256xf32, #tpu.memory_space<vmem>>, vector<64x256xf32>
    %cst_39 = arith.constant dense<0.000000e+00> : vector<48x256xf32>
    %96 = tpu.matmul %94, %95, %cst_39 {dimension_numbers = #tpu.dot_dimension_numbers<[1], [0], [0], [1], [0, 0, 1, 1], [], []>} : vector<48x64xf32>, vector<64x256xf32>, vector<48x256xf32> -> vector<48x256xf32>
    %97 = vector.shape_cast %96 : vector<48x256xf32> to vector<6x8x256xf32>
    %98 = arith.mulf %97, %12 : vector<6x8x256xf32>
    %cst_40 = arith.constant dense<0.000000e+00> : vector<6x256xf32>
    %99 = vector.multi_reduction <add>, %98, %cst_40 [1] : vector<6x8x256xf32> to vector<6x256xf32>
    %c0_41 = arith.constant 0 : index
    %c2 = arith.constant 2 : index
    %c0_42 = arith.constant 0 : index
    %100 = vector.load %arg9[%c0_41, %c2, %c0_42] : memref<6x8x256xf32, #tpu.memory_space<vmem>>, vector<6x1x256xf32>
    %101 = vector.shape_cast %100 : vector<6x1x256xf32> to vector<6x256xf32>
    %102 = vector.shape_cast %99 : vector<6x256xf32> to vector<6x1x256xf32>
    tpu.vector_store %arg9[%c0_41, %c2, %c0_42], %102 {strides = array<i32>} : memref<6x8x256xf32, #tpu.memory_space<vmem>>, vector<6x1x256xf32>,
    %103 = vector.extract_strided_slice %8 {offsets = [0, 3, 0], sizes = [6, 1, 256], strides = [1, 1, 1]} : vector<6x8x256xf32> to vector<6x1x256xf32>
    %104 = vector.broadcast %103 : vector<6x1x256xf32> to vector<6x8x256xf32>
    %105 = arith.mulf %104, %10 : vector<6x8x256xf32>
    %106 = vector.shape_cast %105 : vector<6x8x256xf32> to vector<48x256xf32>
    %c0_43 = arith.constant 0 : index
    %c0_44 = arith.constant 0 : index
    %107 = vector.load %arg4[%c0_43, %c0_44] : memref<256x64xf32, #tpu.memory_space<vmem>>, vector<256x64xf32>
    %cst_45 = arith.constant dense<0.000000e+00> : vector<48x64xf32>
    %108 = tpu.matmul %106, %107, %cst_45 {dimension_numbers = #tpu.dot_dimension_numbers<[1], [0], [0], [1], [0, 0, 1, 1], [], []>} : vector<48x256xf32>, vector<256x64xf32>, vector<48x64xf32> -> vector<48x64xf32>
    %109 = vector.shape_cast %108 : vector<48x64xf32> to vector<6x8x64xf32>
    %cst_46 = arith.constant dense<0xFF800000> : vector<6x64xf32>
    %110 = vector.multi_reduction <maximumf>, %109, %cst_46 [1] : vector<6x8x64xf32> to vector<6x64xf32>
    %111 = vector.shape_cast %110 : vector<6x64xf32> to vector<6x1x64xf32>
    %112 = vector.broadcast %111 : vector<6x1x64xf32> to vector<6x8x64xf32>
    %113 = arith.subf %109, %112 : vector<6x8x64xf32>
    %114 = math.exp %113 : vector<6x8x64xf32>
    %cst_47 = arith.constant dense<0.000000e+00> : vector<6x64xf32>
    %115 = vector.multi_reduction <add>, %114, %cst_47 [1] : vector<6x8x64xf32> to vector<6x64xf32>
    %116 = vector.shape_cast %115 : vector<6x64xf32> to vector<6x1x64xf32>
    %117 = tpu.reciprocal %116 {approx = true} : vector<6x1x64xf32> -> vector<6x1x64xf32>
    %118 = arith.mulf %116, %117 : vector<6x1x64xf32>
    %cst_48 = arith.constant 2.000000e+00 : f32
    %119 = vector.broadcast %cst_48 : f32 to vector<6x1x64xf32>
    %120 = arith.subf %119, %118 : vector<6x1x64xf32>
    %121 = arith.mulf %117, %120 : vector<6x1x64xf32>
    %122 = vector.broadcast %121 : vector<6x1x64xf32> to vector<6x8x64xf32>
    %123 = arith.mulf %114, %122 : vector<6x8x64xf32>
    %124 = vector.shape_cast %123 : vector<6x8x64xf32> to vector<48x64xf32>
    %c0_49 = arith.constant 0 : index
    %c0_50 = arith.constant 0 : index
    %125 = vector.load %arg5[%c0_49, %c0_50] : memref<64x256xf32, #tpu.memory_space<vmem>>, vector<64x256xf32>
    %cst_51 = arith.constant dense<0.000000e+00> : vector<48x256xf32>
    %126 = tpu.matmul %124, %125, %cst_51 {dimension_numbers = #tpu.dot_dimension_numbers<[1], [0], [0], [1], [0, 0, 1, 1], [], []>} : vector<48x64xf32>, vector<64x256xf32>, vector<48x256xf32> -> vector<48x256xf32>
    %127 = vector.shape_cast %126 : vector<48x256xf32> to vector<6x8x256xf32>
    %128 = arith.mulf %127, %12 : vector<6x8x256xf32>
    %cst_52 = arith.constant dense<0.000000e+00> : vector<6x256xf32>
    %129 = vector.multi_reduction <add>, %128, %cst_52 [1] : vector<6x8x256xf32> to vector<6x256xf32>
    %c0_53 = arith.constant 0 : index
    %c3 = arith.constant 3 : index
    %c0_54 = arith.constant 0 : index
    %130 = vector.load %arg9[%c0_53, %c3, %c0_54] : memref<6x8x256xf32, #tpu.memory_space<vmem>>, vector<6x1x256xf32>
    %131 = vector.shape_cast %130 : vector<6x1x256xf32> to vector<6x256xf32>
    %132 = vector.shape_cast %129 : vector<6x256xf32> to vector<6x1x256xf32>
    tpu.vector_store %arg9[%c0_53, %c3, %c0_54], %132 {strides = array<i32>} : memref<6x8x256xf32, #tpu.memory_space<vmem>>, vector<6x1x256xf32>,
    %133 = vector.extract_strided_slice %8 {offsets = [0, 4, 0], sizes = [6, 1, 256], strides = [1, 1, 1]} : vector<6x8x256xf32> to vector<6x1x256xf32>
    %134 = vector.broadcast %133 : vector<6x1x256xf32> to vector<6x8x256xf32>
    %135 = arith.mulf %134, %10 : vector<6x8x256xf32>
    %136 = vector.shape_cast %135 : vector<6x8x256xf32> to vector<48x256xf32>
    %c0_55 = arith.constant 0 : index
    %c0_56 = arith.constant 0 : index
    %137 = vector.load %arg4[%c0_55, %c0_56] : memref<256x64xf32, #tpu.memory_space<vmem>>, vector<256x64xf32>
    %cst_57 = arith.constant dense<0.000000e+00> : vector<48x64xf32>
    %138 = tpu.matmul %136, %137, %cst_57 {dimension_numbers = #tpu.dot_dimension_numbers<[1], [0], [0], [1], [0, 0, 1, 1], [], []>} : vector<48x256xf32>, vector<256x64xf32>, vector<48x64xf32> -> vector<48x64xf32>
    %139 = vector.shape_cast %138 : vector<48x64xf32> to vector<6x8x64xf32>
    %cst_58 = arith.constant dense<0xFF800000> : vector<6x64xf32>
    %140 = vector.multi_reduction <maximumf>, %139, %cst_58 [1] : vector<6x8x64xf32> to vector<6x64xf32>
    %141 = vector.shape_cast %140 : vector<6x64xf32> to vector<6x1x64xf32>
    %142 = vector.broadcast %141 : vector<6x1x64xf32> to vector<6x8x64xf32>
    %143 = arith.subf %139, %142 : vector<6x8x64xf32>
    %144 = math.exp %143 : vector<6x8x64xf32>
    %cst_59 = arith.constant dense<0.000000e+00> : vector<6x64xf32>
    %145 = vector.multi_reduction <add>, %144, %cst_59 [1] : vector<6x8x64xf32> to vector<6x64xf32>
    %146 = vector.shape_cast %145 : vector<6x64xf32> to vector<6x1x64xf32>
    %147 = tpu.reciprocal %146 {approx = true} : vector<6x1x64xf32> -> vector<6x1x64xf32>
    %148 = arith.mulf %146, %147 : vector<6x1x64xf32>
    %cst_60 = arith.constant 2.000000e+00 : f32
    %149 = vector.broadcast %cst_60 : f32 to vector<6x1x64xf32>
    %150 = arith.subf %149, %148 : vector<6x1x64xf32>
    %151 = arith.mulf %147, %150 : vector<6x1x64xf32>
    %152 = vector.broadcast %151 : vector<6x1x64xf32> to vector<6x8x64xf32>
    %153 = arith.mulf %144, %152 : vector<6x8x64xf32>
    %154 = vector.shape_cast %153 : vector<6x8x64xf32> to vector<48x64xf32>
    %c0_61 = arith.constant 0 : index
    %c0_62 = arith.constant 0 : index
    %155 = vector.load %arg5[%c0_61, %c0_62] : memref<64x256xf32, #tpu.memory_space<vmem>>, vector<64x256xf32>
    %cst_63 = arith.constant dense<0.000000e+00> : vector<48x256xf32>
    %156 = tpu.matmul %154, %155, %cst_63 {dimension_numbers = #tpu.dot_dimension_numbers<[1], [0], [0], [1], [0, 0, 1, 1], [], []>} : vector<48x64xf32>, vector<64x256xf32>, vector<48x256xf32> -> vector<48x256xf32>
    %157 = vector.shape_cast %156 : vector<48x256xf32> to vector<6x8x256xf32>
    %158 = arith.mulf %157, %12 : vector<6x8x256xf32>
    %cst_64 = arith.constant dense<0.000000e+00> : vector<6x256xf32>
    %159 = vector.multi_reduction <add>, %158, %cst_64 [1] : vector<6x8x256xf32> to vector<6x256xf32>
    %c0_65 = arith.constant 0 : index
    %c4 = arith.constant 4 : index
    %c0_66 = arith.constant 0 : index
    %160 = vector.load %arg9[%c0_65, %c4, %c0_66] : memref<6x8x256xf32, #tpu.memory_space<vmem>>, vector<6x1x256xf32>
    %161 = vector.shape_cast %160 : vector<6x1x256xf32> to vector<6x256xf32>
    %162 = vector.shape_cast %159 : vector<6x256xf32> to vector<6x1x256xf32>
    tpu.vector_store %arg9[%c0_65, %c4, %c0_66], %162 {strides = array<i32>} : memref<6x8x256xf32, #tpu.memory_space<vmem>>, vector<6x1x256xf32>,
    %163 = vector.extract_strided_slice %8 {offsets = [0, 5, 0], sizes = [6, 1, 256], strides = [1, 1, 1]} : vector<6x8x256xf32> to vector<6x1x256xf32>
    %164 = vector.broadcast %163 : vector<6x1x256xf32> to vector<6x8x256xf32>
    %165 = arith.mulf %164, %10 : vector<6x8x256xf32>
    %166 = vector.shape_cast %165 : vector<6x8x256xf32> to vector<48x256xf32>
    %c0_67 = arith.constant 0 : index
    %c0_68 = arith.constant 0 : index
    %167 = vector.load %arg4[%c0_67, %c0_68] : memref<256x64xf32, #tpu.memory_space<vmem>>, vector<256x64xf32>
    %cst_69 = arith.constant dense<0.000000e+00> : vector<48x64xf32>
    %168 = tpu.matmul %166, %167, %cst_69 {dimension_numbers = #tpu.dot_dimension_numbers<[1], [0], [0], [1], [0, 0, 1, 1], [], []>} : vector<48x256xf32>, vector<256x64xf32>, vector<48x64xf32> -> vector<48x64xf32>
    %169 = vector.shape_cast %168 : vector<48x64xf32> to vector<6x8x64xf32>
    %cst_70 = arith.constant dense<0xFF800000> : vector<6x64xf32>
    %170 = vector.multi_reduction <maximumf>, %169, %cst_70 [1] : vector<6x8x64xf32> to vector<6x64xf32>
    %171 = vector.shape_cast %170 : vector<6x64xf32> to vector<6x1x64xf32>
    %172 = vector.broadcast %171 : vector<6x1x64xf32> to vector<6x8x64xf32>
    %173 = arith.subf %169, %172 : vector<6x8x64xf32>
    %174 = math.exp %173 : vector<6x8x64xf32>
    %cst_71 = arith.constant dense<0.000000e+00> : vector<6x64xf32>
    %175 = vector.multi_reduction <add>, %174, %cst_71 [1] : vector<6x8x64xf32> to vector<6x64xf32>
    %176 = vector.shape_cast %175 : vector<6x64xf32> to vector<6x1x64xf32>
    %177 = tpu.reciprocal %176 {approx = true} : vector<6x1x64xf32> -> vector<6x1x64xf32>
    %178 = arith.mulf %176, %177 : vector<6x1x64xf32>
    %cst_72 = arith.constant 2.000000e+00 : f32
    %179 = vector.broadcast %cst_72 : f32 to vector<6x1x64xf32>
    %180 = arith.subf %179, %178 : vector<6x1x64xf32>
    %181 = arith.mulf %177, %180 : vector<6x1x64xf32>
    %182 = vector.broadcast %181 : vector<6x1x64xf32> to vector<6x8x64xf32>
    %183 = arith.mulf %174, %182 : vector<6x8x64xf32>
    %184 = vector.shape_cast %183 : vector<6x8x64xf32> to vector<48x64xf32>
    %c0_73 = arith.constant 0 : index
    %c0_74 = arith.constant 0 : index
    %185 = vector.load %arg5[%c0_73, %c0_74] : memref<64x256xf32, #tpu.memory_space<vmem>>, vector<64x256xf32>
    %cst_75 = arith.constant dense<0.000000e+00> : vector<48x256xf32>
    %186 = tpu.matmul %184, %185, %cst_75 {dimension_numbers = #tpu.dot_dimension_numbers<[1], [0], [0], [1], [0, 0, 1, 1], [], []>} : vector<48x64xf32>, vector<64x256xf32>, vector<48x256xf32> -> vector<48x256xf32>
    %187 = vector.shape_cast %186 : vector<48x256xf32> to vector<6x8x256xf32>
    %188 = arith.mulf %187, %12 : vector<6x8x256xf32>
    %cst_76 = arith.constant dense<0.000000e+00> : vector<6x256xf32>
    %189 = vector.multi_reduction <add>, %188, %cst_76 [1] : vector<6x8x256xf32> to vector<6x256xf32>
    %c0_77 = arith.constant 0 : index
    %c5 = arith.constant 5 : index
    %c0_78 = arith.constant 0 : index
    %190 = vector.load %arg9[%c0_77, %c5, %c0_78] : memref<6x8x256xf32, #tpu.memory_space<vmem>>, vector<6x1x256xf32>
    %191 = vector.shape_cast %190 : vector<6x1x256xf32> to vector<6x256xf32>
    %192 = vector.shape_cast %189 : vector<6x256xf32> to vector<6x1x256xf32>
    tpu.vector_store %arg9[%c0_77, %c5, %c0_78], %192 {strides = array<i32>} : memref<6x8x256xf32, #tpu.memory_space<vmem>>, vector<6x1x256xf32>,
    %193 = vector.extract_strided_slice %8 {offsets = [0, 6, 0], sizes = [6, 1, 256], strides = [1, 1, 1]} : vector<6x8x256xf32> to vector<6x1x256xf32>
    %194 = vector.broadcast %193 : vector<6x1x256xf32> to vector<6x8x256xf32>
    %195 = arith.mulf %194, %10 : vector<6x8x256xf32>
    %196 = vector.shape_cast %195 : vector<6x8x256xf32> to vector<48x256xf32>
    %c0_79 = arith.constant 0 : index
    %c0_80 = arith.constant 0 : index
    %197 = vector.load %arg4[%c0_79, %c0_80] : memref<256x64xf32, #tpu.memory_space<vmem>>, vector<256x64xf32>
    %cst_81 = arith.constant dense<0.000000e+00> : vector<48x64xf32>
    %198 = tpu.matmul %196, %197, %cst_81 {dimension_numbers = #tpu.dot_dimension_numbers<[1], [0], [0], [1], [0, 0, 1, 1], [], []>} : vector<48x256xf32>, vector<256x64xf32>, vector<48x64xf32> -> vector<48x64xf32>
    %199 = vector.shape_cast %198 : vector<48x64xf32> to vector<6x8x64xf32>
    %cst_82 = arith.constant dense<0xFF800000> : vector<6x64xf32>
    %200 = vector.multi_reduction <maximumf>, %199, %cst_82 [1] : vector<6x8x64xf32> to vector<6x64xf32>
    %201 = vector.shape_cast %200 : vector<6x64xf32> to vector<6x1x64xf32>
    %202 = vector.broadcast %201 : vector<6x1x64xf32> to vector<6x8x64xf32>
    %203 = arith.subf %199, %202 : vector<6x8x64xf32>
    %204 = math.exp %203 : vector<6x8x64xf32>
    %cst_83 = arith.constant dense<0.000000e+00> : vector<6x64xf32>
    %205 = vector.multi_reduction <add>, %204, %cst_83 [1] : vector<6x8x64xf32> to vector<6x64xf32>
    %206 = vector.shape_cast %205 : vector<6x64xf32> to vector<6x1x64xf32>
    %207 = tpu.reciprocal %206 {approx = true} : vector<6x1x64xf32> -> vector<6x1x64xf32>
    %208 = arith.mulf %206, %207 : vector<6x1x64xf32>
    %cst_84 = arith.constant 2.000000e+00 : f32
    %209 = vector.broadcast %cst_84 : f32 to vector<6x1x64xf32>
    %210 = arith.subf %209, %208 : vector<6x1x64xf32>
    %211 = arith.mulf %207, %210 : vector<6x1x64xf32>
    %212 = vector.broadcast %211 : vector<6x1x64xf32> to vector<6x8x64xf32>
    %213 = arith.mulf %204, %212 : vector<6x8x64xf32>
    %214 = vector.shape_cast %213 : vector<6x8x64xf32> to vector<48x64xf32>
    %c0_85 = arith.constant 0 : index
    %c0_86 = arith.constant 0 : index
    %215 = vector.load %arg5[%c0_85, %c0_86] : memref<64x256xf32, #tpu.memory_space<vmem>>, vector<64x256xf32>
    %cst_87 = arith.constant dense<0.000000e+00> : vector<48x256xf32>
    %216 = tpu.matmul %214, %215, %cst_87 {dimension_numbers = #tpu.dot_dimension_numbers<[1], [0], [0], [1], [0, 0, 1, 1], [], []>} : vector<48x64xf32>, vector<64x256xf32>, vector<48x256xf32> -> vector<48x256xf32>
    %217 = vector.shape_cast %216 : vector<48x256xf32> to vector<6x8x256xf32>
    %218 = arith.mulf %217, %12 : vector<6x8x256xf32>
    %cst_88 = arith.constant dense<0.000000e+00> : vector<6x256xf32>
    %219 = vector.multi_reduction <add>, %218, %cst_88 [1] : vector<6x8x256xf32> to vector<6x256xf32>
    %c0_89 = arith.constant 0 : index
    %c6 = arith.constant 6 : index
    %c0_90 = arith.constant 0 : index
    %220 = vector.load %arg9[%c0_89, %c6, %c0_90] : memref<6x8x256xf32, #tpu.memory_space<vmem>>, vector<6x1x256xf32>
    %221 = vector.shape_cast %220 : vector<6x1x256xf32> to vector<6x256xf32>
    %222 = vector.shape_cast %219 : vector<6x256xf32> to vector<6x1x256xf32>
    tpu.vector_store %arg9[%c0_89, %c6, %c0_90], %222 {strides = array<i32>} : memref<6x8x256xf32, #tpu.memory_space<vmem>>, vector<6x1x256xf32>,
    %223 = vector.extract_strided_slice %8 {offsets = [0, 7, 0], sizes = [6, 1, 256], strides = [1, 1, 1]} : vector<6x8x256xf32> to vector<6x1x256xf32>
    %224 = vector.broadcast %223 : vector<6x1x256xf32> to vector<6x8x256xf32>
    %225 = arith.mulf %224, %10 : vector<6x8x256xf32>
    %226 = vector.shape_cast %225 : vector<6x8x256xf32> to vector<48x256xf32>
    %c0_91 = arith.constant 0 : index
    %c0_92 = arith.constant 0 : index
    %227 = vector.load %arg4[%c0_91, %c0_92] : memref<256x64xf32, #tpu.memory_space<vmem>>, vector<256x64xf32>
    %cst_93 = arith.constant dense<0.000000e+00> : vector<48x64xf32>
    %228 = tpu.matmul %226, %227, %cst_93 {dimension_numbers = #tpu.dot_dimension_numbers<[1], [0], [0], [1], [0, 0, 1, 1], [], []>} : vector<48x256xf32>, vector<256x64xf32>, vector<48x64xf32> -> vector<48x64xf32>
    %229 = vector.shape_cast %228 : vector<48x64xf32> to vector<6x8x64xf32>
    %cst_94 = arith.constant dense<0xFF800000> : vector<6x64xf32>
    %230 = vector.multi_reduction <maximumf>, %229, %cst_94 [1] : vector<6x8x64xf32> to vector<6x64xf32>
    %231 = vector.shape_cast %230 : vector<6x64xf32> to vector<6x1x64xf32>
    %232 = vector.broadcast %231 : vector<6x1x64xf32> to vector<6x8x64xf32>
    %233 = arith.subf %229, %232 : vector<6x8x64xf32>
    %234 = math.exp %233 : vector<6x8x64xf32>
    %cst_95 = arith.constant dense<0.000000e+00> : vector<6x64xf32>
    %235 = vector.multi_reduction <add>, %234, %cst_95 [1] : vector<6x8x64xf32> to vector<6x64xf32>
    %236 = vector.shape_cast %235 : vector<6x64xf32> to vector<6x1x64xf32>
    %237 = tpu.reciprocal %236 {approx = true} : vector<6x1x64xf32> -> vector<6x1x64xf32>
    %238 = arith.mulf %236, %237 : vector<6x1x64xf32>
    %cst_96 = arith.constant 2.000000e+00 : f32
    %239 = vector.broadcast %cst_96 : f32 to vector<6x1x64xf32>
    %240 = arith.subf %239, %238 : vector<6x1x64xf32>
    %241 = arith.mulf %237, %240 : vector<6x1x64xf32>
    %242 = vector.broadcast %241 : vector<6x1x64xf32> to vector<6x8x64xf32>
    %243 = arith.mulf %234, %242 : vector<6x8x64xf32>
    %244 = vector.shape_cast %243 : vector<6x8x64xf32> to vector<48x64xf32>
    %c0_97 = arith.constant 0 : index
    %c0_98 = arith.constant 0 : index
    %245 = vector.load %arg5[%c0_97, %c0_98] : memref<64x256xf32, #tpu.memory_space<vmem>>, vector<64x256xf32>
    %cst_99 = arith.constant dense<0.000000e+00> : vector<48x256xf32>
    %246 = tpu.matmul %244, %245, %cst_99 {dimension_numbers = #tpu.dot_dimension_numbers<[1], [0], [0], [1], [0, 0, 1, 1], [], []>} : vector<48x64xf32>, vector<64x256xf32>, vector<48x256xf32> -> vector<48x256xf32>
    %247 = vector.shape_cast %246 : vector<48x256xf32> to vector<6x8x256xf32>
    %248 = arith.mulf %247, %12 : vector<6x8x256xf32>
    %cst_100 = arith.constant dense<0.000000e+00> : vector<6x256xf32>
    %249 = vector.multi_reduction <add>, %248, %cst_100 [1] : vector<6x8x256xf32> to vector<6x256xf32>
    %c0_101 = arith.constant 0 : index
    %c7 = arith.constant 7 : index
    %c0_102 = arith.constant 0 : index
    %250 = vector.load %arg9[%c0_101, %c7, %c0_102] : memref<6x8x256xf32, #tpu.memory_space<vmem>>, vector<6x1x256xf32>
    %251 = vector.shape_cast %250 : vector<6x1x256xf32> to vector<6x256xf32>
    %252 = vector.shape_cast %249 : vector<6x256xf32> to vector<6x1x256xf32>
    tpu.vector_store %arg9[%c0_101, %c7, %c0_102], %252 {strides = array<i32>} : memref<6x8x256xf32, #tpu.memory_space<vmem>>, vector<6x1x256xf32>,
    %c0_103 = arith.constant 0 : index
    %c0_104 = arith.constant 0 : index
    %c0_105 = arith.constant 0 : index
    %253 = vector.load %arg9[%c0_103, %c0_104, %c0_105] : memref<6x8x256xf32, #tpu.memory_space<vmem>>, vector<6x8x256xf32>
    %254 = vector.shape_cast %253 : vector<6x8x256xf32> to vector<48x256xf32>
    %c0_106 = arith.constant 0 : index
    %c0_107 = arith.constant 0 : index
    %255 = vector.load %arg6[%c0_106, %c0_107] : memref<256x256xf32, #tpu.memory_space<vmem>>, vector<256x256xf32>
    %cst_108 = arith.constant dense<0.000000e+00> : vector<48x256xf32>
    %256 = tpu.matmul %254, %255, %cst_108 {dimension_numbers = #tpu.dot_dimension_numbers<[1], [0], [0], [1], [0, 0, 1, 1], [], []>} : vector<48x256xf32>, vector<256x256xf32>, vector<48x256xf32> -> vector<48x256xf32>
    %c0_109 = arith.constant 0 : index
    %c0_110 = arith.constant 0 : index
    %257 = vector.load %arg7[%c0_109, %c0_110] : memref<1x256xf32, #tpu.memory_space<vmem>>, vector<1x256xf32>
    %258 = vector.broadcast %257 : vector<1x256xf32> to vector<48x256xf32>
    %259 = arith.addf %256, %258 : vector<48x256xf32>
    %260 = vector.shape_cast %259 : vector<48x256xf32> to vector<6x8x256xf32>
    %c0_111 = arith.constant 0 : index
    %c0_112 = arith.constant 0 : index
    %c0_113 = arith.constant 0 : index
    %261 = vector.load %arg8[%c0_111, %c0_112, %c0_113] : memref<6x8x256xf32, #tpu.memory_space<vmem>>, vector<6x8x256xf32>
    tpu.vector_store %arg8[%c0_111, %c0_112, %c0_113], %260 {strides = array<i32>} : memref<6x8x256xf32, #tpu.memory_space<vmem>>, vector<6x8x256xf32>,
    return
  }
  func.func @transform_0(%arg0: i32) -> (i32, i32, i32) {
    %c0_i32 = arith.constant 0 : i32
    %c0_i32_0 = arith.constant 0 : i32
    %c0_i32_1 = arith.constant 0 : i32
    return %arg0, %c0_i32, %c0_i32_0 : i32, i32, i32
  }
  func.func @transform_1(%arg0: i32) -> (i32, i32) {
    %c0_i32 = arith.constant 0 : i32
    %c0_i32_0 = arith.constant 0 : i32
    %c0_i32_1 = arith.constant 0 : i32
    return %c0_i32, %c0_i32_0 : i32, i32
  }
  func.func @transform_2(%arg0: i32) -> (i32, i32) {
    %c0_i32 = arith.constant 0 : i32
    %c0_i32_0 = arith.constant 0 : i32
    %c0_i32_1 = arith.constant 0 : i32
    return %c0_i32, %c0_i32_0 : i32, i32
  }
  func.func @transform_3(%arg0: i32) -> (i32, i32) {
    %c0_i32 = arith.constant 0 : i32
    %c0_i32_0 = arith.constant 0 : i32
    %c0_i32_1 = arith.constant 0 : i32
    return %c0_i32, %c0_i32_0 : i32, i32
  }
  func.func @transform_4(%arg0: i32) -> (i32, i32) {
    %c0_i32 = arith.constant 0 : i32
    %c0_i32_0 = arith.constant 0 : i32
    %c0_i32_1 = arith.constant 0 : i32
    return %c0_i32, %c0_i32_0 : i32, i32
  }
  func.func @transform_5(%arg0: i32) -> (i32, i32) {
    %c0_i32 = arith.constant 0 : i32
    %c0_i32_0 = arith.constant 0 : i32
    %c0_i32_1 = arith.constant 0 : i32
    return %c0_i32, %c0_i32_0 : i32, i32
  }
  func.func @transform_6(%arg0: i32) -> (i32, i32) {
    %c0_i32 = arith.constant 0 : i32
    %c0_i32_0 = arith.constant 0 : i32
    %c0_i32_1 = arith.constant 0 : i32
    return %c0_i32, %c0_i32_0 : i32, i32
  }
  func.func @transform_7(%arg0: i32) -> (i32, i32, i32) {
    %c0_i32 = arith.constant 0 : i32
    %c0_i32_0 = arith.constant 0 : i32
    %c0_i32_1 = arith.constant 0 : i32
    return %arg0, %c0_i32, %c0_i32_0 : i32, i32, i32
  }
}

</mosaic_0001>

<bundles_post_ra>
// kernel: tpu_custom_call.1
= control target key start
LH: loop header
LB: loop body
LE: loop exit
PB: predicated region body
PF: predicated region fallthrough
CT: control target
= control target key end

     0   :  { %12 = vsyncpa [#allocation4], 0  ;;  %s9520_s0 = inlined_call_operand.vmem [shape: f32[6,8,256], index: 0, kind: input, shape index: {}]   ;;  %s9521_s1 = inlined_call_operand.hbm [shape: f32[256,768], index: 1, kind: input, shape index: {}]   ;;  %s9522_s2 = inlined_call_operand.vmem [shape: f32[1,768], index: 2, kind: input, shape index: {}]   ;;  %s9523_s3 = inlined_call_operand.vmem [shape: f32[256,64], index: 3, kind: input, shape index: {}]   ;;  %s9524_s4 = inlined_call_operand.vmem [shape: f32[64,256], index: 4, kind: input, shape index: {}]   ;;  %s9525_s5 = inlined_call_operand.hbm [shape: f32[256,256], index: 5, kind: input, shape index: {}]   ;;  %s9526_s6 = inlined_call_operand.vmem [shape: f32[1,256], index: 6, kind: input, shape index: {}]   ;;  %s9527_s7 = inlined_call_operand.hbm [shape: f32[6,8,256], index: 7, kind: output, shape index: {}]  }
   0x1   :  { %13 = vsyncpa [#allocation7], 0 }
   0x2   :  { %14 = vsyncpa [#allocation5], 0  ;;  %s6883_s24 = smov [#allocation3]  }
   0x3   :  { %s22_s25 = sshll.u32 %s6883_s24, 4  ;;  %s23_s25 = int_to_ptr.vmem [resolvable:$true] %s22_s25 }
   0x4   :  { %s6825_s26 = scalar_lea.vmem %s23_s25, 24576  ;;  %p6830_p1 = scmp.lt.s32.totalorder %s23_s25, %s23_s25 }
   0x5   :  { %p6826_p0 = scmp.ne.s32.totalorder %s23_s25, %s6825_s26  ;;  %p6831_p2 = scmp.lt.s32.totalorder %s6825_s26, %s6825_s26 }
   0x7   :  { %p6832_p3 = por %p6831_p2, %p6830_p1 }
   0x9   :  { %p6833_p4 = pnand %p6832_p3, %p6826_p0 }
   0xb   :  { %6836 = shalt.err (!%p6833_p4)
}
   0xc   :  { %s6884_s27 = smov 768   ;;  %s6885_s28 = smov 48  }
   0xd   :  { %28 = dma.hbm_to_vmem [thread:$0]  %s9521_s1, 24576, %s23_s25, [#allocation4], %s6884_s27, %s6884_s27, %s6885_s28  }
   0xe   :  { %s6886_s8 = smov [#allocation6]  }
   0xf   :  { %s40_s9 = sshll.u32 %s6886_s8, 4  ;;  %s41_s9 = int_to_ptr.vmem [resolvable:$true] %s40_s9 }
  0x10   :  { %s6845_s10 = scalar_lea.vmem %s41_s9, 8192  ;;  %p6850_p6 = scmp.lt.s32.totalorder %s41_s9, %s41_s9 }
  0x11   :  { %p6846_p5 = scmp.ne.s32.totalorder %s41_s9, %s6845_s10  ;;  %p6851_p7 = scmp.lt.s32.totalorder %s6845_s10, %s6845_s10 }
  0x13   :  { %p6852_p8 = por %p6851_p7, %p6850_p6 }
  0x15   :  { %p6853_p9 = pnand %p6852_p8, %p6846_p5 }
  0x17   :  { %6856 = shalt.err (!%p6853_p9)
}
  0x18   :  { %s6887_s11 = smov 256   ;;  %s6888_s12 = smov 16  }
  0x19   :  { %46 = dma.hbm_to_vmem [thread:$0]  %s9525_s5, 8192, %s41_s9, [#allocation7], %s6887_s11, %s6887_s11, %s6888_s12  }
  0x1a   :  { %6877 = dma.done.wait [#allocation4], 24576  }
  0x1b   :  { %6878 = vsyncadd [#allocation4], 4294942720 }
  0x1c   :  { %6879 = dma.done.wait [#allocation7], 8192  }
  0x1d   :  { %6880 = vsyncadd [#allocation7], 4294959104  ;;  %v158_v0 = vld [vmem:[#allocation3 + $0x2d8] sm:$0xff]  ;;  %v160_v1 = vld [vmem:[#allocation3 + $0x2e8] sm:$0xff]  ;;  %vm781_vm0 = vcmask 523264  }
  0x1e   :  { %v157_v2 = vld [vmem:[#allocation3 + $0x2d0] sm:$0xff]  ;;  %291 = vmatprep.subr.mxu0 %v158_v0  ;;  %392 = vmatprep.subr.mxu1 %v160_v1  ;;  %v159_v3 = vld [vmem:[#allocation3 + $0x2e0] sm:$0xff]  ;;  %v152_v4 = vld [vmem:[#allocation3 + $0x2a8] sm:$0xff] }
  0x1f   :  { %v154_v5 = vld [vmem:[#allocation3 + $0x2b8] sm:$0xff]  ;;  %292 = vmatpush1.msra.mxu0 %v157_v2  ;;  %393 = vmatpush1.msra.mxu1 %v159_v3  ;;  %v151_v6 = vld [vmem:[#allocation3 + $0x2a0] sm:$0xff]  ;;  %v153_v7 = vld [vmem:[#allocation3 + $0x2b0] sm:$0xff] }
  0x20   :  { %v146_v8 = vld [vmem:[#allocation3 + $0x278] sm:$0xff]  ;;  %293 = vmatprep.subr.mxu0 %v152_v4  ;;  %394 = vmatprep.subr.mxu1 %v154_v5  ;;  %v148_v9 = vld [vmem:[#allocation3 + $0x288] sm:$0xff]  ;;  %v145_v10 = vld [vmem:[#allocation3 + $0x270] sm:$0xff] }
  0x21   :  { %v147_v11 = vld [vmem:[#allocation3 + $0x280] sm:$0xff]  ;;  %294 = vmatpush1.msra.mxu0 %v151_v6  ;;  %395 = vmatpush1.msra.mxu1 %v153_v7  ;;  %v140_v12 = vld [vmem:[#allocation3 + $0x248] sm:$0xff]  ;;  %v142_v13 = vld [vmem:[#allocation3 + $0x258] sm:$0xff] }
  0x22   :  { %295 = vmatprep.subr.mxu0 %v146_v8  ;;  %396 = vmatprep.subr.mxu1 %v148_v9  ;;  %v139_v14 = vld [vmem:[#allocation3 + $0x240] sm:$0xff]  ;;  %v141_v15 = vld [vmem:[#allocation3 + $0x250] sm:$0xff]  ;;  %v134_v16 = vld [vmem:[#allocation3 + $0x218] sm:$0xff] }
  0x23   :  { %296 = vmatpush1.msra.mxu0 %v145_v10  ;;  %397 = vmatpush1.msra.mxu1 %v147_v11  ;;  %v136_v17 = vld [vmem:[#allocation3 + $0x228] sm:$0xff]  ;;  %v133_v18 = vld [vmem:[#allocation3 + $0x210] sm:$0xff]  ;;  %v135_v19 = vld [vmem:[#allocation3 + $0x220] sm:$0xff] }
  0x24   :  { %297 = vmatprep.subr.mxu0 %v140_v12  ;;  %398 = vmatprep.subr.mxu1 %v142_v13  ;;  %v128_v20 = vld [vmem:[#allocation3 + $0x1e8] sm:$0xff]  ;;  %v130_v21 = vld [vmem:[#allocation3 + $0x1f8] sm:$0xff]  ;;  %v127_v22 = vld [vmem:[#allocation3 + $0x1e0] sm:$0xff] }
  0x25   :  { %298 = vmatpush1.msra.mxu0 %v139_v14  ;;  %399 = vmatpush1.msra.mxu1 %v141_v15  ;;  %v129_v23 = vld [vmem:[#allocation3 + $0x1f0] sm:$0xff]  ;;  %v122_v24 = vld [vmem:[#allocation3 + $0x1b8] sm:$0xff]  ;;  %v124_v25 = vld [vmem:[#allocation3 + $0x1c8] sm:$0xff] }
  0x26   :  { %299 = vmatprep.subr.mxu0 %v134_v16  ;;  %400 = vmatprep.subr.mxu1 %v136_v17  ;;  %v121_v26 = vld [vmem:[#allocation3 + $0x1b0] sm:$0xff]  ;;  %v123_v27 = vld [vmem:[#allocation3 + $0x1c0] sm:$0xff]  ;;  %v116_v28 = vld [vmem:[#allocation3 + $0x188] sm:$0xff] }
  0x27   :  { %300 = vmatpush1.msra.mxu0 %v133_v18  ;;  %401 = vmatpush1.msra.mxu1 %v135_v19  ;;  %v118_v29 = vld [vmem:[#allocation3 + $0x198] sm:$0xff]  ;;  %v115_v30 = vld [vmem:[#allocation3 + $0x180] sm:$0xff]  ;;  %v117_v31 = vld [vmem:[#allocation3 + $0x190] sm:$0xff] }
  0x28   :  { %301 = vmatprep.subr.mxu0 %v128_v20  ;;  %402 = vmatprep.subr.mxu1 %v130_v21  ;;  %v110_v32 = vld [vmem:[#allocation3 + $0x158] sm:$0xff]  ;;  %v112_v33 = vld [vmem:[#allocation3 + $0x168] sm:$0xff]  ;;  %v109_v34 = vld [vmem:[#allocation3 + $0x150] sm:$0xff] }
  0x29   :  { %302 = vmatpush1.msra.mxu0 %v127_v22  ;;  %403 = vmatpush1.msra.mxu1 %v129_v23  ;;  %v111_v35 = vld [vmem:[#allocation3 + $0x160] sm:$0xff]  ;;  %v104_v36 = vld [vmem:[#allocation3 + $0x128] sm:$0xff]  ;;  %v106_v37 = vld [vmem:[#allocation3 + $0x138] sm:$0xff] }
  0x2a   :  { %303 = vmatprep.subr.mxu0 %v122_v24  ;;  %404 = vmatprep.subr.mxu1 %v124_v25  ;;  %v103_v38 = vld [vmem:[#allocation3 + $0x120] sm:$0xff]  ;;  %v105_v39 = vld [vmem:[#allocation3 + $0x130] sm:$0xff]  ;;  %v98_v40 = vld [vmem:[#allocation3 + $0xf8] sm:$0xff] }
  0x2b   :  { %304 = vmatpush1.msra.mxu0 %v121_v26  ;;  %405 = vmatpush1.msra.mxu1 %v123_v27  ;;  %v100_v41 = vld [vmem:[#allocation3 + $0x108] sm:$0xff]  ;;  %v97_v42 = vld [vmem:[#allocation3 + $0xf0] sm:$0xff]  ;;  %v99_v43 = vld [vmem:[#allocation3 + $0x100] sm:$0xff] }
  0x2c   :  { %305 = vmatprep.subr.mxu0 %v116_v28  ;;  %406 = vmatprep.subr.mxu1 %v118_v29  ;;  %v92_v44 = vld [vmem:[#allocation3 + $0xc8] sm:$0xff]  ;;  %v94_v45 = vld [vmem:[#allocation3 + $0xd8] sm:$0xff]  ;;  %v91_v46 = vld [vmem:[#allocation3 + $0xc0] sm:$0xff] }
  0x2d   :  { %306 = vmatpush1.msra.mxu0 %v115_v30  ;;  %407 = vmatpush1.msra.mxu1 %v117_v31  ;;  %v93_v47 = vld [vmem:[#allocation3 + $0xd0] sm:$0xff]  ;;  %v86_v48 = vld [vmem:[#allocation3 + $0x98] sm:$0xff]  ;;  %v88_v49 = vld [vmem:[#allocation3 + $0xa8] sm:$0xff] }
  0x2e   :  { %307 = vmatprep.subr.mxu0 %v110_v32  ;;  %408 = vmatprep.subr.mxu1 %v112_v33  ;;  %v85_v50 = vld [vmem:[#allocation3 + $0x90] sm:$0xff]  ;;  %v87_v51 = vld [vmem:[#allocation3 + $0xa0] sm:$0xff]  ;;  %v80_v52 = vld [vmem:[#allocation3 + $0x68] sm:$0xff] }
  0x2f   :  { %308 = vmatpush1.msra.mxu0 %v109_v34  ;;  %409 = vmatpush1.msra.mxu1 %v111_v35  ;;  %v82_v53 = vld [vmem:[#allocation3 + $0x78] sm:$0xff]  ;;  %v79_v54 = vld [vmem:[#allocation3 + $0x60] sm:$0xff]  ;;  %v81_v55 = vld [vmem:[#allocation3 + $0x70] sm:$0xff] }
  0x30   :  { %309 = vmatprep.subr.mxu0 %v104_v36  ;;  %410 = vmatprep.subr.mxu1 %v106_v37  ;;  %v74_v56 = vld [vmem:[#allocation3 + $0x38] sm:$0xff]  ;;  %v76_v57 = vld [vmem:[#allocation3 + $0x48] sm:$0xff]  ;;  %v73_v58 = vld [vmem:[#allocation3 + $0x30] sm:$0xff] }
  0x31   :  { %310 = vmatpush1.msra.mxu0 %v103_v38  ;;  %411 = vmatpush1.msra.mxu1 %v105_v39  ;;  %v75_v59 = vld [vmem:[#allocation3 + $0x40] sm:$0xff]  ;;  %v68_v60 = vld [vmem:[#allocation3 + $0x8] sm:$0xff]  ;;  %v70_v61 = vld [vmem:[#allocation3 + $0x18] sm:$0xff] }
  0x32   :  { %311 = vmatprep.subr.mxu0 %v98_v40  ;;  %412 = vmatprep.subr.mxu1 %v100_v41  ;;  %v67_v62 = vld [vmem:[#allocation3] sm:$0xff]  ;;  %v69_v63 = vld [vmem:[#allocation3 + $0x10] sm:$0xff]  ;;  %v254_v0 = vld [vmem:[#allocation3 + $0x5d8] sm:$0xff] }
  0x33   :  { %312 = vmatpush1.msra.mxu0 %v97_v42  ;;  %413 = vmatpush1.msra.mxu1 %v99_v43  ;;  %v256_v1 = vld [vmem:[#allocation3 + $0x5e8] sm:$0xff]  ;;  %v253_v2 = vld [vmem:[#allocation3 + $0x5d0] sm:$0xff]  ;;  %v255_v3 = vld [vmem:[#allocation3 + $0x5e0] sm:$0xff] }
  0x34   :  { %313 = vmatprep.subr.mxu0 %v92_v44  ;;  %414 = vmatprep.subr.mxu1 %v94_v45  ;;  %v248_v4 = vld [vmem:[#allocation3 + $0x5a8] sm:$0xff]  ;;  %v250_v5 = vld [vmem:[#allocation3 + $0x5b8] sm:$0xff]  ;;  %v247_v6 = vld [vmem:[#allocation3 + $0x5a0] sm:$0xff] }
  0x35   :  { %314 = vmatpush1.msra.mxu0 %v91_v46  ;;  %415 = vmatpush1.msra.mxu1 %v93_v47  ;;  %v249_v7 = vld [vmem:[#allocation3 + $0x5b0] sm:$0xff]  ;;  %v242_v8 = vld [vmem:[#allocation3 + $0x578] sm:$0xff]  ;;  %v244_v9 = vld [vmem:[#allocation3 + $0x588] sm:$0xff] }
  0x36   :  { %315 = vmatprep.subr.mxu0 %v86_v48  ;;  %416 = vmatprep.subr.mxu1 %v88_v49  ;;  %v241_v10 = vld [vmem:[#allocation3 + $0x570] sm:$0xff]  ;;  %v243_v11 = vld [vmem:[#allocation3 + $0x580] sm:$0xff]  ;;  %v236_v12 = vld [vmem:[#allocation3 + $0x548] sm:$0xff] }
  0x37   :  { %316 = vmatpush1.msra.mxu0 %v85_v50  ;;  %417 = vmatpush1.msra.mxu1 %v87_v51  ;;  %v238_v13 = vld [vmem:[#allocation3 + $0x558] sm:$0xff]  ;;  %v235_v14 = vld [vmem:[#allocation3 + $0x540] sm:$0xff]  ;;  %v237_v15 = vld [vmem:[#allocation3 + $0x550] sm:$0xff] }
  0x38   :  { %317 = vmatprep.subr.mxu0 %v80_v52  ;;  %418 = vmatprep.subr.mxu1 %v82_v53  ;;  %v230_v16 = vld [vmem:[#allocation3 + $0x518] sm:$0xff]  ;;  %v232_v17 = vld [vmem:[#allocation3 + $0x528] sm:$0xff]  ;;  %v229_v18 = vld [vmem:[#allocation3 + $0x510] sm:$0xff] }
  0x39   :  { %318 = vmatpush1.msra.mxu0 %v79_v54  ;;  %419 = vmatpush1.msra.mxu1 %v81_v55  ;;  %v231_v19 = vld [vmem:[#allocation3 + $0x520] sm:$0xff]  ;;  %v224_v20 = vld [vmem:[#allocation3 + $0x4e8] sm:$0xff]  ;;  %v226_v21 = vld [vmem:[#allocation3 + $0x4f8] sm:$0xff] }
  0x3a   :  { %319 = vmatprep.subr.mxu0 %v74_v56  ;;  %420 = vmatprep.subr.mxu1 %v76_v57  ;;  %v223_v22 = vld [vmem:[#allocation3 + $0x4e0] sm:$0xff]  ;;  %v225_v23 = vld [vmem:[#allocation3 + $0x4f0] sm:$0xff]  ;;  %v218_v24 = vld [vmem:[#allocation3 + $0x4b8] sm:$0xff] }
  0x3b   :  { %320 = vmatpush1.msra.mxu0 %v73_v58  ;;  %421 = vmatpush1.msra.mxu1 %v75_v59  ;;  %v220_v25 = vld [vmem:[#allocation3 + $0x4c8] sm:$0xff]  ;;  %v217_v26 = vld [vmem:[#allocation3 + $0x4b0] sm:$0xff]  ;;  %v219_v27 = vld [vmem:[#allocation3 + $0x4c0] sm:$0xff] }
  0x3c   :  { %321 = vmatprep.subr.mxu0 %v68_v60  ;;  %422 = vmatprep.subr.mxu1 %v70_v61  ;;  %v212_v28 = vld [vmem:[#allocation3 + $0x488] sm:$0xff]  ;;  %v214_v29 = vld [vmem:[#allocation3 + $0x498] sm:$0xff]  ;;  %v211_v30 = vld [vmem:[#allocation3 + $0x480] sm:$0xff] }
  0x3d   :  { %322 = vmatpush1.msra.mxu0 %v67_v62  ;;  %423 = vmatpush1.msra.mxu1 %v69_v63  ;;  %v213_v31 = vld [vmem:[#allocation3 + $0x490] sm:$0xff]  ;;  %v206_v32 = vld [vmem:[#allocation3 + $0x458] sm:$0xff]  ;;  %v208_v33 = vld [vmem:[#allocation3 + $0x468] sm:$0xff] }
  0x3e   :  { %323 = vmatprep.subr.mxu0 %v254_v0  ;;  %424 = vmatprep.subr.mxu1 %v256_v1  ;;  %v205_v34 = vld [vmem:[#allocation3 + $0x450] sm:$0xff]  ;;  %v207_v35 = vld [vmem:[#allocation3 + $0x460] sm:$0xff]  ;;  %v200_v36 = vld [vmem:[#allocation3 + $0x428] sm:$0xff] }
  0x3f   :  { %324 = vmatpush2.msra.mxu0 %v253_v2  ;;  %425 = vmatpush2.msra.mxu1 %v255_v3  ;;  %v202_v37 = vld [vmem:[#allocation3 + $0x438] sm:$0xff]  ;;  %v199_v38 = vld [vmem:[#allocation3 + $0x420] sm:$0xff]  ;;  %v201_v39 = vld [vmem:[#allocation3 + $0x430] sm:$0xff] }
  0x40   :  { %325 = vmatprep.subr.mxu0 %v248_v4  ;;  %426 = vmatprep.subr.mxu1 %v250_v5  ;;  %v194_v40 = vld [vmem:[#allocation3 + $0x3f8] sm:$0xff]  ;;  %v196_v41 = vld [vmem:[#allocation3 + $0x408] sm:$0xff]  ;;  %v193_v42 = vld [vmem:[#allocation3 + $0x3f0] sm:$0xff] }
  0x41   :  { %326 = vmatpush2.msra.mxu0 %v247_v6  ;;  %427 = vmatpush2.msra.mxu1 %v249_v7  ;;  %v195_v43 = vld [vmem:[#allocation3 + $0x400] sm:$0xff]  ;;  %v188_v44 = vld [vmem:[#allocation3 + $0x3c8] sm:$0xff]  ;;  %v190_v45 = vld [vmem:[#allocation3 + $0x3d8] sm:$0xff] }
  0x42   :  { %327 = vmatprep.subr.mxu0 %v242_v8  ;;  %428 = vmatprep.subr.mxu1 %v244_v9  ;;  %v187_v46 = vld [vmem:[#allocation3 + $0x3c0] sm:$0xff]  ;;  %v189_v47 = vld [vmem:[#allocation3 + $0x3d0] sm:$0xff]  ;;  %v182_v48 = vld [vmem:[#allocation3 + $0x398] sm:$0xff] }
  0x43   :  { %328 = vmatpush2.msra.mxu0 %v241_v10  ;;  %429 = vmatpush2.msra.mxu1 %v243_v11  ;;  %v184_v49 = vld [vmem:[#allocation3 + $0x3a8] sm:$0xff]  ;;  %v181_v50 = vld [vmem:[#allocation3 + $0x390] sm:$0xff]  ;;  %v183_v51 = vld [vmem:[#allocation3 + $0x3a0] sm:$0xff] }
  0x44   :  { %329 = vmatprep.subr.mxu0 %v236_v12  ;;  %430 = vmatprep.subr.mxu1 %v238_v13  ;;  %v176_v52 = vld [vmem:[#allocation3 + $0x368] sm:$0xff]  ;;  %v178_v53 = vld [vmem:[#allocation3 + $0x378] sm:$0xff]  ;;  %v175_v54 = vld [vmem:[#allocation3 + $0x360] sm:$0xff] }
  0x45   :  { %330 = vmatpush2.msra.mxu0 %v235_v14  ;;  %431 = vmatpush2.msra.mxu1 %v237_v15  ;;  %v177_v55 = vld [vmem:[#allocation3 + $0x370] sm:$0xff]  ;;  %v170_v56 = vld [vmem:[#allocation3 + $0x338] sm:$0xff]  ;;  %v172_v57 = vld [vmem:[#allocation3 + $0x348] sm:$0xff] }
  0x46   :  { %331 = vmatprep.subr.mxu0 %v230_v16  ;;  %432 = vmatprep.subr.mxu1 %v232_v17  ;;  %v169_v58 = vld [vmem:[#allocation3 + $0x330] sm:$0xff]  ;;  %v171_v59 = vld [vmem:[#allocation3 + $0x340] sm:$0xff]  ;;  %v164_v60 = vld [vmem:[#allocation3 + $0x308] sm:$0xff] }
  0x47   :  { %332 = vmatpush2.msra.mxu0 %v229_v18  ;;  %433 = vmatpush2.msra.mxu1 %v231_v19  ;;  %v166_v61 = vld [vmem:[#allocation3 + $0x318] sm:$0xff]  ;;  %v163_v62 = vld [vmem:[#allocation3 + $0x300] sm:$0xff]  ;;  %v6944_v63 = vld [vmem:[%s9520_s0 + $0x8] sm:$0xff] }
  0x48   :  { %333 = vmatprep.subr.mxu0 %v224_v20  ;;  %434 = vmatprep.subr.mxu1 %v226_v21  ;;  %v165_v0 = vld [vmem:[#allocation3 + $0x310] sm:$0xff]  ;;  %v55_v1 = vld [vmem:[%s9520_s0] sm:$0xff]  ;;  %v58_v2 = vld [vmem:[%s9520_s0 + $0x18] sm:$0xff] }
  0x49   :  { %334 = vmatpush2.msra.mxu0 %v223_v22  ;;  %435 = vmatpush2.msra.mxu1 %v225_v23  ;;  %v685_v3 = vld [vmem:[%s9523_s3 + $0xf8] sm:$0xff]  ;;  %v57_v5 = vld [vmem:[%s9520_s0 + $0x10] sm:$0xff]  ;;  %v60_v6 = vld [vmem:[%s9520_s0 + $0x28] sm:$0xff] }
  0x4a   :  { %335 = vmatprep.subr.mxu0 %v218_v24  ;;  %436 = vmatprep.subr.mxu1 %v220_v25  ;;  %v669_v4 = vld [vmem:[%s9523_s3 + $0x78] sm:$0xff]  ;;  %v684_v7 = vld [vmem:[%s9523_s3 + $0xf0] sm:$0xff]  ;;  %v59_v9 = vld [vmem:[%s9520_s0 + $0x20] sm:$0xff] }
  0x4b   :  { %336 = vmatpush2.msra.mxu0 %v217_v26  ;;  %437 = vmatpush2.msra.mxu1 %v219_v27  ;;  %v668_v8 = vld [vmem:[%s9523_s3 + $0x70] sm:$0xff]  ;;  %v62_v10 = vld [vmem:[%s9520_s0 + $0x38] sm:$0xff]  ;;  %v683_v11 = vld [vmem:[%s9523_s3 + $0xe8] sm:$0xff] }
  0x4c   :  { %337 = vmatprep.subr.mxu0 %v212_v28  ;;  %438 = vmatprep.subr.mxu1 %v214_v29  ;;  %v667_v12 = vld [vmem:[%s9523_s3 + $0x68] sm:$0xff]  ;;  %v6987_v13 = vld [vmem:[%s9520_s0 + $0x30] sm:$0xff]  ;;  %v682_v15 = vld [vmem:[%s9523_s3 + $0xe0] sm:$0xff] }
  0x4d   :  { %338 = vmatpush2.msra.mxu0 %v211_v30  ;;  %439 = vmatpush2.msra.mxu1 %v213_v31  ;;  %v6992_v14 = vld [vmem:[%s9520_s0 + $0x48] sm:$0xff]  ;;  %v666_v16 = vld [vmem:[%s9523_s3 + $0x60] sm:$0xff]  ;;  %v7012_v18 = vld [vmem:[%s9520_s0 + $0x58] sm:$0xff] }
  0x4e   :  { %339 = vmatprep.subr.mxu0 %v206_v32  ;;  %440 = vmatprep.subr.mxu1 %v208_v33  ;;  %v7006_v17 = vld [vmem:[%s9520_s0 + $0x40] sm:$0xff]  ;;  %v681_v19 = vld [vmem:[%s9523_s3 + $0xd8] sm:$0xff]  ;;  %v7026_v21 = vld [vmem:[%s9520_s0 + $0x50] sm:$0xff] }
  0x4f   :  { %340 = vmatpush2.msra.mxu0 %v205_v34  ;;  %441 = vmatpush2.msra.mxu1 %v207_v35  ;;  %v665_v20 = vld [vmem:[%s9523_s3 + $0x58] sm:$0xff]  ;;  %v680_v22 = vld [vmem:[%s9523_s3 + $0xd0] sm:$0xff]  ;;  %v679_v24 = vld [vmem:[%s9523_s3 + $0xc8] sm:$0xff] }
  0x50   :  { %341 = vmatprep.subr.mxu0 %v200_v36  ;;  %442 = vmatprep.subr.mxu1 %v202_v37  ;;  %v664_v23 = vld [vmem:[%s9523_s3 + $0x50] sm:$0xff]  ;;  %v663_v25 = vld [vmem:[%s9523_s3 + $0x48] sm:$0xff]  ;;  %v678_v26 = vld [vmem:[%s9523_s3 + $0xc0] sm:$0xff] }
  0x51   :  { %342 = vmatpush2.msra.mxu0 %v199_v38  ;;  %443 = vmatpush2.msra.mxu1 %v201_v39  ;;  %v662_v27 = vld [vmem:[%s9523_s3 + $0x40] sm:$0xff]  ;;  %v677_v28 = vld [vmem:[%s9523_s3 + $0xb8] sm:$0xff]  ;;  %v676_v30 = vld [vmem:[%s9523_s3 + $0xb0] sm:$0xff] }
  0x52   :  { %343 = vmatprep.subr.mxu0 %v194_v40  ;;  %444 = vmatprep.subr.mxu1 %v196_v41  ;;  %v661_v29 = vld [vmem:[%s9523_s3 + $0x38] sm:$0xff]  ;;  %v660_v31 = vld [vmem:[%s9523_s3 + $0x30] sm:$0xff]  ;;  %v675_v32 = vld [vmem:[%s9523_s3 + $0xa8] sm:$0xff] }
  0x53   :  { %344 = vmatpush2.msra.mxu0 %v193_v42  ;;  %445 = vmatpush2.msra.mxu1 %v195_v43  ;;  %v659_v33 = vld [vmem:[%s9523_s3 + $0x28] sm:$0xff]  ;;  %v674_v34 = vld [vmem:[%s9523_s3 + $0xa0] sm:$0xff]  ;;  %v673_v36 = vld [vmem:[%s9523_s3 + $0x98] sm:$0xff] }
  0x54   :  { %345 = vmatprep.subr.mxu0 %v188_v44  ;;  %446 = vmatprep.subr.mxu1 %v190_v45  ;;  %v658_v35 = vld [vmem:[%s9523_s3 + $0x20] sm:$0xff]  ;;  %v657_v37 = vld [vmem:[%s9523_s3 + $0x18] sm:$0xff]  ;;  %v672_v38 = vld [vmem:[%s9523_s3 + $0x90] sm:$0xff]  ;;  %v9528_v44 = vlaneseq }
  0x55   :  { %346 = vmatpush2.msra.mxu0 %v187_v46  ;;  %447 = vmatpush2.msra.mxu1 %v189_v47  ;;  %v656_v39 = vld [vmem:[%s9523_s3 + $0x10] sm:$0xff]  ;;  %v671_v40 = vld [vmem:[%s9523_s3 + $0x88] sm:$0xff]  ;;  %v670_v42 = vld [vmem:[%s9523_s3 + $0x80] sm:$0xff] }
  0x56   :  { %347 = vmatprep.subr.mxu0 %v182_v48  ;;  %448 = vmatprep.subr.mxu1 %v184_v49  ;;  %v655_v41 = vld [vmem:[%s9523_s3 + $0x8] sm:$0xff]  ;;  %v654_v43 = vld [vmem:[%s9523_s3] sm:$0xff]  ;;  %v7099_v45 = vshrl.u32 %v9528_v44, 7 }
  0x57   :  { %348 = vmatpush2.msra.mxu0 %v181_v50  ;;  %449 = vmatpush2.msra.mxu1 %v183_v51  ;;  %v259_v48 = vld [vmem:[%s9522_s2] sm:$0x3f] }
  0x58   :  { %349 = vmatprep.subr.mxu0 %v176_v52  ;;  %450 = vmatprep.subr.mxu1 %v178_v53  ;;  %9571 = vst [vmem:[#allocation12_spill] sm:$0xff] %v7099_v45  ;;  %v7102_v46 = vsub.s32 0, %v7099_v45  ;;  %v7105_v47 = vsub.s32 2, %v7099_v45  ;;  %v7111_v49 = vsub.s32 1, %v7099_v45  ;;  %v7114_v50 = vsub.s32 3, %v7099_v45 }
  0x59   :  { %350 = vmatpush2.msra.mxu0 %v175_v54  ;;  %451 = vmatpush2.msra.mxu1 %v177_v55 }
  0x5a   :  { %351 = vmatprep.subr.mxu0 %v170_v56  ;;  %452 = vmatprep.subr.mxu1 %v172_v57  ;;  %9572 = vst [vmem:[#allocation13_spill] sm:$0xff] %v7102_v46  ;;  %9573 = vst [vmem:[#allocation14_spill] sm:$0xff] %v7111_v49  ;;  %v7117_v51 = vrot.slane %v259_v48, %v7102_v46  ;;  %v7120_v52 = vrot.slane %v259_v48, %v7105_v47  ;;  %v7129_v57 = vsub.s32 4, %v7099_v45 }
  0x5b   :  { %352 = vmatpush2.msra.mxu0 %v169_v58  ;;  %453 = vmatpush2.msra.mxu1 %v171_v59  ;;  %v7123_v53 = vrot.slane %v259_v48, %v7111_v49  ;;  %v7126_v54 = vrot.slane %v259_v48, %v7114_v50  ;;  %v7132_v58 = vsub.s32 5, %v7099_v45 }
  0x5c   :  { %353 = vmatprep.subr.mxu0 %v164_v60  ;;  %454 = vmatprep.subr.mxu1 %v166_v61 }
  0x5d   :  { %354 = vmatpush2.msra.mxu0 %v163_v62  ;;  %355 = vmatprep.mubr.f32.mxu0 %v6944_v63 }
  0x5e   :  { %455 = vmatpush2.msra.mxu1 %v165_v0  ;;  %456 = vmatprep.mubr.f32.mxu1 %v6944_v63  ;;  %v7144_v0 = vsub.s32 7, %v7099_v45 }
  0x5f   :  { %356 = vmatmul.mubr.f32.vlgmr.msra.gmra.mxu0 %v55_v1  ;;  %457 = vmatmul.mubr.f32.vlgmr.msra.gmra.mxu1 %v55_v1 }
  0x60   :  { %361 = vmatprep.mubr.f32.mxu0 %v58_v2  ;;  %462 = vmatprep.mubr.f32.mxu1 %v58_v2 }
  0x61   :  { %6177 = vmatprep.subr.mxu1 %v685_v3 }
  0x62   :  { %6178 = vmatpush3.msra.mxu1 %v669_v4 }
  0x63   :  { %362 = vmatmul.mubr.f32.gmra.mxu0 %v57_v5  ;;  %463 = vmatmul.mubr.f32.gmra.mxu1 %v57_v5 }
  0x64   :  { %367 = vmatprep.mubr.f32.mxu0 %v60_v6  ;;  %468 = vmatprep.mubr.f32.mxu1 %v60_v6 }
  0x65   :  { %6179 = vmatprep.subr.mxu1 %v684_v7 }
  0x66   :  { %6180 = vmatpush3.msra.mxu1 %v668_v8 }
  0x67   :  { %368 = vmatmul.mubr.f32.gmra.mxu0 %v59_v9  ;;  %469 = vmatmul.mubr.f32.gmra.mxu1 %v59_v9 }
  0x68   :  { %373 = vmatprep.mubr.f32.mxu0 %v62_v10  ;;  %474 = vmatprep.mubr.f32.mxu1 %v62_v10 }
  0x69   :  { %6181 = vmatprep.subr.mxu1 %v683_v11 }
  0x6a   :  { %6182 = vmatpush3.msra.mxu1 %v667_v12 }
  0x6b   :  { %374 = vmatmul.mubr.f32.gmra.mxu0 %v6987_v13  ;;  %475 = vmatmul.mubr.f32.gmra.mxu1 %v6987_v13 }
  0x6c   :  { %379 = vmatprep.mubr.f32.mxu0 %v6992_v14  ;;  %480 = vmatprep.mubr.f32.mxu1 %v6992_v14 }
  0x6d   :  { %6183 = vmatprep.subr.mxu1 %v682_v15 }
  0x6e   :  { %6184 = vmatpush3.msra.mxu1 %v666_v16 }
  0x6f   :  { %380 = vmatmul.mubr.f32.gmra.mxu0 %v7006_v17  ;;  %481 = vmatmul.mubr.f32.gmra.mxu1 %v7006_v17 }
  0x70   :  { %385 = vmatprep.mubr.f32.mxu0 %v7012_v18  ;;  %486 = vmatprep.mubr.f32.mxu1 %v7012_v18 }
  0x71   :  { %6185 = vmatprep.subr.mxu1 %v681_v19 }
  0x72   :  { %6186 = vmatpush3.msra.mxu1 %v665_v20 }
  0x73   :  { %386 = vmatmul.mubr.f32.gmra.mxu0 %v7026_v21  ;;  %487 = vmatmul.mubr.f32.gmra.mxu1 %v7026_v21 }
  0x74   :  { %6187 = vmatprep.subr.mxu1 %v680_v22  ;;  %557 = vmatprep.mubr.f32.mxu0 %v6944_v63  ;;  %v7141_v63 = vsub.s32 6, %v7099_v45 }
  0x75   :  { %6188 = vmatpush3.msra.mxu1 %v664_v23 }
  0x76   :  { %6189 = vmatprep.subr.mxu1 %v679_v24 }
  0x77   :  { %6190 = vmatpush3.msra.mxu1 %v663_v25 }
  0x78   :  { %6191 = vmatprep.subr.mxu1 %v678_v26 }
  0x79   :  { %6192 = vmatpush3.msra.mxu1 %v662_v27 }
  0x7a   :  { %6193 = vmatprep.subr.mxu1 %v677_v28 }
  0x7b   :  { %6194 = vmatpush3.msra.mxu1 %v661_v29 }
  0x7c   :  { %6195 = vmatprep.subr.mxu1 %v676_v30 }
  0x7d   :  { %6196 = vmatpush3.msra.mxu1 %v660_v31 }
  0x7e   :  { %6197 = vmatprep.subr.mxu1 %v675_v32 }
  0x7f   :  { %6198 = vmatpush3.msra.mxu1 %v659_v33 }
  0x80   :  { %6199 = vmatprep.subr.mxu1 %v674_v34 }
  0x81   :  { %6200 = vmatpush3.msra.mxu1 %v658_v35 }
  0x82   :  { %6201 = vmatprep.subr.mxu1 %v673_v36 }
  0x83   :  { %6202 = vmatpush3.msra.mxu1 %v657_v37 }
  0x84   :  { %6203 = vmatprep.subr.mxu1 %v672_v38 }
  0x85   :  { %6204 = vmatpush3.msra.mxu1 %v656_v39 }
  0x86   :  { %6205 = vmatprep.subr.mxu1 %v671_v40 }
  0x87   :  { %6206 = vmatpush3.msra.mxu1 %v655_v41 }
  0x88   :  { %6207 = vmatprep.subr.mxu1 %v670_v42 }
  0x89   :  { %6208 = vmatpush3.msra.mxu1 %v654_v43 }
 0x11f   :  { %v357_v55 = vpop.f32.mrf.mxu0  ;;  %v458_v56 = vpop.f32.mrf.mxu1 }
 0x120   :  { %v7135_v59 = vadd.f32 %v357_v55, %v7117_v51  ;;  %v7138_v60 = vadd.f32 %v458_v56, %v7120_v52 }
 0x121   :  { %v359_v61 = vpop.f32.mrf.mxu0  ;;  %v460_v62 = vpop.f32.mrf.mxu1 }
 0x122   :  { %v7147_v1 = vadd.f32 %v359_v61, %v7123_v53  ;;  %v7150_v2 = vadd.f32 %v460_v62, %v7126_v54  ;;  %v597_v3 = vrot.slane %v7135_v59, %v7102_v46  ;;  %v1265_v4 = vrot.slane %v7135_v59, %v7111_v49 }
 0x123   :  { %v363_v5 = vpop.f32.mrf.mxu0  ;;  %v464_v6 = vpop.f32.mrf.mxu1  ;;  %v1929_v7 = vrot.slane %v7135_v59, %v7105_v47 }
 0x124   :  { %v7165_v11 = vadd.f32 %v363_v5, %v7117_v51  ;;  %v7168_v12 = vadd.f32 %v464_v6, %v7120_v52  ;;  %v601_v15 = vrot.slane %v7147_v1, %v7102_v46  ;;  %v642_v16 = vmul.f32 %v597_v3, %v7138_v60 }
 0x125   :  { %v365_v19 = vpop.f32.mrf.mxu0  ;;  %v466_v20 = vpop.f32.mrf.mxu1  ;;  %v1269_v22 = vrot.slane %v7147_v1, %v7111_v49  ;;  %v7176_v23 = vmul.f32 %v1265_v4, %v7138_v60  ;;  %v1933_v24 = vrot.slane %v7147_v1, %v7105_v47  ;;  %v7181_v25 = vmul.f32 %v1929_v7, %v7138_v60 }
 0x126   :  { %v7184_v26 = vadd.f32 %v365_v19, %v7123_v53  ;;  %v7187_v27 = vadd.f32 %v466_v20, %v7126_v54  ;;  %v643_v28 = vmul.f32 %v601_v15, %v7150_v2  ;;  %v605_v29 = vrot.slane %v7165_v11, %v7102_v46 }
 0x127   :  { %v369_v30 = vpop.f32.mrf.mxu0  ;;  %v470_v31 = vpop.f32.mrf.mxu1  ;;  %v7193_v32 = vmul.f32 %v1269_v22, %v7150_v2  ;;  %v1273_v33 = vrot.slane %v7165_v11, %v7111_v49  ;;  %v7198_v34 = vmul.f32 %v1933_v24, %v7150_v2  ;;  %v1937_v35 = vrot.slane %v7165_v11, %v7105_v47 }
 0x128   :  { %v7203_v36 = vadd.f32 %v369_v30, %v7117_v51  ;;  %750 = vmatprep.mubr.f32.mxu1 %v643_v28  ;;  %v7206_v37 = vadd.f32 %v470_v31, %v7120_v52  ;;  %v609_v38 = vrot.slane %v7184_v26, %v7102_v46  ;;  %v644_v39 = vmul.f32 %v605_v29, %v7168_v12 }
 0x129   :  { %v371_v40 = vpop.f32.mrf.mxu0  ;;  %751 = vmatmul.mubr.f32.vlgmr.msra.gmra.mxu1 %v642_v16  ;;  %v472_v41 = vpop.f32.mrf.mxu1  ;;  %v1277_v42 = vrot.slane %v7184_v26, %v7111_v49  ;;  %v7214_v43 = vmul.f32 %v1273_v33, %v7168_v12  ;;  %v1941_v48 = vrot.slane %v7184_v26, %v7105_v47  ;;  %v7219_v55 = vmul.f32 %v1937_v35, %v7168_v12 }
 0x12a   :  { %v7222_v56 = vadd.f32 %v371_v40, %v7123_v53  ;;  %v7225_v61 = vadd.f32 %v472_v41, %v7126_v54  ;;  %v645_v62 = vmul.f32 %v609_v38, %v7187_v27  ;;  %v613_v3 = vrot.slane %v7203_v36, %v7102_v46 }
 0x12b   :  { %v375_v4 = vpop.f32.mrf.mxu0  ;;  %v476_v5 = vpop.f32.mrf.mxu1  ;;  %v7231_v6 = vmul.f32 %v1277_v42, %v7187_v27  ;;  %v1281_v7 = vrot.slane %v7203_v36, %v7111_v49  ;;  %v7236_v15 = vmul.f32 %v1941_v48, %v7187_v27  ;;  %v1945_v16 = vrot.slane %v7203_v36, %v7105_v47 }
 0x12c   :  { %v7241_v19 = vadd.f32 %v375_v4, %v7117_v51  ;;  %755 = vmatprep.mubr.f32.mxu1 %v645_v62  ;;  %v7244_v20 = vadd.f32 %v476_v5, %v7120_v52  ;;  %v617_v22 = vrot.slane %v7222_v56, %v7102_v46  ;;  %v646_v24 = vmul.f32 %v613_v3, %v7206_v37 }
 0x12d   :  { %v377_v28 = vpop.f32.mrf.mxu0  ;;  %756 = vmatmul.mubr.f32.gmra.mxu1 %v644_v39  ;;  %v478_v29 = vpop.f32.mrf.mxu1  ;;  %v1285_v30 = vrot.slane %v7222_v56, %v7111_v49  ;;  %v7252_v31 = vmul.f32 %v1281_v7, %v7206_v37  ;;  %v1949_v33 = vrot.slane %v7222_v56, %v7105_v47  ;;  %v7257_v35 = vmul.f32 %v1945_v16, %v7206_v37 }
 0x12e   :  { %v7260_v38 = vadd.f32 %v377_v28, %v7123_v53  ;;  %v7263_v40 = vadd.f32 %v478_v29, %v7126_v54  ;;  %v647_v39 = vmul.f32 %v617_v22, %v7225_v61  ;;  %v621_v41 = vrot.slane %v7241_v19, %v7102_v46 }
 0x12f   :  { %9574 = vst [vmem:[#allocation15_spill] sm:$0xff] %v7257_v35  ;;  %v381_v42 = vpop.f32.mrf.mxu0  ;;  %v482_v48 = vpop.f32.mrf.mxu1  ;;  %v7269_v62 = vmul.f32 %v1285_v30, %v7225_v61  ;;  %v1289_v3 = vrot.slane %v7241_v19, %v7111_v49  ;;  %v7274_v4 = vmul.f32 %v1949_v33, %v7225_v61  ;;  %v1953_v5 = vrot.slane %v7241_v19, %v7105_v47 }
 0x130   :  { %v7279_v7 = vadd.f32 %v381_v42, %v7117_v51  ;;  %760 = vmatprep.mubr.f32.mxu1 %v647_v39  ;;  %v7282_v16 = vadd.f32 %v482_v48, %v7120_v52  ;;  %v625_v22 = vrot.slane %v7260_v38, %v7102_v46  ;;  %v648_v28 = vmul.f32 %v621_v41, %v7244_v20 }
 0x131   :  { %9575 = vst [vmem:[#allocation16_spill] sm:$0xff] %v7274_v4  ;;  %v383_v29 = vpop.f32.mrf.mxu0  ;;  %761 = vmatmul.mubr.f32.gmra.mxu1 %v646_v24  ;;  %v484_v30 = vpop.f32.mrf.mxu1  ;;  %v1293_v33 = vrot.slane %v7260_v38, %v7111_v49  ;;  %v7290_v44 = vmul.f32 %v1289_v3, %v7244_v20  ;;  %v1957_v39 = vrot.slane %v7260_v38, %v7105_v47 }
 0x132   :  { %v7295_v42 = vmul.f32 %v1953_v5, %v7244_v20  ;;  %v7298_v48 = vadd.f32 %v383_v29, %v7123_v53  ;;  %v7301_v41 = vadd.f32 %v484_v30, %v7126_v54  ;;  %v649_v24 = vmul.f32 %v625_v22, %v7263_v40 }
 0x133   :  { %v629_v10 = vrot.slane %v7279_v7, %v7102_v46  ;;  %v387_v9 = vpop.f32.mrf.mxu0  ;;  %v488_v3 = vpop.f32.mrf.mxu1  ;;  %v7307_v8 = vmul.f32 %v1293_v33, %v7263_v40  ;;  %v1297_v5 = vrot.slane %v7279_v7, %v7111_v49  ;;  %v7312_v45 = vmul.f32 %v1957_v39, %v7263_v40 }
 0x134   :  { %9576 = vst [vmem:[#allocation17_spill] sm:$0xff] %v7295_v42  ;;  %v1961_v29 = vrot.slane %v7279_v7, %v7105_v47  ;;  %v7317_v30 = vadd.f32 %v387_v9, %v7117_v51  ;;  %765 = vmatprep.mubr.f32.mxu1 %v649_v24  ;;  %v7320_v22 = vadd.f32 %v488_v3, %v7120_v52 }
 0x135   :  { %9577 = vst [vmem:[#allocation18_spill] sm:$0xff] %v7312_v45  ;;  %v633_v33 = vrot.slane %v7298_v48, %v7102_v46  ;;  %v650_v42 = vmul.f32 %v629_v10, %v7282_v16  ;;  %v389_v35 = vpop.f32.mrf.mxu0  ;;  %766 = vmatmul.mubr.f32.gmra.mxu1 %v648_v28  ;;  %v490_v4 = vpop.f32.mrf.mxu1  ;;  %v1301_v39 = vrot.slane %v7298_v48, %v7111_v49 }
 0x136   :  { %v7328_v45 = vmul.f32 %v1297_v5, %v7282_v16  ;;  %v1965_v51 = vrot.slane %v7298_v48, %v7105_v47  ;;  %v7333_v52 = vmul.f32 %v1961_v29, %v7282_v16  ;;  %v7336_v9 = vadd.f32 %v389_v35, %v7123_v53 }
 0x137   :  { %v7339_v10 = vadd.f32 %v490_v4, %v7126_v54  ;;  %v651_v28 = vmul.f32 %v633_v33, %v7301_v41  ;;  %v637_v24 = vrot.slane %v7317_v30, %v7102_v46  ;;  %v7345_v3 = vmul.f32 %v1301_v39, %v7301_v41 }
 0x138   :  { %9578 = vst [vmem:[#allocation19_spill] sm:$0xff] %v7333_v52  ;;  %v1305_v5 = vrot.slane %v7317_v30, %v7111_v49  ;;  %v7350_v29 = vmul.f32 %v1965_v51, %v7301_v41  ;;  %v1969_v53 = vrot.slane %v7317_v30, %v7105_v47  ;;  %v641_v54 = vrot.slane %v7336_v9, %v7102_v46 }
 0x139   :  { %770 = vmatprep.mubr.f32.mxu1 %v651_v28  ;;  %v652_v35 = vmul.f32 %v637_v24, %v7320_v22  ;;  %v1309_v4 = vrot.slane %v7336_v9, %v7111_v49  ;;  %v1973_v33 = vrot.slane %v7336_v9, %v7105_v47  ;;  %v2597_v28 = vrot.slane %v7147_v1, %v7114_v50 }
 0x13a   :  { %771 = vmatmul.mubr.f32.gmra.mxu1 %v650_v42  ;;  %v7362_v39 = vmul.f32 %v1305_v5, %v7320_v22  ;;  %v7365_v51 = vmul.f32 %v1969_v53, %v7320_v22  ;;  %v9580_v24 = vrot.slane %v7135_v59, %v7114_v50  ;;  %v653_v49 = vmul.f32 %v641_v54, %v7339_v10 }
 0x13b   :  { %v7377_v47 = vmul.f32 %v1309_v4, %v7339_v10  ;;  %v7380_v42 = vmul.f32 %v1973_v33, %v7339_v10  ;;  %v2605_v5 = vrot.slane %v7184_v26, %v7114_v50  ;;  %v7385_v53 = vmul.f32 %v2597_v28, %v7150_v2 }
 0x13c   :  { %9579 = vst [vmem:[#allocation20_spill] sm:$0xff] %v7365_v51  ;;  %v7373_v46 = vmul.f32 %v9580_v24, %v7138_v60  ;;  %v2601_v51 = vrot.slane %v7165_v11, %v7114_v50  ;;  %v2613_v24 = vrot.slane %v7222_v56, %v7114_v50  ;;  %v2609_v54 = vrot.slane %v7203_v36, %v7114_v50 }
 0x13d   :  { %9582 = vst [vmem:[#allocation22_spill] sm:$0xff] %v7380_v42  ;;  %9583 = vst [vmem:[#allocation23_spill] sm:$0xff] %v7385_v53  ;;  %775 = vmatprep.mubr.f32.mxu1 %v653_v49  ;;  %v7394_v4 = vmul.f32 %v2605_v5, %v7187_v27  ;;  %v2621_v33 = vrot.slane %v7260_v38, %v7114_v50  ;;  %v2617_v28 = vrot.slane %v7241_v19, %v7114_v50 }
 0x13e   :  { %9581 = vst [vmem:[#allocation21_spill] sm:$0xff] %v7373_v46  ;;  %v2629_v46 = vrot.slane %v7298_v48, %v7114_v50  ;;  %776 = vmatmul.mubr.f32.gmra.mxu1 %v652_v35  ;;  %v7403_v53 = vmul.f32 %v2601_v51, %v7168_v12  ;;  %v7406_v42 = vmul.f32 %v2613_v24, %v7225_v61 }
 0x13f   :  { %9584 = vst [vmem:[#allocation24_spill] sm:$0xff] %v7394_v4  ;;  %v7409_v49 = vmul.f32 %v2609_v54, %v7206_v37  ;;  %v2625_v5 = vrot.slane %v7279_v7, %v7114_v50  ;;  %v7414_v4 = vmul.f32 %v2621_v33, %v7263_v40  ;;  %v7417_v52 = vmul.f32 %v2617_v28, %v7244_v20 }
 0x140   :  { %9585 = vst [vmem:[#allocation25_spill] sm:$0xff] %v7406_v42  ;;  %v7420_v35 = vmul.f32 %v2629_v46, %v7301_v41  ;;  %v2637_v51 = vrot.slane %v7336_v9, %v7114_v50  ;;  %v2633_v54 = vrot.slane %v7317_v30, %v7114_v50  ;;  %v9591_v33 = vrot.slane %v7135_v59, %v7129_v57 }
 0x141   :  { %9586 = vst [vmem:[#allocation26_spill] sm:$0xff] %v7409_v49  ;;  %9587 = vst [vmem:[#allocation27_spill] sm:$0xff] %v7414_v4  ;;  %v7425_v24 = vmul.f32 %v2625_v5, %v7282_v16  ;;  %v3261_v49 = vrot.slane %v7147_v1, %v7129_v57  ;;  %v3265_v5 = vrot.slane %v7165_v11, %v7129_v57 }
 0x142   :  { %9588 = vst [vmem:[#allocation28_spill] sm:$0xff] %v7417_v52  ;;  %9589 = vst [vmem:[#allocation29_spill] sm:$0xff] %v7420_v35  ;;  %v7435_v28 = vmul.f32 %v9591_v33, %v7138_v60  ;;  %v7438_v46 = vmul.f32 %v2637_v51, %v7339_v10  ;;  %v3269_v35 = vrot.slane %v7184_v26, %v7129_v57 }
 0x143   :  { %9590 = vst [vmem:[#allocation30_spill] sm:$0xff] %v7425_v24  ;;  %v3277_v50 = vrot.slane %v7222_v56, %v7129_v57  ;;  %v7447_v24 = vmul.f32 %v2633_v54, %v7320_v22  ;;  %v7450_v52 = vmul.f32 %v3261_v49, %v7150_v2  ;;  %v3273_v33 = vrot.slane %v7203_v36, %v7129_v57 }
 0x144   :  { %9592 = vst [vmem:[#allocation31_spill] sm:$0xff] %v7435_v28  ;;  %9593 = vst [vmem:[#allocation32_spill] sm:$0xff] %v7438_v46  ;;  %v3285_v51 = vrot.slane %v7260_v38, %v7129_v57  ;;  %v7457_v28 = vmul.f32 %v3269_v35, %v7187_v27  ;;  %v7460_v46 = vmul.f32 %v3265_v5, %v7168_v12 }
 0x145   :  { %9594 = vst [vmem:[#allocation33_spill] sm:$0xff] %v7447_v24  ;;  %9595 = vst [vmem:[#allocation34_spill] sm:$0xff] %v7450_v52  ;;  %v7463_v4 = vmul.f32 %v3277_v50, %v7225_v61  ;;  %v3281_v54 = vrot.slane %v7241_v19, %v7129_v57  ;;  %v7468_v49 = vmul.f32 %v3273_v33, %v7206_v37 }
 0x146   :  { %9596 = vst [vmem:[#allocation35_spill] sm:$0xff] %v7457_v28  ;;  %9597 = vst [vmem:[#allocation36_spill] sm:$0xff] %v7460_v46  ;;  %v7471_v52 = vmul.f32 %v3285_v51, %v7263_v40  ;;  %v3293_v24 = vrot.slane %v7298_v48, %v7129_v57  ;;  %v3289_v35 = vrot.slane %v7279_v7, %v7129_v57 }
 0x147   :  { %9598 = vst [vmem:[#allocation37_spill] sm:$0xff] %v7463_v4  ;;  %9599 = vst [vmem:[#allocation38_spill] sm:$0xff] %v7468_v49  ;;  %v7478_v5 = vmul.f32 %v3281_v54, %v7244_v20  ;;  %v3301_v50 = vrot.slane %v7336_v9, %v7129_v57  ;;  %v3297_v4 = vrot.slane %v7317_v30, %v7129_v57 }
 0x148   :  { %9600 = vst [vmem:[#allocation39_spill] sm:$0xff] %v7471_v52  ;;  %v3925_v33 = vrot.slane %v7147_v1, %v7132_v58  ;;  %v7487_v51 = vmul.f32 %v3293_v24, %v7301_v41  ;;  %v7490_v52 = vmul.f32 %v3289_v35, %v7282_v16  ;;  %v9604_v54 = vrot.slane %v7135_v59, %v7132_v58 }
 0x149   :  { %9601 = vst [vmem:[#allocation40_spill] sm:$0xff] %v7478_v5  ;;  %v3933_v49 = vrot.slane %v7184_v26, %v7132_v58  ;;  %v7501_v46 = vmul.f32 %v3301_v50, %v7339_v10  ;;  %v7504_v28 = vmul.f32 %v3297_v4, %v7320_v22  ;;  %v3929_v35 = vrot.slane %v7165_v11, %v7132_v58 }
 0x14a   :  { %9602 = vst [vmem:[#allocation41_spill] sm:$0xff] %v7487_v51  ;;  %9603 = vst [vmem:[#allocation42_spill] sm:$0xff] %v7490_v52  ;;  %v7496_v5 = vmul.f32 %v9604_v54, %v7138_v60  ;;  %v7507_v24 = vmul.f32 %v3925_v33, %v7150_v2  ;;  %v3941_v54 = vrot.slane %v7222_v56, %v7132_v58 }
 0x14b   :  { %9606 = vst [vmem:[#allocation44_spill] sm:$0xff] %v7501_v46  ;;  %9607 = vst [vmem:[#allocation45_spill] sm:$0xff] %v7504_v28  ;;  %v7512_v52 = vmul.f32 %v3933_v49, %v7187_v27  ;;  %v3949_v50 = vrot.slane %v7260_v38, %v7132_v58  ;;  %v7521_v4 = vmul.f32 %v3929_v35, %v7168_v12 }
 0x14c   :  { %9605 = vst [vmem:[#allocation43_spill] sm:$0xff] %v7496_v5  ;;  %9608 = vst [vmem:[#allocation46_spill] sm:$0xff] %v7507_v24  ;;  %v3937_v5 = vrot.slane %v7203_v36, %v7132_v58  ;;  %v3945_v33 = vrot.slane %v7241_v19, %v7132_v58  ;;  %v3957_v24 = vrot.slane %v7298_v48, %v7132_v58 }
 0x14d   :  { %9609 = vst [vmem:[#allocation47_spill] sm:$0xff] %v7512_v52  ;;  %9610 = vst [vmem:[#allocation48_spill] sm:$0xff] %v7521_v4  ;;  %v3953_v49 = vrot.slane %v7279_v7, %v7132_v58  ;;  %v7530_v52 = vmul.f32 %v3941_v54, %v7225_v61  ;;  %v7536_v46 = vmul.f32 %v3949_v50, %v7263_v40 }
 0x14e   :  { %v7533_v28 = vmul.f32 %v3937_v5, %v7206_v37  ;;  %v3965_v35 = vrot.slane %v7336_v9, %v7132_v58  ;;  %v7541_v4 = vmul.f32 %v3945_v33, %v7244_v20  ;;  %v7544_v51 = vmul.f32 %v3957_v24, %v7301_v41 }
 0x14f   :  { %9611 = vst [vmem:[#allocation49_spill] sm:$0xff] %v7530_v52  ;;  %9613 = vst [vmem:[#allocation51_spill] sm:$0xff] %v7536_v46  ;;  %v7547_v42 = vmul.f32 %v3953_v49, %v7282_v16  ;;  %v3961_v54 = vrot.slane %v7317_v30, %v7132_v58  ;;  %v4589_v50 = vrot.slane %v7147_v1, %v7141_v63 }
 0x150   :  { %9612 = vst [vmem:[#allocation50_spill] sm:$0xff] %v7533_v28  ;;  %9614 = vst [vmem:[#allocation52_spill] sm:$0xff] %v7541_v4  ;;  %v7552_v5 = vmul.f32 %v3965_v35, %v7339_v10  ;;  %v4585_v46 = vrot.slane %v7135_v59, %v7141_v63  ;;  %v4597_v33 = vrot.slane %v7184_v26, %v7141_v63 }
 0x151   :  { %9615 = vst [vmem:[#allocation53_spill] sm:$0xff] %v7544_v51  ;;  %9616 = vst [vmem:[#allocation54_spill] sm:$0xff] %v7547_v42  ;;  %v7561_v24 = vmul.f32 %v3961_v54, %v7320_v22  ;;  %v4593_v49 = vrot.slane %v7165_v11, %v7141_v63  ;;  %v4605_v42 = vrot.slane %v7222_v56, %v7141_v63 }
 0x152   :  { %9617 = vst [vmem:[#allocation55_spill] sm:$0xff] %v7552_v5  ;;  %v4601_v35 = vrot.slane %v7203_v36, %v7141_v63  ;;  %v7570_v5 = vmul.f32 %v4589_v50, %v7150_v2  ;;  %v7573_v51 = vmul.f32 %v4585_v46, %v7138_v60  ;;  %v7576_v4 = vmul.f32 %v4597_v33, %v7187_v27 }
 0x153   :  { %9618 = vst [vmem:[#allocation56_spill] sm:$0xff] %v7561_v24  ;;  %v4613_v54 = vrot.slane %v7260_v38, %v7141_v63  ;;  %v7581_v24 = vmul.f32 %v4593_v49, %v7168_v12  ;;  %v7584_v28 = vmul.f32 %v4605_v42, %v7225_v61  ;;  %v4609_v50 = vrot.slane %v7241_v19, %v7141_v63 }
 0x154   :  { %9619 = vst [vmem:[#allocation57_spill] sm:$0xff] %v7570_v5  ;;  %9620 = vst [vmem:[#allocation58_spill] sm:$0xff] %v7573_v51  ;;  %v7587_v52 = vmul.f32 %v4601_v35, %v7206_v37  ;;  %v4621_v33 = vrot.slane %v7298_v48, %v7141_v63  ;;  %v4629_v49 = vrot.slane %v7336_v9, %v7141_v63 }
 0x155   :  { %9621 = vst [vmem:[#allocation59_spill] sm:$0xff] %v7576_v4  ;;  %9622 = vst [vmem:[#allocation60_spill] sm:$0xff] %v7581_v24  ;;  %v7592_v46 = vmul.f32 %v4613_v54, %v7263_v40  ;;  %v4617_v4 = vrot.slane %v7279_v7, %v7141_v63  ;;  %v7601_v42 = vmul.f32 %v4609_v50, %v7244_v20 }
 0x156   :  { %9623 = vst [vmem:[#allocation61_spill] sm:$0xff] %v7584_v28  ;;  %9624 = vst [vmem:[#allocation62_spill] sm:$0xff] %v7587_v52  ;;  %v4625_v35 = vrot.slane %v7317_v30, %v7141_v63  ;;  %v5253_v52 = vrot.slane %v7147_v1, %v7144_v0  ;;  %v5249_v54 = vrot.slane %v7135_v59, %v7144_v0 }
 0x157   :  { %9625 = vst [vmem:[#allocation63_spill] sm:$0xff] %v7592_v46  ;;  %9626 = vst [vmem:[#allocation64_spill] sm:$0xff] %v7601_v42  ;;  %v7610_v46 = vmul.f32 %v4621_v33, %v7301_v41  ;;  %v7613_v28 = vmul.f32 %v4617_v4, %v7282_v16  ;;  %v7616_v24 = vmul.f32 %v4629_v49, %v7339_v10 }
 0x158   :  { %v5261_v50 = vrot.slane %v7184_v26, %v7144_v0  ;;  %v7621_v63 = vmul.f32 %v4625_v35, %v7320_v22  ;;  %v7624_v1 = vmul.f32 %v5253_v52, %v7150_v2  ;;  %v7627_v59 = vmul.f32 %v5249_v54, %v7138_v60  ;;  %v162_v52 = vld [vmem:[#allocation3 + $0x2f8] sm:$0xff] }
 0x159   :  { %9627 = vst [vmem:[#allocation65_spill] sm:$0xff] %v7610_v46  ;;  %9628 = vst [vmem:[#allocation66_spill] sm:$0xff] %v7613_v28  ;;  %v5257_v33 = vrot.slane %v7165_v11, %v7144_v0  ;;  %v5269_v49 = vrot.slane %v7222_v56, %v7144_v0  ;;  %v5265_v26 = vrot.slane %v7203_v36, %v7144_v0  ;;  %493 = vmatprep.subr.mxu0 %v162_v52  ;;  %v150_v54 = vld [vmem:[#allocation3 + $0x298] sm:$0xff] }
 0x15a   :  { %9629 = vst [vmem:[#allocation67_spill] sm:$0xff] %v7616_v24  ;;  %9630 = vst [vmem:[#allocation68_spill] sm:$0xff] %v7621_v63  ;;  %v7632_v4 = vmul.f32 %v5261_v50, %v7187_v27  ;;  %v5277_v35 = vrot.slane %v7260_v38, %v7144_v0  ;;  %v5273_v60 = vrot.slane %v7241_v19, %v7144_v0  ;;  %v144_v50 = vld [vmem:[#allocation3 + $0x268] sm:$0xff]  ;;  %v102_v52 = vld [vmem:[#allocation3 + $0x118] sm:$0xff] }
 0x15b   :  { %9631 = vst [vmem:[#allocation69_spill] sm:$0xff] %v7624_v1  ;;  %9632 = vst [vmem:[#allocation70_spill] sm:$0xff] %v7627_v59  ;;  %v7641_v2 = vmul.f32 %v5257_v33, %v7168_v12  ;;  %v5285_v11 = vrot.slane %v7298_v48, %v7144_v0  ;;  %v5281_v27 = vrot.slane %v7279_v7, %v7144_v0  ;;  %v131_v33 = vld [vmem:[#allocation3 + $0x200] sm:$0xff] }
 0x15c   :  { %9633 = vst [vmem:[#allocation71_spill] sm:$0xff] %v7632_v4  ;;  %v7650_v56 = vmul.f32 %v5269_v49, %v7225_v61  ;;  %v7653_v36 = vmul.f32 %v5265_v26, %v7206_v37  ;;  %v7656_v38 = vmul.f32 %v5277_v35, %v7263_v40  ;;  %v5293_v12 = vrot.slane %v7336_v9, %v7144_v0  ;;  %v161_v9 = vld [vmem:[#allocation3 + $0x2f0] sm:$0xff]  ;;  %v126_v49 = vld [vmem:[#allocation3 + $0x1d8] sm:$0xff]  ;;  %v120_v35 = vld [vmem:[#allocation3 + $0x1a8] sm:$0xff] }
 0x15d   :  { %9634 = vst [vmem:[#allocation72_spill] sm:$0xff] %v7641_v2  ;;  %v7661_v19 = vmul.f32 %v5273_v60, %v7244_v20  ;;  %v7664_v48 = vmul.f32 %v5285_v11, %v7301_v41  ;;  %v7667_v7 = vmul.f32 %v5281_v27, %v7282_v16  ;;  %v5289_v61 = vrot.slane %v7317_v30, %v7144_v0  ;;  %v156_v20 = vld [vmem:[#allocation3 + $0x2c8] sm:$0xff]  ;;  %v155_v41 = vld [vmem:[#allocation3 + $0x2c0] sm:$0xff]  ;;  %v149_v16 = vld [vmem:[#allocation3 + $0x290] sm:$0xff] }
 0x15e   :  { %9635 = vst [vmem:[#allocation73_spill] sm:$0xff] %v7650_v56  ;;  %9636 = vst [vmem:[#allocation74_spill] sm:$0xff] %v7653_v36  ;;  %v7672_v37 = vmul.f32 %v5293_v12, %v7339_v10  ;;  %494 = vmatpush1.msra.mxu0 %v161_v9  ;;  %v143_v0 = vld [vmem:[#allocation3 + $0x260] sm:$0xff]  ;;  %v138_v30 = vld [vmem:[#allocation3 + $0x238] sm:$0xff] }
 0x15f   :  { %9637 = vst [vmem:[#allocation75_spill] sm:$0xff] %v7656_v38  ;;  %9638 = vst [vmem:[#allocation76_spill] sm:$0xff] %v7661_v19  ;;  %v7675_v40 = vmul.f32 %v5289_v61, %v7320_v22  ;;  %495 = vmatprep.subr.mxu0 %v156_v20  ;;  %v137_v22 = vld [vmem:[#allocation3 + $0x230] sm:$0xff]  ;;  %v132_v10 = vld [vmem:[#allocation3 + $0x208] sm:$0xff] }
 0x160   :  { %9639 = vst [vmem:[#allocation77_spill] sm:$0xff] %v7664_v48  ;;  %9640 = vst [vmem:[#allocation78_spill] sm:$0xff] %v7667_v7  ;;  %496 = vmatpush1.msra.mxu0 %v155_v41  ;;  %v125_v26 = vld [vmem:[#allocation3 + $0x1d0] sm:$0xff]  ;;  %v119_v60 = vld [vmem:[#allocation3 + $0x1a0] sm:$0xff] }
 0x161   :  { %9641 = vst [vmem:[#allocation79_spill] sm:$0xff] %v7672_v37  ;;  %9642 = vst [vmem:[#allocation80_spill] sm:$0xff] %v7675_v40  ;;  %497 = vmatprep.subr.mxu0 %v150_v54  ;;  %v114_v11 = vld [vmem:[#allocation3 + $0x178] sm:$0xff]  ;;  %v113_v27 = vld [vmem:[#allocation3 + $0x170] sm:$0xff] }
 0x162   :  { %498 = vmatpush1.msra.mxu0 %v149_v16  ;;  %v108_v12 = vld [vmem:[#allocation3 + $0x148] sm:$0xff]  ;;  %v107_v61 = vld [vmem:[#allocation3 + $0x140] sm:$0xff]  ;;  %v101_v9 = vld [vmem:[#allocation3 + $0x110] sm:$0xff] }
 0x163   :  { %499 = vmatprep.subr.mxu0 %v144_v50  ;;  %v96_v20 = vld [vmem:[#allocation3 + $0xe8] sm:$0xff]  ;;  %v95_v41 = vld [vmem:[#allocation3 + $0xe0] sm:$0xff]  ;;  %v90_v54 = vld [vmem:[#allocation3 + $0xb8] sm:$0xff] }
 0x164   :  { %500 = vmatpush1.msra.mxu0 %v143_v0  ;;  %v89_v16 = vld [vmem:[#allocation3 + $0xb0] sm:$0xff]  ;;  %v84_v50 = vld [vmem:[#allocation3 + $0x88] sm:$0xff]  ;;  %v83_v0 = vld [vmem:[#allocation3 + $0x80] sm:$0xff] }
 0x165   :  { %501 = vmatprep.subr.mxu0 %v138_v30  ;;  %v78_v30 = vld [vmem:[#allocation3 + $0x58] sm:$0xff] }
 0x166   :  { %502 = vmatpush1.msra.mxu0 %v137_v22  ;;  %v77_v22 = vld [vmem:[#allocation3 + $0x50] sm:$0xff] }
 0x167   :  { %503 = vmatprep.subr.mxu0 %v132_v10  ;;  %v72_v10 = vld [vmem:[#allocation3 + $0x28] sm:$0xff] }
 0x168   :  { %504 = vmatpush1.msra.mxu0 %v131_v33  ;;  %v71_v33 = vld [vmem:[#allocation3 + $0x20] sm:$0xff] }
 0x169   :  { %505 = vmatprep.subr.mxu0 %v126_v49  ;;  %v258_v49 = vld [vmem:[#allocation3 + $0x5f8] sm:$0xff] }
 0x16a   :  { %506 = vmatpush1.msra.mxu0 %v125_v26  ;;  %v257_v26 = vld [vmem:[#allocation3 + $0x5f0] sm:$0xff] }
 0x16b   :  { %507 = vmatprep.subr.mxu0 %v120_v35  ;;  %v252_v35 = vld [vmem:[#allocation3 + $0x5c8] sm:$0xff] }
 0x16c   :  { %508 = vmatpush1.msra.mxu0 %v119_v60  ;;  %v251_v60 = vld [vmem:[#allocation3 + $0x5c0] sm:$0xff] }
 0x16d   :  { %509 = vmatprep.subr.mxu0 %v114_v11  ;;  %v246_v11 = vld [vmem:[#allocation3 + $0x598] sm:$0xff] }
 0x16e   :  { %510 = vmatpush1.msra.mxu0 %v113_v27  ;;  %v245_v27 = vld [vmem:[#allocation3 + $0x590] sm:$0xff] }
 0x16f   :  { %511 = vmatprep.subr.mxu0 %v108_v12  ;;  %v240_v12 = vld [vmem:[#allocation3 + $0x568] sm:$0xff] }
 0x170   :  { %512 = vmatpush1.msra.mxu0 %v107_v61  ;;  %v239_v61 = vld [vmem:[#allocation3 + $0x560] sm:$0xff] }
 0x171   :  { %513 = vmatprep.subr.mxu0 %v102_v52  ;;  %v234_v52 = vld [vmem:[#allocation3 + $0x538] sm:$0xff] }
 0x172   :  { %514 = vmatpush1.msra.mxu0 %v101_v9  ;;  %v233_v9 = vld [vmem:[#allocation3 + $0x530] sm:$0xff] }
 0x173   :  { %515 = vmatprep.subr.mxu0 %v96_v20  ;;  %v228_v20 = vld [vmem:[#allocation3 + $0x508] sm:$0xff] }
 0x174   :  { %516 = vmatpush1.msra.mxu0 %v95_v41  ;;  %v227_v41 = vld [vmem:[#allocation3 + $0x500] sm:$0xff] }
 0x175   :  { %517 = vmatprep.subr.mxu0 %v90_v54  ;;  %v222_v54 = vld [vmem:[#allocation3 + $0x4d8] sm:$0xff] }
 0x176   :  { %518 = vmatpush1.msra.mxu0 %v89_v16  ;;  %v221_v16 = vld [vmem:[#allocation3 + $0x4d0] sm:$0xff] }
 0x177   :  { %519 = vmatprep.subr.mxu0 %v84_v50  ;;  %v216_v50 = vld [vmem:[#allocation3 + $0x4a8] sm:$0xff] }
 0x178   :  { %520 = vmatpush1.msra.mxu0 %v83_v0  ;;  %v215_v0 = vld [vmem:[#allocation3 + $0x4a0] sm:$0xff] }
 0x179   :  { %521 = vmatprep.subr.mxu0 %v78_v30  ;;  %v210_v30 = vld [vmem:[#allocation3 + $0x478] sm:$0xff] }
 0x17a   :  { %522 = vmatpush1.msra.mxu0 %v77_v22  ;;  %v929_v22 = vld [vmem:[%s9524_s4 + $0x78] sm:$0xff] }
 0x17b   :  { %523 = vmatprep.subr.mxu0 %v72_v10  ;;  %v209_v10 = vld [vmem:[#allocation3 + $0x470] sm:$0xff]  ;;  %964 = vmatprep.subr.mxu1 %v929_v22  ;;  %v919_v22 = vld [vmem:[%s9524_s4 + $0x28] sm:$0xff] }
 0x17c   :  { %524 = vmatpush1.msra.mxu0 %v71_v33  ;;  %v928_v33 = vld [vmem:[%s9524_s4 + $0x70] sm:$0xff] }
 0x17d   :  { %525 = vmatprep.subr.mxu0 %v258_v49  ;;  %v204_v49 = vld [vmem:[#allocation3 + $0x448] sm:$0xff]  ;;  %965 = vmatpush1.msra.mxu1 %v928_v33  ;;  %v918_v33 = vld [vmem:[%s9524_s4 + $0x20] sm:$0xff] }
 0x17e   :  { %526 = vmatpush2.msra.mxu0 %v257_v26  ;;  %v927_v26 = vld [vmem:[%s9524_s4 + $0x68] sm:$0xff] }
 0x17f   :  { %527 = vmatprep.subr.mxu0 %v252_v35  ;;  %v203_v35 = vld [vmem:[#allocation3 + $0x440] sm:$0xff]  ;;  %966 = vmatprep.subr.mxu1 %v927_v26  ;;  %v917_v26 = vld [vmem:[%s9524_s4 + $0x18] sm:$0xff] }
 0x180   :  { %528 = vmatpush2.msra.mxu0 %v251_v60  ;;  %v926_v60 = vld [vmem:[%s9524_s4 + $0x60] sm:$0xff] }
 0x181   :  { %529 = vmatprep.subr.mxu0 %v246_v11  ;;  %v925_v11 = vld [vmem:[%s9524_s4 + $0x58] sm:$0xff]  ;;  %967 = vmatpush1.msra.mxu1 %v926_v60  ;;  %v916_v60 = vld [vmem:[%s9524_s4 + $0x10] sm:$0xff] }
 0x182   :  { %530 = vmatpush2.msra.mxu0 %v245_v27  ;;  %v924_v27 = vld [vmem:[%s9524_s4 + $0x50] sm:$0xff]  ;;  %968 = vmatprep.subr.mxu1 %v925_v11 }
 0x183   :  { %531 = vmatprep.subr.mxu0 %v240_v12  ;;  %v923_v12 = vld [vmem:[%s9524_s4 + $0x48] sm:$0xff]  ;;  %969 = vmatpush1.msra.mxu1 %v924_v27  ;;  %v173_v11 = vld [vmem:[#allocation3 + $0x350] sm:$0xff] }
 0x184   :  { %532 = vmatpush2.msra.mxu0 %v239_v61  ;;  %v198_v61 = vld [vmem:[#allocation3 + $0x418] sm:$0xff]  ;;  %970 = vmatprep.subr.mxu1 %v923_v12  ;;  %v168_v27 = vld [vmem:[#allocation3 + $0x328] sm:$0xff] }
 0x185   :  { %533 = vmatprep.subr.mxu0 %v234_v52  ;;  %v9532_v52 = vmov 0.0   ;;  %v915_v12 = vld [vmem:[%s9524_s4 + $0x8] sm:$0xff] }
 0x186   :  { %534 = vmatpush2.msra.mxu0 %v233_v9  ;;  %1012 = vmatprep.mubr.f32.mxu1 %v9532_v52  ;;  %v922_v9 = vld [vmem:[%s9524_s4 + $0x40] sm:$0xff] }
 0x187   :  { %535 = vmatprep.subr.mxu0 %v228_v20  ;;  %v197_v20 = vld [vmem:[#allocation3 + $0x410] sm:$0xff]  ;;  %971 = vmatpush1.msra.mxu1 %v922_v9  ;;  %v914_v9 = vld [vmem:[%s9524_s4] sm:$0xff] }
 0x188   :  { %536 = vmatpush2.msra.mxu0 %v227_v41  ;;  %v192_v41 = vld [vmem:[#allocation3 + $0x3e8] sm:$0xff] }
 0x189   :  { %537 = vmatprep.subr.mxu0 %v222_v54  ;;  %v921_v54 = vld [vmem:[%s9524_s4 + $0x38] sm:$0xff] }
 0x18a   :  { %538 = vmatpush2.msra.mxu0 %v221_v16  ;;  %v191_v16 = vld [vmem:[#allocation3 + $0x3e0] sm:$0xff]  ;;  %972 = vmatprep.subr.mxu1 %v921_v54  ;;  %v6780_v54 = vld [vmem:[%s9520_s0 + $0x18] sm:$0xff] }
 0x18b   :  { %539 = vmatprep.subr.mxu0 %v216_v50  ;;  %v186_v50 = vld [vmem:[#allocation3 + $0x3b8] sm:$0xff] }
 0x18c   :  { %540 = vmatpush2.msra.mxu0 %v215_v0  ;;  %v920_v0 = vld [vmem:[%s9524_s4 + $0x30] sm:$0xff] }
 0x18d   :  { %541 = vmatprep.subr.mxu0 %v210_v30  ;;  %v185_v30 = vld [vmem:[#allocation3 + $0x3b0] sm:$0xff]  ;;  %973 = vmatpush1.msra.mxu1 %v920_v0  ;;  %v6783_v0 = vld [vmem:[%s9520_s0 + $0x20] sm:$0xff] }
 0x18e   :  { %542 = vmatpush2.msra.mxu0 %v209_v10  ;;  %v180_v10 = vld [vmem:[#allocation3 + $0x388] sm:$0xff]  ;;  %974 = vmatprep.subr.mxu1 %v919_v22 }
 0x18f   :  { %543 = vmatprep.subr.mxu0 %v204_v49  ;;  %v179_v49 = vld [vmem:[#allocation3 + $0x380] sm:$0xff]  ;;  %975 = vmatpush1.msra.mxu1 %v918_v33 }
 0x190   :  { %544 = vmatpush2.msra.mxu0 %v203_v35  ;;  %v174_v35 = vld [vmem:[#allocation3 + $0x358] sm:$0xff]  ;;  %976 = vmatprep.subr.mxu1 %v917_v26 }
 0x191   :  { %545 = vmatprep.subr.mxu0 %v198_v61  ;;  %v167_v61 = vld [vmem:[#allocation3 + $0x320] sm:$0xff]  ;;  %977 = vmatpush1.msra.mxu1 %v916_v60 }
 0x192   :  { %546 = vmatpush2.msra.mxu0 %v197_v20  ;;  %978 = vmatprep.subr.mxu1 %v915_v12  ;;  %v6778_v20 = vld [vmem:[%s9520_s0] sm:$0xff] }
 0x193   :  { %547 = vmatprep.subr.mxu0 %v192_v41  ;;  %979 = vmatpush1.msra.mxu1 %v914_v9  ;;  %v6779_v41 = vld [vmem:[%s9523_s3 + $0xf8] sm:$0xff] }
 0x194   :  { %548 = vmatpush2.msra.mxu0 %v191_v16  ;;  %6227 = vmatprep.subr.mxu1 %v6779_v41  ;;  %v6781_v16 = vld [vmem:[%s9520_s0 + $0x10] sm:$0xff] }
 0x195   :  { %549 = vmatprep.subr.mxu0 %v186_v50  ;;  %v6782_v50 = vld [vmem:[%s9520_s0 + $0x28] sm:$0xff] }
 0x196   :  { %550 = vmatpush2.msra.mxu0 %v185_v30  ;;  %v6784_v30 = vld [vmem:[%s9520_s0 + $0x38] sm:$0xff] }
 0x197   :  { %551 = vmatprep.subr.mxu0 %v180_v10 }
 0x198   :  { %552 = vmatpush2.msra.mxu0 %v179_v49 }
 0x199   :  { %553 = vmatprep.subr.mxu0 %v174_v35 }
 0x19a   :  { %554 = vmatpush2.msra.mxu0 %v173_v11 }
 0x19b   :  { %555 = vmatprep.subr.mxu0 %v168_v27 }
 0x19c   :  { %556 = vmatpush2.msra.mxu0 %v167_v61 }
 0x19d   :  { %558 = vmatmul.mubr.f32.vlgmr.msra.gmra.mxu0 %v6778_v20 }
 0x19e   :  { %563 = vmatprep.mubr.f32.mxu0 %v6780_v54 }
 0x1a1   :  { %564 = vmatmul.mubr.f32.gmra.mxu0 %v6781_v16 }
 0x1a2   :  { %569 = vmatprep.mubr.f32.mxu0 %v6782_v50 }
 0x1a5   :  { %570 = vmatmul.mubr.f32.gmra.mxu0 %v6783_v0 }
 0x1a6   :  { %575 = vmatprep.mubr.f32.mxu0 %v6784_v30 }
 0x1a9   :  { %576 = vmatmul.mubr.f32.gmra.mxu0 %v6987_v13 }
 0x1aa   :  { %581 = vmatprep.mubr.f32.mxu0 %v6992_v14 }
 0x1ad   :  { %582 = vmatmul.mubr.f32.gmra.mxu0 %v7006_v17 }
 0x1ae   :  { %587 = vmatprep.mubr.f32.mxu0 %v7012_v18 }
 0x1b1   :  { %588 = vmatmul.mubr.f32.gmra.mxu0 %v7026_v21 }
 0x1b2   :  { %1679 = vmatprep.mubr.f32.mxu0 %v9532_v52 }
 0x1e9   :  { %v6209_v22 = vpop.f32.mrf.mxu1 }
 0x1eb   :  { %v6210_v10 = vpop.f32.mrf.mxu1 }
 0x1ec   :  { %v6211_v33 = vadd.f32 %v6210_v10, %v6209_v22 }
 0x1ed   :  { %v6212_v49 = vpop.f32.mrf.mxu1 }
 0x1ee   :  { %v782_v26 = vsel %vm781_vm0, %v6211_v33, -inf }
 0x1ef   :  { %v783_v35 = vrot.slane %v782_v26, 4  ;;  %v6213_v60 = vpop.f32.mrf.mxu1 }
 0x1f0   :  { %v6214_v13 = vadd.f32 %v6213_v60, %v6212_v49 }
 0x1f1   :  { %v784_v11 = vmax.f32 %v782_v26, %v783_v35  ;;  %v6215_v14 = vpop.f32.mrf.mxu1 }
 0x1f2   :  { %v789_v17 = vsel %vm781_vm0, %v6214_v13, -inf }
 0x1f3   :  { %v785_v27 = vrot.slane %v784_v11, 2  ;;  %v790_v18 = vrot.slane %v789_v17, 4  ;;  %v6216_v12 = vpop.f32.mrf.mxu1 }
 0x1f4   :  { %v6217_v21 = vadd.f32 %v6216_v12, %v6215_v14 }
 0x1f5   :  { %v786_v61 = vmax.f32 %v784_v11, %v785_v27  ;;  %v791_v9 = vmax.f32 %v789_v17, %v790_v18  ;;  %v6218_v20 = vpop.f32.mrf.mxu1 }
 0x1f6   :  { %v796_v41 = vsel %vm781_vm0, %v6217_v21, -inf }
 0x1f7   :  { %v787_v54 = vrot.slane %v786_v61, 1  ;;  %v792_v16 = vrot.slane %v791_v9, 2  ;;  %v797_v50 = vrot.slane %v796_v41, 4  ;;  %v6219_v0 = vpop.f32.mrf.mxu1 }
 0x1f8   :  { %v6220_v30 = vadd.f32 %v6219_v0, %v6218_v20 }
 0x1f9   :  { %v788_v22 = vmax.f32 %v786_v61, %v787_v54  ;;  %v793_v10 = vmax.f32 %v791_v9, %v792_v16  ;;  %v798_v49 = vmax.f32 %v796_v41, %v797_v50 }
 0x1fa   :  { %v6221_v26 = vpop.f32.mrf.mxu1  ;;  %v803_v35 = vsel %vm781_vm0, %v6220_v30, -inf }
 0x1fb   :  { %v824_v60 = vsub.f32 %v6211_v33, %v788_v22  ;;  %v794_v52 = vrot.slane %v793_v10, 1  ;;  %v799_v40 = vrot.slane %v798_v49, 2  ;;  %v804_v14 = vrot.slane %v803_v35, 4 }
 0x1fc   :  { %v6222_v11 = vpop.f32.mrf.mxu1 }
 0x1fd   :  { %v6223_v17 = vadd.f32 %v6222_v11, %v6221_v26  ;;  %v830_v27 = vmul.f32 1.442695, %v824_v60  ;;  %v795_v18 = vmax.f32 %v793_v10, %v794_v52  ;;  %v800_v12 = vmax.f32 %v798_v49, %v799_v40 }
 0x1fe   :  { %v805_v37 = vmax.f32 %v803_v35, %v804_v14  ;;  %v6224_v7 = vpop.f32.mrf.mxu1 }
 0x1ff   :  { %v810_v48 = vsel %vm781_vm0, %v6223_v17, -inf  ;;  %6586 = vpow2.f32 %v830_v27  ;;  %v825_v61 = vsub.f32 %v6214_v13, %v795_v18  ;;  %v801_v9 = vrot.slane %v800_v12, 1 }
 0x200   :  { %v806_v20 = vrot.slane %v805_v37, 2  ;;  %v6225_v41 = vpop.f32.mrf.mxu1  ;;  %v811_v54 = vrot.slane %v810_v48, 4 }
 0x201   :  { %v6226_v16 = vadd.f32 %v6225_v41, %v6224_v7  ;;  %v832_v33 = vmul.f32 1.442695, %v825_v61  ;;  %v802_v50 = vmax.f32 %v800_v12, %v801_v9 }
 0x202   :  { %v807_v0 = vmax.f32 %v805_v37, %v806_v20  ;;  %v812_v22 = vmax.f32 %v810_v48, %v811_v54 }
 0x203   :  { %v817_v26 = vsel %vm781_vm0, %v6226_v16, -inf  ;;  %6588 = vpow2.f32 %v832_v33  ;;  %v826_v52 = vsub.f32 %v6217_v21, %v802_v50 }
 0x204   :  { %v808_v40 = vrot.slane %v807_v0, 1  ;;  %v818_v10 = vrot.slane %v817_v26, 4  ;;  %v813_v49 = vrot.slane %v812_v22, 2 }
 0x205   :  { %v834_v35 = vmul.f32 1.442695, %v826_v52 }
 0x206   :  { %v809_v60 = vmax.f32 %v807_v0, %v808_v40  ;;  %v819_v14 = vmax.f32 %v817_v26, %v818_v10  ;;  %v814_v13 = vmax.f32 %v812_v22, %v813_v49 }
 0x207   :  { %6590 = vpow2.f32 %v834_v35 }
 0x208   :  { %v827_v11 = vsub.f32 %v6220_v30, %v809_v60  ;;  %v820_v27 = vrot.slane %v819_v14, 2  ;;  %v815_v18 = vrot.slane %v814_v13, 1 }
 0x20a   :  { %v836_v7 = vmul.f32 1.442695, %v827_v11  ;;  %v821_v61 = vmax.f32 %v819_v14, %v820_v27  ;;  %v816_v12 = vmax.f32 %v814_v13, %v815_v18 }
 0x20c   :  { %6592 = vpow2.f32 %v836_v7  ;;  %v822_v48 = vrot.slane %v821_v61, 1  ;;  %v7759_v37 = vpop.eup %6586  ;;  %v828_v9 = vsub.f32 %v6223_v17, %v816_v12 }
 0x20d   :  { %v842_v21 = vsel %vm781_vm0, %v7759_v37, 0.0 }
 0x20e   :  { %v823_v20 = vmax.f32 %v821_v61, %v822_v48  ;;  %v843_v41 = vrot.slane %v842_v21, 4  ;;  %v838_v54 = vmul.f32 1.442695, %v828_v9 }
 0x210   :  { %v829_v33 = vsub.f32 %v6226_v16, %v823_v20  ;;  %v7763_v50 = vpop.eup %6588  ;;  %v844_v30 = vadd.f32 %v843_v41, %v842_v21  ;;  %6594 = vpow2.f32 %v838_v54 }
 0x211   :  { %v849_v0 = vsel %vm781_vm0, %v7763_v50, 0.0 }
 0x212   :  { %v840_v22 = vmul.f32 1.442695, %v829_v33  ;;  %v845_v26 = vrot.slane %v844_v30, 2  ;;  %v850_v52 = vrot.slane %v849_v0, 4 }
 0x214   :  { %6596 = vpow2.f32 %v840_v22  ;;  %v7767_v40 = vpop.eup %6590  ;;  %v846_v17 = vadd.f32 %v845_v26, %v844_v30  ;;  %v851_v10 = vadd.f32 %v850_v52, %v849_v0 }
 0x215   :  { %v856_v49 = vsel %vm781_vm0, %v7767_v40, 0.0 }
 0x216   :  { %v847_v35 = vrot.slane %v846_v17, 1  ;;  %v857_v16 = vrot.slane %v856_v49, 4  ;;  %v852_v60 = vrot.slane %v851_v10, 2 }
 0x218   :  { %v848_v13 = vadd.f32 %v847_v35, %v846_v17  ;;  %v853_v11 = vadd.f32 %v852_v60, %v851_v10  ;;  %v858_v27 = vadd.f32 %v857_v16, %v856_v49 }
 0x219   :  { %v7771_v14 = vpop.eup %6592 }
 0x21a   :  { %v863_v18 = vsel %vm781_vm0, %v7771_v14, 0.0  ;;  %6598 = vrcp.f32 %v848_v13  ;;  %v854_v61 = vrot.slane %v853_v11, 1  ;;  %v859_v12 = vrot.slane %v858_v27, 2 }
 0x21b   :  { %v864_v7 = vrot.slane %v863_v18, 4 }
 0x21c   :  { %v855_v48 = vadd.f32 %v854_v61, %v853_v11  ;;  %v860_v9 = vadd.f32 %v859_v12, %v858_v27 }
 0x21d   :  { %v865_v21 = vadd.f32 %v864_v7, %v863_v18  ;;  %v7775_v20 = vpop.eup %6594 }
 0x21e   :  { %v870_v41 = vsel %vm781_vm0, %v7775_v20, 0.0  ;;  %6600 = vrcp.f32 %v855_v48  ;;  %v861_v54 = vrot.slane %v860_v9, 1 }
 0x21f   :  { %v866_v33 = vrot.slane %v865_v21, 2  ;;  %v871_v30 = vrot.slane %v870_v41, 4 }
 0x220   :  { %v862_v22 = vadd.f32 %v861_v54, %v860_v9 }
 0x221   :  { %v7779_v0 = vpop.eup %6596  ;;  %v867_v26 = vadd.f32 %v866_v33, %v865_v21  ;;  %v872_v17 = vadd.f32 %v871_v30, %v870_v41 }
 0x222   :  { %v877_v52 = vsel %vm781_vm0, %v7779_v0, 0.0  ;;  %6602 = vrcp.f32 %v862_v22 }
 0x223   :  { %v878_v10 = vrot.slane %v877_v52, 4  ;;  %v868_v49 = vrot.slane %v867_v26, 1  ;;  %v873_v35 = vrot.slane %v872_v17, 2 }
 0x225   :  { %v869_v16 = vadd.f32 %v868_v49, %v867_v26  ;;  %v879_v60 = vadd.f32 %v878_v10, %v877_v52  ;;  %v874_v11 = vadd.f32 %v873_v35, %v872_v17  ;;  %v9643_v10 = vmov 0.0  }
 0x227   :  { %6604 = vrcp.f32 %v869_v16  ;;  %v880_v27 = vrot.slane %v879_v60, 2  ;;  %v6599_v18 = vpop.eup %6598  ;;  %v875_v7 = vrot.slane %v874_v11, 1 }
 0x228   :  { %v890_v61 = vmul.f32 %v6599_v18, %v848_v13  ;;  %v6785_v13 = vld [vmem:[%s9523_s3 + $0x78] sm:$0xff] }
 0x229   :  { %v881_v12 = vadd.f32 %v880_v27, %v879_v60  ;;  %v876_v19 = vadd.f32 %v875_v7, %v874_v11  ;;  %v6790_v11 = vld [vmem:[%s9523_s3 + $0xe0] sm:$0xff] }
 0x22a   :  { %v896_v9 = vsub.f32 2.0, %v890_v61  ;;  %v6791_v7 = vld [vmem:[%s9523_s3 + $0x60] sm:$0xff]  ;;  %v6792_v61 = vld [vmem:[%s9523_s3 + $0xd8] sm:$0xff] }
 0x22b   :  { %v882_v21 = vrot.slane %v881_v12, 1  ;;  %v6601_v54 = vpop.eup %6600  ;;  %6606 = vrcp.f32 %v876_v19 }
 0x22c   :  { %v902_v33 = vmul.f32 %v6599_v18, %v896_v9  ;;  %v891_v41 = vmul.f32 %v6601_v54, %v855_v48  ;;  %v6786_v48 = vld [vmem:[%s9523_s3 + $0xf0] sm:$0xff]  ;;  %v6793_v9 = vld [vmem:[%s9523_s3 + $0x58] sm:$0xff] }
 0x22d   :  { %v883_v30 = vadd.f32 %v882_v21, %v881_v12  ;;  %v6794_v21 = vld [vmem:[%s9523_s3 + $0xd0] sm:$0xff] }
 0x22e   :  { %v908_v38 = vmul.f32 %v7759_v37, %v902_v33  ;;  %v897_v36 = vsub.f32 2.0, %v891_v41  ;;  %v6795_v41 = vld [vmem:[%s9523_s3 + $0x50] sm:$0xff] }
 0x22f   :  { %6608 = vrcp.f32 %v883_v30  ;;  %v6603_v26 = vpop.eup %6602 }
 0x230   :  { %6129 = vmatmul.mubr.msk.f32.vlgmr.msra.gmra.mxu1 %vm781_vm0, %v908_v38  ;;  %v903_v52 = vmul.f32 %v6601_v54, %v897_v36  ;;  %v892_v17 = vmul.f32 %v6603_v26, %v862_v22  ;;  %v6787_v36 = vld [vmem:[%s9523_s3 + $0x70] sm:$0xff]  ;;  %v6788_v38 = vld [vmem:[%s9523_s3 + $0xe8] sm:$0xff] }
 0x231   :  { %6228 = vmatpush3.msra.mxu1 %v6785_v13  ;;  %1018 = vmatprep.mubr.f32.mxu1 %v9643_v10  ;;  %v6798_v13 = vld [vmem:[%s9523_s3 + $0xc0] sm:$0xff] }
 0x232   :  { %6229 = vmatprep.subr.mxu1 %v6786_v48  ;;  %v909_v37 = vmul.f32 %v7763_v50, %v903_v52  ;;  %v898_v49 = vsub.f32 2.0, %v892_v17  ;;  %v6789_v50 = vld [vmem:[%s9523_s3 + $0x68] sm:$0xff] }
 0x233   :  { %6230 = vmatpush3.msra.mxu1 %v6787_v36  ;;  %v6796_v52 = vld [vmem:[%s9523_s3 + $0xc8] sm:$0xff]  ;;  %v6801_v36 = vld [vmem:[%s9523_s3 + $0x38] sm:$0xff] }
 0x234   :  { %v6605_v35 = vpop.eup %6604  ;;  %6231 = vmatprep.subr.mxu1 %v6788_v38  ;;  %6130 = vmatmul.mubr.msk.f32.gmra.mxu1 %vm781_vm0, %v909_v37  ;;  %v904_v22 = vmul.f32 %v6603_v26, %v898_v49  ;;  %v6797_v17 = vld [vmem:[%s9523_s3 + $0x48] sm:$0xff]  ;;  %v6799_v37 = vld [vmem:[%s9523_s3 + $0x40] sm:$0xff]  ;;  %v6800_v49 = vld [vmem:[%s9523_s3 + $0xb8] sm:$0xff] }
 0x235   :  { %v893_v60 = vmul.f32 %v6605_v35, %v869_v16  ;;  %6232 = vmatpush3.msra.mxu1 %v6789_v50  ;;  %1024 = vmatprep.mubr.f32.mxu1 %v9643_v10  ;;  %v6806_v50 = vld [vmem:[%s9523_s3 + $0xa0] sm:$0xff] }
 0x236   :  { %6233 = vmatprep.subr.mxu1 %v6790_v11  ;;  %v910_v27 = vmul.f32 %v7767_v40, %v904_v22  ;;  %v6803_v22 = vld [vmem:[%s9523_s3 + $0x30] sm:$0xff]  ;;  %v6807_v11 = vld [vmem:[%s9523_s3 + $0x20] sm:$0xff] }
 0x237   :  { %v899_v18 = vsub.f32 2.0, %v893_v60  ;;  %6234 = vmatpush3.msra.mxu1 %v6791_v7  ;;  %v6804_v60 = vld [vmem:[%s9523_s3 + $0xa8] sm:$0xff]  ;;  %v6811_v7 = vld [vmem:[%s9523_s3 + $0x10] sm:$0xff] }
 0x238   :  { %v6607_v16 = vpop.eup %6606  ;;  %6235 = vmatprep.subr.mxu1 %v6792_v61  ;;  %6131 = vmatmul.mubr.msk.f32.gmra.mxu1 %vm781_vm0, %v910_v27  ;;  %v6808_v27 = vld [vmem:[%s9523_s3 + $0x98] sm:$0xff]  ;;  %v6813_v61 = vld [vmem:[%s9523_s3 + $0x8] sm:$0xff] }
 0x239   :  { %v905_v12 = vmul.f32 %v6605_v35, %v899_v18  ;;  %6236 = vmatpush3.msra.mxu1 %v6793_v9  ;;  %1030 = vmatprep.mubr.f32.mxu1 %v9643_v10  ;;  %v894_v40 = vmul.f32 %v6607_v16, %v876_v19  ;;  %v6809_v18 = vld [vmem:[%s9523_s3 + $0x18] sm:$0xff]  ;;  %v6814_v9 = vld [vmem:[%s9523_s3 + $0x80] sm:$0xff] }
 0x23a   :  { %6237 = vmatprep.subr.mxu1 %v6794_v21  ;;  %v6815_v21 = vld [vmem:[%s9523_s3] sm:$0xff] }
 0x23b   :  { %v911_v54 = vmul.f32 %v7771_v14, %v905_v12  ;;  %6238 = vmatpush3.msra.mxu1 %v6795_v41  ;;  %v900_v26 = vsub.f32 2.0, %v894_v40  ;;  %v2017_v12 = vld [vmem:[%s9523_s3 + $0xf8] sm:$0xff]  ;;  %v2015_v41 = vld [vmem:[%s9523_s3 + $0xe8] sm:$0xff] }
 0x23c   :  { %v6609_v33 = vpop.eup %6608  ;;  %6239 = vmatprep.subr.mxu1 %v6796_v52  ;;  %v2001_v40 = vld [vmem:[%s9523_s3 + $0x78] sm:$0xff] }
 0x23d   :  { %6132 = vmatmul.mubr.msk.f32.gmra.mxu1 %vm781_vm0, %v911_v54  ;;  %v895_v19 = vmul.f32 %v6609_v33, %v883_v30  ;;  %v906_v14 = vmul.f32 %v6607_v16, %v900_v26  ;;  %v6812_v16 = vld [vmem:[%s9523_s3 + $0x88] sm:$0xff]  ;;  %v2016_v54 = vld [vmem:[%s9523_s3 + $0xf0] sm:$0xff]  ;;  %v2013_v52 = vld [vmem:[%s9523_s3 + $0xd8] sm:$0xff] }
 0x23e   :  { %6240 = vmatpush3.msra.mxu1 %v6797_v17  ;;  %1036 = vmatprep.mubr.f32.mxu1 %v9643_v10  ;;  %v1999_v26 = vld [vmem:[%s9523_s3 + $0x68] sm:$0xff] }
 0x23f   :  { %6241 = vmatprep.subr.mxu1 %v6798_v13  ;;  %v901_v48 = vsub.f32 2.0, %v895_v19  ;;  %v912_v30 = vmul.f32 %v7775_v20, %v906_v14  ;;  %v6802_v20 = vld [vmem:[%s9523_s3 + $0xb0] sm:$0xff]  ;;  %v1997_v19 = vld [vmem:[%s9523_s3 + $0x58] sm:$0xff]  ;;  %v2011_v17 = vld [vmem:[%s9523_s3 + $0xc8] sm:$0xff] }
 0x240   :  { %6242 = vmatpush3.msra.mxu1 %v6799_v37  ;;  %v1995_v14 = vld [vmem:[%s9523_s3 + $0x48] sm:$0xff]  ;;  %v2009_v13 = vld [vmem:[%s9523_s3 + $0xb8] sm:$0xff] }
 0x241   :  { %6243 = vmatprep.subr.mxu1 %v6800_v49  ;;  %v907_v35 = vmul.f32 %v6609_v33, %v901_v48  ;;  %6133 = vmatmul.mubr.msk.f32.gmra.mxu1 %vm781_vm0, %v912_v30  ;;  %v2000_v33 = vld [vmem:[%s9523_s3 + $0x70] sm:$0xff]  ;;  %v1993_v48 = vld [vmem:[%s9523_s3 + $0x38] sm:$0xff]  ;;  %v2007_v37 = vld [vmem:[%s9523_s3 + $0xa8] sm:$0xff] }
 0x242   :  { %6244 = vmatpush3.msra.mxu1 %v6801_v36  ;;  %1042 = vmatprep.mubr.f32.mxu1 %v9643_v10  ;;  %v1991_v30 = vld [vmem:[%s9523_s3 + $0x28] sm:$0xff]  ;;  %v2005_v49 = vld [vmem:[%s9523_s3 + $0x98] sm:$0xff]  ;;  %v1988_v36 = vld [vmem:[%s9523_s3 + $0x10] sm:$0xff] }
 0x243   :  { %v913_v38 = vmul.f32 %v7779_v0, %v907_v35  ;;  %6245 = vmatprep.subr.mxu1 %v6802_v20  ;;  %v6805_v0 = vld [vmem:[%s9523_s3 + $0x28] sm:$0xff]  ;;  %v1989_v35 = vld [vmem:[%s9523_s3 + $0x18] sm:$0xff]  ;;  %v2002_v20 = vld [vmem:[%s9523_s3 + $0x80] sm:$0xff] }
 0x244   :  { %6246 = vmatpush3.msra.mxu1 %v6803_v22  ;;  %v1986_v22 = vld [vmem:[%s9523_s3] sm:$0xff] }
 0x245   :  { %6247 = vmatprep.subr.mxu1 %v6804_v60  ;;  %6134 = vmatmul.mubr.msk.f32.gmra.mxu1 %vm781_vm0, %v913_v38  ;;  %v1987_v38 = vld [vmem:[%s9523_s3 + $0x8] sm:$0xff]  ;;  %v9644_v60 = vld [vmem:[#allocation16_spill] sm:$0xff] }
 0x246   :  { %6248 = vmatpush3.msra.mxu1 %v6805_v0  ;;  %1418 = vmatprep.mubr.f32.mxu1 %v7193_v32  ;;  %v6810_v32 = vld [vmem:[%s9523_s3 + $0x90] sm:$0xff]  ;;  %v9645_v0 = vld [vmem:[#allocation15_spill] sm:$0xff] }
 0x247   :  { %6249 = vmatprep.subr.mxu1 %v6806_v50  ;;  %v9646_v50 = vld [vmem:[#allocation18_spill] sm:$0xff] }
 0x248   :  { %6250 = vmatpush3.msra.mxu1 %v6807_v11  ;;  %v9647_v11 = vld [vmem:[#allocation17_spill] sm:$0xff] }
 0x249   :  { %6251 = vmatprep.subr.mxu1 %v6808_v27  ;;  %v9648_v27 = vld [vmem:[#allocation19_spill] sm:$0xff] }
 0x24a   :  { %6252 = vmatpush3.msra.mxu1 %v6809_v18  ;;  %v9649_v18 = vld [vmem:[#allocation22_spill] sm:$0xff] }
 0x24b   :  { %6253 = vmatprep.subr.mxu1 %v6810_v32  ;;  %v9650_v32 = vld [vmem:[#allocation20_spill] sm:$0xff] }
 0x24c   :  { %6254 = vmatpush3.msra.mxu1 %v6811_v7  ;;  %v1592_v7 = vld [vmem:[%s9524_s4 + $0x58] sm:$0xff] }
 0x24d   :  { %6255 = vmatprep.subr.mxu1 %v6812_v16  ;;  %v1591_v16 = vld [vmem:[%s9524_s4 + $0x50] sm:$0xff] }
 0x24e   :  { %6256 = vmatpush3.msra.mxu1 %v6813_v61  ;;  %v1590_v61 = vld [vmem:[%s9524_s4 + $0x48] sm:$0xff] }
 0x24f   :  { %6257 = vmatprep.subr.mxu1 %v6814_v9  ;;  %v1588_v9 = vld [vmem:[%s9524_s4 + $0x38] sm:$0xff] }
 0x250   :  { %6258 = vmatpush3.msra.mxu1 %v6815_v21 }
 0x251   :  { %1419 = vmatmul.mubr.f32.vlgmr.msra.gmra.mxu1 %v7176_v23  ;;  %6277 = vmatprep.subr.mxu1 %v2017_v12  ;;  %v2014_v23 = vld [vmem:[%s9523_s3 + $0xe0] sm:$0xff] }
 0x252   :  { %1423 = vmatprep.mubr.f32.mxu1 %v7231_v6  ;;  %6278 = vmatpush3.msra.mxu1 %v2001_v40  ;;  %v1998_v6 = vld [vmem:[%s9523_s3 + $0x60] sm:$0xff]  ;;  %v1587_v40 = vld [vmem:[%s9524_s4 + $0x30] sm:$0xff] }
 0x253   :  { %6279 = vmatprep.subr.mxu1 %v2016_v54  ;;  %v1589_v12 = vld [vmem:[%s9524_s4 + $0x40] sm:$0xff]  ;;  %v1586_v54 = vld [vmem:[%s9524_s4 + $0x28] sm:$0xff] }
 0x254   :  { %6280 = vmatpush3.msra.mxu1 %v2000_v33  ;;  %v1585_v33 = vld [vmem:[%s9524_s4 + $0x20] sm:$0xff] }
 0x255   :  { %1424 = vmatmul.mubr.f32.gmra.mxu1 %v7214_v43  ;;  %6281 = vmatprep.subr.mxu1 %v2015_v41  ;;  %v2012_v43 = vld [vmem:[%s9523_s3 + $0xd0] sm:$0xff]  ;;  %v1584_v41 = vld [vmem:[%s9524_s4 + $0x18] sm:$0xff] }
 0x256   :  { %1428 = vmatprep.mubr.f32.mxu1 %v7269_v62  ;;  %6282 = vmatpush3.msra.mxu1 %v1999_v26  ;;  %v1996_v62 = vld [vmem:[%s9523_s3 + $0x50] sm:$0xff] }
 0x257   :  { %6283 = vmatprep.subr.mxu1 %v2014_v23  ;;  %v1583_v26 = vld [vmem:[%s9524_s4 + $0x10] sm:$0xff] }
 0x258   :  { %6284 = vmatpush3.msra.mxu1 %v1998_v6  ;;  %v1582_v6 = vld [vmem:[%s9524_s4 + $0x8] sm:$0xff] }
 0x259   :  { %1429 = vmatmul.mubr.f32.gmra.mxu1 %v7252_v31  ;;  %6285 = vmatprep.subr.mxu1 %v2013_v52  ;;  %v2010_v31 = vld [vmem:[%s9523_s3 + $0xc0] sm:$0xff] }
 0x25a   :  { %1433 = vmatprep.mubr.f32.mxu1 %v7307_v8  ;;  %6286 = vmatpush3.msra.mxu1 %v1997_v19  ;;  %v1994_v8 = vld [vmem:[%s9523_s3 + $0x40] sm:$0xff] }
 0x25b   :  { %6287 = vmatprep.subr.mxu1 %v2012_v43  ;;  %v1581_v52 = vld [vmem:[%s9524_s4] sm:$0xff] }
 0x25c   :  { %6288 = vmatpush3.msra.mxu1 %v1996_v62 }
 0x25d   :  { %1434 = vmatmul.mubr.f32.gmra.mxu1 %v7290_v44  ;;  %6289 = vmatprep.subr.mxu1 %v2011_v17  ;;  %v2008_v44 = vld [vmem:[%s9523_s3 + $0xb0] sm:$0xff]  ;;  %v559_v21 = vpop.f32.mrf.mxu0 }
 0x25e   :  { %1438 = vmatprep.mubr.f32.mxu1 %v7345_v3  ;;  %6290 = vmatpush3.msra.mxu1 %v1995_v14  ;;  %v1992_v3 = vld [vmem:[%s9523_s3 + $0x30] sm:$0xff]  ;;  %v6816_v14 = vld [vmem:[%s9522_s2] sm:$0x3f] }
 0x25f   :  { %6291 = vmatprep.subr.mxu1 %v2010_v31  ;;  %v561_v23 = vpop.f32.mrf.mxu0  ;;  %v8066_v31 = vrot.slane %v6816_v14, %v7129_v57  ;;  %v2681_v57 = vld [vmem:[%s9523_s3 + $0xf8] sm:$0xff] }
 0x260   :  { %6292 = vmatpush3.msra.mxu1 %v1994_v8 }
 0x261   :  { %1439 = vmatmul.mubr.f32.gmra.mxu1 %v7328_v45  ;;  %6293 = vmatprep.subr.mxu1 %v2009_v13  ;;  %v2006_v45 = vld [vmem:[%s9523_s3 + $0xa0] sm:$0xff]  ;;  %v565_v19 = vpop.f32.mrf.mxu0  ;;  %v8069_v13 = vrot.slane %v6816_v14, %v7132_v58 }
 0x262   :  { %1443 = vmatprep.mubr.f32.mxu1 %v7377_v47  ;;  %6294 = vmatpush3.msra.mxu1 %v1993_v48  ;;  %v1990_v47 = vld [vmem:[%s9523_s3 + $0x20] sm:$0xff]  ;;  %v8072_v48 = vadd.f32 %v559_v21, %v8066_v31 }
 0x263   :  { %6295 = vmatprep.subr.mxu1 %v2008_v44  ;;  %v567_v43 = vpop.f32.mrf.mxu0 }
 0x264   :  { %6296 = vmatpush3.msra.mxu1 %v1992_v3  ;;  %9651 = vst [vmem:[#allocation16_spill] sm:$0xff] %v8072_v48  ;;  %v8075_v3 = vadd.f32 %v561_v23, %v8069_v13 }
 0x265   :  { %1444 = vmatmul.mubr.f32.gmra.mxu1 %v7362_v39  ;;  %6297 = vmatprep.subr.mxu1 %v2007_v37  ;;  %v2004_v39 = vld [vmem:[%s9523_s3 + $0x90] sm:$0xff]  ;;  %v571_v62 = vpop.f32.mrf.mxu0 }
 0x266   :  { %6298 = vmatpush3.msra.mxu1 %v1991_v30  ;;  %2082 = vmatprep.mubr.f32.mxu1 %v7198_v34  ;;  %v2003_v34 = vld [vmem:[%s9523_s3 + $0x88] sm:$0xff]  ;;  %9652 = vst [vmem:[#allocation15_spill] sm:$0xff] %v8075_v3 }
 0x267   :  { %6299 = vmatprep.subr.mxu1 %v2006_v45  ;;  %v573_v17 = vpop.f32.mrf.mxu0  ;;  %v8079_v45 = vadd.f32 %v565_v19, %v8066_v31 }
 0x268   :  { %6300 = vmatpush3.msra.mxu1 %v1990_v47 }
 0x269   :  { %6301 = vmatprep.subr.mxu1 %v2005_v49  ;;  %v577_v8 = vpop.f32.mrf.mxu0  ;;  %9653 = vst [vmem:[#allocation18_spill] sm:$0xff] %v8079_v45 }
 0x26a   :  { %6302 = vmatpush3.msra.mxu1 %v1989_v35 }
 0x26b   :  { %6303 = vmatprep.subr.mxu1 %v2004_v39  ;;  %v579_v44 = vpop.f32.mrf.mxu0  ;;  %v8086_v39 = vadd.f32 %v567_v43, %v8069_v13  ;;  %v9658_v43 = vlaneseq }
 0x26c   :  { %6304 = vmatpush3.msra.mxu1 %v1988_v36  ;;  %v6890_v36 = vmov 1966171168  }
 0x26d   :  { %6305 = vmatprep.subr.mxu1 %v2003_v34  ;;  %v583_v58 = vpop.f32.mrf.mxu0  ;;  %9654 = vst [vmem:[#allocation17_spill] sm:$0xff] %v8086_v39  ;;  %v1147_v34 = vunpack.c.l.s4 %v6890_v36  ;;  %vm8107_vm1 = vcmp.lt.s32.totalorder %v9658_v43, 256 }
 0x26e   :  { %6306 = vmatpush3.msra.mxu1 %v1987_v38 }
 0x26f   :  { %6307 = vmatprep.subr.mxu1 %v2002_v20 }
 0x270   :  { %6308 = vmatpush3.msra.mxu1 %v1986_v22 }
 0x271   :  { %2083 = vmatmul.mubr.f32.vlgmr.msra.gmra.mxu1 %v7181_v25  ;;  %v1596_v25 = vld [vmem:[%s9524_s4 + $0x78] sm:$0xff] }
 0x272   :  { %2087 = vmatprep.mubr.f32.mxu1 %v7236_v15  ;;  %1631 = vmatprep.subr.mxu0 %v1596_v25  ;;  %v1594_v15 = vld [vmem:[%s9524_s4 + $0x68] sm:$0xff] }
 0x273   :  { %2295 = vmatprep.subr.mxu1 %v1596_v25 }
 0x275   :  { %2088 = vmatmul.mubr.f32.gmra.mxu1 %v7219_v55  ;;  %v1595_v55 = vld [vmem:[%s9524_s4 + $0x70] sm:$0xff] }
 0x276   :  { %2092 = vmatprep.mubr.f32.mxu1 %v9644_v60  ;;  %1632 = vmatpush1.msra.mxu0 %v1595_v55 }
 0x277   :  { %2296 = vmatpush1.msra.mxu1 %v1595_v55  ;;  %1633 = vmatprep.subr.mxu0 %v1594_v15  ;;  %v1148_v55 = vunpack.c.0.s8 %v1147_v34 }
 0x278   :  { %2297 = vmatprep.subr.mxu1 %v1594_v15  ;;  %v8094_v15 = vadd.f32 %v573_v17, %v8069_v13 }
 0x279   :  { %2093 = vmatmul.mubr.f32.gmra.mxu1 %v9645_v0  ;;  %v8090_v0 = vadd.f32 %v571_v62, %v8066_v31 }
 0x27a   :  { %2097 = vmatprep.mubr.f32.mxu1 %v9646_v50  ;;  %9656 = vst [vmem:[#allocation22_spill] sm:$0xff] %v8094_v15 }
 0x27b   :  { %9655 = vst [vmem:[#allocation19_spill] sm:$0xff] %v8090_v0 }
 0x27d   :  { %2098 = vmatmul.mubr.f32.gmra.mxu1 %v9647_v11  ;;  %v585_v11 = vpop.f32.mrf.mxu0 }
 0x27e   :  { %2102 = vmatprep.mubr.f32.mxu1 %v7350_v29  ;;  %v1593_v29 = vld [vmem:[%s9524_s4 + $0x60] sm:$0xff] }
 0x27f   :  { %1634 = vmatpush1.msra.mxu0 %v1593_v29  ;;  %2298 = vmatpush1.msra.mxu1 %v1593_v29 }
 0x280   :  { %1635 = vmatprep.subr.mxu0 %v1592_v7  ;;  %2299 = vmatprep.subr.mxu1 %v1592_v7 }
 0x281   :  { %2103 = vmatmul.mubr.f32.gmra.mxu1 %v9648_v27  ;;  %1636 = vmatpush1.msra.mxu0 %v1591_v16 }
 0x282   :  { %2107 = vmatprep.mubr.f32.mxu1 %v9649_v18  ;;  %2300 = vmatpush1.msra.mxu1 %v1591_v16 }
 0x283   :  { %1637 = vmatprep.subr.mxu0 %v1590_v61  ;;  %2301 = vmatprep.subr.mxu1 %v1590_v61 }
 0x284   :  { %1638 = vmatpush1.msra.mxu0 %v1589_v12  ;;  %2302 = vmatpush1.msra.mxu1 %v1589_v12 }
 0x285   :  { %2108 = vmatmul.mubr.f32.gmra.mxu1 %v9650_v32  ;;  %1639 = vmatprep.subr.mxu0 %v1588_v9 }
 0x286   :  { %2343 = vmatprep.mubr.f32.mxu1 %v9643_v10  ;;  %2303 = vmatprep.subr.mxu1 %v1588_v9 }
 0x287   :  { %1640 = vmatpush1.msra.mxu0 %v1587_v40  ;;  %2304 = vmatpush1.msra.mxu1 %v1587_v40  ;;  %v8098_v40 = vadd.f32 %v577_v8, %v8066_v31 }
 0x288   :  { %1641 = vmatprep.subr.mxu0 %v1586_v54  ;;  %2305 = vmatprep.subr.mxu1 %v1586_v54  ;;  %v8101_v54 = vadd.f32 %v579_v44, %v8069_v13  ;;  %v8113_v44 = vadd.f32 %v583_v58, %v8066_v31 }
 0x289   :  { %1642 = vmatpush1.msra.mxu0 %v1585_v33  ;;  %2306 = vmatpush1.msra.mxu1 %v1585_v33  ;;  %v589_v33 = vpop.f32.mrf.mxu0 }
 0x28a   :  { %1643 = vmatprep.subr.mxu0 %v1584_v41  ;;  %2307 = vmatprep.subr.mxu1 %v1584_v41  ;;  %9661 = vst [vmem:[#allocation20_spill] sm:$0xff] %v8113_v44 }
 0x28b   :  { %1644 = vmatpush1.msra.mxu0 %v1583_v26  ;;  %2308 = vmatpush1.msra.mxu1 %v1583_v26 }
 0x28c   :  { %1645 = vmatprep.subr.mxu0 %v1582_v6  ;;  %2309 = vmatprep.subr.mxu1 %v1582_v6 }
 0x28d   :  { %1646 = vmatpush1.msra.mxu0 %v1581_v52  ;;  %2310 = vmatpush1.msra.mxu1 %v1581_v52  ;;  %v9657_v52 = vld [vmem:[#allocation12_spill] sm:$0xff] }
 0x28e   :  { %6327 = vmatprep.subr.mxu1 %v2681_v57  ;;  %v8104_v19 = vsub.s32 %v1148_v55, %v9657_v52 }
 0x2f0   :  { %v1014_v37 = vpop.f32.mrf.mxu1 }
 0x2f1   :  { %v1049_v30 = vmul.f32 %v1014_v37, %v8072_v48 }
 0x2f2   :  { %v1016_v47 = vpop.f32.mrf.mxu1 }
 0x2f3   :  { %v1061_v49 = vrot.slane %v1049_v30, 4  ;;  %v1050_v35 = vmul.f32 %v1016_v47, %v8075_v3  ;;  %v8116_v47 = vadd.f32 %v585_v11, %v8069_v13 }
 0x2f4   :  { %v1020_v38 = vpop.f32.mrf.mxu1 }
 0x2f5   :  { %v1062_v20 = vadd.f32 %v1061_v49, %v1049_v30  ;;  %v1067_v22 = vrot.slane %v1050_v35, 4  ;;  %v1051_v60 = vmul.f32 %v1020_v38, %v8079_v45 }
 0x2f6   :  { %v1022_v50 = vpop.f32.mrf.mxu1 }
 0x2f7   :  { %v1063_v27 = vrot.slane %v1062_v20, 2  ;;  %v1068_v18 = vadd.f32 %v1067_v22, %v1050_v35  ;;  %v1073_v32 = vrot.slane %v1051_v60, 4  ;;  %v1052_v25 = vmul.f32 %v1022_v50, %v8086_v39 }
 0x2f8   :  { %v1026_v29 = vpop.f32.mrf.mxu1 }
 0x2f9   :  { %v1064_v7 = vadd.f32 %v1063_v27, %v1062_v20  ;;  %v1069_v16 = vrot.slane %v1068_v18, 2  ;;  %v1074_v61 = vadd.f32 %v1073_v32, %v1051_v60  ;;  %v1079_v12 = vrot.slane %v1052_v25, 4  ;;  %v591_v20 = vpop.f32.mrf.mxu0 }
 0x2fa   :  { %v1053_v9 = vmul.f32 %v1026_v29, %v8090_v0  ;;  %v1028_v21 = vpop.f32.mrf.mxu1 }
 0x2fb   :  { %v1065_v41 = vrot.slane %v1064_v7, 1  ;;  %v1070_v26 = vadd.f32 %v1069_v16, %v1068_v18  ;;  %v1075_v23 = vrot.slane %v1074_v61, 2  ;;  %v1080_v6 = vadd.f32 %v1079_v12, %v1052_v25 }
 0x2fc   :  { %v1085_v17 = vrot.slane %v1053_v9, 4  ;;  %v1054_v14 = vmul.f32 %v1028_v21, %v8094_v15  ;;  %v8121_v25 = vadd.f32 %v589_v33, %v8066_v31  ;;  %v8124_v16 = vadd.f32 %v591_v20, %v8069_v13 }
 0x2fd   :  { %v1032_v8 = vpop.f32.mrf.mxu1  ;;  %v1071_v37 = vrot.slane %v1070_v26, 1  ;;  %v1076_v30 = vadd.f32 %v1075_v23, %v1074_v61  ;;  %v1081_v57 = vrot.slane %v1080_v6, 2  ;;  %v1066_v49 = vadd.f32 %v1065_v41, %v1064_v7 }
 0x2fe   :  { %v1086_v35 = vadd.f32 %v1085_v17, %v1053_v9  ;;  %v1091_v36 = vrot.slane %v1054_v14, 4  ;;  %v1055_v34 = vmul.f32 %v1032_v8, %v8098_v40  ;;  %9662 = vst [vmem:[#allocation12_spill] sm:$0xff] %v8121_v25  ;;  %9663 = vst [vmem:[#allocation81_spill] sm:$0xff] %v8124_v16 }
 0x2ff   :  { %v1034_v38 = vpop.f32.mrf.mxu1  ;;  %v1072_v22 = vadd.f32 %v1071_v37, %v1070_v26  ;;  %v1077_v60 = vrot.slane %v1076_v30, 1  ;;  %v1082_v50 = vadd.f32 %v1081_v57, %v1080_v6 }
 0x300   :  { %v1056_v27 = vmul.f32 %v1034_v38, %v8101_v54  ;;  %v1087_v58 = vrot.slane %v1086_v35, 2  ;;  %v1092_v18 = vadd.f32 %v1091_v36, %v1054_v14  ;;  %v1097_v32 = vrot.slane %v1055_v34, 4 }
 0x301   :  { %v1145_v11 = vcombine.low %v1066_v49, %v1072_v22  ;;  %v1083_v55 = vrot.slane %v1082_v50, 1  ;;  %v1038_v7 = vpop.f32.mrf.mxu1  ;;  %v1078_v26 = vadd.f32 %v1077_v60, %v1076_v30 }
 0x302   :  { %v1103_v29 = vrot.slane %v1056_v27, 4  ;;  %v1088_v61 = vadd.f32 %v1087_v58, %v1086_v35  ;;  %v1093_v12 = vrot.slane %v1092_v18, 2  ;;  %v1098_v9 = vadd.f32 %v1097_v32, %v1055_v34 }
 0x303   :  { %v1057_v21 = vmul.f32 %v1038_v7, %v8113_v44  ;;  %v1152_v41 = vrot.slane %v1145_v11, %v8104_v19  ;;  %v1084_v23 = vadd.f32 %v1083_v55, %v1082_v50  ;;  %v1040_v52 = vpop.f32.mrf.mxu1 }
 0x304   :  { %v1104_v6 = vadd.f32 %v1103_v29, %v1056_v27  ;;  %v1089_v31 = vrot.slane %v1088_v61, 1  ;;  %v1094_v33 = vadd.f32 %v1093_v12, %v1092_v18  ;;  %v1099_v43 = vrot.slane %v1098_v9, 2 }
 0x305   :  { %v1109_v17 = vrot.slane %v1057_v21, 4  ;;  %v1159_v14 = vrot.slane %v1152_v41, %v8104_v19  ;;  %v1160_v8 = vcombine.low %v1078_v26, %v1084_v23  ;;  %v1058_v37 = vmul.f32 %v1040_v52, %v8116_v47  ;;  %v1044_v57 = vpop.f32.mrf.mxu1 }
 0x306   :  { %v1105_v13 = vrot.slane %v1104_v6, 2  ;;  %v1090_v49 = vadd.f32 %v1089_v31, %v1088_v61  ;;  %v1095_v35 = vrot.slane %v1094_v33, 1  ;;  %v1100_v36 = vadd.f32 %v1099_v43, %v1098_v9 }
 0x307   :  { %v1110_v34 = vadd.f32 %v1109_v17, %v1057_v21  ;;  %1245 = vst.msk [vmem:[#allocation2] ss:$8 sm:$0x3] %vm8107_vm1, %v1159_v14  ;;  %v1167_v30 = vrot.slane %v1160_v8, %v8104_v19  ;;  %v1115_v20 = vrot.slane %v1058_v37, 4  ;;  %v1059_v22 = vmul.f32 %v1044_v57, %v8121_v25  ;;  %v1046_v60 = vpop.f32.mrf.mxu1 }
 0x308   :  { %v1106_v38 = vadd.f32 %v1105_v13, %v1104_v6  ;;  %v1096_v50 = vadd.f32 %v1095_v35, %v1094_v33  ;;  %v1101_v27 = vrot.slane %v1100_v36, 1  ;;  %v1060_v18 = vmul.f32 %v1046_v60, %v8124_v16 }
 0x309   :  { %v1111_v58 = vrot.slane %v1110_v34, 2  ;;  %v1174_v32 = vrot.slane %v1167_v30, %v8104_v19  ;;  %v1116_v55 = vadd.f32 %v1115_v20, %v1058_v37  ;;  %v1121_v29 = vrot.slane %v1059_v22, 4 }
 0x30a   :  { %v1107_v11 = vrot.slane %v1106_v38, 1  ;;  %v1175_v7 = vcombine.low %v1090_v49, %v1096_v50  ;;  %v1127_v12 = vrot.slane %v1060_v18, 4  ;;  %v1102_v9 = vadd.f32 %v1101_v27, %v1100_v36 }
 0x30b   :  { %v1112_v61 = vadd.f32 %v1111_v58, %v1110_v34  ;;  %1248 = vst.msk [vmem:[#allocation2 + $0x10] ss:$8 sm:$0x3] %vm8107_vm1, %v1174_v32  ;;  %v1117_v41 = vrot.slane %v1116_v55, 2  ;;  %v1122_v26 = vadd.f32 %v1121_v29, %v1059_v22 }
 0x30c   :  { %v1108_v21 = vadd.f32 %v1107_v11, %v1106_v38  ;;  %v1182_v23 = vrot.slane %v1175_v7, %v8104_v19  ;;  %v1128_v6 = vadd.f32 %v1127_v12, %v1060_v18 }
 0x30d   :  { %v1113_v31 = vrot.slane %v1112_v61, 1  ;;  %v1118_v33 = vadd.f32 %v1117_v41, %v1116_v55  ;;  %v1123_v43 = vrot.slane %v1122_v26, 2 }
 0x30e   :  { %v1190_v52 = vcombine.low %v1102_v9, %v1108_v21  ;;  %v1189_v17 = vrot.slane %v1182_v23, %v8104_v19  ;;  %v1129_v14 = vrot.slane %v1128_v6, 2 }
 0x30f   :  { %v1119_v13 = vrot.slane %v1118_v33, 1  ;;  %v1124_v37 = vadd.f32 %v1123_v43, %v1122_v26  ;;  %v1114_v35 = vadd.f32 %v1113_v31, %v1112_v61 }
 0x310   :  { %v1197_v8 = vrot.slane %v1190_v52, %v8104_v19  ;;  %1251 = vst.msk [vmem:[#allocation2 + $0x20] ss:$8 sm:$0x3] %vm8107_vm1, %v1189_v17  ;;  %v1130_v57 = vadd.f32 %v1129_v14, %v1128_v6 }
 0x311   :  { %v1120_v36 = vadd.f32 %v1119_v13, %v1118_v33  ;;  %v1125_v34 = vrot.slane %v1124_v37, 1  ;;  %v6259_v30 = vpop.f32.mrf.mxu1 }
 0x312   :  { %v1204_v49 = vrot.slane %v1197_v8, %v8104_v19  ;;  %v1131_v38 = vrot.slane %v1130_v57, 1 }
 0x313   :  { %v1205_v20 = vcombine.low %v1114_v35, %v1120_v36  ;;  %v6260_v22 = vpop.f32.mrf.mxu1  ;;  %v1126_v60 = vadd.f32 %v1125_v34, %v1124_v37 }
 0x314   :  { %1254 = vst.msk [vmem:[#allocation2 + $0x30] ss:$8 sm:$0x3] %vm8107_vm1, %v1204_v49  ;;  %v1132_v50 = vadd.f32 %v1131_v38, %v1130_v57  ;;  %v6261_v27 = vadd.f32 %v6260_v22, %v6259_v30 }
 0x315   :  { %v1212_v58 = vrot.slane %v1205_v20, %v8104_v19  ;;  %v6262_v18 = vpop.f32.mrf.mxu1 }
 0x316   :  { %v1220_v32 = vcombine.low %v1126_v60, %v1132_v50  ;;  %v1449_v11 = vsel %vm781_vm0, %v6261_v27, -inf }
 0x317   :  { %v1219_v55 = vrot.slane %v1212_v58, %v8104_v19  ;;  %v1450_v29 = vrot.slane %v1449_v11, 4  ;;  %v6263_v7 = vpop.f32.mrf.mxu1 }
 0x318   :  { %v1227_v61 = vrot.slane %v1220_v32, %v8104_v19  ;;  %v6264_v12 = vadd.f32 %v6263_v7, %v6262_v18 }
 0x319   :  { %1257 = vst.msk [vmem:[#allocation2 + $0x40] ss:$8 sm:$0x3] %vm8107_vm1, %v1219_v55  ;;  %v1451_v9 = vmax.f32 %v1449_v11, %v1450_v29  ;;  %v6265_v21 = vpop.f32.mrf.mxu1 }
 0x31a   :  { %v1234_v41 = vrot.slane %v1227_v61, %v8104_v19  ;;  %v1456_v26 = vsel %vm781_vm0, %v6264_v12, -inf }
 0x31b   :  { %v1452_v23 = vrot.slane %v1451_v9, 2  ;;  %v1457_v6 = vrot.slane %v1456_v26, 4  ;;  %v6266_v52 = vpop.f32.mrf.mxu1 }
 0x31c   :  { %1260 = vst.msk [vmem:[#allocation2 + $0x50] ss:$8 sm:$0x3] %vm8107_vm1, %v1234_v41  ;;  %v6267_v31 = vadd.f32 %v6266_v52, %v6265_v21 }
 0x31d   :  { %v1453_v33 = vmax.f32 %v1451_v9, %v1452_v23  ;;  %v1458_v43 = vmax.f32 %v1456_v26, %v1457_v6  ;;  %v6268_v17 = vpop.f32.mrf.mxu1 }
 0x31e   :  { %v1463_v14 = vsel %vm781_vm0, %v6267_v31, -inf }
 0x31f   :  { %v1454_v8 = vrot.slane %v1453_v33, 1  ;;  %v1459_v13 = vrot.slane %v1458_v43, 2  ;;  %v1464_v37 = vrot.slane %v1463_v14, 4  ;;  %v6269_v57 = vpop.f32.mrf.mxu1 }
 0x320   :  { %v6270_v49 = vadd.f32 %v6269_v57, %v6268_v17 }
 0x321   :  { %v1455_v35 = vmax.f32 %v1453_v33, %v1454_v8  ;;  %v1460_v36 = vmax.f32 %v1458_v43, %v1459_v13  ;;  %v1465_v34 = vmax.f32 %v1463_v14, %v1464_v37  ;;  %v6271_v30 = vpop.f32.mrf.mxu1 }
 0x322   :  { %v1470_v38 = vsel %vm781_vm0, %v6270_v49, -inf }
 0x323   :  { %v1491_v20 = vsub.f32 %v6261_v27, %v1455_v35  ;;  %v1461_v22 = vrot.slane %v1460_v36, 1  ;;  %v1466_v60 = vrot.slane %v1465_v34, 2  ;;  %v1471_v50 = vrot.slane %v1470_v38, 4  ;;  %v6272_v58 = vpop.f32.mrf.mxu1 }
 0x324   :  { %v6273_v18 = vadd.f32 %v6272_v58, %v6271_v30 }
 0x325   :  { %v1497_v32 = vmul.f32 1.442695, %v1491_v20  ;;  %v1462_v11 = vmax.f32 %v1460_v36, %v1461_v22  ;;  %v1467_v55 = vmax.f32 %v1465_v34, %v1466_v60  ;;  %v1472_v29 = vmax.f32 %v1470_v38, %v1471_v50  ;;  %v6274_v7 = vpop.f32.mrf.mxu1 }
 0x326   :  { %v1477_v61 = vsel %vm781_vm0, %v6273_v18, -inf }
 0x327   :  { %6610 = vpow2.f32 %v1497_v32  ;;  %v1492_v9 = vsub.f32 %v6264_v12, %v1462_v11  ;;  %v1468_v21 = vrot.slane %v1467_v55, 1  ;;  %v1473_v41 = vrot.slane %v1472_v29, 2  ;;  %v6275_v26 = vpop.f32.mrf.mxu1 }
 0x328   :  { %v1478_v23 = vrot.slane %v1477_v61, 4  ;;  %v6276_v6 = vadd.f32 %v6275_v26, %v6274_v7 }
 0x329   :  { %v1499_v27 = vmul.f32 1.442695, %v1492_v9  ;;  %v1469_v52 = vmax.f32 %v1467_v55, %v1468_v21  ;;  %v1474_v33 = vmax.f32 %v1472_v29, %v1473_v41 }
 0x32a   :  { %v1479_v43 = vmax.f32 %v1477_v61, %v1478_v23  ;;  %v1484_v17 = vsel %vm781_vm0, %v6276_v6, -inf }
 0x32b   :  { %6612 = vpow2.f32 %v1499_v27  ;;  %v1493_v14 = vsub.f32 %v6267_v31, %v1469_v52  ;;  %v1475_v8 = vrot.slane %v1474_v33, 1  ;;  %v1485_v13 = vrot.slane %v1484_v17, 4 }
 0x32c   :  { %v1480_v37 = vrot.slane %v1479_v43, 2 }
 0x32d   :  { %v1501_v57 = vmul.f32 1.442695, %v1493_v14  ;;  %v1476_v35 = vmax.f32 %v1474_v33, %v1475_v8  ;;  %v1486_v36 = vmax.f32 %v1484_v17, %v1485_v13 }
 0x32e   :  { %v1481_v12 = vmax.f32 %v1479_v43, %v1480_v37 }
 0x32f   :  { %6614 = vpow2.f32 %v1501_v57  ;;  %v1494_v34 = vsub.f32 %v6270_v49, %v1476_v35  ;;  %v1487_v30 = vrot.slane %v1486_v36, 2 }
 0x330   :  { %v1482_v38 = vrot.slane %v1481_v12, 1 }
 0x331   :  { %v1503_v20 = vmul.f32 1.442695, %v1494_v34  ;;  %v1488_v22 = vmax.f32 %v1486_v36, %v1487_v30  ;;  %v6309_v60 = vpop.f32.mrf.mxu1 }
 0x332   :  { %v1483_v50 = vmax.f32 %v1481_v12, %v1482_v38 }
 0x333   :  { %6616 = vpow2.f32 %v1503_v20  ;;  %v1489_v58 = vrot.slane %v1488_v22, 1  ;;  %v6310_v32 = vpop.f32.mrf.mxu1 }
 0x334   :  { %v8160_v11 = vpop.eup %6610  ;;  %v1495_v31 = vsub.f32 %v6273_v18, %v1483_v50  ;;  %v8162_v55 = vadd.f32 %v6310_v32, %v6309_v60 }
 0x335   :  { %v1509_v29 = vsel %vm781_vm0, %v8160_v11, 0.0  ;;  %v1490_v7 = vmax.f32 %v1488_v22, %v1489_v58  ;;  %v6312_v61 = vpop.f32.mrf.mxu1 }
 0x336   :  { %v1510_v49 = vrot.slane %v1509_v29, 4  ;;  %v1505_v9 = vmul.f32 1.442695, %v1495_v31  ;;  %v2113_v21 = vsel %vm781_vm0, %v8162_v55, -inf }
 0x337   :  { %v1496_v41 = vsub.f32 %v6276_v6, %v1490_v7  ;;  %v2114_v26 = vrot.slane %v2113_v21, 4  ;;  %v6313_v23 = vpop.f32.mrf.mxu1 }
 0x338   :  { %v8168_v27 = vpop.eup %6612  ;;  %v1511_v52 = vadd.f32 %v1510_v49, %v1509_v29  ;;  %6618 = vpow2.f32 %v1505_v9  ;;  %v8170_v18 = vadd.f32 %v6313_v23, %v6312_v61 }
 0x339   :  { %v1516_v33 = vsel %vm781_vm0, %v8168_v27, 0.0  ;;  %v1507_v43 = vmul.f32 1.442695, %v1496_v41  ;;  %v2115_v17 = vmax.f32 %v2113_v21, %v2114_v26  ;;  %v6315_v14 = vpop.f32.mrf.mxu1 }
 0x33a   :  { %v1512_v8 = vrot.slane %v1511_v52, 2  ;;  %v1517_v13 = vrot.slane %v1516_v33, 4  ;;  %v2120_v37 = vsel %vm781_vm0, %v8170_v18, -inf }
 0x33b   :  { %6620 = vpow2.f32 %v1507_v43  ;;  %v2116_v6 = vrot.slane %v2115_v17, 2  ;;  %v2121_v57 = vrot.slane %v2120_v37, 4  ;;  %v6316_v35 = vpop.f32.mrf.mxu1 }
 0x33c   :  { %v8176_v36 = vpop.eup %6614  ;;  %v1513_v12 = vadd.f32 %v1512_v8, %v1511_v52  ;;  %v8178_v34 = vadd.f32 %v6316_v35, %v6315_v14  ;;  %v1518_v30 = vadd.f32 %v1517_v13, %v1516_v33 }
 0x33d   :  { %v1523_v38 = vsel %vm781_vm0, %v8176_v36, 0.0  ;;  %v2117_v20 = vmax.f32 %v2115_v17, %v2116_v6  ;;  %v2122_v22 = vmax.f32 %v2120_v37, %v2121_v57  ;;  %v6318_v60 = vpop.f32.mrf.mxu1 }
 0x33e   :  { %v1514_v50 = vrot.slane %v1513_v12, 1  ;;  %v1524_v58 = vrot.slane %v1523_v38, 4  ;;  %v2127_v32 = vsel %vm781_vm0, %v8178_v34, -inf  ;;  %v1519_v31 = vrot.slane %v1518_v30, 2 }
 0x33f   :  { %v2118_v29 = vrot.slane %v2117_v20, 1  ;;  %v2123_v7 = vrot.slane %v2122_v22, 2  ;;  %v2128_v61 = vrot.slane %v2127_v32, 4  ;;  %v6319_v49 = vpop.f32.mrf.mxu1 }
 0x340   :  { %v8184_v9 = vpop.eup %6616  ;;  %v8186_v21 = vadd.f32 %v1514_v50, %v1513_v12  ;;  %v8188_v41 = vadd.f32 %v6319_v49, %v6318_v60  ;;  %v1520_v26 = vadd.f32 %v1519_v31, %v1518_v30  ;;  %v1525_v23 = vadd.f32 %v1524_v58, %v1523_v38 }
 0x341   :  { %v1530_v52 = vsel %vm781_vm0, %v8184_v9, 0.0  ;;  %v2119_v33 = vmax.f32 %v2117_v20, %v2118_v29  ;;  %v2124_v43 = vmax.f32 %v2122_v22, %v2123_v7  ;;  %v2129_v17 = vmax.f32 %v2127_v32, %v2128_v61  ;;  %v6321_v14 = vpop.f32.mrf.mxu1 }
 0x342   :  { %6622 = vrcp.f32 %v8186_v21  ;;  %v1531_v8 = vrot.slane %v1530_v52, 4  ;;  %v2134_v13 = vsel %vm781_vm0, %v8188_v41, -inf  ;;  %v1521_v37 = vrot.slane %v1520_v26, 1 }
 0x343   :  { %v2155_v6 = vsub.f32 %v8162_v55, %v2119_v33  ;;  %v2125_v57 = vrot.slane %v2124_v43, 1  ;;  %v2130_v35 = vrot.slane %v2129_v17, 2  ;;  %v2135_v12 = vrot.slane %v2134_v13, 4  ;;  %v6322_v30 = vpop.f32.mrf.mxu1 }
 0x344   :  { %v8196_v38 = vadd.f32 %v6322_v30, %v6321_v14  ;;  %v8198_v60 = vadd.f32 %v1521_v37, %v1520_v26  ;;  %v1526_v20 = vrot.slane %v1525_v23, 2  ;;  %v1532_v22 = vadd.f32 %v1531_v8, %v1530_v52 }
 0x345   :  { %v8200_v50 = vpop.eup %6618  ;;  %v2161_v58 = vmul.f32 1.442695, %v2155_v6  ;;  %v2126_v32 = vmax.f32 %v2124_v43, %v2125_v57  ;;  %v2131_v31 = vmax.f32 %v2129_v17, %v2130_v35  ;;  %v2136_v29 = vmax.f32 %v2134_v13, %v2135_v12  ;;  %v6324_v7 = vpop.f32.mrf.mxu1 }
 0x346   :  { %v1537_v55 = vsel %vm781_vm0, %v8200_v50, 0.0  ;;  %v2141_v61 = vsel %vm781_vm0, %v8196_v38, -inf  ;;  %6624 = vrcp.f32 %v8198_v60  ;;  %v1527_v49 = vadd.f32 %v1526_v20, %v1525_v23 }
 0x347   :  { %v1538_v26 = vrot.slane %v1537_v55, 4  ;;  %6626 = vpow2.f32 %v2161_v58  ;;  %v2156_v52 = vsub.f32 %v8170_v18, %v2126_v32  ;;  %v2132_v33 = vrot.slane %v2131_v31, 1  ;;  %v6325_v14 = vpop.f32.mrf.mxu1 }
 0x348   :  { %v8208_v8 = vpop.eup %6620  ;;  %v2137_v43 = vrot.slane %v2136_v29, 2  ;;  %v2142_v17 = vrot.slane %v2141_v61, 4  ;;  %v8210_v13 = vadd.f32 %v6325_v14, %v6324_v7  ;;  %v1528_v37 = vrot.slane %v1527_v49, 1 }
 0x349   :  { %v1544_v6 = vsel %vm781_vm0, %v8208_v8, 0.0  ;;  %v2163_v57 = vmul.f32 1.442695, %v2156_v52  ;;  %v2133_v35 = vmax.f32 %v2131_v31, %v2132_v33  ;;  %v1533_v12 = vrot.slane %v1532_v22, 2 }
 0x34a   :  { %v1545_v23 = vrot.slane %v1544_v6, 4  ;;  %v2138_v30 = vmax.f32 %v2136_v29, %v2137_v43  ;;  %v2143_v20 = vmax.f32 %v2141_v61, %v2142_v17  ;;  %v2148_v18 = vsel %vm781_vm0, %v8210_v13, -inf }
 0x34b   :  { %6628 = vpow2.f32 %v2163_v57  ;;  %v2157_v58 = vsub.f32 %v8178_v34, %v2133_v35  ;;  %v2149_v32 = vrot.slane %v2148_v18, 4  ;;  %v1529_v56 = vadd.f32 %v1528_v37, %v1527_v49 }
 0x34c   :  { %v2139_v7 = vrot.slane %v2138_v30, 1  ;;  %v2144_v14 = vrot.slane %v2143_v20, 2  ;;  %v1534_v2 = vadd.f32 %v1533_v12, %v1532_v22  ;;  %v1539_v4 = vadd.f32 %v1538_v26, %v1537_v55 }
 0x34d   :  { %v2165_v59 = vmul.f32 1.442695, %v2157_v58  ;;  %v2150_v1 = vmax.f32 %v2148_v18, %v2149_v32  ;;  %6630 = vrcp.f32 %v1529_v56  ;;  %v1546_v31 = vadd.f32 %v1545_v23, %v1544_v6 }
 0x34e   :  { %v2140_v52 = vmax.f32 %v2138_v30, %v2139_v7  ;;  %v2145_v33 = vmax.f32 %v2143_v20, %v2144_v14  ;;  %v1535_v29 = vrot.slane %v1534_v2, 1  ;;  %v1540_v61 = vrot.slane %v1539_v4, 2 }
 0x34f   :  { %v6623_v43 = vpop.eup %6622  ;;  %6632 = vpow2.f32 %v2165_v59  ;;  %v2151_v17 = vrot.slane %v2150_v1, 2  ;;  %v1547_v57 = vrot.slane %v1546_v31, 2 }
 0x350   :  { %v2158_v34 = vsub.f32 %v8188_v41, %v2140_v52  ;;  %v2146_v35 = vrot.slane %v2145_v33, 1  ;;  %v1557_v49 = vmul.f32 %v6623_v43, %v8186_v21  ;;  %v1536_v37 = vadd.f32 %v1535_v29, %v1534_v2 }
 0x351   :  { %v2152_v22 = vmax.f32 %v2150_v1, %v2151_v17  ;;  %v1541_v55 = vadd.f32 %v1540_v61, %v1539_v4  ;;  %v1548_v26 = vadd.f32 %v1547_v57, %v1546_v31 }
 0x352   :  { %v2167_v12 = vmul.f32 1.442695, %v2158_v34  ;;  %v2147_v18 = vmax.f32 %v2145_v33, %v2146_v35  ;;  %v1563_v6 = vsub.f32 2.0, %v1557_v49  ;;  %6634 = vrcp.f32 %v1536_v37 }
 0x353   :  { %v6625_v23 = vpop.eup %6624  ;;  %v2153_v30 = vrot.slane %v2152_v22, 1  ;;  %v1542_v20 = vrot.slane %v1541_v55, 1  ;;  %v1549_v58 = vrot.slane %v1548_v26, 1 }
 0x354   :  { %v8219_v59 = vpop.eup %6626  ;;  %6636 = vpow2.f32 %v2167_v12  ;;  %v2159_v41 = vsub.f32 %v8196_v38, %v2147_v18  ;;  %v1569_v32 = vmul.f32 %v6623_v43, %v1563_v6  ;;  %v1558_v21 = vmul.f32 %v6625_v23, %v8198_v60 }
 0x355   :  { %v2173_v1 = vsel %vm781_vm0, %v8219_v59, 0.0  ;;  %v2154_v4 = vmax.f32 %v2152_v22, %v2153_v30  ;;  %v1543_v2 = vadd.f32 %v1542_v20, %v1541_v55  ;;  %v1550_v7 = vadd.f32 %v1549_v58, %v1548_v26 }
 0x356   :  { %v2174_v14 = vrot.slane %v2173_v1, 4  ;;  %v2169_v31 = vmul.f32 1.442695, %v2159_v41  ;;  %v1575_v52 = vmul.f32 %v8160_v11, %v1569_v32  ;;  %v1564_v33 = vsub.f32 2.0, %v1558_v21 }
 0x357   :  { %v2160_v29 = vsub.f32 %v8210_v13, %v2154_v4  ;;  %6638 = vrcp.f32 %v1543_v2 }
 0x358   :  { %v8227_v61 = vpop.eup %6628  ;;  %v2175_v38 = vadd.f32 %v2174_v14, %v2173_v1  ;;  %6640 = vpow2.f32 %v2169_v31  ;;  %6135 = vmatmul.mubr.msk.f32.vlgmr.msra.gmra.mxu0 %vm781_vm0, %v1575_v52  ;;  %v1570_v60 = vmul.f32 %v6625_v23, %v1564_v33 }
 0x359   :  { %v2180_v43 = vsel %vm781_vm0, %v8227_v61, 0.0  ;;  %v2171_v17 = vmul.f32 1.442695, %v2160_v29  ;;  %1685 = vmatprep.mubr.f32.mxu0 %v9643_v10  ;;  %6642 = vrcp.f32 %v1550_v7 }
 0x35a   :  { %v6631_v57 = vpop.eup %6630  ;;  %v2176_v11 = vrot.slane %v2175_v38, 2  ;;  %v2181_v34 = vrot.slane %v2180_v43, 4  ;;  %v1576_v13 = vmul.f32 %v8168_v27, %v1570_v60 }
 0x35b   :  { %6644 = vpow2.f32 %v2171_v17  ;;  %v1559_v35 = vmul.f32 %v6631_v57, %v1529_v56 }
 0x35c   :  { %v8234_v49 = vpop.eup %6632  ;;  %v2177_v22 = vadd.f32 %v2176_v11, %v2175_v38  ;;  %6136 = vmatmul.mubr.msk.f32.gmra.mxu0 %vm781_vm0, %v1576_v13  ;;  %v2182_v55 = vadd.f32 %v2181_v34, %v2180_v43 }
 0x35d   :  { %v2187_v26 = vsel %vm781_vm0, %v8234_v49, 0.0  ;;  %1691 = vmatprep.mubr.f32.mxu0 %v9643_v10  ;;  %v1565_v12 = vsub.f32 2.0, %v1559_v35 }
 0x35e   :  { %v2178_v18 = vrot.slane %v2177_v22, 1  ;;  %v2188_v6 = vrot.slane %v2187_v26, 4  ;;  %v2183_v23 = vrot.slane %v2182_v55, 2 }
 0x35f   :  { %v6635_v30 = vpop.eup %6634  ;;  %v1571_v20 = vmul.f32 %v6631_v57, %v1565_v12 }
 0x360   :  { %v2179_v27 = vadd.f32 %v2178_v18, %v2177_v22  ;;  %v1560_v58 = vmul.f32 %v6635_v30, %v1536_v37  ;;  %v2184_v56 = vadd.f32 %v2183_v23, %v2182_v55  ;;  %v2189_v41 = vadd.f32 %v2188_v6, %v2187_v26 }
 0x361   :  { %v8240_v32 = vpop.eup %6636  ;;  %v1577_v21 = vmul.f32 %v8176_v36, %v1571_v20 }
 0x362   :  { %6646 = vrcp.f32 %v2179_v27  ;;  %v2194_v1 = vsel %vm781_vm0, %v8240_v32, 0.0  ;;  %v1566_v4 = vsub.f32 2.0, %v1560_v58  ;;  %v2185_v14 = vrot.slane %v2184_v56, 1 }
 0x363   :  { %v2195_v31 = vrot.slane %v2194_v1, 4  ;;  %6137 = vmatmul.mubr.msk.f32.gmra.mxu0 %vm781_vm0, %v1577_v21  ;;  %v2190_v52 = vrot.slane %v2189_v41, 2 }
 0x364   :  { %v6639_v33 = vpop.eup %6638  ;;  %1697 = vmatprep.mubr.f32.mxu0 %v9643_v10  ;;  %v1572_v37 = vmul.f32 %v6635_v30, %v1566_v4  ;;  %v2186_v29 = vadd.f32 %v2185_v14, %v2184_v56 }
 0x365   :  { %v8247_v38 = vpop.eup %6640  ;;  %v1561_v60 = vmul.f32 %v6639_v33, %v1543_v2  ;;  %v2191_v43 = vadd.f32 %v2190_v52, %v2189_v41  ;;  %v2196_v36 = vadd.f32 %v2195_v31, %v2194_v1 }
 0x366   :  { %v6643_v17 = vpop.eup %6642  ;;  %v2201_v57 = vsel %vm781_vm0, %v8247_v38, 0.0  ;;  %v1578_v11 = vmul.f32 %v8184_v9, %v1572_v37  ;;  %6648 = vrcp.f32 %v2186_v29 }
 0x367   :  { %v2202_v34 = vrot.slane %v2201_v57, 4  ;;  %v1567_v13 = vsub.f32 2.0, %v1561_v60  ;;  %v1562_v35 = vmul.f32 %v6643_v17, %v1550_v7  ;;  %v2192_v22 = vrot.slane %v2191_v43, 1 }
 0x368   :  { %v8252_v55 = vpop.eup %6644  ;;  %6138 = vmatmul.mubr.msk.f32.gmra.mxu0 %vm781_vm0, %v1578_v11  ;;  %v2197_v26 = vrot.slane %v2196_v36, 2 }
 0x369   :  { %v2208_v2 = vsel %vm781_vm0, %v8252_v55, 0.0  ;;  %1703 = vmatprep.mubr.f32.mxu0 %v9643_v10  ;;  %v1573_v12 = vmul.f32 %v6639_v33, %v1567_v13  ;;  %v1568_v18 = vsub.f32 2.0, %v1562_v35  ;;  %v2193_v6 = vadd.f32 %v2192_v22, %v2191_v43  ;;  %v2680_v13 = vld [vmem:[%s9523_s3 + $0xf0] sm:$0xff] }
 0x36a   :  { %v2209_v23 = vrot.slane %v2208_v2, 4  ;;  %v2198_v9 = vadd.f32 %v2197_v26, %v2196_v36  ;;  %v2203_v30 = vadd.f32 %v2202_v34, %v2201_v57 }
 0x36b   :  { %v1579_v20 = vmul.f32 %v8200_v50, %v1573_v12  ;;  %v1574_v7 = vmul.f32 %v6643_v17, %v1568_v18  ;;  %6650 = vrcp.f32 %v2193_v6  ;;  %v2663_v12 = vld [vmem:[%s9523_s3 + $0x68] sm:$0xff]  ;;  %v2678_v18 = vld [vmem:[%s9523_s3 + $0xe0] sm:$0xff] }
 0x36c   :  { %v2199_v58 = vrot.slane %v2198_v9, 1  ;;  %v2204_v56 = vrot.slane %v2203_v30, 2  ;;  %v2210_v41 = vadd.f32 %v2209_v23, %v2208_v2 }
 0x36d   :  { %6139 = vmatmul.mubr.msk.f32.gmra.mxu0 %vm781_vm0, %v1579_v20  ;;  %v1580_v21 = vmul.f32 %v8208_v8, %v1574_v7 }
 0x36e   :  { %1709 = vmatprep.mubr.f32.mxu0 %v9643_v10  ;;  %v2200_v1 = vadd.f32 %v2199_v58, %v2198_v9  ;;  %v2205_v4 = vadd.f32 %v2204_v56, %v2203_v30  ;;  %v2211_v14 = vrot.slane %v2210_v41, 2  ;;  %v2661_v58 = vld [vmem:[%s9523_s3 + $0x58] sm:$0xff]  ;;  %v2676_v56 = vld [vmem:[%s9523_s3 + $0xd0] sm:$0xff] }
 0x36f   :  { %v6647_v31 = vpop.eup %6646 }
 0x370   :  { %v2221_v52 = vmul.f32 %v6647_v31, %v2179_v27  ;;  %6652 = vrcp.f32 %v2200_v1  ;;  %v2206_v33 = vrot.slane %v2205_v4, 1  ;;  %v2212_v37 = vadd.f32 %v2211_v14, %v2210_v41  ;;  %v2665_v27 = vld [vmem:[%s9523_s3 + $0x78] sm:$0xff] }
 0x371   :  { %6140 = vmatmul.mubr.msk.f32.gmra.mxu0 %vm781_vm0, %v1580_v21 }
 0x372   :  { %v2227_v50 = vsub.f32 2.0, %v2221_v52  ;;  %v2207_v60 = vadd.f32 %v2206_v33, %v2205_v4  ;;  %v2213_v43 = vrot.slane %v2212_v37, 1  ;;  %3007 = vmatprep.mubr.f32.mxu0 %v9643_v10  ;;  %v2659_v33 = vld [vmem:[%s9523_s3 + $0x48] sm:$0xff] }
 0x373   :  { %v6649_v36 = vpop.eup %6648 }
 0x374   :  { %v2233_v17 = vmul.f32 %v6647_v31, %v2227_v50  ;;  %v2222_v8 = vmul.f32 %v6649_v36, %v2186_v29  ;;  %6654 = vrcp.f32 %v2207_v60  ;;  %v2214_v57 = vadd.f32 %v2213_v43, %v2212_v37  ;;  %v2664_v29 = vld [vmem:[%s9523_s3 + $0x70] sm:$0xff]  ;;  %v2674_v43 = vld [vmem:[%s9523_s3 + $0xc0] sm:$0xff] }
 0x376   :  { %v2239_v11 = vmul.f32 %v8219_v59, %v2233_v17  ;;  %v2228_v34 = vsub.f32 2.0, %v2222_v8  ;;  %6656 = vrcp.f32 %v2214_v57  ;;  %v2679_v59 = vld [vmem:[%s9523_s3 + $0xe8] sm:$0xff] }
 0x378   :  { %v6651_v35 = vpop.eup %6650  ;;  %6141 = vmatmul.mubr.msk.f32.vlgmr.msra.gmra.mxu1 %vm781_vm0, %v2239_v11  ;;  %v2234_v22 = vmul.f32 %v6649_v36, %v2228_v34  ;;  %v2656_v34 = vld [vmem:[%s9523_s3 + $0x30] sm:$0xff] }
 0x379   :  { %6328 = vmatpush3.msra.mxu1 %v2665_v27  ;;  %2349 = vmatprep.mubr.f32.mxu1 %v9643_v10  ;;  %v2223_v26 = vmul.f32 %v6651_v35, %v2193_v6  ;;  %v2662_v6 = vld [vmem:[%s9523_s3 + $0x60] sm:$0xff]  ;;  %v2672_v27 = vld [vmem:[%s9523_s3 + $0xb0] sm:$0xff] }
 0x37a   :  { %6329 = vmatprep.subr.mxu1 %v2680_v13  ;;  %v2240_v2 = vmul.f32 %v8227_v61, %v2234_v22  ;;  %v2677_v61 = vld [vmem:[%s9523_s3 + $0xd8] sm:$0xff] }
 0x37b   :  { %6330 = vmatpush3.msra.mxu1 %v2664_v29  ;;  %v2229_v23 = vsub.f32 2.0, %v2223_v26  ;;  %v2670_v29 = vld [vmem:[%s9523_s3 + $0xa0] sm:$0xff]  ;;  %v9664_v22 = vld [vmem:[#allocation23_spill] sm:$0xff] }
 0x37c   :  { %6331 = vmatprep.subr.mxu1 %v2679_v59  ;;  %6142 = vmatmul.mubr.msk.f32.gmra.mxu1 %vm781_vm0, %v2240_v2  ;;  %v2669_v59 = vld [vmem:[%s9523_s3 + $0x98] sm:$0xff]  ;;  %v2668_v2 = vld [vmem:[%s9523_s3 + $0x90] sm:$0xff] }
 0x37d   :  { %v6653_v9 = vpop.eup %6652  ;;  %6332 = vmatpush3.msra.mxu1 %v2663_v12  ;;  %2355 = vmatprep.mubr.f32.mxu1 %v9643_v10  ;;  %v2235_v30 = vmul.f32 %v6651_v35, %v2229_v23  ;;  %v2655_v35 = vld [vmem:[%s9523_s3 + $0x28] sm:$0xff]  ;;  %v2653_v26 = vld [vmem:[%s9523_s3 + $0x18] sm:$0xff]  ;;  %v2652_v12 = vld [vmem:[%s9523_s3 + $0x10] sm:$0xff] }
 0x37e   :  { %6333 = vmatprep.subr.mxu1 %v2678_v18  ;;  %v2224_v20 = vmul.f32 %v6653_v9, %v2200_v1  ;;  %v2660_v1 = vld [vmem:[%s9523_s3 + $0x50] sm:$0xff]  ;;  %v2667_v18 = vld [vmem:[%s9523_s3 + $0x88] sm:$0xff] }
 0x37f   :  { %6334 = vmatpush3.msra.mxu1 %v2662_v6  ;;  %v2241_v7 = vmul.f32 %v8234_v49, %v2235_v30  ;;  %v2675_v49 = vld [vmem:[%s9523_s3 + $0xc8] sm:$0xff]  ;;  %v2666_v6 = vld [vmem:[%s9523_s3 + $0x80] sm:$0xff] }
 0x380   :  { %6335 = vmatprep.subr.mxu1 %v2677_v61  ;;  %v2230_v41 = vsub.f32 2.0, %v2224_v20  ;;  %v2651_v23 = vld [vmem:[%s9523_s3 + $0x8] sm:$0xff]  ;;  %v9666_v30 = vld [vmem:[#allocation24_spill] sm:$0xff] }
 0x381   :  { %v6655_v21 = vpop.eup %6654  ;;  %6143 = vmatmul.mubr.msk.f32.gmra.mxu1 %vm781_vm0, %v2241_v7  ;;  %v9665_v61 = vld [vmem:[#allocation21_spill] sm:$0xff]  ;;  %v9668_v7 = vld [vmem:[#allocation26_spill] sm:$0xff] }
 0x382   :  { %6336 = vmatpush3.msra.mxu1 %v2661_v58  ;;  %2361 = vmatprep.mubr.f32.mxu1 %v9643_v10  ;;  %v2236_v4 = vmul.f32 %v6653_v9, %v2230_v41  ;;  %v2225_v14 = vmul.f32 %v6655_v21, %v2207_v60  ;;  %v2658_v60 = vld [vmem:[%s9523_s3 + $0x40] sm:$0xff]  ;;  %v9667_v20 = vld [vmem:[#allocation25_spill] sm:$0xff]  ;;  %v9669_v58 = vld [vmem:[#allocation27_spill] sm:$0xff] }
 0x383   :  { %v6657_v31 = vpop.eup %6656  ;;  %6337 = vmatprep.subr.mxu1 %v2676_v56  ;;  %v2650_v9 = vld [vmem:[%s9523_s3] sm:$0xff]  ;;  %v9671_v41 = vld [vmem:[#allocation29_spill] sm:$0xff] }
 0x384   :  { %6338 = vmatpush3.msra.mxu1 %v2660_v1  ;;  %v2242_v52 = vmul.f32 %v8240_v32, %v2236_v4  ;;  %v2231_v37 = vsub.f32 2.0, %v2225_v14  ;;  %v2226_v50 = vmul.f32 %v6657_v31, %v2214_v57  ;;  %v2673_v32 = vld [vmem:[%s9523_s3 + $0xb8] sm:$0xff]  ;;  %v9670_v56 = vld [vmem:[#allocation28_spill] sm:$0xff]  ;;  %v2923_v4 = vld [vmem:[%s9524_s4 + $0x70] sm:$0xff] }
 0x385   :  { %6339 = vmatprep.subr.mxu1 %v2675_v49  ;;  %v2657_v57 = vld [vmem:[%s9523_s3 + $0x38] sm:$0xff]  ;;  %v9673_v1 = vld [vmem:[#allocation32_spill] sm:$0xff]  ;;  %v9674_v49 = vld [vmem:[#allocation33_spill] sm:$0xff] }
 0x386   :  { %6144 = vmatmul.mubr.msk.f32.gmra.mxu1 %vm781_vm0, %v2242_v52  ;;  %v2237_v36 = vmul.f32 %v6655_v21, %v2231_v37  ;;  %v2232_v17 = vsub.f32 2.0, %v2226_v50  ;;  %v9672_v21 = vld [vmem:[#allocation30_spill] sm:$0xff]  ;;  %v2922_v14 = vld [vmem:[%s9524_s4 + $0x68] sm:$0xff]  ;;  %v2920_v52 = vld [vmem:[%s9524_s4 + $0x58] sm:$0xff] }
 0x387   :  { %6340 = vmatpush3.msra.mxu1 %v2659_v33  ;;  %2367 = vmatprep.mubr.f32.mxu1 %v9643_v10  ;;  %v2919_v33 = vld [vmem:[%s9524_s4 + $0x50] sm:$0xff]  ;;  %v2918_v37 = vld [vmem:[%s9524_s4 + $0x48] sm:$0xff] }
 0x388   :  { %6341 = vmatprep.subr.mxu1 %v2674_v43  ;;  %v2243_v8 = vmul.f32 %v8247_v38, %v2237_v36  ;;  %v2238_v11 = vmul.f32 %v6657_v31, %v2232_v17  ;;  %v2671_v38 = vld [vmem:[%s9523_s3 + $0xa8] sm:$0xff]  ;;  %v2921_v31 = vld [vmem:[%s9524_s4 + $0x60] sm:$0xff]  ;;  %v2916_v36 = vld [vmem:[%s9524_s4 + $0x38] sm:$0xff] }
 0x389   :  { %6342 = vmatpush3.msra.mxu1 %v2658_v60  ;;  %v2917_v43 = vld [vmem:[%s9524_s4 + $0x40] sm:$0xff] }
 0x38a   :  { %6343 = vmatprep.subr.mxu1 %v2673_v32  ;;  %6145 = vmatmul.mubr.msk.f32.gmra.mxu1 %vm781_vm0, %v2243_v8  ;;  %v2244_v13 = vmul.f32 %v8252_v55, %v2238_v11  ;;  %v2654_v55 = vld [vmem:[%s9523_s3 + $0x20] sm:$0xff]  ;;  %v2915_v32 = vld [vmem:[%s9524_s4 + $0x30] sm:$0xff]  ;;  %v2914_v11 = vld [vmem:[%s9524_s4 + $0x28] sm:$0xff] }
 0x38b   :  { %6344 = vmatpush3.msra.mxu1 %v2657_v57  ;;  %2373 = vmatprep.mubr.f32.mxu1 %v9643_v10 }
 0x38c   :  { %6345 = vmatprep.subr.mxu1 %v2672_v27 }
 0x38d   :  { %6346 = vmatpush3.msra.mxu1 %v2656_v34  ;;  %v2913_v34 = vld [vmem:[%s9524_s4 + $0x20] sm:$0xff] }
 0x38e   :  { %6347 = vmatprep.subr.mxu1 %v2671_v38  ;;  %6146 = vmatmul.mubr.msk.f32.gmra.mxu1 %vm781_vm0, %v2244_v13 }
 0x38f   :  { %6348 = vmatpush3.msra.mxu1 %v2655_v35  ;;  %2746 = vmatprep.mubr.f32.mxu1 %v9664_v22  ;;  %v2911_v22 = vld [vmem:[%s9524_s4 + $0x10] sm:$0xff] }
 0x390   :  { %6349 = vmatprep.subr.mxu1 %v2670_v29  ;;  %v2912_v29 = vld [vmem:[%s9524_s4 + $0x18] sm:$0xff] }
 0x391   :  { %6350 = vmatpush3.msra.mxu1 %v2654_v55 }
 0x392   :  { %6351 = vmatprep.subr.mxu1 %v2669_v59 }
 0x393   :  { %6352 = vmatpush3.msra.mxu1 %v2653_v26 }
 0x394   :  { %6353 = vmatprep.subr.mxu1 %v2668_v2 }
 0x395   :  { %6354 = vmatpush3.msra.mxu1 %v2652_v12 }
 0x396   :  { %6355 = vmatprep.subr.mxu1 %v2667_v18  ;;  %v2910_v18 = vld [vmem:[%s9524_s4 + $0x8] sm:$0xff] }
 0x397   :  { %6356 = vmatpush3.msra.mxu1 %v2651_v23  ;;  %v2909_v23 = vld [vmem:[%s9524_s4] sm:$0xff] }
 0x398   :  { %6357 = vmatprep.subr.mxu1 %v2666_v6 }
 0x399   :  { %6358 = vmatpush3.msra.mxu1 %v2650_v9 }
 0x39a   :  { %2747 = vmatmul.mubr.f32.vlgmr.msra.gmra.mxu1 %v9665_v61 }
 0x39b   :  { %2751 = vmatprep.mubr.f32.mxu1 %v9666_v30 }
 0x39e   :  { %2752 = vmatmul.mubr.f32.gmra.mxu1 %v7403_v53  ;;  %v2924_v53 = vld [vmem:[%s9524_s4 + $0x78] sm:$0xff] }
 0x39f   :  { %2756 = vmatprep.mubr.f32.mxu1 %v9667_v20  ;;  %2959 = vmatprep.subr.mxu0 %v2924_v53  ;;  %v3345_v20 = vld [vmem:[%s9523_s3 + $0xf8] sm:$0xff] }
 0x3a0   :  { %3623 = vmatprep.subr.mxu1 %v2924_v53  ;;  %2960 = vmatpush1.msra.mxu0 %v2923_v4 }
 0x3a1   :  { %3624 = vmatpush1.msra.mxu1 %v2923_v4  ;;  %2961 = vmatprep.subr.mxu0 %v2922_v14 }
 0x3a2   :  { %2757 = vmatmul.mubr.f32.gmra.mxu1 %v9668_v7  ;;  %3625 = vmatprep.subr.mxu1 %v2922_v14 }
 0x3a3   :  { %2761 = vmatprep.mubr.f32.mxu1 %v9669_v58  ;;  %2962 = vmatpush1.msra.mxu0 %v2921_v31 }
 0x3a4   :  { %3626 = vmatpush1.msra.mxu1 %v2921_v31  ;;  %2963 = vmatprep.subr.mxu0 %v2920_v52 }
 0x3a5   :  { %3627 = vmatprep.subr.mxu1 %v2920_v52  ;;  %2964 = vmatpush1.msra.mxu0 %v2919_v33 }
 0x3a6   :  { %2762 = vmatmul.mubr.f32.gmra.mxu1 %v9670_v56  ;;  %2965 = vmatprep.subr.mxu0 %v2918_v37 }
 0x3a7   :  { %2766 = vmatprep.mubr.f32.mxu1 %v9671_v41  ;;  %3628 = vmatpush1.msra.mxu1 %v2919_v33 }
 0x3a8   :  { %3629 = vmatprep.subr.mxu1 %v2918_v37  ;;  %2966 = vmatpush1.msra.mxu0 %v2917_v43 }
 0x3a9   :  { %3630 = vmatpush1.msra.mxu1 %v2917_v43  ;;  %2967 = vmatprep.subr.mxu0 %v2916_v36 }
 0x3aa   :  { %2767 = vmatmul.mubr.f32.gmra.mxu1 %v9672_v21  ;;  %3631 = vmatprep.subr.mxu1 %v2916_v36 }
 0x3ab   :  { %2771 = vmatprep.mubr.f32.mxu1 %v9673_v1  ;;  %2968 = vmatpush1.msra.mxu0 %v2915_v32 }
 0x3ac   :  { %3632 = vmatpush1.msra.mxu1 %v2915_v32  ;;  %2969 = vmatprep.subr.mxu0 %v2914_v11 }
 0x3ad   :  { %3633 = vmatprep.subr.mxu1 %v2914_v11  ;;  %2970 = vmatpush1.msra.mxu0 %v2913_v34 }
 0x3ae   :  { %2772 = vmatmul.mubr.f32.gmra.mxu1 %v9674_v49  ;;  %2971 = vmatprep.subr.mxu0 %v2912_v29 }
 0x3af   :  { %3671 = vmatprep.mubr.f32.mxu1 %v9643_v10  ;;  %3634 = vmatpush1.msra.mxu1 %v2913_v34 }
 0x3b0   :  { %3635 = vmatprep.subr.mxu1 %v2912_v29  ;;  %2972 = vmatpush1.msra.mxu0 %v2911_v22 }
 0x3b1   :  { %3636 = vmatpush1.msra.mxu1 %v2911_v22  ;;  %2973 = vmatprep.subr.mxu0 %v2910_v18 }
 0x3b2   :  { %3637 = vmatprep.subr.mxu1 %v2910_v18  ;;  %2974 = vmatpush1.msra.mxu0 %v2909_v23 }
 0x3b3   :  { %3638 = vmatpush1.msra.mxu1 %v2909_v23  ;;  %6377 = vmatprep.subr.mxu0 %v3345_v20 }
 0x3b4   :  { %6427 = vmatprep.subr.mxu1 %v3345_v20 }
 0x418   :  { %v1681_v50 = vpop.f32.mrf.mxu0 }
 0x419   :  { %v1716_v60 = vmul.f32 %v1681_v50, %v8072_v48 }
 0x41a   :  { %v1683_v17 = vpop.f32.mrf.mxu0 }
 0x41b   :  { %v1728_v8 = vrot.slane %v1716_v60, 4  ;;  %v1717_v57 = vmul.f32 %v1683_v17, %v8075_v3 }
 0x41c   :  { %v1687_v27 = vpop.f32.mrf.mxu0 }
 0x41d   :  { %v1729_v13 = vadd.f32 %v1728_v8, %v1716_v60  ;;  %v1734_v38 = vrot.slane %v1717_v57, 4  ;;  %v1718_v35 = vmul.f32 %v1687_v27, %v8079_v45 }
 0x41e   :  { %v1689_v55 = vpop.f32.mrf.mxu0 }
 0x41f   :  { %v1730_v59 = vrot.slane %v1729_v13, 2  ;;  %v1735_v26 = vadd.f32 %v1734_v38, %v1717_v57  ;;  %v1740_v2 = vrot.slane %v1718_v35, 4  ;;  %v1719_v12 = vmul.f32 %v1689_v55, %v8086_v39 }
 0x421   :  { %v1731_v6 = vadd.f32 %v1730_v59, %v1729_v13  ;;  %v1736_v9 = vrot.slane %v1735_v26, 2  ;;  %v1741_v61 = vadd.f32 %v1740_v2, %v1718_v35  ;;  %v1746_v30 = vrot.slane %v1719_v12, 4 }
 0x423   :  { %v1732_v7 = vrot.slane %v1731_v6, 1  ;;  %v1737_v58 = vadd.f32 %v1736_v9, %v1735_v26  ;;  %v1742_v56 = vrot.slane %v1741_v61, 2  ;;  %v1747_v41 = vadd.f32 %v1746_v30, %v1719_v12  ;;  %v1693_v21 = vpop.f32.mrf.mxu0 }
 0x424   :  { %v1720_v1 = vmul.f32 %v1693_v21, %v8090_v0 }
 0x425   :  { %v1738_v49 = vrot.slane %v1737_v58, 1  ;;  %v1743_v53 = vadd.f32 %v1742_v56, %v1741_v61  ;;  %v1748_v4 = vrot.slane %v1747_v41, 2  ;;  %v1695_v14 = vpop.f32.mrf.mxu0  ;;  %v1733_v33 = vadd.f32 %v1732_v7, %v1731_v6 }
 0x426   :  { %v1752_v31 = vrot.slane %v1720_v1, 4  ;;  %v1721_v52 = vmul.f32 %v1695_v14, %v8094_v15 }
 0x427   :  { %v1739_v37 = vadd.f32 %v1738_v49, %v1737_v58  ;;  %v1744_v50 = vrot.slane %v1743_v53, 1  ;;  %v1749_v43 = vadd.f32 %v1748_v4, %v1747_v41 }
 0x428   :  { %v1753_v60 = vadd.f32 %v1752_v31, %v1720_v1  ;;  %v1758_v36 = vrot.slane %v1721_v52, 4  ;;  %v1699_v17 = vpop.f32.mrf.mxu0 }
 0x429   :  { %v1812_v32 = vcombine.low %v1733_v33, %v1739_v37  ;;  %v1750_v8 = vrot.slane %v1749_v43, 1  ;;  %v1722_v57 = vmul.f32 %v1699_v17, %v8098_v40  ;;  %v1745_v11 = vadd.f32 %v1744_v50, %v1743_v53 }
 0x42a   :  { %v1754_v27 = vrot.slane %v1753_v60, 2  ;;  %v1759_v34 = vadd.f32 %v1758_v36, %v1721_v52  ;;  %v1701_v13 = vpop.f32.mrf.mxu0 }
 0x42b   :  { %v1819_v38 = vrot.slane %v1812_v32, %v8104_v19  ;;  %v1751_v35 = vadd.f32 %v1750_v8, %v1749_v43  ;;  %v1764_v29 = vrot.slane %v1722_v57, 4  ;;  %v1723_v55 = vmul.f32 %v1701_v13, %v8101_v54 }
 0x42c   :  { %v1755_v22 = vadd.f32 %v1754_v27, %v1753_v60  ;;  %v1760_v59 = vrot.slane %v1759_v34, 2 }
 0x42d   :  { %v1826_v26 = vrot.slane %v1819_v38, %v8104_v19  ;;  %v1827_v2 = vcombine.low %v1745_v11, %v1751_v35  ;;  %v1765_v12 = vadd.f32 %v1764_v29, %v1722_v57  ;;  %v1770_v18 = vrot.slane %v1723_v55, 4  ;;  %v1705_v23 = vpop.f32.mrf.mxu0 }
 0x42e   :  { %v1756_v6 = vrot.slane %v1755_v22, 1  ;;  %v1761_v9 = vadd.f32 %v1760_v59, %v1759_v34  ;;  %v1724_v61 = vmul.f32 %v1705_v23, %v8113_v44 }
 0x42f   :  { %1909 = vst.msk [vmem:[#allocation2 + $0x1] ss:$8 sm:$0x3] %vm8107_vm1, %v1826_v26  ;;  %v1834_v30 = vrot.slane %v1827_v2, %v8104_v19  ;;  %v1766_v20 = vrot.slane %v1765_v12, 2  ;;  %v1771_v7 = vadd.f32 %v1770_v18, %v1723_v55  ;;  %v1707_v58 = vpop.f32.mrf.mxu0 }
 0x430   :  { %v1762_v56 = vrot.slane %v1761_v9, 1  ;;  %v1776_v41 = vrot.slane %v1724_v61, 4  ;;  %v1725_v21 = vmul.f32 %v1707_v58, %v8116_v47  ;;  %v1757_v49 = vadd.f32 %v1756_v6, %v1755_v22 }
 0x431   :  { %v1841_v1 = vrot.slane %v1834_v30, %v8104_v19  ;;  %v1767_v53 = vadd.f32 %v1766_v20, %v1765_v12  ;;  %v1772_v4 = vrot.slane %v1771_v7, 2  ;;  %v1711_v14 = vpop.f32.mrf.mxu0 }
 0x432   :  { %v1763_v31 = vadd.f32 %v1762_v56, %v1761_v9  ;;  %v1777_v52 = vadd.f32 %v1776_v41, %v1724_v61  ;;  %v1782_v33 = vrot.slane %v1725_v21, 4  ;;  %v1726_v37 = vmul.f32 %v1711_v14, %v8121_v25 }
 0x433   :  { %1912 = vst.msk [vmem:[#allocation2 + $0x11] ss:$8 sm:$0x3] %vm8107_vm1, %v1841_v1  ;;  %v1768_v50 = vrot.slane %v1767_v53, 1  ;;  %v1773_v43 = vadd.f32 %v1772_v4, %v1771_v7  ;;  %v1713_v60 = vpop.f32.mrf.mxu0 }
 0x434   :  { %v1842_v36 = vcombine.low %v1757_v49, %v1763_v31  ;;  %v1778_v17 = vrot.slane %v1777_v52, 2  ;;  %v1783_v32 = vadd.f32 %v1782_v33, %v1725_v21  ;;  %v1788_v8 = vrot.slane %v1726_v37, 4 }
 0x435   :  { %v1774_v57 = vrot.slane %v1773_v43, 1  ;;  %v1727_v11 = vmul.f32 %v1713_v60, %v8124_v16  ;;  %v1769_v35 = vadd.f32 %v1768_v50, %v1767_v53 }
 0x436   :  { %v1849_v27 = vrot.slane %v1842_v36, %v8104_v19  ;;  %v1779_v34 = vadd.f32 %v1778_v17, %v1777_v52  ;;  %v1784_v13 = vrot.slane %v1783_v32, 2  ;;  %v1789_v38 = vadd.f32 %v1788_v8, %v1726_v37 }
 0x437   :  { %v1775_v29 = vadd.f32 %v1774_v57, %v1773_v43  ;;  %v1794_v55 = vrot.slane %v1727_v11, 4 }
 0x438   :  { %v1856_v22 = vrot.slane %v1849_v27, %v8104_v19  ;;  %v1780_v59 = vrot.slane %v1779_v34, 1  ;;  %v1785_v26 = vadd.f32 %v1784_v13, %v1783_v32  ;;  %v1790_v2 = vrot.slane %v1789_v38, 2  ;;  %v2345_v12 = vpop.f32.mrf.mxu1 }
 0x439   :  { %v1857_v18 = vcombine.low %v1769_v35, %v1775_v29  ;;  %v1795_v23 = vadd.f32 %v1794_v55, %v1727_v11  ;;  %v2380_v6 = vmul.f32 %v2345_v12, %v8072_v48 }
 0x43a   :  { %1915 = vst.msk [vmem:[#allocation2 + $0x21] ss:$8 sm:$0x3] %vm8107_vm1, %v1856_v22  ;;  %v1786_v9 = vrot.slane %v1785_v26, 1  ;;  %v1791_v61 = vadd.f32 %v1790_v2, %v1789_v38  ;;  %v2347_v30 = vpop.f32.mrf.mxu1  ;;  %v1781_v41 = vadd.f32 %v1780_v59, %v1779_v34 }
 0x43b   :  { %v1864_v20 = vrot.slane %v1857_v18, %v8104_v19  ;;  %v1796_v7 = vrot.slane %v1795_v23, 2  ;;  %v2392_v58 = vrot.slane %v2380_v6, 4  ;;  %v2381_v56 = vmul.f32 %v2347_v30, %v8075_v3 }
 0x43c   :  { %v1787_v21 = vadd.f32 %v1786_v9, %v1785_v26  ;;  %v1792_v1 = vrot.slane %v1791_v61, 1  ;;  %v2351_v49 = vpop.f32.mrf.mxu1 }
 0x43d   :  { %v1871_v53 = vrot.slane %v1864_v20, %v8104_v19  ;;  %v1797_v4 = vadd.f32 %v1796_v7, %v1795_v23  ;;  %v2393_v14 = vadd.f32 %v2392_v58, %v2380_v6  ;;  %v2398_v31 = vrot.slane %v2381_v56, 4 }
 0x43e   :  { %v1872_v52 = vcombine.low %v1781_v41, %v1787_v21  ;;  %v2382_v33 = vmul.f32 %v2351_v49, %v8079_v45  ;;  %v2353_v37 = vpop.f32.mrf.mxu1  ;;  %v1793_v32 = vadd.f32 %v1792_v1, %v1791_v61 }
 0x43f   :  { %1918 = vst.msk [vmem:[#allocation2 + $0x31] ss:$8 sm:$0x3] %vm8107_vm1, %v1871_v53  ;;  %v1798_v50 = vrot.slane %v1797_v4, 1  ;;  %v2394_v43 = vrot.slane %v2393_v14, 2  ;;  %v2399_v60 = vadd.f32 %v2398_v31, %v2381_v56  ;;  %v2383_v36 = vmul.f32 %v2353_v37, %v8086_v39 }
 0x440   :  { %v1879_v17 = vrot.slane %v1872_v52, %v8104_v19  ;;  %v2404_v8 = vrot.slane %v2382_v33, 4 }
 0x441   :  { %v1799_v57 = vadd.f32 %v1798_v50, %v1797_v4  ;;  %v2395_v11 = vadd.f32 %v2394_v43, %v2393_v14  ;;  %v2400_v27 = vrot.slane %v2399_v60, 2  ;;  %v2410_v34 = vrot.slane %v2383_v36, 4  ;;  %v2357_v13 = vpop.f32.mrf.mxu1 }
 0x442   :  { %v1886_v38 = vrot.slane %v1879_v17, %v8104_v19  ;;  %v2405_v35 = vadd.f32 %v2404_v8, %v2382_v33  ;;  %v2384_v29 = vmul.f32 %v2357_v13, %v8090_v0 }
 0x443   :  { %v1887_v55 = vcombine.low %v1793_v32, %v1799_v57  ;;  %v2396_v22 = vrot.slane %v2395_v11, 1  ;;  %v2401_v59 = vadd.f32 %v2400_v27, %v2399_v60  ;;  %v2411_v26 = vadd.f32 %v2410_v34, %v2383_v36  ;;  %v2359_v2 = vpop.f32.mrf.mxu1 }
 0x444   :  { %1921 = vst.msk [vmem:[#allocation2 + $0x41] ss:$8 sm:$0x3] %vm8107_vm1, %v1886_v38  ;;  %v2406_v12 = vrot.slane %v2405_v35, 2  ;;  %v2416_v18 = vrot.slane %v2384_v29, 4  ;;  %v2385_v23 = vmul.f32 %v2359_v2, %v8094_v15 }
 0x445   :  { %v1894_v6 = vrot.slane %v1887_v55, %v8104_v19  ;;  %v2402_v9 = vrot.slane %v2401_v59, 1  ;;  %v2412_v61 = vrot.slane %v2411_v26, 2  ;;  %v2397_v30 = vadd.f32 %v2396_v22, %v2395_v11 }
 0x446   :  { %v2407_v20 = vadd.f32 %v2406_v12, %v2405_v35  ;;  %v2417_v7 = vadd.f32 %v2416_v18, %v2384_v29  ;;  %v2422_v58 = vrot.slane %v2385_v23, 4  ;;  %v2363_v56 = vpop.f32.mrf.mxu1 }
 0x447   :  { %v1901_v41 = vrot.slane %v1894_v6, %v8104_v19  ;;  %v2403_v21 = vadd.f32 %v2402_v9, %v2401_v59  ;;  %v2413_v1 = vadd.f32 %v2412_v61, %v2411_v26  ;;  %v2386_v49 = vmul.f32 %v2363_v56, %v8098_v40 }
 0x448   :  { %v2408_v53 = vrot.slane %v2407_v20, 1  ;;  %v2418_v4 = vrot.slane %v2417_v7, 2  ;;  %v2423_v14 = vadd.f32 %v2422_v58, %v2385_v23  ;;  %v2365_v31 = vpop.f32.mrf.mxu1 }
 0x449   :  { %1924 = vst.msk [vmem:[#allocation2 + $0x51] ss:$8 sm:$0x3] %vm8107_vm1, %v1901_v41  ;;  %v2476_v52 = vcombine.low %v2397_v30, %v2403_v21  ;;  %v2414_v33 = vrot.slane %v2413_v1, 1  ;;  %v2428_v37 = vrot.slane %v2386_v49, 4  ;;  %v2387_v50 = vmul.f32 %v2365_v31, %v8101_v54 }
 0x44a   :  { %v2409_v43 = vadd.f32 %v2408_v53, %v2407_v20  ;;  %v2419_v60 = vadd.f32 %v2418_v4, %v2417_v7  ;;  %v2424_v36 = vrot.slane %v2423_v14, 2  ;;  %v2369_v17 = vpop.f32.mrf.mxu1 }
 0x44b   :  { %v2483_v32 = vrot.slane %v2476_v52, %v8104_v19  ;;  %v2415_v8 = vadd.f32 %v2414_v33, %v2413_v1  ;;  %v2429_v57 = vadd.f32 %v2428_v37, %v2386_v49  ;;  %v2434_v11 = vrot.slane %v2387_v50, 4 }
 0x44c   :  { %v2420_v27 = vrot.slane %v2419_v60, 1  ;;  %v2425_v34 = vadd.f32 %v2424_v36, %v2423_v14  ;;  %v2388_v13 = vmul.f32 %v2369_v17, %v8113_v44  ;;  %v2371_v38 = vpop.f32.mrf.mxu1 }
 0x44d   :  { %v2490_v35 = vrot.slane %v2483_v32, %v8104_v19  ;;  %v2491_v29 = vcombine.low %v2409_v43, %v2415_v8  ;;  %v2430_v55 = vrot.slane %v2429_v57, 2  ;;  %v2435_v22 = vadd.f32 %v2434_v11, %v2387_v50 }
 0x44e   :  { %v2426_v59 = vrot.slane %v2425_v34, 1  ;;  %v2440_v26 = vrot.slane %v2388_v13, 4  ;;  %v2389_v2 = vmul.f32 %v2371_v38, %v8116_v47  ;;  %v2375_v12 = vpop.f32.mrf.mxu1  ;;  %v2421_v61 = vadd.f32 %v2420_v27, %v2419_v60 }
 0x44f   :  { %2573 = vst.msk [vmem:[#allocation2 + $0x2] ss:$8 sm:$0x3] %vm8107_vm1, %v2490_v35  ;;  %v2498_v18 = vrot.slane %v2491_v29, %v8104_v19  ;;  %v2431_v23 = vadd.f32 %v2430_v55, %v2429_v57  ;;  %v2436_v6 = vrot.slane %v2435_v22, 2  ;;  %v2390_v9 = vmul.f32 %v2375_v12, %v8121_v25 }
 0x450   :  { %v2427_v30 = vadd.f32 %v2426_v59, %v2425_v34  ;;  %v2441_v20 = vadd.f32 %v2440_v26, %v2388_v13  ;;  %v2446_v7 = vrot.slane %v2389_v2, 4  ;;  %v2377_v58 = vpop.f32.mrf.mxu1 }
 0x451   :  { %v2505_v56 = vrot.slane %v2498_v18, %v8104_v19  ;;  %v2432_v41 = vrot.slane %v2431_v23, 1  ;;  %v2437_v21 = vadd.f32 %v2436_v6, %v2435_v22  ;;  %v2452_v1 = vrot.slane %v2390_v9, 4 }
 0x452   :  { %v2506_v49 = vcombine.low %v2421_v61, %v2427_v30  ;;  %v2442_v53 = vrot.slane %v2441_v20, 2  ;;  %v2447_v4 = vadd.f32 %v2446_v7, %v2389_v2  ;;  %v2391_v14 = vmul.f32 %v2377_v58, %v8124_v16 }
 0x453   :  { %2576 = vst.msk [vmem:[#allocation2 + $0x12] ss:$8 sm:$0x3] %vm8107_vm1, %v2505_v56  ;;  %v2438_v31 = vrot.slane %v2437_v21, 1  ;;  %v2453_v52 = vadd.f32 %v2452_v1, %v2390_v9  ;;  %v2433_v60 = vadd.f32 %v2432_v41, %v2431_v23 }
 0x454   :  { %v2513_v33 = vrot.slane %v2506_v49, %v8104_v19  ;;  %v2443_v37 = vadd.f32 %v2442_v53, %v2441_v20  ;;  %v2448_v50 = vrot.slane %v2447_v4, 2  ;;  %v2458_v43 = vrot.slane %v2391_v14, 4 }
 0x455   :  { %v2439_v36 = vadd.f32 %v2438_v31, %v2437_v21  ;;  %v2454_v17 = vrot.slane %v2453_v52, 2 }
 0x456   :  { %v2520_v32 = vrot.slane %v2513_v33, %v8104_v19  ;;  %v2444_v8 = vrot.slane %v2443_v37, 1  ;;  %v2449_v57 = vadd.f32 %v2448_v50, %v2447_v4  ;;  %v2459_v11 = vadd.f32 %v2458_v43, %v2391_v14 }
 0x457   :  { %v2521_v27 = vcombine.low %v2433_v60, %v2439_v36  ;;  %v2455_v34 = vadd.f32 %v2454_v17, %v2453_v52 }
 0x458   :  { %2579 = vst.msk [vmem:[#allocation2 + $0x22] ss:$8 sm:$0x3] %vm8107_vm1, %v2520_v32  ;;  %v2450_v13 = vrot.slane %v2449_v57, 1  ;;  %v2460_v38 = vrot.slane %v2459_v11, 2  ;;  %v2445_v29 = vadd.f32 %v2444_v8, %v2443_v37 }
 0x459   :  { %v2528_v35 = vrot.slane %v2521_v27, %v8104_v19  ;;  %v2456_v22 = vrot.slane %v2455_v34, 1 }
 0x45a   :  { %v2451_v55 = vadd.f32 %v2450_v13, %v2449_v57  ;;  %v2461_v59 = vadd.f32 %v2460_v38, %v2459_v11  ;;  %v6359_v26 = vpop.f32.mrf.mxu1 }
 0x45b   :  { %v2535_v2 = vrot.slane %v2528_v35, %v8104_v19  ;;  %v2457_v61 = vadd.f32 %v2456_v22, %v2455_v34 }
 0x45c   :  { %v2536_v12 = vcombine.low %v2445_v29, %v2451_v55  ;;  %v2462_v18 = vrot.slane %v2461_v59, 1  ;;  %v6360_v23 = vpop.f32.mrf.mxu1 }
 0x45d   :  { %2582 = vst.msk [vmem:[#allocation2 + $0x32] ss:$8 sm:$0x3] %vm8107_vm1, %v2535_v2  ;;  %v6361_v6 = vadd.f32 %v6360_v23, %v6359_v26 }
 0x45e   :  { %v2543_v9 = vrot.slane %v2536_v12, %v8104_v19  ;;  %v2463_v30 = vadd.f32 %v2462_v18, %v2461_v59  ;;  %v6362_v20 = vpop.f32.mrf.mxu1 }
 0x45f   :  { %v2777_v7 = vsel %vm781_vm0, %v6361_v6, -inf }
 0x460   :  { %v2550_v58 = vrot.slane %v2543_v9, %v8104_v19  ;;  %v2551_v56 = vcombine.low %v2457_v61, %v2463_v30  ;;  %v2778_v41 = vrot.slane %v2777_v7, 4  ;;  %v6363_v21 = vpop.f32.mrf.mxu1 }
 0x461   :  { %v6364_v1 = vadd.f32 %v6363_v21, %v6362_v20 }
 0x462   :  { %2585 = vst.msk [vmem:[#allocation2 + $0x42] ss:$8 sm:$0x3] %vm8107_vm1, %v2550_v58  ;;  %v2558_v49 = vrot.slane %v2551_v56, %v8104_v19  ;;  %v2779_v53 = vmax.f32 %v2777_v7, %v2778_v41  ;;  %v6365_v4 = vpop.f32.mrf.mxu1 }
 0x463   :  { %v2784_v14 = vsel %vm781_vm0, %v6364_v1, -inf }
 0x464   :  { %v2565_v31 = vrot.slane %v2558_v49, %v8104_v19  ;;  %v2780_v52 = vrot.slane %v2779_v53, 2  ;;  %v2785_v33 = vrot.slane %v2784_v14, 4  ;;  %v6366_v37 = vpop.f32.mrf.mxu1 }
 0x465   :  { %v6367_v50 = vadd.f32 %v6366_v37, %v6365_v4 }
 0x466   :  { %2588 = vst.msk [vmem:[#allocation2 + $0x52] ss:$8 sm:$0x3] %vm8107_vm1, %v2565_v31  ;;  %v2781_v43 = vmax.f32 %v2779_v53, %v2780_v52  ;;  %v2786_v60 = vmax.f32 %v2784_v14, %v2785_v33  ;;  %v6368_v36 = vpop.f32.mrf.mxu1 }
 0x467   :  { %v2791_v17 = vsel %vm781_vm0, %v6367_v50, -inf }
 0x468   :  { %v2782_v32 = vrot.slane %v2781_v43, 1  ;;  %v2787_v8 = vrot.slane %v2786_v60, 2  ;;  %v2792_v57 = vrot.slane %v2791_v17, 4  ;;  %v6369_v11 = vpop.f32.mrf.mxu1 }
 0x469   :  { %v6370_v27 = vadd.f32 %v6369_v11, %v6368_v36 }
 0x46a   :  { %v2783_v34 = vmax.f32 %v2781_v43, %v2782_v32  ;;  %v2788_v13 = vmax.f32 %v2786_v60, %v2787_v8  ;;  %v2793_v38 = vmax.f32 %v2791_v17, %v2792_v57  ;;  %v6371_v35 = vpop.f32.mrf.mxu1 }
 0x46b   :  { %v2798_v29 = vsel %vm781_vm0, %v6370_v27, -inf }
 0x46c   :  { %v2819_v55 = vsub.f32 %v6361_v6, %v2783_v34  ;;  %v2789_v22 = vrot.slane %v2788_v13, 1  ;;  %v2794_v59 = vrot.slane %v2793_v38, 2  ;;  %v2799_v26 = vrot.slane %v2798_v29, 4  ;;  %v6372_v2 = vpop.f32.mrf.mxu1 }
 0x46d   :  { %v6373_v12 = vadd.f32 %v6372_v2, %v6371_v35 }
 0x46e   :  { %v2825_v18 = vmul.f32 1.442695, %v2819_v55  ;;  %v2790_v23 = vmax.f32 %v2788_v13, %v2789_v22  ;;  %v2795_v9 = vmax.f32 %v2793_v38, %v2794_v59  ;;  %v2800_v61 = vmax.f32 %v2798_v29, %v2799_v26  ;;  %v6374_v30 = vpop.f32.mrf.mxu1 }
 0x46f   :  { %v2805_v20 = vsel %vm781_vm0, %v6373_v12, -inf }
 0x470   :  { %6658 = vpow2.f32 %v2825_v18  ;;  %v2820_v7 = vsub.f32 %v6364_v1, %v2790_v23  ;;  %v2796_v58 = vrot.slane %v2795_v9, 1  ;;  %v2801_v56 = vrot.slane %v2800_v61, 2  ;;  %v6375_v41 = vpop.f32.mrf.mxu1 }
 0x471   :  { %v2806_v21 = vrot.slane %v2805_v20, 4  ;;  %v6376_v49 = vadd.f32 %v6375_v41, %v6374_v30 }
 0x472   :  { %v2827_v6 = vmul.f32 1.442695, %v2820_v7  ;;  %v2797_v53 = vmax.f32 %v2795_v9, %v2796_v58  ;;  %v2802_v4 = vmax.f32 %v2800_v61, %v2801_v56 }
 0x473   :  { %v2807_v14 = vmax.f32 %v2805_v20, %v2806_v21  ;;  %v2812_v31 = vsel %vm781_vm0, %v6376_v49, -inf }
 0x474   :  { %6660 = vpow2.f32 %v2827_v6  ;;  %v2821_v52 = vsub.f32 %v6367_v50, %v2797_v53  ;;  %v2803_v33 = vrot.slane %v2802_v4, 1  ;;  %v2813_v37 = vrot.slane %v2812_v31, 4 }
 0x475   :  { %v2808_v43 = vrot.slane %v2807_v14, 2 }
 0x476   :  { %v2829_v60 = vmul.f32 1.442695, %v2821_v52  ;;  %v2804_v36 = vmax.f32 %v2802_v4, %v2803_v33  ;;  %v2814_v17 = vmax.f32 %v2812_v31, %v2813_v37 }
 0x477   :  { %v2809_v1 = vmax.f32 %v2807_v14, %v2808_v43 }
 0x478   :  { %6662 = vpow2.f32 %v2829_v60  ;;  %v2822_v32 = vsub.f32 %v6370_v27, %v2804_v36  ;;  %v2815_v8 = vrot.slane %v2814_v17, 2 }
 0x479   :  { %v2810_v57 = vrot.slane %v2809_v1, 1 }
 0x47a   :  { %v2831_v11 = vmul.f32 1.442695, %v2822_v32  ;;  %v2816_v34 = vmax.f32 %v2814_v17, %v2815_v8 }
 0x47b   :  { %v2811_v13 = vmax.f32 %v2809_v1, %v2810_v57 }
 0x47c   :  { %6664 = vpow2.f32 %v2831_v11  ;;  %v2817_v38 = vrot.slane %v2816_v34, 1 }
 0x47d   :  { %v8516_v35 = vpop.eup %6658  ;;  %v2823_v29 = vsub.f32 %v6373_v12, %v2811_v13 }
 0x47e   :  { %v2837_v50 = vsel %vm781_vm0, %v8516_v35, 0.0  ;;  %v2818_v55 = vmax.f32 %v2816_v34, %v2817_v38 }
 0x47f   :  { %v2838_v22 = vrot.slane %v2837_v50, 4  ;;  %v2833_v59 = vmul.f32 1.442695, %v2823_v29 }
 0x480   :  { %v2824_v26 = vsub.f32 %v6376_v49, %v2818_v55 }
 0x481   :  { %v8520_v2 = vpop.eup %6660  ;;  %v2839_v27 = vadd.f32 %v2838_v22, %v2837_v50  ;;  %6666 = vpow2.f32 %v2833_v59 }
 0x482   :  { %v2844_v18 = vsel %vm781_vm0, %v8520_v2, 0.0  ;;  %v2835_v23 = vmul.f32 1.442695, %v2824_v26 }
 0x483   :  { %v2840_v9 = vrot.slane %v2839_v27, 2  ;;  %v2845_v61 = vrot.slane %v2844_v18, 4 }
 0x484   :  { %6668 = vpow2.f32 %v2835_v23 }
 0x485   :  { %v8524_v30 = vpop.eup %6662  ;;  %v2841_v12 = vadd.f32 %v2840_v9, %v2839_v27  ;;  %v2846_v20 = vadd.f32 %v2845_v61, %v2844_v18 }
 0x486   :  { %v2851_v7 = vsel %vm781_vm0, %v8524_v30, 0.0 }
 0x487   :  { %v2842_v58 = vrot.slane %v2841_v12, 1  ;;  %v2852_v56 = vrot.slane %v2851_v7, 4  ;;  %v2847_v41 = vrot.slane %v2846_v20, 2 }
 0x489   :  { %v8528_v21 = vpop.eup %6664  ;;  %v2843_v49 = vadd.f32 %v2842_v58, %v2841_v12  ;;  %v2848_v6 = vadd.f32 %v2847_v41, %v2846_v20  ;;  %v2853_v53 = vadd.f32 %v2852_v56, %v2851_v7 }
 0x48a   :  { %v2858_v4 = vsel %vm781_vm0, %v8528_v21, 0.0 }
 0x48b   :  { %6670 = vrcp.f32 %v2843_v49  ;;  %v2859_v14 = vrot.slane %v2858_v4, 4  ;;  %v2849_v31 = vrot.slane %v2848_v6, 1  ;;  %v2854_v52 = vrot.slane %v2853_v53, 2 }
 0x48d   :  { %v2850_v33 = vadd.f32 %v2849_v31, %v2848_v6  ;;  %v2855_v37 = vadd.f32 %v2854_v52, %v2853_v53  ;;  %v2860_v43 = vadd.f32 %v2859_v14, %v2858_v4  ;;  %v8544_v53 = vld [vmem:[%s9523_s3 + $0x78] sm:$0xff]  ;;  %v8555_v31 = vld [vmem:[%s9523_s3 + $0x70] sm:$0xff] }
 0x48e   :  { %v8532_v60 = vpop.eup %6666 }
 0x48f   :  { %v2865_v36 = vsel %vm781_vm0, %v8532_v60, 0.0  ;;  %6672 = vrcp.f32 %v2850_v33  ;;  %v2856_v17 = vrot.slane %v2855_v37, 1  ;;  %v2861_v1 = vrot.slane %v2860_v43, 2 }
 0x490   :  { %v2866_v32 = vrot.slane %v2865_v36, 4 }
 0x491   :  { %v8536_v8 = vpop.eup %6668  ;;  %v2857_v57 = vadd.f32 %v2856_v17, %v2855_v37  ;;  %v2862_v11 = vadd.f32 %v2861_v1, %v2860_v43  ;;  %v8569_v43 = vld [vmem:[%s9523_s3 + $0x68] sm:$0xff]  ;;  %v8575_v1 = vld [vmem:[%s9523_s3 + $0xe0] sm:$0xff] }
 0x492   :  { %v2872_v34 = vsel %vm781_vm0, %v8536_v8, 0.0  ;;  %v2867_v13 = vadd.f32 %v2866_v32, %v2865_v36 }
 0x493   :  { %v2873_v38 = vrot.slane %v2872_v34, 4  ;;  %6674 = vrcp.f32 %v2857_v57  ;;  %v2863_v29 = vrot.slane %v2862_v11, 1 }
 0x494   :  { %v2868_v50 = vrot.slane %v2867_v13, 2 }
 0x495   :  { %v2864_v55 = vadd.f32 %v2863_v29, %v2862_v11  ;;  %v2874_v22 = vadd.f32 %v2873_v38, %v2872_v34  ;;  %v8589_v11 = vld [vmem:[%s9523_s3 + $0xd8] sm:$0xff]  ;;  %v8602_v29 = vld [vmem:[%s9523_s3 + $0xd0] sm:$0xff] }
 0x496   :  { %v2869_v59 = vadd.f32 %v2868_v50, %v2867_v13  ;;  %v8596_v13 = vld [vmem:[%s9523_s3 + $0x58] sm:$0xff] }
 0x497   :  { %6676 = vrcp.f32 %v2864_v55  ;;  %v2875_v26 = vrot.slane %v2874_v22, 2 }
 0x498   :  { %v6671_v27 = vpop.eup %6670  ;;  %v2870_v18 = vrot.slane %v2869_v59, 1 }
 0x499   :  { %v2885_v23 = vmul.f32 %v6671_v27, %v2843_v49  ;;  %v2876_v9 = vadd.f32 %v2875_v26, %v2874_v22  ;;  %v8549_v49 = vld [vmem:[%s9523_s3 + $0xf0] sm:$0xff]  ;;  %v8616_v22 = vld [vmem:[%s9523_s3 + $0xc8] sm:$0xff] }
 0x49a   :  { %v2871_v61 = vadd.f32 %v2870_v18, %v2869_v59 }
 0x49b   :  { %v2891_v12 = vsub.f32 2.0, %v2885_v23  ;;  %v2877_v20 = vrot.slane %v2876_v9, 1  ;;  %v8629_v23 = vld [vmem:[%s9523_s3 + $0xc0] sm:$0xff] }
 0x49c   :  { %v6673_v7 = vpop.eup %6672  ;;  %6678 = vrcp.f32 %v2871_v61 }
 0x49d   :  { %v2897_v58 = vmul.f32 %v6671_v27, %v2891_v12  ;;  %v2886_v56 = vmul.f32 %v6673_v7, %v2850_v33  ;;  %v2878_v41 = vadd.f32 %v2877_v20, %v2876_v9  ;;  %v8562_v33 = vld [vmem:[%s9523_s3 + $0xe8] sm:$0xff]  ;;  %v8643_v12 = vld [vmem:[%s9523_s3 + $0xb8] sm:$0xff] }
 0x49e   :  { %v8623_v27 = vld [vmem:[%s9523_s3 + $0x48] sm:$0xff] }
 0x49f   :  { %v2903_v6 = vmul.f32 %v8516_v35, %v2897_v58  ;;  %v2892_v4 = vsub.f32 2.0, %v2886_v56  ;;  %6680 = vrcp.f32 %v2878_v41  ;;  %v8651_v56 = vld [vmem:[%s9523_s3 + $0x38] sm:$0xff] }
 0x4a0   :  { %v6675_v14 = vpop.eup %6674 }
 0x4a1   :  { %6147 = vmatmul.mubr.msk.f32.vlgmr.msra.gmra.mxu0 %vm781_vm0, %v2903_v6  ;;  %v2898_v35 = vmul.f32 %v6673_v7, %v2892_v4  ;;  %v2887_v52 = vmul.f32 %v6675_v14, %v2857_v57  ;;  %v8663_v4 = vld [vmem:[%s9523_s3 + $0x30] sm:$0xff] }
 0x4a2   :  { %6378 = vmatpush3.msra.mxu0 %v8544_v53  ;;  %3013 = vmatprep.mubr.f32.mxu0 %v9643_v10 }
 0x4a3   :  { %6379 = vmatprep.subr.mxu0 %v8549_v49  ;;  %v2904_v37 = vmul.f32 %v8520_v2, %v2898_v35  ;;  %v2893_v36 = vsub.f32 2.0, %v2887_v52  ;;  %v8582_v2 = vld [vmem:[%s9523_s3 + $0x60] sm:$0xff]  ;;  %v8677_v35 = vld [vmem:[%s9523_s3 + $0x28] sm:$0xff] }
 0x4a4   :  { %v6677_v17 = vpop.eup %6676  ;;  %6380 = vmatpush3.msra.mxu0 %v8555_v31  ;;  %v8683_v52 = vld [vmem:[%s9523_s3 + $0xa0] sm:$0xff] }
 0x4a5   :  { %6381 = vmatprep.subr.mxu0 %v8562_v33  ;;  %6148 = vmatmul.mubr.msk.f32.gmra.mxu0 %vm781_vm0, %v2904_v37  ;;  %v2899_v32 = vmul.f32 %v6675_v14, %v2893_v36  ;;  %v2888_v57 = vmul.f32 %v6677_v17, %v2864_v55  ;;  %v9675_v37 = vld [vmem:[#allocation34_spill] sm:$0xff]  ;;  %v8697_v36 = vld [vmem:[%s9523_s3 + $0x98] sm:$0xff] }
 0x4a6   :  { %6382 = vmatpush3.msra.mxu0 %v8569_v43  ;;  %3019 = vmatprep.mubr.f32.mxu0 %v9643_v10 }
 0x4a7   :  { %6383 = vmatprep.subr.mxu0 %v8575_v1  ;;  %v2905_v34 = vmul.f32 %v8524_v30, %v2899_v32  ;;  %v2894_v38 = vsub.f32 2.0, %v2888_v57  ;;  %v8609_v30 = vld [vmem:[%s9523_s3 + $0x50] sm:$0xff] }
 0x4a8   :  { %6384 = vmatpush3.msra.mxu0 %v8582_v2  ;;  %v8709_v32 = vld [vmem:[%s9523_s3 + $0x90] sm:$0xff] }
 0x4a9   :  { %v6679_v50 = vpop.eup %6678  ;;  %6385 = vmatprep.subr.mxu0 %v8589_v11  ;;  %6149 = vmatmul.mubr.msk.f32.gmra.mxu0 %vm781_vm0, %v2905_v34  ;;  %v2900_v55 = vmul.f32 %v6677_v17, %v2894_v38  ;;  %v8703_v17 = vld [vmem:[%s9523_s3 + $0x18] sm:$0xff]  ;;  %v8715_v57 = vld [vmem:[%s9523_s3 + $0x10] sm:$0xff]  ;;  %v8721_v34 = vld [vmem:[%s9523_s3 + $0x88] sm:$0xff] }
 0x4aa   :  { %6386 = vmatpush3.msra.mxu0 %v8596_v13  ;;  %3025 = vmatprep.mubr.f32.mxu0 %v9643_v10  ;;  %v2889_v59 = vmul.f32 %v6679_v50, %v2871_v61  ;;  %9676 = vst [vmem:[#allocation23_spill] sm:$0xff] %v8715_v57  ;;  %9677 = vst [vmem:[#allocation21_spill] sm:$0xff] %v8721_v34  ;;  %v8727_v38 = vld [vmem:[%s9523_s3 + $0x8] sm:$0xff] }
 0x4ab   :  { %6387 = vmatprep.subr.mxu0 %v8602_v29  ;;  %v2906_v26 = vmul.f32 %v8528_v21, %v2900_v55  ;;  %v8636_v21 = vld [vmem:[%s9523_s3 + $0x40] sm:$0xff]  ;;  %9678 = vst [vmem:[#allocation24_spill] sm:$0xff] %v8727_v38 }
 0x4ac   :  { %v6681_v18 = vpop.eup %6680  ;;  %6388 = vmatpush3.msra.mxu0 %v8609_v30  ;;  %v2895_v9 = vsub.f32 2.0, %v2889_v59  ;;  %v8739_v55 = vld [vmem:[%s9523_s3] sm:$0xff]  ;;  %v9681_v59 = vld [vmem:[#allocation31_spill] sm:$0xff] }
 0x4ad   :  { %6389 = vmatprep.subr.mxu0 %v8616_v22  ;;  %6150 = vmatmul.mubr.msk.f32.gmra.mxu0 %vm781_vm0, %v2906_v26  ;;  %v2890_v61 = vmul.f32 %v6681_v18, %v2878_v41  ;;  %v8657_v41 = vld [vmem:[%s9523_s3 + $0xb0] sm:$0xff]  ;;  %9680 = vst [vmem:[#allocation26_spill] sm:$0xff] %v8739_v55  ;;  %v9682_v26 = vld [vmem:[#allocation35_spill] sm:$0xff] }
 0x4ae   :  { %6390 = vmatpush3.msra.mxu0 %v8623_v27  ;;  %3031 = vmatprep.mubr.f32.mxu0 %v9643_v10  ;;  %v2901_v20 = vmul.f32 %v6679_v50, %v2895_v9  ;;  %v8733_v50 = vld [vmem:[%s9523_s3 + $0x80] sm:$0xff]  ;;  %v9684_v9 = vld [vmem:[#allocation37_spill] sm:$0xff] }
 0x4af   :  { %6391 = vmatprep.subr.mxu0 %v8629_v23  ;;  %v2896_v7 = vsub.f32 2.0, %v2890_v61  ;;  %9679 = vst [vmem:[#allocation25_spill] sm:$0xff] %v8733_v50  ;;  %v9685_v61 = vld [vmem:[#allocation38_spill] sm:$0xff] }
 0x4b0   :  { %6392 = vmatpush3.msra.mxu0 %v8636_v21  ;;  %v2907_v58 = vmul.f32 %v8532_v60, %v2901_v20  ;;  %v8670_v60 = vld [vmem:[%s9523_s3 + $0xa8] sm:$0xff]  ;;  %v9686_v20 = vld [vmem:[#allocation39_spill] sm:$0xff] }
 0x4b1   :  { %6393 = vmatprep.subr.mxu0 %v8643_v12  ;;  %v2902_v6 = vmul.f32 %v6681_v18, %v2896_v7  ;;  %v9683_v18 = vld [vmem:[#allocation36_spill] sm:$0xff] }
 0x4b2   :  { %6151 = vmatmul.mubr.msk.f32.gmra.mxu0 %vm781_vm0, %v2907_v58  ;;  %v9687_v7 = vld [vmem:[#allocation40_spill] sm:$0xff]  ;;  %v9688_v58 = vld [vmem:[#allocation41_spill] sm:$0xff] }
 0x4b3   :  { %6394 = vmatpush3.msra.mxu0 %v8651_v56  ;;  %3037 = vmatprep.mubr.f32.mxu0 %v9643_v10  ;;  %v2908_v14 = vmul.f32 %v8536_v8, %v2902_v6  ;;  %v8690_v8 = vld [vmem:[%s9523_s3 + $0x20] sm:$0xff]  ;;  %v9689_v6 = vld [vmem:[#allocation42_spill] sm:$0xff] }
 0x4b4   :  { %6395 = vmatprep.subr.mxu0 %v8657_v41 }
 0x4b5   :  { %6396 = vmatpush3.msra.mxu0 %v8663_v4 }
 0x4b6   :  { %6397 = vmatprep.subr.mxu0 %v8670_v60  ;;  %6152 = vmatmul.mubr.msk.f32.gmra.mxu0 %vm781_vm0, %v2908_v14  ;;  %v9690_v14 = vld [vmem:[#allocation44_spill] sm:$0xff] }
 0x4b7   :  { %6398 = vmatpush3.msra.mxu0 %v8677_v35  ;;  %3410 = vmatprep.mubr.f32.mxu0 %v9675_v37  ;;  %v9691_v37 = vld [vmem:[#allocation45_spill] sm:$0xff] }
 0x4b8   :  { %6399 = vmatprep.subr.mxu0 %v8683_v52 }
 0x4b9   :  { %6400 = vmatpush3.msra.mxu0 %v8690_v8 }
 0x4ba   :  { %6401 = vmatprep.subr.mxu0 %v8697_v36 }
 0x4bb   :  { %6402 = vmatpush3.msra.mxu0 %v8703_v17 }
 0x4bc   :  { %6403 = vmatprep.subr.mxu0 %v8709_v32 }
 0x4bd   :  { %6404 = vmatpush3.msra.mxu0 %v8715_v57 }
 0x4be   :  { %6405 = vmatprep.subr.mxu0 %v8721_v34 }
 0x4bf   :  { %6406 = vmatpush3.msra.mxu0 %v8727_v38 }
 0x4c0   :  { %6407 = vmatprep.subr.mxu0 %v8733_v50 }
 0x4c1   :  { %6408 = vmatpush3.msra.mxu0 %v8739_v55 }
 0x4c2   :  { %3411 = vmatmul.mubr.f32.vlgmr.msra.gmra.mxu0 %v9681_v59 }
 0x4c3   :  { %3415 = vmatprep.mubr.f32.mxu0 %v9682_v26 }
 0x4c6   :  { %3416 = vmatmul.mubr.f32.gmra.mxu0 %v9683_v18 }
 0x4c7   :  { %3420 = vmatprep.mubr.f32.mxu0 %v9684_v9 }
 0x4ca   :  { %3421 = vmatmul.mubr.f32.gmra.mxu0 %v9685_v61 }
 0x4cb   :  { %3425 = vmatprep.mubr.f32.mxu0 %v9686_v20 }
 0x4ce   :  { %3426 = vmatmul.mubr.f32.gmra.mxu0 %v9687_v7 }
 0x4cf   :  { %3430 = vmatprep.mubr.f32.mxu0 %v9688_v58 }
 0x4d2   :  { %3431 = vmatmul.mubr.f32.gmra.mxu0 %v9689_v6 }
 0x4d3   :  { %3435 = vmatprep.mubr.f32.mxu0 %v9690_v14 }
 0x4d6   :  { %3436 = vmatmul.mubr.f32.gmra.mxu0 %v9691_v37 }
 0x4d7   :  { %4335 = vmatprep.mubr.f32.mxu0 %v9643_v10 }
 0x561   :  { %v3009_v59 = vpop.f32.mrf.mxu0 }
 0x562   :  { %v3044_v26 = vmul.f32 %v3009_v59, %v8072_v48 }
 0x563   :  { %v3011_v18 = vpop.f32.mrf.mxu0 }
 0x564   :  { %v3056_v9 = vrot.slane %v3044_v26, 4  ;;  %v3045_v61 = vmul.f32 %v3011_v18, %v8075_v3 }
 0x565   :  { %v3015_v20 = vpop.f32.mrf.mxu0 }
 0x566   :  { %v3057_v63 = vadd.f32 %v3056_v9, %v3044_v26  ;;  %v3062_v7 = vrot.slane %v3045_v61, 4  ;;  %v3046_v58 = vmul.f32 %v3015_v20, %v8079_v45 }
 0x567   :  { %v3017_v24 = vpop.f32.mrf.mxu0 }
 0x568   :  { %v3058_v6 = vrot.slane %v3057_v63, 2  ;;  %v3063_v28 = vadd.f32 %v3062_v7, %v3045_v61  ;;  %v3068_v14 = vrot.slane %v3046_v58, 4  ;;  %v3047_v37 = vmul.f32 %v3017_v24, %v8086_v39 }
 0x569   :  { %v3021_v46 = vpop.f32.mrf.mxu0 }
 0x56a   :  { %v3059_v42 = vadd.f32 %v3058_v6, %v3057_v63  ;;  %v3064_v51 = vrot.slane %v3063_v28, 2  ;;  %v3069_v5 = vadd.f32 %v3068_v14, %v3046_v58  ;;  %v3074_v59 = vrot.slane %v3047_v37, 4 }
 0x56b   :  { %v3048_v48 = vmul.f32 %v3021_v46, %v8090_v0  ;;  %v3023_v55 = vpop.f32.mrf.mxu0 }
 0x56c   :  { %v3060_v18 = vrot.slane %v3059_v42, 1  ;;  %v3065_v3 = vadd.f32 %v3064_v51, %v3063_v28  ;;  %v3070_v26 = vrot.slane %v3069_v5, 2  ;;  %v3075_v9 = vadd.f32 %v3074_v59, %v3047_v37 }
 0x56d   :  { %v3080_v50 = vrot.slane %v3048_v48, 4  ;;  %v3049_v20 = vmul.f32 %v3023_v55, %v8094_v15  ;;  %v3027_v45 = vpop.f32.mrf.mxu0 }
 0x56e   :  { %v3066_v61 = vrot.slane %v3065_v3, 1  ;;  %v3071_v7 = vadd.f32 %v3070_v26, %v3069_v5  ;;  %v3076_v38 = vrot.slane %v3075_v9, 2  ;;  %v3061_v24 = vadd.f32 %v3060_v18, %v3059_v42 }
 0x56f   :  { %v3081_v39 = vadd.f32 %v3080_v50, %v3048_v48  ;;  %v3086_v63 = vrot.slane %v3049_v20, 4  ;;  %v3050_v58 = vmul.f32 %v3027_v45, %v8098_v40  ;;  %v3029_v6 = vpop.f32.mrf.mxu0 }
 0x570   :  { %v3067_v14 = vadd.f32 %v3066_v61, %v3065_v3  ;;  %v3072_v46 = vrot.slane %v3071_v7, 1  ;;  %v3077_v0 = vadd.f32 %v3076_v38, %v3075_v9  ;;  %v3051_v28 = vmul.f32 %v3029_v6, %v8101_v54 }
 0x571   :  { %v3082_v51 = vrot.slane %v3081_v39, 2  ;;  %v3087_v37 = vadd.f32 %v3086_v63, %v3049_v20  ;;  %v3092_v59 = vrot.slane %v3050_v58, 4 }
 0x572   :  { %v3140_v34 = vcombine.low %v3061_v24, %v3067_v14  ;;  %v3078_v55 = vrot.slane %v3077_v0, 1  ;;  %v3098_v15 = vrot.slane %v3051_v28, 4  ;;  %v3033_v57 = vpop.f32.mrf.mxu0  ;;  %v3073_v50 = vadd.f32 %v3072_v46, %v3071_v7 }
 0x573   :  { %v3083_v5 = vadd.f32 %v3082_v51, %v3081_v39  ;;  %v3088_v26 = vrot.slane %v3087_v37, 2  ;;  %v3093_v42 = vadd.f32 %v3092_v59, %v3050_v58  ;;  %v3052_v48 = vmul.f32 %v3033_v57, %v8113_v44 }
 0x574   :  { %v3147_v45 = vrot.slane %v3140_v34, %v8104_v19  ;;  %v3079_v3 = vadd.f32 %v3078_v55, %v3077_v0  ;;  %v3099_v18 = vadd.f32 %v3098_v15, %v3051_v28  ;;  %v3035_v38 = vpop.f32.mrf.mxu0 }
 0x575   :  { %v3084_v9 = vrot.slane %v3083_v5, 1  ;;  %v3089_v61 = vadd.f32 %v3088_v26, %v3087_v37  ;;  %v3094_v6 = vrot.slane %v3093_v42, 2  ;;  %v3104_v20 = vrot.slane %v3052_v48, 4 }
 0x576   :  { %v3154_v24 = vrot.slane %v3147_v45, %v8104_v19  ;;  %v3155_v63 = vcombine.low %v3073_v50, %v3079_v3  ;;  %v3100_v14 = vrot.slane %v3099_v18, 2  ;;  %v3053_v39 = vmul.f32 %v3035_v38, %v8116_v47  ;;  %v3039_v51 = vpop.f32.mrf.mxu0 }
 0x577   :  { %v3085_v58 = vadd.f32 %v3084_v9, %v3083_v5  ;;  %v3090_v59 = vrot.slane %v3089_v61, 1  ;;  %v3095_v57 = vadd.f32 %v3094_v6, %v3093_v42  ;;  %v3105_v44 = vadd.f32 %v3104_v20, %v3052_v48 }
 0x578   :  { %3237 = vst.msk [vmem:[#allocation2 + $0x3] ss:$8 sm:$0x3] %vm8107_vm1, %v3154_v24  ;;  %v3162_v0 = vrot.slane %v3155_v63, %v8104_v19  ;;  %v3101_v15 = vadd.f32 %v3100_v14, %v3099_v18  ;;  %v3110_v34 = vrot.slane %v3053_v39, 4  ;;  %v3054_v7 = vmul.f32 %v3039_v51, %v8121_v25  ;;  %v3041_v46 = vpop.f32.mrf.mxu0 }
 0x579   :  { %v3091_v28 = vadd.f32 %v3090_v59, %v3089_v61  ;;  %v3096_v37 = vrot.slane %v3095_v57, 1  ;;  %v3106_v55 = vrot.slane %v3105_v44, 2  ;;  %v3055_v26 = vmul.f32 %v3041_v46, %v8124_v16 }
 0x57a   :  { %v3169_v5 = vrot.slane %v3162_v0, %v8104_v19  ;;  %v3102_v45 = vrot.slane %v3101_v15, 1  ;;  %v3111_v42 = vadd.f32 %v3110_v34, %v3053_v39  ;;  %v3116_v48 = vrot.slane %v3054_v7, 4 }
 0x57b   :  { %v3170_v50 = vcombine.low %v3085_v58, %v3091_v28  ;;  %v3107_v3 = vadd.f32 %v3106_v55, %v3105_v44  ;;  %v3122_v38 = vrot.slane %v3055_v26, 4  ;;  %v3097_v18 = vadd.f32 %v3096_v37, %v3095_v57 }
 0x57c   :  { %3240 = vst.msk [vmem:[#allocation2 + $0x13] ss:$8 sm:$0x3] %vm8107_vm1, %v3169_v5  ;;  %v3103_v9 = vadd.f32 %v3102_v45, %v3101_v15  ;;  %v3112_v6 = vrot.slane %v3111_v42, 2  ;;  %v3117_v20 = vadd.f32 %v3116_v48, %v3054_v7 }
 0x57d   :  { %v3177_v61 = vrot.slane %v3170_v50, %v8104_v19  ;;  %v3123_v24 = vadd.f32 %v3122_v38, %v3055_v26  ;;  %v3108_v14 = vrot.slane %v3107_v3, 1 }
 0x57e   :  { %v3185_v63 = vcombine.low %v3097_v18, %v3103_v9  ;;  %v3113_v51 = vadd.f32 %v3112_v6, %v3111_v42  ;;  %v3118_v59 = vrot.slane %v3117_v20, 2 }
 0x57f   :  { %v3184_v39 = vrot.slane %v3177_v61, %v8104_v19  ;;  %v3124_v0 = vrot.slane %v3123_v24, 2  ;;  %v3109_v7 = vadd.f32 %v3108_v14, %v3107_v3 }
 0x580   :  { %v3192_v44 = vrot.slane %v3185_v63, %v8104_v19  ;;  %v3114_v58 = vrot.slane %v3113_v51, 1  ;;  %v3119_v34 = vadd.f32 %v3118_v59, %v3117_v20 }
 0x581   :  { %3243 = vst.msk [vmem:[#allocation2 + $0x23] ss:$8 sm:$0x3] %vm8107_vm1, %v3184_v39  ;;  %v3125_v57 = vadd.f32 %v3124_v0, %v3123_v24 }
 0x582   :  { %v3199_v15 = vrot.slane %v3192_v44, %v8104_v19  ;;  %v3115_v46 = vadd.f32 %v3114_v58, %v3113_v51  ;;  %v3120_v28 = vrot.slane %v3119_v34, 1  ;;  %v6409_v37 = vpop.f32.mrf.mxu0 }
 0x583   :  { %v3126_v55 = vrot.slane %v3125_v57, 1 }
 0x584   :  { %3246 = vst.msk [vmem:[#allocation2 + $0x33] ss:$8 sm:$0x3] %vm8107_vm1, %v3199_v15  ;;  %v3200_v26 = vcombine.low %v3109_v7, %v3115_v46  ;;  %v6410_v5 = vpop.f32.mrf.mxu0  ;;  %v3121_v45 = vadd.f32 %v3120_v28, %v3119_v34 }
 0x585   :  { %v3127_v42 = vadd.f32 %v3126_v55, %v3125_v57  ;;  %v6411_v48 = vadd.f32 %v6410_v5, %v6409_v37 }
 0x586   :  { %v3207_v50 = vrot.slane %v3200_v26, %v8104_v19  ;;  %v6412_v38 = vpop.f32.mrf.mxu0 }
 0x587   :  { %v3215_v18 = vcombine.low %v3121_v45, %v3127_v42  ;;  %v3441_v9 = vsel %vm781_vm0, %v6411_v48, -inf }
 0x588   :  { %v3214_v3 = vrot.slane %v3207_v50, %v8104_v19  ;;  %v3442_v6 = vrot.slane %v3441_v9, 4  ;;  %v6413_v20 = vpop.f32.mrf.mxu0 }
 0x589   :  { %v3222_v61 = vrot.slane %v3215_v18, %v8104_v19  ;;  %v6414_v24 = vadd.f32 %v6413_v20, %v6412_v38 }
 0x58a   :  { %3249 = vst.msk [vmem:[#allocation2 + $0x43] ss:$8 sm:$0x3] %vm8107_vm1, %v3214_v3  ;;  %v3443_v63 = vmax.f32 %v3441_v9, %v3442_v6  ;;  %v6415_v14 = vpop.f32.mrf.mxu0 }
 0x58b   :  { %v3229_v51 = vrot.slane %v3222_v61, %v8104_v19  ;;  %v3448_v59 = vsel %vm781_vm0, %v6414_v24, -inf }
 0x58c   :  { %v3444_v39 = vrot.slane %v3443_v63, 2  ;;  %v3449_v0 = vrot.slane %v3448_v59, 4  ;;  %v6416_v44 = vpop.f32.mrf.mxu0 }
 0x58d   :  { %3252 = vst.msk [vmem:[#allocation2 + $0x53] ss:$8 sm:$0x3] %vm8107_vm1, %v3229_v51  ;;  %v6417_v58 = vadd.f32 %v6416_v44, %v6415_v14 }
 0x58e   :  { %v3445_v34 = vmax.f32 %v3443_v63, %v3444_v39  ;;  %v3450_v57 = vmax.f32 %v3448_v59, %v3449_v0  ;;  %v6418_v15 = vpop.f32.mrf.mxu0 }
 0x58f   :  { %v3455_v7 = vsel %vm781_vm0, %v6417_v58, -inf }
 0x590   :  { %v3446_v46 = vrot.slane %v3445_v34, 1  ;;  %v3451_v28 = vrot.slane %v3450_v57, 2  ;;  %v3456_v37 = vrot.slane %v3455_v7, 4  ;;  %v6419_v55 = vpop.f32.mrf.mxu0 }
 0x591   :  { %v6420_v26 = vadd.f32 %v6419_v55, %v6418_v15 }
 0x592   :  { %v3447_v5 = vmax.f32 %v3445_v34, %v3446_v46  ;;  %v3452_v45 = vmax.f32 %v3450_v57, %v3451_v28  ;;  %v3457_v42 = vmax.f32 %v3455_v7, %v3456_v37  ;;  %v6421_v50 = vpop.f32.mrf.mxu0 }
 0x593   :  { %v3462_v38 = vsel %vm781_vm0, %v6420_v26, -inf }
 0x594   :  { %v3483_v18 = vsub.f32 %v6411_v48, %v3447_v5  ;;  %v3453_v9 = vrot.slane %v3452_v45, 1  ;;  %v3458_v3 = vrot.slane %v3457_v42, 2  ;;  %v3463_v6 = vrot.slane %v3462_v38, 4  ;;  %v6422_v20 = vpop.f32.mrf.mxu0 }
 0x595   :  { %v6423_v61 = vadd.f32 %v6422_v20, %v6421_v50 }
 0x596   :  { %v3489_v63 = vmul.f32 1.442695, %v3483_v18  ;;  %v3454_v14 = vmax.f32 %v3452_v45, %v3453_v9  ;;  %v3459_v51 = vmax.f32 %v3457_v42, %v3458_v3  ;;  %v3464_v59 = vmax.f32 %v3462_v38, %v3463_v6  ;;  %v6424_v39 = vpop.f32.mrf.mxu0 }
 0x597   :  { %v3469_v0 = vsel %vm781_vm0, %v6423_v61, -inf }
 0x598   :  { %6682 = vpow2.f32 %v3489_v63  ;;  %v3484_v44 = vsub.f32 %v6414_v24, %v3454_v14  ;;  %v3460_v34 = vrot.slane %v3459_v51, 1  ;;  %v3465_v57 = vrot.slane %v3464_v59, 2  ;;  %v6425_v15 = vpop.f32.mrf.mxu0 }
 0x599   :  { %v3470_v7 = vrot.slane %v3469_v0, 4  ;;  %v6426_v46 = vadd.f32 %v6425_v15, %v6424_v39 }
 0x59a   :  { %v3491_v48 = vmul.f32 1.442695, %v3484_v44  ;;  %v3461_v28 = vmax.f32 %v3459_v51, %v3460_v34  ;;  %v3466_v37 = vmax.f32 %v3464_v59, %v3465_v57 }
 0x59b   :  { %v3471_v55 = vmax.f32 %v3469_v0, %v3470_v7  ;;  %v3476_v5 = vsel %vm781_vm0, %v6426_v46, -inf }
 0x59c   :  { %6684 = vpow2.f32 %v3491_v48  ;;  %v3485_v45 = vsub.f32 %v6417_v58, %v3461_v28  ;;  %v3467_v42 = vrot.slane %v3466_v37, 1  ;;  %v3477_v50 = vrot.slane %v3476_v5, 4 }
 0x59d   :  { %v3472_v38 = vrot.slane %v3471_v55, 2 }
 0x59e   :  { %v3493_v18 = vmul.f32 1.442695, %v3485_v45  ;;  %v3468_v9 = vmax.f32 %v3466_v37, %v3467_v42  ;;  %v3478_v3 = vmax.f32 %v3476_v5, %v3477_v50 }
 0x59f   :  { %v3473_v24 = vmax.f32 %v3471_v55, %v3472_v38 }
 0x5a0   :  { %6686 = vpow2.f32 %v3493_v18  ;;  %v3486_v6 = vsub.f32 %v6420_v26, %v3468_v9  ;;  %v3479_v20 = vrot.slane %v3478_v3, 2 }
 0x5a1   :  { %v3474_v63 = vrot.slane %v3473_v24, 1 }
 0x5a2   :  { %v3495_v14 = vmul.f32 1.442695, %v3486_v6  ;;  %v3480_v39 = vmax.f32 %v3478_v3, %v3479_v20 }
 0x5a3   :  { %v3475_v51 = vmax.f32 %v3473_v24, %v3474_v63 }
 0x5a4   :  { %6688 = vpow2.f32 %v3495_v14  ;;  %v3481_v59 = vrot.slane %v3480_v39, 1 }
 0x5a5   :  { %v8798_v0 = vpop.eup %6682  ;;  %v3487_v44 = vsub.f32 %v6423_v61, %v3475_v51 }
 0x5a6   :  { %v3501_v58 = vsel %vm781_vm0, %v8798_v0, 0.0  ;;  %v3482_v34 = vmax.f32 %v3480_v39, %v3481_v59 }
 0x5a7   :  { %v3502_v57 = vrot.slane %v3501_v58, 4  ;;  %v3497_v15 = vmul.f32 1.442695, %v3487_v44 }
 0x5a8   :  { %v3488_v7 = vsub.f32 %v6426_v46, %v3482_v34 }
 0x5a9   :  { %v8802_v48 = vpop.eup %6684  ;;  %v3503_v26 = vadd.f32 %v3502_v57, %v3501_v58  ;;  %6690 = vpow2.f32 %v3497_v15 }
 0x5aa   :  { %v3508_v28 = vsel %vm781_vm0, %v8802_v48, 0.0  ;;  %v3499_v37 = vmul.f32 1.442695, %v3488_v7 }
 0x5ab   :  { %v3504_v55 = vrot.slane %v3503_v26, 2  ;;  %v3509_v5 = vrot.slane %v3508_v28, 4 }
 0x5ac   :  { %6692 = vpow2.f32 %v3499_v37 }
 0x5ad   :  { %v8806_v45 = vpop.eup %6686  ;;  %v3505_v61 = vadd.f32 %v3504_v55, %v3503_v26  ;;  %v3510_v42 = vadd.f32 %v3509_v5, %v3508_v28 }
 0x5ae   :  { %v3515_v50 = vsel %vm781_vm0, %v8806_v45, 0.0 }
 0x5af   :  { %v3506_v38 = vrot.slane %v3505_v61, 1  ;;  %v3516_v46 = vrot.slane %v3515_v50, 4  ;;  %v3511_v18 = vrot.slane %v3510_v42, 2 }
 0x5b1   :  { %v8810_v9 = vpop.eup %6688  ;;  %v3507_v3 = vadd.f32 %v3506_v38, %v3505_v61  ;;  %v3512_v24 = vadd.f32 %v3511_v18, %v3510_v42  ;;  %v3517_v6 = vadd.f32 %v3516_v46, %v3515_v50 }
 0x5b2   :  { %v3522_v20 = vsel %vm781_vm0, %v8810_v9, 0.0 }
 0x5b3   :  { %6694 = vrcp.f32 %v3507_v3  ;;  %v3523_v63 = vrot.slane %v3522_v20, 4  ;;  %v3513_v14 = vrot.slane %v3512_v24, 1  ;;  %v3518_v39 = vrot.slane %v3517_v6, 2 }
 0x5b5   :  { %v3514_v51 = vadd.f32 %v3513_v14, %v3512_v24  ;;  %v3519_v59 = vadd.f32 %v3518_v39, %v3517_v6  ;;  %v3524_v44 = vadd.f32 %v3523_v63, %v3522_v20 }
 0x5b6   :  { %v8814_v58 = vpop.eup %6690 }
 0x5b7   :  { %v3529_v34 = vsel %vm781_vm0, %v8814_v58, 0.0  ;;  %6696 = vrcp.f32 %v3514_v51  ;;  %v3520_v57 = vrot.slane %v3519_v59, 1  ;;  %v3525_v15 = vrot.slane %v3524_v44, 2 }
 0x5b8   :  { %v3530_v7 = vrot.slane %v3529_v34, 4 }
 0x5b9   :  { %v8818_v26 = vpop.eup %6692  ;;  %v3521_v28 = vadd.f32 %v3520_v57, %v3519_v59  ;;  %v3526_v37 = vadd.f32 %v3525_v15, %v3524_v44 }
 0x5ba   :  { %v3536_v55 = vsel %vm781_vm0, %v8818_v26, 0.0  ;;  %v3531_v5 = vadd.f32 %v3530_v7, %v3529_v34 }
 0x5bb   :  { %v3537_v61 = vrot.slane %v3536_v55, 4  ;;  %6698 = vrcp.f32 %v3521_v28  ;;  %v3527_v42 = vrot.slane %v3526_v37, 1 }
 0x5bc   :  { %v3532_v50 = vrot.slane %v3531_v5, 2 }
 0x5bd   :  { %v3528_v38 = vadd.f32 %v3527_v42, %v3526_v37  ;;  %v3538_v46 = vadd.f32 %v3537_v61, %v3536_v55  ;;  %v4250_v42 = vld [vmem:[%s9524_s4 + $0x68] sm:$0xff] }
 0x5be   :  { %v3533_v18 = vadd.f32 %v3532_v50, %v3531_v5  ;;  %v4249_v50 = vld [vmem:[%s9524_s4 + $0x60] sm:$0xff] }
 0x5bf   :  { %6700 = vrcp.f32 %v3528_v38  ;;  %v3539_v24 = vrot.slane %v3538_v46, 2 }
 0x5c0   :  { %v6695_v6 = vpop.eup %6694  ;;  %v3534_v20 = vrot.slane %v3533_v18, 1 }
 0x5c1   :  { %v3549_v63 = vmul.f32 %v6695_v6, %v3507_v3  ;;  %v3540_v14 = vadd.f32 %v3539_v24, %v3538_v46  ;;  %v4247_v46 = vld [vmem:[%s9524_s4 + $0x50] sm:$0xff]  ;;  %v4245_v24 = vld [vmem:[%s9524_s4 + $0x40] sm:$0xff] }
 0x5c2   :  { %v3535_v39 = vadd.f32 %v3534_v20, %v3533_v18  ;;  %v4246_v18 = vld [vmem:[%s9524_s4 + $0x48] sm:$0xff]  ;;  %v4243_v20 = vld [vmem:[%s9524_s4 + $0x30] sm:$0xff] }
 0x5c3   :  { %v3555_v59 = vsub.f32 2.0, %v3549_v63  ;;  %v3541_v44 = vrot.slane %v3540_v14, 1  ;;  %v4242_v63 = vld [vmem:[%s9524_s4 + $0x28] sm:$0xff] }
 0x5c4   :  { %v6697_v57 = vpop.eup %6696  ;;  %6702 = vrcp.f32 %v3535_v39 }
 0x5c5   :  { %v3561_v15 = vmul.f32 %v6695_v6, %v3555_v59  ;;  %v3550_v34 = vmul.f32 %v6697_v57, %v3514_v51  ;;  %v3542_v7 = vadd.f32 %v3541_v44, %v3540_v14  ;;  %v4244_v6 = vld [vmem:[%s9524_s4 + $0x38] sm:$0xff]  ;;  %v4241_v14 = vld [vmem:[%s9524_s4 + $0x20] sm:$0xff]  ;;  %v4239_v59 = vld [vmem:[%s9524_s4 + $0x10] sm:$0xff] }
 0x5c6   :  { %v4238_v44 = vld [vmem:[%s9524_s4 + $0x8] sm:$0xff] }
 0x5c7   :  { %v3567_v16 = vmul.f32 %v8798_v0, %v3561_v15  ;;  %v3556_v25 = vsub.f32 2.0, %v3550_v34  ;;  %6704 = vrcp.f32 %v3542_v7  ;;  %v4673_v15 = vld [vmem:[%s9523_s3 + $0xf8] sm:$0xff] }
 0x5c8   :  { %v6699_v37 = vpop.eup %6698 }
 0x5c9   :  { %6153 = vmatmul.mubr.msk.f32.vlgmr.msra.gmra.mxu1 %vm781_vm0, %v3567_v16  ;;  %v3562_v55 = vmul.f32 %v6697_v57, %v3556_v25  ;;  %v3551_v5 = vmul.f32 %v6699_v37, %v3521_v28  ;;  %v4251_v28 = vld [vmem:[%s9524_s4 + $0x70] sm:$0xff]  ;;  %v4237_v57 = vld [vmem:[%s9524_s4] sm:$0xff] }
 0x5ca   :  { %6428 = vmatpush3.msra.mxu1 %v8544_v53  ;;  %3677 = vmatprep.mubr.f32.mxu1 %v9643_v10 }
 0x5cb   :  { %6429 = vmatprep.subr.mxu1 %v8549_v49  ;;  %v3568_v3 = vmul.f32 %v8802_v48, %v3562_v55  ;;  %v3557_v61 = vsub.f32 2.0, %v3551_v5 }
 0x5cc   :  { %v6701_v51 = vpop.eup %6700  ;;  %6430 = vmatpush3.msra.mxu1 %v8555_v31 }
 0x5cd   :  { %6431 = vmatprep.subr.mxu1 %v8562_v33  ;;  %6154 = vmatmul.mubr.msk.f32.gmra.mxu1 %vm781_vm0, %v3568_v3  ;;  %v3563_v0 = vmul.f32 %v6699_v37, %v3557_v61  ;;  %v3552_v16 = vmul.f32 %v6701_v51, %v3528_v38  ;;  %v4248_v38 = vld [vmem:[%s9524_s4 + $0x58] sm:$0xff] }
 0x5ce   :  { %6432 = vmatpush3.msra.mxu1 %v8569_v43  ;;  %3683 = vmatprep.mubr.f32.mxu1 %v9643_v10  ;;  %v9710_v3 = vld [vmem:[#allocation15_spill] sm:$0xff] }
 0x5cf   :  { %6433 = vmatprep.subr.mxu1 %v8575_v1  ;;  %v3569_v25 = vmul.f32 %v8806_v45, %v3563_v0  ;;  %v3558_v53 = vsub.f32 2.0, %v3552_v16  ;;  %v9706_v45 = vld [vmem:[#allocation54_spill] sm:$0xff] }
 0x5d0   :  { %6434 = vmatpush3.msra.mxu1 %v8582_v2 }
 0x5d1   :  { %v6703_v49 = vpop.eup %6702  ;;  %6435 = vmatprep.subr.mxu1 %v8589_v11  ;;  %6155 = vmatmul.mubr.msk.f32.gmra.mxu1 %vm781_vm0, %v3569_v25  ;;  %v3564_v31 = vmul.f32 %v6701_v51, %v3558_v53  ;;  %v9711_v25 = vld [vmem:[#allocation18_spill] sm:$0xff] }
 0x5d2   :  { %6436 = vmatpush3.msra.mxu1 %v8596_v13  ;;  %3689 = vmatprep.mubr.f32.mxu1 %v9643_v10  ;;  %v3553_v33 = vmul.f32 %v6703_v49, %v3535_v39  ;;  %v4240_v39 = vld [vmem:[%s9524_s4 + $0x18] sm:$0xff] }
 0x5d3   :  { %6437 = vmatprep.subr.mxu1 %v8602_v29  ;;  %v3570_v43 = vmul.f32 %v8810_v9, %v3564_v31  ;;  %v9707_v9 = vld [vmem:[#allocation55_spill] sm:$0xff] }
 0x5d4   :  { %v6705_v1 = vpop.eup %6704  ;;  %6438 = vmatpush3.msra.mxu1 %v8609_v30  ;;  %v3559_v48 = vsub.f32 2.0, %v3553_v33 }
 0x5d5   :  { %6439 = vmatprep.subr.mxu1 %v8616_v22  ;;  %6156 = vmatmul.mubr.msk.f32.gmra.mxu1 %vm781_vm0, %v3570_v43  ;;  %v3554_v2 = vmul.f32 %v6705_v1, %v3542_v7  ;;  %v9709_v7 = vld [vmem:[#allocation16_spill] sm:$0xff] }
 0x5d6   :  { %6440 = vmatpush3.msra.mxu1 %v8623_v27  ;;  %3695 = vmatprep.mubr.f32.mxu1 %v9643_v10  ;;  %v3565_v11 = vmul.f32 %v6703_v49, %v3559_v48  ;;  %v9692_v27 = vld [vmem:[#allocation46_spill] sm:$0xff] }
 0x5d7   :  { %6441 = vmatprep.subr.mxu1 %v8629_v23  ;;  %v3560_v13 = vsub.f32 2.0, %v3554_v2  ;;  %v9693_v23 = vld [vmem:[#allocation23_spill] sm:$0xff] }
 0x5d8   :  { %6442 = vmatpush3.msra.mxu1 %v8636_v21  ;;  %v3571_v29 = vmul.f32 %v8814_v58, %v3565_v11  ;;  %v9694_v21 = vld [vmem:[#allocation21_spill] sm:$0xff]  ;;  %v9708_v58 = vld [vmem:[#allocation56_spill] sm:$0xff] }
 0x5d9   :  { %6443 = vmatprep.subr.mxu1 %v8643_v12  ;;  %v3566_v30 = vmul.f32 %v6705_v1, %v3560_v13  ;;  %v9695_v12 = vld [vmem:[#allocation24_spill] sm:$0xff]  ;;  %v9712_v1 = vld [vmem:[#allocation17_spill] sm:$0xff] }
 0x5da   :  { %6157 = vmatmul.mubr.msk.f32.gmra.mxu1 %vm781_vm0, %v3571_v29 }
 0x5db   :  { %6444 = vmatpush3.msra.mxu1 %v8651_v56  ;;  %3701 = vmatprep.mubr.f32.mxu1 %v9643_v10  ;;  %v3572_v22 = vmul.f32 %v8818_v26, %v3566_v30  ;;  %v9696_v56 = vld [vmem:[#allocation25_spill] sm:$0xff]  ;;  %v4252_v26 = vld [vmem:[%s9524_s4 + $0x78] sm:$0xff] }
 0x5dc   :  { %6445 = vmatprep.subr.mxu1 %v8657_v41  ;;  %v9697_v41 = vld [vmem:[#allocation26_spill] sm:$0xff]  ;;  %4287 = vmatprep.subr.mxu0 %v4252_v26 }
 0x5dd   :  { %6446 = vmatpush3.msra.mxu1 %v8663_v4  ;;  %v9698_v4 = vld [vmem:[#allocation43_spill] sm:$0xff]  ;;  %4288 = vmatpush1.msra.mxu0 %v4251_v28 }
 0x5de   :  { %6447 = vmatprep.subr.mxu1 %v8670_v60  ;;  %6158 = vmatmul.mubr.msk.f32.gmra.mxu1 %vm781_vm0, %v3572_v22  ;;  %v9699_v60 = vld [vmem:[#allocation47_spill] sm:$0xff] }
 0x5df   :  { %6448 = vmatpush3.msra.mxu1 %v8677_v35  ;;  %4074 = vmatprep.mubr.f32.mxu1 %v9692_v27  ;;  %v9700_v35 = vld [vmem:[#allocation48_spill] sm:$0xff]  ;;  %v9713_v22 = vld [vmem:[#allocation19_spill] sm:$0xff] }
 0x5e0   :  { %6449 = vmatprep.subr.mxu1 %v8683_v52  ;;  %v9701_v52 = vld [vmem:[#allocation49_spill] sm:$0xff]  ;;  %4289 = vmatprep.subr.mxu0 %v4250_v42 }
 0x5e1   :  { %6450 = vmatpush3.msra.mxu1 %v8690_v8  ;;  %v9702_v8 = vld [vmem:[#allocation50_spill] sm:$0xff]  ;;  %4290 = vmatpush1.msra.mxu0 %v4249_v50 }
 0x5e2   :  { %6451 = vmatprep.subr.mxu1 %v8697_v36  ;;  %v9703_v36 = vld [vmem:[#allocation51_spill] sm:$0xff]  ;;  %4291 = vmatprep.subr.mxu0 %v4248_v38 }
 0x5e3   :  { %6452 = vmatpush3.msra.mxu1 %v8703_v17  ;;  %v9704_v17 = vld [vmem:[#allocation52_spill] sm:$0xff]  ;;  %4292 = vmatpush1.msra.mxu0 %v4247_v46 }
 0x5e4   :  { %6453 = vmatprep.subr.mxu1 %v8709_v32  ;;  %v9705_v32 = vld [vmem:[#allocation53_spill] sm:$0xff]  ;;  %4293 = vmatprep.subr.mxu0 %v4246_v18 }
 0x5e5   :  { %6454 = vmatpush3.msra.mxu1 %v9693_v23  ;;  %4294 = vmatpush1.msra.mxu0 %v4245_v24 }
 0x5e6   :  { %6455 = vmatprep.subr.mxu1 %v9694_v21  ;;  %4295 = vmatprep.subr.mxu0 %v4244_v6 }
 0x5e7   :  { %6456 = vmatpush3.msra.mxu1 %v9695_v12  ;;  %4296 = vmatpush1.msra.mxu0 %v4243_v20 }
 0x5e8   :  { %6457 = vmatprep.subr.mxu1 %v9696_v56  ;;  %4297 = vmatprep.subr.mxu0 %v4242_v63 }
 0x5e9   :  { %6458 = vmatpush3.msra.mxu1 %v9697_v41  ;;  %4298 = vmatpush1.msra.mxu0 %v4241_v14 }
 0x5ea   :  { %4075 = vmatmul.mubr.f32.vlgmr.msra.gmra.mxu1 %v9698_v4  ;;  %4951 = vmatprep.subr.mxu1 %v4252_v26 }
 0x5eb   :  { %4079 = vmatprep.mubr.f32.mxu1 %v9699_v60  ;;  %4952 = vmatpush1.msra.mxu1 %v4251_v28  ;;  %v9714_v60 = vld [vmem:[#allocation22_spill] sm:$0xff] }
 0x5ec   :  { %4953 = vmatprep.subr.mxu1 %v4250_v42  ;;  %4299 = vmatprep.subr.mxu0 %v4240_v39 }
 0x5ed   :  { %4954 = vmatpush1.msra.mxu1 %v4249_v50  ;;  %4300 = vmatpush1.msra.mxu0 %v4239_v59 }
 0x5ee   :  { %4080 = vmatmul.mubr.f32.gmra.mxu1 %v9700_v35  ;;  %4955 = vmatprep.subr.mxu1 %v4248_v38 }
 0x5ef   :  { %4084 = vmatprep.mubr.f32.mxu1 %v9701_v52  ;;  %4956 = vmatpush1.msra.mxu1 %v4247_v46 }
 0x5f0   :  { %4957 = vmatprep.subr.mxu1 %v4246_v18  ;;  %4301 = vmatprep.subr.mxu0 %v4238_v44 }
 0x5f1   :  { %4958 = vmatpush1.msra.mxu1 %v4245_v24  ;;  %4302 = vmatpush1.msra.mxu0 %v4237_v57 }
 0x5f2   :  { %4085 = vmatmul.mubr.f32.gmra.mxu1 %v9702_v8  ;;  %4959 = vmatprep.subr.mxu1 %v4244_v6 }
 0x5f3   :  { %4089 = vmatprep.mubr.f32.mxu1 %v9703_v36  ;;  %4960 = vmatpush1.msra.mxu1 %v4243_v20 }
 0x5f4   :  { %4961 = vmatprep.subr.mxu1 %v4242_v63  ;;  %6477 = vmatprep.subr.mxu0 %v4673_v15 }
 0x5f5   :  { %4962 = vmatpush1.msra.mxu1 %v4241_v14 }
 0x5f6   :  { %4090 = vmatmul.mubr.f32.gmra.mxu1 %v9704_v17  ;;  %4963 = vmatprep.subr.mxu1 %v4240_v39 }
 0x5f7   :  { %4094 = vmatprep.mubr.f32.mxu1 %v9705_v32  ;;  %4964 = vmatpush1.msra.mxu1 %v4239_v59 }
 0x5f8   :  { %4965 = vmatprep.subr.mxu1 %v4238_v44 }
 0x5f9   :  { %4966 = vmatpush1.msra.mxu1 %v4237_v57  ;;  %v9715_v57 = vld [vmem:[#allocation20_spill] sm:$0xff] }
 0x5fa   :  { %4095 = vmatmul.mubr.f32.gmra.mxu1 %v9706_v45  ;;  %6527 = vmatprep.subr.mxu1 %v4673_v15 }
 0x5fb   :  { %4099 = vmatprep.mubr.f32.mxu1 %v9707_v9 }
 0x5fe   :  { %4100 = vmatmul.mubr.f32.gmra.mxu1 %v9708_v58 }
 0x5ff   :  { %4999 = vmatprep.mubr.f32.mxu1 %v9643_v10 }
 0x689   :  { %v3673_v34 = vpop.f32.mrf.mxu1 }
 0x68a   :  { %v3708_v37 = vmul.f32 %v3673_v34, %v9709_v7 }
 0x68b   :  { %v3675_v55 = vpop.f32.mrf.mxu1 }
 0x68c   :  { %v3720_v5 = vrot.slane %v3708_v37, 4  ;;  %v3709_v61 = vmul.f32 %v3675_v55, %v9710_v3 }
 0x68d   :  { %v3679_v51 = vpop.f32.mrf.mxu1 }
 0x68e   :  { %v3721_v0 = vadd.f32 %v3720_v5, %v3708_v37  ;;  %v3726_v16 = vrot.slane %v3709_v61, 4  ;;  %v3710_v53 = vmul.f32 %v3679_v51, %v9711_v25 }
 0x68f   :  { %v3681_v49 = vpop.f32.mrf.mxu1 }
 0x690   :  { %v3722_v31 = vrot.slane %v3721_v0, 2  ;;  %v3727_v33 = vadd.f32 %v3726_v16, %v3709_v61  ;;  %v3732_v43 = vrot.slane %v3710_v53, 4  ;;  %v3711_v48 = vmul.f32 %v3681_v49, %v9712_v1 }
 0x691   :  { %v3685_v2 = vpop.f32.mrf.mxu1 }
 0x692   :  { %v3723_v11 = vadd.f32 %v3722_v31, %v3721_v0  ;;  %v3728_v13 = vrot.slane %v3727_v33, 2  ;;  %v3733_v29 = vadd.f32 %v3732_v43, %v3710_v53  ;;  %v3738_v30 = vrot.slane %v3711_v48, 4 }
 0x693   :  { %v3712_v27 = vmul.f32 %v3685_v2, %v9713_v22  ;;  %v3687_v23 = vpop.f32.mrf.mxu1 }
 0x694   :  { %v3724_v21 = vrot.slane %v3723_v11, 1  ;;  %v3729_v12 = vadd.f32 %v3728_v13, %v3727_v33  ;;  %v3734_v56 = vrot.slane %v3733_v29, 2  ;;  %v3739_v41 = vadd.f32 %v3738_v30, %v3711_v48 }
 0x695   :  { %v3744_v4 = vrot.slane %v3712_v27, 4  ;;  %v3713_v35 = vmul.f32 %v3687_v23, %v9714_v60  ;;  %v3691_v52 = vpop.f32.mrf.mxu1 }
 0x696   :  { %v3730_v8 = vrot.slane %v3729_v12, 1  ;;  %v3735_v36 = vadd.f32 %v3734_v56, %v3733_v29  ;;  %v3740_v17 = vrot.slane %v3739_v41, 2  ;;  %v3725_v32 = vadd.f32 %v3724_v21, %v3723_v11  ;;  %v9716_v21 = vld [vmem:[#allocation12_spill] sm:$0xff] }
 0x697   :  { %v3745_v45 = vadd.f32 %v3744_v4, %v3712_v27  ;;  %v3750_v9 = vrot.slane %v3713_v35, 4  ;;  %v3714_v58 = vmul.f32 %v3691_v52, %v8098_v40  ;;  %v3693_v26 = vpop.f32.mrf.mxu1  ;;  %v9717_v52 = vld [vmem:[#allocation81_spill] sm:$0xff] }
 0x698   :  { %v3731_v28 = vadd.f32 %v3730_v8, %v3729_v12  ;;  %v3736_v42 = vrot.slane %v3735_v36, 1  ;;  %v3741_v50 = vadd.f32 %v3740_v17, %v3739_v41  ;;  %v3715_v38 = vmul.f32 %v3693_v26, %v8101_v54 }
 0x699   :  { %v3746_v46 = vrot.slane %v3745_v45, 2  ;;  %v3751_v18 = vadd.f32 %v3750_v9, %v3713_v35  ;;  %v3756_v24 = vrot.slane %v3714_v58, 4 }
 0x69a   :  { %v3804_v6 = vcombine.low %v3725_v32, %v3731_v28  ;;  %v3742_v20 = vrot.slane %v3741_v50, 1  ;;  %v3762_v63 = vrot.slane %v3715_v38, 4  ;;  %v3697_v14 = vpop.f32.mrf.mxu1  ;;  %v3737_v37 = vadd.f32 %v3736_v42, %v3735_v36 }
 0x69b   :  { %v3747_v39 = vadd.f32 %v3746_v46, %v3745_v45  ;;  %v3752_v59 = vrot.slane %v3751_v18, 2  ;;  %v3757_v44 = vadd.f32 %v3756_v24, %v3714_v58  ;;  %v3716_v15 = vmul.f32 %v3697_v14, %v9715_v57 }
 0x69c   :  { %v3811_v34 = vrot.slane %v3804_v6, %v8104_v19  ;;  %v3743_v55 = vadd.f32 %v3742_v20, %v3741_v50  ;;  %v3763_v5 = vadd.f32 %v3762_v63, %v3715_v38  ;;  %v3699_v61 = vpop.f32.mrf.mxu1 }
 0x69d   :  { %v3748_v51 = vrot.slane %v3747_v39, 1  ;;  %v3753_v0 = vadd.f32 %v3752_v59, %v3751_v18  ;;  %v3758_v16 = vrot.slane %v3757_v44, 2  ;;  %v3768_v53 = vrot.slane %v3716_v15, 4 }
 0x69e   :  { %v3818_v49 = vrot.slane %v3811_v34, %v8104_v19  ;;  %v3819_v31 = vcombine.low %v3737_v37, %v3743_v55  ;;  %v3764_v33 = vrot.slane %v3763_v5, 2  ;;  %v3717_v43 = vmul.f32 %v3699_v61, %v8116_v47  ;;  %v3703_v48 = vpop.f32.mrf.mxu1 }
 0x69f   :  { %v3749_v2 = vadd.f32 %v3748_v51, %v3747_v39  ;;  %v3754_v11 = vrot.slane %v3753_v0, 1  ;;  %v3759_v13 = vadd.f32 %v3758_v16, %v3757_v44  ;;  %v3769_v29 = vadd.f32 %v3768_v53, %v3716_v15 }
 0x6a0   :  { %3901 = vst.msk [vmem:[#allocation2 + $0x4] ss:$8 sm:$0x3] %vm8107_vm1, %v3818_v49  ;;  %v3826_v30 = vrot.slane %v3819_v31, %v8104_v19  ;;  %v3765_v27 = vadd.f32 %v3764_v33, %v3763_v5  ;;  %v3774_v23 = vrot.slane %v3717_v43, 4  ;;  %v3718_v12 = vmul.f32 %v3703_v48, %v9716_v21  ;;  %v3705_v56 = vpop.f32.mrf.mxu1 }
 0x6a1   :  { %v3755_v41 = vadd.f32 %v3754_v11, %v3753_v0  ;;  %v3760_v4 = vrot.slane %v3759_v13, 1  ;;  %v3770_v35 = vrot.slane %v3769_v29, 2  ;;  %v3719_v8 = vmul.f32 %v3705_v56, %v9717_v52 }
 0x6a2   :  { %v3833_v36 = vrot.slane %v3826_v30, %v8104_v19  ;;  %v3766_v17 = vrot.slane %v3765_v27, 1  ;;  %v3775_v32 = vadd.f32 %v3774_v23, %v3717_v43  ;;  %v3780_v45 = vrot.slane %v3718_v12, 4 }
 0x6a3   :  { %v3834_v9 = vcombine.low %v3749_v2, %v3755_v41  ;;  %v3771_v58 = vadd.f32 %v3770_v35, %v3769_v29  ;;  %v3786_v26 = vrot.slane %v3719_v8, 4  ;;  %v3761_v28 = vadd.f32 %v3760_v4, %v3759_v13 }
 0x6a4   :  { %3904 = vst.msk [vmem:[#allocation2 + $0x14] ss:$8 sm:$0x3] %vm8107_vm1, %v3833_v36  ;;  %v3767_v42 = vadd.f32 %v3766_v17, %v3765_v27  ;;  %v3776_v50 = vrot.slane %v3775_v32, 2  ;;  %v3781_v38 = vadd.f32 %v3780_v45, %v3718_v12 }
 0x6a5   :  { %v3841_v46 = vrot.slane %v3834_v9, %v8104_v19  ;;  %v3787_v18 = vadd.f32 %v3786_v26, %v3719_v8  ;;  %v3772_v6 = vrot.slane %v3771_v58, 1 }
 0x6a6   :  { %v3849_v24 = vcombine.low %v3761_v28, %v3767_v42  ;;  %v3777_v20 = vadd.f32 %v3776_v50, %v3775_v32  ;;  %v3782_v63 = vrot.slane %v3781_v38, 2 }
 0x6a7   :  { %v3848_v14 = vrot.slane %v3841_v46, %v8104_v19  ;;  %v3788_v39 = vrot.slane %v3787_v18, 2  ;;  %v3773_v55 = vadd.f32 %v3772_v6, %v3771_v58 }
 0x6a8   :  { %v3856_v59 = vrot.slane %v3849_v24, %v8104_v19  ;;  %v3778_v44 = vrot.slane %v3777_v20, 1  ;;  %v3783_v15 = vadd.f32 %v3782_v63, %v3781_v38 }
 0x6a9   :  { %3907 = vst.msk [vmem:[#allocation2 + $0x24] ss:$8 sm:$0x3] %vm8107_vm1, %v3848_v14  ;;  %v3789_v34 = vadd.f32 %v3788_v39, %v3787_v18 }
 0x6aa   :  { %v3863_v37 = vrot.slane %v3856_v59, %v8104_v19  ;;  %v3779_v5 = vadd.f32 %v3778_v44, %v3777_v20  ;;  %v3784_v61 = vrot.slane %v3783_v15, 1  ;;  %v6459_v51 = vpop.f32.mrf.mxu1 }
 0x6ab   :  { %v3790_v0 = vrot.slane %v3789_v34, 1 }
 0x6ac   :  { %3910 = vst.msk [vmem:[#allocation2 + $0x34] ss:$8 sm:$0x3] %vm8107_vm1, %v3863_v37  ;;  %v3864_v16 = vcombine.low %v3773_v55, %v3779_v5  ;;  %v6460_v53 = vpop.f32.mrf.mxu1  ;;  %v3785_v49 = vadd.f32 %v3784_v61, %v3783_v15 }
 0x6ad   :  { %v3791_v31 = vadd.f32 %v3790_v0, %v3789_v34  ;;  %v6461_v33 = vadd.f32 %v6460_v53, %v6459_v51 }
 0x6ae   :  { %v3871_v43 = vrot.slane %v3864_v16, %v8104_v19  ;;  %v6462_v48 = vpop.f32.mrf.mxu1 }
 0x6af   :  { %v3879_v2 = vcombine.low %v3785_v49, %v3791_v31  ;;  %v4105_v11 = vsel %vm781_vm0, %v6461_v33, -inf }
 0x6b0   :  { %v3878_v13 = vrot.slane %v3871_v43, %v8104_v19  ;;  %v4106_v29 = vrot.slane %v4105_v11, 4  ;;  %v6463_v30 = vpop.f32.mrf.mxu1 }
 0x6b1   :  { %v3886_v27 = vrot.slane %v3879_v2, %v8104_v19  ;;  %v6464_v23 = vadd.f32 %v6463_v30, %v6462_v48 }
 0x6b2   :  { %3913 = vst.msk [vmem:[#allocation2 + $0x44] ss:$8 sm:$0x3] %vm8107_vm1, %v3878_v13  ;;  %v4107_v12 = vmax.f32 %v4105_v11, %v4106_v29  ;;  %v6465_v56 = vpop.f32.mrf.mxu1 }
 0x6b3   :  { %v3893_v41 = vrot.slane %v3886_v27, %v8104_v19  ;;  %v4112_v4 = vsel %vm781_vm0, %v6464_v23, -inf }
 0x6b4   :  { %v4108_v35 = vrot.slane %v4107_v12, 2  ;;  %v4113_v8 = vrot.slane %v4112_v4, 4  ;;  %v6466_v36 = vpop.f32.mrf.mxu1 }
 0x6b5   :  { %3916 = vst.msk [vmem:[#allocation2 + $0x54] ss:$8 sm:$0x3] %vm8107_vm1, %v3893_v41  ;;  %v6467_v17 = vadd.f32 %v6466_v36, %v6465_v56 }
 0x6b6   :  { %v4109_v32 = vmax.f32 %v4107_v12, %v4108_v35  ;;  %v4114_v45 = vmax.f32 %v4112_v4, %v4113_v8  ;;  %v6468_v9 = vpop.f32.mrf.mxu1 }
 0x6b7   :  { %v4119_v58 = vsel %vm781_vm0, %v6467_v17, -inf }
 0x6b8   :  { %v4110_v26 = vrot.slane %v4109_v32, 1  ;;  %v4115_v28 = vrot.slane %v4114_v45, 2  ;;  %v4120_v42 = vrot.slane %v4119_v58, 4  ;;  %v6469_v50 = vpop.f32.mrf.mxu1 }
 0x6b9   :  { %v6470_v38 = vadd.f32 %v6469_v50, %v6468_v9 }
 0x6ba   :  { %v4111_v46 = vmax.f32 %v4109_v32, %v4110_v26  ;;  %v4116_v18 = vmax.f32 %v4114_v45, %v4115_v28  ;;  %v4121_v24 = vmax.f32 %v4119_v58, %v4120_v42  ;;  %v6471_v6 = vpop.f32.mrf.mxu1 }
 0x6bb   :  { %v4126_v20 = vsel %vm781_vm0, %v6470_v38, -inf }
 0x6bc   :  { %v4147_v63 = vsub.f32 %v6461_v33, %v4111_v46  ;;  %v4117_v14 = vrot.slane %v4116_v18, 1  ;;  %v4122_v39 = vrot.slane %v4121_v24, 2  ;;  %v4127_v59 = vrot.slane %v4126_v20, 4  ;;  %v6472_v44 = vpop.f32.mrf.mxu1 }
 0x6bd   :  { %v6473_v15 = vadd.f32 %v6472_v44, %v6471_v6 }
 0x6be   :  { %v4153_v34 = vmul.f32 1.442695, %v4147_v63  ;;  %v4118_v37 = vmax.f32 %v4116_v18, %v4117_v14  ;;  %v4123_v55 = vmax.f32 %v4121_v24, %v4122_v39  ;;  %v4128_v5 = vmax.f32 %v4126_v20, %v4127_v59  ;;  %v6474_v61 = vpop.f32.mrf.mxu1 }
 0x6bf   :  { %v4133_v51 = vsel %vm781_vm0, %v6473_v15, -inf }
 0x6c0   :  { %6706 = vpow2.f32 %v4153_v34  ;;  %v4148_v0 = vsub.f32 %v6464_v23, %v4118_v37  ;;  %v4124_v16 = vrot.slane %v4123_v55, 1  ;;  %v4129_v53 = vrot.slane %v4128_v5, 2  ;;  %v6475_v49 = vpop.f32.mrf.mxu1 }
 0x6c1   :  { %v4134_v31 = vrot.slane %v4133_v51, 4  ;;  %v6476_v43 = vadd.f32 %v6475_v49, %v6474_v61 }
 0x6c2   :  { %v4155_v33 = vmul.f32 1.442695, %v4148_v0  ;;  %v4125_v48 = vmax.f32 %v4123_v55, %v4124_v16  ;;  %v4130_v2 = vmax.f32 %v4128_v5, %v4129_v53 }
 0x6c3   :  { %v4135_v11 = vmax.f32 %v4133_v51, %v4134_v31  ;;  %v4140_v13 = vsel %vm781_vm0, %v6476_v43, -inf }
 0x6c4   :  { %6708 = vpow2.f32 %v4155_v33  ;;  %v4149_v29 = vsub.f32 %v6467_v17, %v4125_v48  ;;  %v4131_v30 = vrot.slane %v4130_v2, 1  ;;  %v4141_v27 = vrot.slane %v4140_v13, 4 }
 0x6c5   :  { %v4136_v12 = vrot.slane %v4135_v11, 2 }
 0x6c6   :  { %v4157_v56 = vmul.f32 1.442695, %v4149_v29  ;;  %v4132_v41 = vmax.f32 %v4130_v2, %v4131_v30  ;;  %v4142_v4 = vmax.f32 %v4140_v13, %v4141_v27 }
 0x6c7   :  { %v4137_v23 = vmax.f32 %v4135_v11, %v4136_v12 }
 0x6c8   :  { %6710 = vpow2.f32 %v4157_v56  ;;  %v4150_v35 = vsub.f32 %v6470_v38, %v4132_v41  ;;  %v4143_v8 = vrot.slane %v4142_v4, 2 }
 0x6c9   :  { %v4138_v36 = vrot.slane %v4137_v23, 1 }
 0x6ca   :  { %v4159_v32 = vmul.f32 1.442695, %v4150_v35  ;;  %v4144_v45 = vmax.f32 %v4142_v4, %v4143_v8 }
 0x6cb   :  { %v4139_v9 = vmax.f32 %v4137_v23, %v4138_v36 }
 0x6cc   :  { %6712 = vpow2.f32 %v4159_v32  ;;  %v4145_v58 = vrot.slane %v4144_v45, 1 }
 0x6cd   :  { %v8976_v26 = vpop.eup %6706  ;;  %v4151_v28 = vsub.f32 %v6473_v15, %v4139_v9 }
 0x6ce   :  { %v4165_v17 = vsel %vm781_vm0, %v8976_v26, 0.0  ;;  %v4146_v42 = vmax.f32 %v4144_v45, %v4145_v58 }
 0x6cf   :  { %v4166_v50 = vrot.slane %v4165_v17, 4  ;;  %v4161_v46 = vmul.f32 1.442695, %v4151_v28 }
 0x6d0   :  { %v4152_v18 = vsub.f32 %v6476_v43, %v4146_v42 }
 0x6d1   :  { %v8980_v24 = vpop.eup %6708  ;;  %v4167_v38 = vadd.f32 %v4166_v50, %v4165_v17  ;;  %6714 = vpow2.f32 %v4161_v46 }
 0x6d2   :  { %v4172_v6 = vsel %vm781_vm0, %v8980_v24, 0.0  ;;  %v4163_v20 = vmul.f32 1.442695, %v4152_v18 }
 0x6d3   :  { %v4168_v63 = vrot.slane %v4167_v38, 2  ;;  %v4173_v14 = vrot.slane %v4172_v6, 4 }
 0x6d4   :  { %6716 = vpow2.f32 %v4163_v20 }
 0x6d5   :  { %v8984_v39 = vpop.eup %6710  ;;  %v4169_v59 = vadd.f32 %v4168_v63, %v4167_v38  ;;  %v4174_v44 = vadd.f32 %v4173_v14, %v4172_v6 }
 0x6d6   :  { %v4179_v15 = vsel %vm781_vm0, %v8984_v39, 0.0 }
 0x6d7   :  { %v4170_v34 = vrot.slane %v4169_v59, 1  ;;  %v4180_v37 = vrot.slane %v4179_v15, 4  ;;  %v4175_v55 = vrot.slane %v4174_v44, 2 }
 0x6d9   :  { %v8988_v5 = vpop.eup %6712  ;;  %v4171_v61 = vadd.f32 %v4170_v34, %v4169_v59  ;;  %v4176_v51 = vadd.f32 %v4175_v55, %v4174_v44  ;;  %v4181_v0 = vadd.f32 %v4180_v37, %v4179_v15  ;;  %v9004_v59 = vld [vmem:[%s9523_s3 + $0x78] sm:$0xff]  ;;  %v9009_v34 = vld [vmem:[%s9523_s3 + $0xf0] sm:$0xff] }
 0x6da   :  { %v4186_v16 = vsel %vm781_vm0, %v8988_v5, 0.0  ;;  %v9015_v37 = vld [vmem:[%s9523_s3 + $0x70] sm:$0xff] }
 0x6db   :  { %6718 = vrcp.f32 %v4171_v61  ;;  %v4187_v53 = vrot.slane %v4186_v16, 4  ;;  %v4177_v49 = vrot.slane %v4176_v51, 1  ;;  %v4182_v31 = vrot.slane %v4181_v0, 2 }
 0x6dd   :  { %v4178_v43 = vadd.f32 %v4177_v49, %v4176_v51  ;;  %v4183_v33 = vadd.f32 %v4182_v31, %v4181_v0  ;;  %v4188_v48 = vadd.f32 %v4187_v53, %v4186_v16  ;;  %v9029_v0 = vld [vmem:[%s9523_s3 + $0x68] sm:$0xff]  ;;  %v9035_v49 = vld [vmem:[%s9523_s3 + $0xe0] sm:$0xff] }
 0x6de   :  { %v8992_v2 = vpop.eup %6714 }
 0x6df   :  { %v4193_v11 = vsel %vm781_vm0, %v8992_v2, 0.0  ;;  %6720 = vrcp.f32 %v4178_v43  ;;  %v4184_v13 = vrot.slane %v4183_v33, 1  ;;  %v4189_v29 = vrot.slane %v4188_v48, 2 }
 0x6e0   :  { %v4194_v30 = vrot.slane %v4193_v11, 4 }
 0x6e1   :  { %v8996_v27 = vpop.eup %6716  ;;  %v4185_v12 = vadd.f32 %v4184_v13, %v4183_v33  ;;  %v4190_v56 = vadd.f32 %v4189_v29, %v4188_v48  ;;  %v9049_v33 = vld [vmem:[%s9523_s3 + $0xd8] sm:$0xff]  ;;  %v9062_v29 = vld [vmem:[%s9523_s3 + $0xd0] sm:$0xff] }
 0x6e2   :  { %v4200_v41 = vsel %vm781_vm0, %v8996_v27, 0.0  ;;  %v4195_v4 = vadd.f32 %v4194_v30, %v4193_v11  ;;  %v9056_v11 = vld [vmem:[%s9523_s3 + $0x58] sm:$0xff] }
 0x6e3   :  { %v4201_v23 = vrot.slane %v4200_v41, 4  ;;  %6722 = vrcp.f32 %v4185_v12  ;;  %v4191_v35 = vrot.slane %v4190_v56, 1 }
 0x6e4   :  { %v4196_v8 = vrot.slane %v4195_v4, 2 }
 0x6e5   :  { %v4192_v36 = vadd.f32 %v4191_v35, %v4190_v56  ;;  %v4202_v32 = vadd.f32 %v4201_v23, %v4200_v41  ;;  %v9076_v56 = vld [vmem:[%s9523_s3 + $0xc8] sm:$0xff] }
 0x6e6   :  { %v4197_v45 = vadd.f32 %v4196_v8, %v4195_v4  ;;  %v9083_v23 = vld [vmem:[%s9523_s3 + $0x48] sm:$0xff]  ;;  %v9089_v8 = vld [vmem:[%s9523_s3 + $0xc0] sm:$0xff] }
 0x6e7   :  { %6724 = vrcp.f32 %v4192_v36  ;;  %v4203_v9 = vrot.slane %v4202_v32, 2 }
 0x6e8   :  { %v6719_v58 = vpop.eup %6718  ;;  %v4198_v28 = vrot.slane %v4197_v45, 1 }
 0x6e9   :  { %v4213_v17 = vmul.f32 %v6719_v58, %v4171_v61  ;;  %v4204_v42 = vadd.f32 %v4203_v9, %v4202_v32  ;;  %v9022_v61 = vld [vmem:[%s9523_s3 + $0xe8] sm:$0xff] }
 0x6ea   :  { %v4199_v50 = vadd.f32 %v4198_v28, %v4197_v45  ;;  %v9103_v45 = vld [vmem:[%s9523_s3 + $0xb8] sm:$0xff] }
 0x6eb   :  { %v4219_v46 = vsub.f32 2.0, %v4213_v17  ;;  %v4205_v18 = vrot.slane %v4204_v42, 1  ;;  %v9111_v17 = vld [vmem:[%s9523_s3 + $0x38] sm:$0xff] }
 0x6ec   :  { %v6721_v38 = vpop.eup %6720  ;;  %6726 = vrcp.f32 %v4199_v50 }
 0x6ed   :  { %v4225_v6 = vmul.f32 %v6719_v58, %v4219_v46  ;;  %v4214_v20 = vmul.f32 %v6721_v38, %v4178_v43  ;;  %v4206_v63 = vadd.f32 %v4205_v18, %v4204_v42  ;;  %v9117_v42 = vld [vmem:[%s9523_s3 + $0xb0] sm:$0xff] }
 0x6ee   :  { %v9123_v46 = vld [vmem:[%s9523_s3 + $0x30] sm:$0xff] }
 0x6ef   :  { %v4231_v14 = vmul.f32 %v8976_v26, %v4225_v6  ;;  %v4220_v44 = vsub.f32 2.0, %v4214_v20  ;;  %6728 = vrcp.f32 %v4206_v63  ;;  %v9143_v6 = vld [vmem:[%s9523_s3 + $0xa0] sm:$0xff]  ;;  %v9718_v20 = vld [vmem:[#allocation57_spill] sm:$0xff] }
 0x6f0   :  { %v6723_v15 = vpop.eup %6722 }
 0x6f1   :  { %6159 = vmatmul.mubr.msk.f32.vlgmr.msra.gmra.mxu0 %vm781_vm0, %v4231_v14  ;;  %v4226_v26 = vmul.f32 %v6721_v38, %v4220_v44  ;;  %v4215_v55 = vmul.f32 %v6723_v15, %v4185_v12  ;;  %v9137_v38 = vld [vmem:[%s9523_s3 + $0x28] sm:$0xff]  ;;  %v9163_v14 = vld [vmem:[%s9523_s3 + $0x18] sm:$0xff]  ;;  %v9169_v44 = vld [vmem:[%s9523_s3 + $0x90] sm:$0xff] }
 0x6f2   :  { %6478 = vmatpush3.msra.mxu0 %v9004_v59  ;;  %4341 = vmatprep.mubr.f32.mxu0 %v9643_v10 }
 0x6f3   :  { %6479 = vmatprep.subr.mxu0 %v9009_v34  ;;  %v4232_v51 = vmul.f32 %v8980_v24, %v4226_v26  ;;  %v4221_v16 = vsub.f32 2.0, %v4215_v55  ;;  %v9042_v24 = vld [vmem:[%s9523_s3 + $0x60] sm:$0xff]  ;;  %v9181_v26 = vld [vmem:[%s9523_s3 + $0x88] sm:$0xff] }
 0x6f4   :  { %v6725_v53 = vpop.eup %6724  ;;  %6480 = vmatpush3.msra.mxu0 %v9015_v37  ;;  %9720 = vst [vmem:[#allocation28_spill] sm:$0xff] %v9181_v26  ;;  %v9187_v55 = vld [vmem:[%s9523_s3 + $0x8] sm:$0xff] }
 0x6f5   :  { %6481 = vmatprep.subr.mxu0 %v9022_v61  ;;  %6160 = vmatmul.mubr.msk.f32.gmra.mxu0 %vm781_vm0, %v4232_v51  ;;  %v4227_v31 = vmul.f32 %v6723_v15, %v4221_v16  ;;  %v4216_v43 = vmul.f32 %v6725_v53, %v4192_v36  ;;  %v9175_v15 = vld [vmem:[%s9523_s3 + $0x10] sm:$0xff]  ;;  %9721 = vst [vmem:[#allocation29_spill] sm:$0xff] %v9187_v55  ;;  %v9193_v51 = vld [vmem:[%s9523_s3 + $0x80] sm:$0xff] }
 0x6f6   :  { %6482 = vmatpush3.msra.mxu0 %v9029_v0  ;;  %4347 = vmatprep.mubr.f32.mxu0 %v9643_v10  ;;  %9719 = vst [vmem:[#allocation27_spill] sm:$0xff] %v9175_v15  ;;  %9722 = vst [vmem:[#allocation30_spill] sm:$0xff] %v9193_v51  ;;  %v9199_v16 = vld [vmem:[%s9523_s3] sm:$0xff] }
 0x6f7   :  { %6483 = vmatprep.subr.mxu0 %v9035_v49  ;;  %v4233_v48 = vmul.f32 %v8984_v39, %v4227_v31  ;;  %v4222_v13 = vsub.f32 2.0, %v4216_v43  ;;  %v9069_v39 = vld [vmem:[%s9523_s3 + $0x50] sm:$0xff]  ;;  %9723 = vst [vmem:[#allocation32_spill] sm:$0xff] %v9199_v16  ;;  %v9725_v31 = vld [vmem:[#allocation59_spill] sm:$0xff]  ;;  %v9726_v43 = vld [vmem:[#allocation60_spill] sm:$0xff] }
 0x6f8   :  { %6484 = vmatpush3.msra.mxu0 %v9042_v24 }
 0x6f9   :  { %v6727_v30 = vpop.eup %6726  ;;  %6485 = vmatprep.subr.mxu0 %v9049_v33  ;;  %6161 = vmatmul.mubr.msk.f32.gmra.mxu0 %vm781_vm0, %v4233_v48  ;;  %v4228_v12 = vmul.f32 %v6725_v53, %v4222_v13  ;;  %v9724_v53 = vld [vmem:[#allocation58_spill] sm:$0xff]  ;;  %v9727_v48 = vld [vmem:[#allocation61_spill] sm:$0xff] }
 0x6fa   :  { %6486 = vmatpush3.msra.mxu0 %v9056_v11  ;;  %4353 = vmatprep.mubr.f32.mxu0 %v9643_v10  ;;  %v4217_v41 = vmul.f32 %v6727_v30, %v4199_v50  ;;  %v9728_v13 = vld [vmem:[#allocation62_spill] sm:$0xff] }
 0x6fb   :  { %6487 = vmatprep.subr.mxu0 %v9062_v29  ;;  %v4234_v4 = vmul.f32 %v8988_v5, %v4228_v12  ;;  %v9096_v5 = vld [vmem:[%s9523_s3 + $0x40] sm:$0xff] }
 0x6fc   :  { %v6729_v35 = vpop.eup %6728  ;;  %6488 = vmatpush3.msra.mxu0 %v9069_v39  ;;  %v4223_v36 = vsub.f32 2.0, %v4217_v41  ;;  %v9730_v12 = vld [vmem:[#allocation64_spill] sm:$0xff]  ;;  %v9731_v41 = vld [vmem:[#allocation65_spill] sm:$0xff] }
 0x6fd   :  { %6489 = vmatprep.subr.mxu0 %v9076_v56  ;;  %6162 = vmatmul.mubr.msk.f32.gmra.mxu0 %vm781_vm0, %v4234_v4  ;;  %v4218_v32 = vmul.f32 %v6729_v35, %v4206_v63  ;;  %v9157_v63 = vld [vmem:[%s9523_s3 + $0x98] sm:$0xff]  ;;  %v9732_v4 = vld [vmem:[#allocation66_spill] sm:$0xff] }
 0x6fe   :  { %6490 = vmatpush3.msra.mxu0 %v9083_v23  ;;  %4359 = vmatprep.mubr.f32.mxu0 %v9643_v10  ;;  %v4229_v9 = vmul.f32 %v6727_v30, %v4223_v36  ;;  %v9729_v30 = vld [vmem:[#allocation63_spill] sm:$0xff]  ;;  %v9734_v36 = vld [vmem:[#allocation68_spill] sm:$0xff] }
 0x6ff   :  { %6491 = vmatprep.subr.mxu0 %v9089_v8  ;;  %v4224_v58 = vsub.f32 2.0, %v4218_v32 }
 0x700   :  { %6492 = vmatpush3.msra.mxu0 %v9096_v5  ;;  %v4235_v28 = vmul.f32 %v8992_v2, %v4229_v9  ;;  %v9130_v2 = vld [vmem:[%s9523_s3 + $0xa8] sm:$0xff] }
 0x701   :  { %6493 = vmatprep.subr.mxu0 %v9103_v45  ;;  %v4230_v50 = vmul.f32 %v6729_v35, %v4224_v58  ;;  %v9733_v35 = vld [vmem:[#allocation67_spill] sm:$0xff] }
 0x702   :  { %6163 = vmatmul.mubr.msk.f32.gmra.mxu0 %vm781_vm0, %v4235_v28 }
 0x703   :  { %6494 = vmatpush3.msra.mxu0 %v9111_v17  ;;  %4365 = vmatprep.mubr.f32.mxu0 %v9643_v10  ;;  %v4236_v18 = vmul.f32 %v8996_v27, %v4230_v50  ;;  %v9150_v27 = vld [vmem:[%s9523_s3 + $0x20] sm:$0xff] }
 0x704   :  { %6495 = vmatprep.subr.mxu0 %v9117_v42 }
 0x705   :  { %6496 = vmatpush3.msra.mxu0 %v9123_v46 }
 0x706   :  { %6497 = vmatprep.subr.mxu0 %v9130_v2  ;;  %6164 = vmatmul.mubr.msk.f32.gmra.mxu0 %vm781_vm0, %v4236_v18 }
 0x707   :  { %6498 = vmatpush3.msra.mxu0 %v9137_v38  ;;  %4738 = vmatprep.mubr.f32.mxu0 %v9718_v20 }
 0x708   :  { %6499 = vmatprep.subr.mxu0 %v9143_v6 }
 0x709   :  { %6500 = vmatpush3.msra.mxu0 %v9150_v27 }
 0x70a   :  { %6501 = vmatprep.subr.mxu0 %v9157_v63 }
 0x70b   :  { %6502 = vmatpush3.msra.mxu0 %v9163_v14 }
 0x70c   :  { %6503 = vmatprep.subr.mxu0 %v9169_v44 }
 0x70d   :  { %6504 = vmatpush3.msra.mxu0 %v9175_v15 }
 0x70e   :  { %6505 = vmatprep.subr.mxu0 %v9181_v26 }
 0x70f   :  { %6506 = vmatpush3.msra.mxu0 %v9187_v55 }
 0x710   :  { %6507 = vmatprep.subr.mxu0 %v9193_v51 }
 0x711   :  { %6508 = vmatpush3.msra.mxu0 %v9199_v16 }
 0x712   :  { %4739 = vmatmul.mubr.f32.vlgmr.msra.gmra.mxu0 %v9724_v53 }
 0x713   :  { %4743 = vmatprep.mubr.f32.mxu0 %v9725_v31 }
 0x716   :  { %4744 = vmatmul.mubr.f32.gmra.mxu0 %v9726_v43 }
 0x717   :  { %4748 = vmatprep.mubr.f32.mxu0 %v9727_v48 }
 0x71a   :  { %4749 = vmatmul.mubr.f32.gmra.mxu0 %v9728_v13 }
 0x71b   :  { %4753 = vmatprep.mubr.f32.mxu0 %v9729_v30 }
 0x71e   :  { %4754 = vmatmul.mubr.f32.gmra.mxu0 %v9730_v12 }
 0x71f   :  { %4758 = vmatprep.mubr.f32.mxu0 %v9731_v41 }
 0x722   :  { %4759 = vmatmul.mubr.f32.gmra.mxu0 %v9732_v4 }
 0x723   :  { %4763 = vmatprep.mubr.f32.mxu0 %v9733_v35 }
 0x726   :  { %4764 = vmatmul.mubr.f32.gmra.mxu0 %v9734_v36 }
 0x727   :  { %5663 = vmatprep.mubr.f32.mxu0 %v9643_v10 }
 0x7b1   :  { %v4337_v32 = vpop.f32.mrf.mxu0 }
 0x7b2   :  { %v4372_v9 = vmul.f32 %v4337_v32, %v9709_v7 }
 0x7b3   :  { %v4339_v58 = vpop.f32.mrf.mxu0 }
 0x7b4   :  { %v4384_v28 = vrot.slane %v4372_v9, 4  ;;  %v4373_v50 = vmul.f32 %v4339_v58, %v9710_v3 }
 0x7b5   :  { %v4343_v18 = vpop.f32.mrf.mxu0 }
 0x7b6   :  { %v4385_v20 = vadd.f32 %v4384_v28, %v4372_v9  ;;  %v4390_v53 = vrot.slane %v4373_v50, 4  ;;  %v4374_v31 = vmul.f32 %v4343_v18, %v9711_v25 }
 0x7b7   :  { %v4345_v43 = vpop.f32.mrf.mxu0 }
 0x7b8   :  { %v4386_v48 = vrot.slane %v4385_v20, 2  ;;  %v4391_v13 = vadd.f32 %v4390_v53, %v4373_v50  ;;  %v4396_v30 = vrot.slane %v4374_v31, 4  ;;  %v4375_v12 = vmul.f32 %v4345_v43, %v9712_v1 }
 0x7b9   :  { %v4349_v41 = vpop.f32.mrf.mxu0 }
 0x7ba   :  { %v4387_v4 = vadd.f32 %v4386_v48, %v4385_v20  ;;  %v4392_v35 = vrot.slane %v4391_v13, 2  ;;  %v4397_v36 = vadd.f32 %v4396_v30, %v4374_v31  ;;  %v4402_v32 = vrot.slane %v4375_v12, 4 }
 0x7bb   :  { %v4376_v7 = vmul.f32 %v4349_v41, %v9713_v22  ;;  %v4351_v16 = vpop.f32.mrf.mxu0 }
 0x7bc   :  { %v4388_v58 = vrot.slane %v4387_v4, 1  ;;  %v4393_v3 = vadd.f32 %v4392_v35, %v4391_v13  ;;  %v4398_v9 = vrot.slane %v4397_v36, 2  ;;  %v4403_v28 = vadd.f32 %v4402_v32, %v4375_v12 }
 0x7bd   :  { %v4408_v51 = vrot.slane %v4376_v7, 4  ;;  %v4377_v18 = vmul.f32 %v4351_v16, %v9714_v60  ;;  %v4355_v25 = vpop.f32.mrf.mxu0 }
 0x7be   :  { %v4394_v50 = vrot.slane %v4393_v3, 1  ;;  %v4399_v53 = vadd.f32 %v4398_v9, %v4397_v36  ;;  %v4404_v55 = vrot.slane %v4403_v28, 2  ;;  %v4389_v43 = vadd.f32 %v4388_v58, %v4387_v4 }
 0x7bf   :  { %v4409_v1 = vadd.f32 %v4408_v51, %v4376_v7  ;;  %v4414_v20 = vrot.slane %v4377_v18, 4  ;;  %v4378_v31 = vmul.f32 %v4355_v25, %v8098_v40  ;;  %v4357_v48 = vpop.f32.mrf.mxu0 }
 0x7c0   :  { %v4395_v30 = vadd.f32 %v4394_v50, %v4393_v3  ;;  %v4400_v41 = vrot.slane %v4399_v53, 1  ;;  %v4405_v22 = vadd.f32 %v4404_v55, %v4403_v28  ;;  %v4379_v13 = vmul.f32 %v4357_v48, %v8101_v54 }
 0x7c1   :  { %v4410_v35 = vrot.slane %v4409_v1, 2  ;;  %v4415_v12 = vadd.f32 %v4414_v20, %v4377_v18  ;;  %v4420_v32 = vrot.slane %v4378_v31, 4 }
 0x7c2   :  { %v4468_v26 = vcombine.low %v4389_v43, %v4395_v30  ;;  %v4406_v16 = vrot.slane %v4405_v22, 1  ;;  %v4426_v60 = vrot.slane %v4379_v13, 4  ;;  %v4361_v15 = vpop.f32.mrf.mxu0  ;;  %v4401_v51 = vadd.f32 %v4400_v41, %v4399_v53 }
 0x7c3   :  { %v4411_v36 = vadd.f32 %v4410_v35, %v4409_v1  ;;  %v4416_v9 = vrot.slane %v4415_v12, 2  ;;  %v4421_v4 = vadd.f32 %v4420_v32, %v4378_v31  ;;  %v4380_v7 = vmul.f32 %v4361_v15, %v9715_v57 }
 0x7c4   :  { %v4475_v25 = vrot.slane %v4468_v26, %v8104_v19  ;;  %v4407_v3 = vadd.f32 %v4406_v16, %v4405_v22  ;;  %v4427_v58 = vadd.f32 %v4426_v60, %v4379_v13  ;;  %v4363_v55 = vpop.f32.mrf.mxu0 }
 0x7c5   :  { %v4412_v28 = vrot.slane %v4411_v36, 1  ;;  %v4417_v50 = vadd.f32 %v4416_v9, %v4415_v12  ;;  %v4422_v48 = vrot.slane %v4421_v4, 2  ;;  %v4432_v18 = vrot.slane %v4380_v7, 4 }
 0x7c6   :  { %v4482_v43 = vrot.slane %v4475_v25, %v8104_v19  ;;  %v4483_v20 = vcombine.low %v4401_v51, %v4407_v3  ;;  %v4428_v30 = vrot.slane %v4427_v58, 2  ;;  %v4381_v1 = vmul.f32 %v4363_v55, %v8116_v47  ;;  %v4367_v35 = vpop.f32.mrf.mxu0 }
 0x7c7   :  { %v4413_v31 = vadd.f32 %v4412_v28, %v4411_v36  ;;  %v4418_v32 = vrot.slane %v4417_v50, 1  ;;  %v4423_v15 = vadd.f32 %v4422_v48, %v4421_v4  ;;  %v4433_v57 = vadd.f32 %v4432_v18, %v4380_v7 }
 0x7c8   :  { %4565 = vst.msk [vmem:[#allocation2 + $0x5] ss:$8 sm:$0x3] %vm8107_vm1, %v4482_v43  ;;  %v4490_v22 = vrot.slane %v4483_v20, %v8104_v19  ;;  %v4429_v60 = vadd.f32 %v4428_v30, %v4427_v58  ;;  %v4438_v26 = vrot.slane %v4381_v1, 4  ;;  %v4382_v53 = vmul.f32 %v4367_v35, %v9716_v21  ;;  %v4369_v41 = vpop.f32.mrf.mxu0 }
 0x7c9   :  { %v4419_v13 = vadd.f32 %v4418_v32, %v4417_v50  ;;  %v4424_v12 = vrot.slane %v4423_v15, 1  ;;  %v4434_v16 = vrot.slane %v4433_v57, 2  ;;  %v4383_v9 = vmul.f32 %v4369_v41, %v9717_v52 }
 0x7ca   :  { %v4497_v36 = vrot.slane %v4490_v22, %v8104_v19  ;;  %v4430_v25 = vrot.slane %v4429_v60, 1  ;;  %v4439_v4 = vadd.f32 %v4438_v26, %v4381_v1  ;;  %v4444_v7 = vrot.slane %v4382_v53, 4 }
 0x7cb   :  { %v4498_v51 = vcombine.low %v4413_v31, %v4419_v13  ;;  %v4435_v3 = vadd.f32 %v4434_v16, %v4433_v57  ;;  %v4450_v55 = vrot.slane %v4383_v9, 4  ;;  %v4425_v58 = vadd.f32 %v4424_v12, %v4423_v15 }
 0x7cc   :  { %4568 = vst.msk [vmem:[#allocation2 + $0x15] ss:$8 sm:$0x3] %vm8107_vm1, %v4497_v36  ;;  %v4431_v28 = vadd.f32 %v4430_v25, %v4429_v60  ;;  %v4440_v48 = vrot.slane %v4439_v4, 2  ;;  %v4445_v18 = vadd.f32 %v4444_v7, %v4382_v53 }
 0x7cd   :  { %v4505_v50 = vrot.slane %v4498_v51, %v8104_v19  ;;  %v4451_v43 = vadd.f32 %v4450_v55, %v4383_v9  ;;  %v4436_v30 = vrot.slane %v4435_v3, 1 }
 0x7ce   :  { %v4513_v20 = vcombine.low %v4425_v58, %v4431_v28  ;;  %v4441_v35 = vadd.f32 %v4440_v48, %v4439_v4  ;;  %v4446_v32 = vrot.slane %v4445_v18, 2 }
 0x7cf   :  { %v4512_v1 = vrot.slane %v4505_v50, %v8104_v19  ;;  %v4452_v22 = vrot.slane %v4451_v43, 2  ;;  %v4437_v53 = vadd.f32 %v4436_v30, %v4435_v3 }
 0x7d0   :  { %v4520_v57 = vrot.slane %v4513_v20, %v8104_v19  ;;  %v4442_v31 = vrot.slane %v4441_v35, 1  ;;  %v4447_v26 = vadd.f32 %v4446_v32, %v4445_v18 }
 0x7d1   :  { %4571 = vst.msk [vmem:[#allocation2 + $0x25] ss:$8 sm:$0x3] %vm8107_vm1, %v4512_v1  ;;  %v4453_v15 = vadd.f32 %v4452_v22, %v4451_v43 }
 0x7d2   :  { %v4527_v60 = vrot.slane %v4520_v57, %v8104_v19  ;;  %v4443_v41 = vadd.f32 %v4442_v31, %v4441_v35  ;;  %v4448_v13 = vrot.slane %v4447_v26, 1  ;;  %v6509_v12 = vpop.f32.mrf.mxu0 }
 0x7d3   :  { %v4454_v16 = vrot.slane %v4453_v15, 1 }
 0x7d4   :  { %4574 = vst.msk [vmem:[#allocation2 + $0x35] ss:$8 sm:$0x3] %vm8107_vm1, %v4527_v60  ;;  %v4528_v9 = vcombine.low %v4437_v53, %v4443_v41  ;;  %v6510_v36 = vpop.f32.mrf.mxu0  ;;  %v4449_v25 = vadd.f32 %v4448_v13, %v4447_v26 }
 0x7d5   :  { %v4455_v4 = vadd.f32 %v4454_v16, %v4453_v15  ;;  %v6511_v7 = vadd.f32 %v6510_v36, %v6509_v12 }
 0x7d6   :  { %v4535_v51 = vrot.slane %v4528_v9, %v8104_v19  ;;  %v6512_v55 = vpop.f32.mrf.mxu0 }
 0x7d7   :  { %v4543_v58 = vcombine.low %v4449_v25, %v4455_v4  ;;  %v4769_v28 = vsel %vm781_vm0, %v6511_v7, -inf }
 0x7d8   :  { %v4542_v3 = vrot.slane %v4535_v51, %v8104_v19  ;;  %v4770_v48 = vrot.slane %v4769_v28, 4  ;;  %v6513_v18 = vpop.f32.mrf.mxu0 }
 0x7d9   :  { %v4550_v50 = vrot.slane %v4543_v58, %v8104_v19  ;;  %v6514_v43 = vadd.f32 %v6513_v18, %v6512_v55 }
 0x7da   :  { %4577 = vst.msk [vmem:[#allocation2 + $0x45] ss:$8 sm:$0x3] %vm8107_vm1, %v4542_v3  ;;  %v4771_v20 = vmax.f32 %v4769_v28, %v4770_v48  ;;  %v6515_v30 = vpop.f32.mrf.mxu0 }
 0x7db   :  { %v4557_v35 = vrot.slane %v4550_v50, %v8104_v19  ;;  %v4776_v32 = vsel %vm781_vm0, %v6514_v43, -inf }
 0x7dc   :  { %v4772_v1 = vrot.slane %v4771_v20, 2  ;;  %v4777_v22 = vrot.slane %v4776_v32, 4  ;;  %v6516_v57 = vpop.f32.mrf.mxu0 }
 0x7dd   :  { %4580 = vst.msk [vmem:[#allocation2 + $0x55] ss:$8 sm:$0x3] %vm8107_vm1, %v4557_v35  ;;  %v6517_v31 = vadd.f32 %v6516_v57, %v6515_v30 }
 0x7de   :  { %v4773_v26 = vmax.f32 %v4771_v20, %v4772_v1  ;;  %v4778_v15 = vmax.f32 %v4776_v32, %v4777_v22  ;;  %v6518_v60 = vpop.f32.mrf.mxu0 }
 0x7df   :  { %v4783_v53 = vsel %vm781_vm0, %v6517_v31, -inf }
 0x7e0   :  { %v4774_v41 = vrot.slane %v4773_v26, 1  ;;  %v4779_v13 = vrot.slane %v4778_v15, 2  ;;  %v4784_v12 = vrot.slane %v4783_v53, 4  ;;  %v6519_v16 = vpop.f32.mrf.mxu0 }
 0x7e1   :  { %v6520_v9 = vadd.f32 %v6519_v16, %v6518_v60 }
 0x7e2   :  { %v4775_v36 = vmax.f32 %v4773_v26, %v4774_v41  ;;  %v4780_v25 = vmax.f32 %v4778_v15, %v4779_v13  ;;  %v4785_v4 = vmax.f32 %v4783_v53, %v4784_v12  ;;  %v6521_v51 = vpop.f32.mrf.mxu0 }
 0x7e3   :  { %v4790_v55 = vsel %vm781_vm0, %v6520_v9, -inf }
 0x7e4   :  { %v4811_v58 = vsub.f32 %v6511_v7, %v4775_v36  ;;  %v4781_v28 = vrot.slane %v4780_v25, 1  ;;  %v4786_v3 = vrot.slane %v4785_v4, 2  ;;  %v4791_v48 = vrot.slane %v4790_v55, 4  ;;  %v6522_v18 = vpop.f32.mrf.mxu0 }
 0x7e5   :  { %v6523_v50 = vadd.f32 %v6522_v18, %v6521_v51 }
 0x7e6   :  { %v4817_v20 = vmul.f32 1.442695, %v4811_v58  ;;  %v4782_v30 = vmax.f32 %v4780_v25, %v4781_v28  ;;  %v4787_v35 = vmax.f32 %v4785_v4, %v4786_v3  ;;  %v4792_v32 = vmax.f32 %v4790_v55, %v4791_v48  ;;  %v6524_v1 = vpop.f32.mrf.mxu0 }
 0x7e7   :  { %v4797_v22 = vsel %vm781_vm0, %v6523_v50, -inf }
 0x7e8   :  { %6730 = vpow2.f32 %v4817_v20  ;;  %v4812_v57 = vsub.f32 %v6514_v43, %v4782_v30  ;;  %v4788_v26 = vrot.slane %v4787_v35, 1  ;;  %v4793_v15 = vrot.slane %v4792_v32, 2  ;;  %v6525_v60 = vpop.f32.mrf.mxu0 }
 0x7e9   :  { %v4798_v53 = vrot.slane %v4797_v22, 4  ;;  %v6526_v41 = vadd.f32 %v6525_v60, %v6524_v1 }
 0x7ea   :  { %v4819_v7 = vmul.f32 1.442695, %v4812_v57  ;;  %v4789_v13 = vmax.f32 %v4787_v35, %v4788_v26  ;;  %v4794_v12 = vmax.f32 %v4792_v32, %v4793_v15 }
 0x7eb   :  { %v4799_v16 = vmax.f32 %v4797_v22, %v4798_v53  ;;  %v4804_v36 = vsel %vm781_vm0, %v6526_v41, -inf }
 0x7ec   :  { %6732 = vpow2.f32 %v4819_v7  ;;  %v4813_v25 = vsub.f32 %v6517_v31, %v4789_v13  ;;  %v4795_v4 = vrot.slane %v4794_v12, 1  ;;  %v4805_v51 = vrot.slane %v4804_v36, 4 }
 0x7ed   :  { %v4800_v55 = vrot.slane %v4799_v16, 2 }
 0x7ee   :  { %v4821_v58 = vmul.f32 1.442695, %v4813_v25  ;;  %v4796_v28 = vmax.f32 %v4794_v12, %v4795_v4  ;;  %v4806_v3 = vmax.f32 %v4804_v36, %v4805_v51 }
 0x7ef   :  { %v4801_v43 = vmax.f32 %v4799_v16, %v4800_v55 }
 0x7f0   :  { %6734 = vpow2.f32 %v4821_v58  ;;  %v4814_v48 = vsub.f32 %v6520_v9, %v4796_v28  ;;  %v4807_v18 = vrot.slane %v4806_v3, 2 }
 0x7f1   :  { %v4802_v20 = vrot.slane %v4801_v43, 1 }
 0x7f2   :  { %v4823_v30 = vmul.f32 1.442695, %v4814_v48  ;;  %v4808_v1 = vmax.f32 %v4806_v3, %v4807_v18 }
 0x7f3   :  { %v4803_v35 = vmax.f32 %v4801_v43, %v4802_v20 }
 0x7f4   :  { %6736 = vpow2.f32 %v4823_v30  ;;  %v4809_v32 = vrot.slane %v4808_v1, 1 }
 0x7f5   :  { %v9258_v22 = vpop.eup %6730  ;;  %v4815_v57 = vsub.f32 %v6523_v50, %v4803_v35 }
 0x7f6   :  { %v4829_v31 = vsel %vm781_vm0, %v9258_v22, 0.0  ;;  %v4810_v26 = vmax.f32 %v4808_v1, %v4809_v32 }
 0x7f7   :  { %v4830_v15 = vrot.slane %v4829_v31, 4  ;;  %v4825_v60 = vmul.f32 1.442695, %v4815_v57 }
 0x7f8   :  { %v4816_v53 = vsub.f32 %v6526_v41, %v4810_v26 }
 0x7f9   :  { %v9262_v7 = vpop.eup %6732  ;;  %v4831_v9 = vadd.f32 %v4830_v15, %v4829_v31  ;;  %6738 = vpow2.f32 %v4825_v60 }
 0x7fa   :  { %v4836_v13 = vsel %vm781_vm0, %v9262_v7, 0.0  ;;  %v4827_v12 = vmul.f32 1.442695, %v4816_v53 }
 0x7fb   :  { %v4832_v16 = vrot.slane %v4831_v9, 2  ;;  %v4837_v36 = vrot.slane %v4836_v13, 4 }
 0x7fc   :  { %6740 = vpow2.f32 %v4827_v12 }
 0x7fd   :  { %v9266_v25 = vpop.eup %6734  ;;  %v4833_v50 = vadd.f32 %v4832_v16, %v4831_v9  ;;  %v4838_v4 = vadd.f32 %v4837_v36, %v4836_v13 }
 0x7fe   :  { %v4843_v51 = vsel %vm781_vm0, %v9266_v25, 0.0 }
 0x7ff   :  { %v4834_v55 = vrot.slane %v4833_v50, 1  ;;  %v4844_v41 = vrot.slane %v4843_v51, 4  ;;  %v4839_v58 = vrot.slane %v4838_v4, 2 }
 0x801   :  { %v9270_v28 = vpop.eup %6736  ;;  %v4835_v3 = vadd.f32 %v4834_v55, %v4833_v50  ;;  %v4845_v43 = vadd.f32 %v4844_v41, %v4843_v51  ;;  %v4840_v48 = vadd.f32 %v4839_v58, %v4838_v4 }
 0x802   :  { %v4850_v18 = vsel %vm781_vm0, %v9270_v28, 0.0 }
 0x803   :  { %6742 = vrcp.f32 %v4835_v3  ;;  %v4846_v20 = vrot.slane %v4845_v43, 2  ;;  %v4851_v30 = vrot.slane %v4850_v18, 4  ;;  %v4841_v1 = vrot.slane %v4840_v48, 1 }
 0x805   :  { %v4852_v35 = vadd.f32 %v4851_v30, %v4850_v18  ;;  %v4842_v32 = vadd.f32 %v4841_v1, %v4840_v48  ;;  %v4847_v57 = vadd.f32 %v4846_v20, %v4845_v43 }
 0x806   :  { %v9274_v31 = vpop.eup %6738 }
 0x807   :  { %v4853_v26 = vrot.slane %v4852_v35, 2  ;;  %v4857_v15 = vsel %vm781_vm0, %v9274_v31, 0.0  ;;  %6744 = vrcp.f32 %v4842_v32  ;;  %v4848_v60 = vrot.slane %v4847_v57, 1 }
 0x808   :  { %v4858_v53 = vrot.slane %v4857_v15, 4 }
 0x809   :  { %v9278_v9 = vpop.eup %6740  ;;  %v4849_v13 = vadd.f32 %v4848_v60, %v4847_v57  ;;  %v4854_v12 = vadd.f32 %v4853_v26, %v4852_v35 }
 0x80a   :  { %v4859_v16 = vadd.f32 %v4858_v53, %v4857_v15  ;;  %v4864_v36 = vsel %vm781_vm0, %v9278_v9, 0.0 }
 0x80b   :  { %v4865_v50 = vrot.slane %v4864_v36, 4  ;;  %6746 = vrcp.f32 %v4849_v13  ;;  %v4855_v4 = vrot.slane %v4854_v12, 1 }
 0x80c   :  { %v4860_v51 = vrot.slane %v4859_v16, 2 }
 0x80d   :  { %v4866_v55 = vadd.f32 %v4865_v50, %v4864_v36  ;;  %v4856_v41 = vadd.f32 %v4855_v4, %v4854_v12  ;;  %v5578_v4 = vld [vmem:[%s9524_s4 + $0x68] sm:$0xff] }
 0x80e   :  { %v4861_v58 = vadd.f32 %v4860_v51, %v4859_v16  ;;  %v5577_v51 = vld [vmem:[%s9524_s4 + $0x60] sm:$0xff] }
 0x80f   :  { %v4867_v43 = vrot.slane %v4866_v55, 2  ;;  %6748 = vrcp.f32 %v4856_v41 }
 0x810   :  { %v6743_v48 = vpop.eup %6742  ;;  %v4862_v18 = vrot.slane %v4861_v58, 1 }
 0x811   :  { %v4877_v20 = vmul.f32 %v6743_v48, %v4835_v3  ;;  %v4868_v30 = vadd.f32 %v4867_v43, %v4866_v55  ;;  %v5576_v55 = vld [vmem:[%s9524_s4 + $0x58] sm:$0xff]  ;;  %v5573_v43 = vld [vmem:[%s9524_s4 + $0x40] sm:$0xff] }
 0x812   :  { %v4863_v1 = vadd.f32 %v4862_v18, %v4861_v58  ;;  %v5574_v58 = vld [vmem:[%s9524_s4 + $0x48] sm:$0xff]  ;;  %v5571_v18 = vld [vmem:[%s9524_s4 + $0x30] sm:$0xff] }
 0x813   :  { %v4883_v57 = vsub.f32 2.0, %v4877_v20  ;;  %v4869_v35 = vrot.slane %v4868_v30, 1  ;;  %v5570_v20 = vld [vmem:[%s9524_s4 + $0x28] sm:$0xff] }
 0x814   :  { %v6745_v26 = vpop.eup %6744  ;;  %6750 = vrcp.f32 %v4863_v1 }
 0x815   :  { %v4889_v15 = vmul.f32 %v6743_v48, %v4883_v57  ;;  %v4878_v60 = vmul.f32 %v6745_v26, %v4842_v32  ;;  %v4870_v53 = vadd.f32 %v4869_v35, %v4868_v30  ;;  %v5572_v48 = vld [vmem:[%s9524_s4 + $0x38] sm:$0xff]  ;;  %v5569_v30 = vld [vmem:[%s9524_s4 + $0x20] sm:$0xff]  ;;  %v5567_v57 = vld [vmem:[%s9524_s4 + $0x10] sm:$0xff] }
 0x816   :  { %v5566_v35 = vld [vmem:[%s9524_s4 + $0x8] sm:$0xff] }
 0x817   :  { %v4895_v52 = vmul.f32 %v9258_v22, %v4889_v15  ;;  %v4884_v21 = vsub.f32 2.0, %v4878_v60  ;;  %6752 = vrcp.f32 %v4870_v53  ;;  %v5953_v15 = vld [vmem:[#allocation6 + $0xf8] sm:$0xff] }
 0x818   :  { %v6747_v12 = vpop.eup %6746 }
 0x819   :  { %6165 = vmatmul.mubr.msk.f32.vlgmr.msra.gmra.mxu1 %vm781_vm0, %v4895_v52  ;;  %v4890_v16 = vmul.f32 %v6745_v26, %v4884_v21  ;;  %v4879_v36 = vmul.f32 %v6747_v12, %v4849_v13  ;;  %v5579_v13 = vld [vmem:[%s9524_s4 + $0x70] sm:$0xff]  ;;  %v5565_v26 = vld [vmem:[%s9524_s4] sm:$0xff] }
 0x81a   :  { %6528 = vmatpush3.msra.mxu1 %v9004_v59  ;;  %5005 = vmatprep.mubr.f32.mxu1 %v9643_v10 }
 0x81b   :  { %6529 = vmatprep.subr.mxu1 %v9009_v34  ;;  %v4896_v3 = vmul.f32 %v9262_v7, %v4890_v16  ;;  %v4885_v50 = vsub.f32 2.0, %v4879_v36 }
 0x81c   :  { %v6749_v32 = vpop.eup %6748  ;;  %6530 = vmatpush3.msra.mxu1 %v9015_v37 }
 0x81d   :  { %6531 = vmatprep.subr.mxu1 %v9022_v61  ;;  %6166 = vmatmul.mubr.msk.f32.gmra.mxu1 %vm781_vm0, %v4896_v3  ;;  %v4891_v22 = vmul.f32 %v6747_v12, %v4885_v50  ;;  %v4880_v52 = vmul.f32 %v6749_v32, %v4856_v41  ;;  %v5575_v41 = vld [vmem:[%s9524_s4 + $0x50] sm:$0xff]  ;;  %v9753_v3 = vld [vmem:[#allocation15_spill] sm:$0xff] }
 0x81e   :  { %6532 = vmatpush3.msra.mxu1 %v9029_v0  ;;  %5011 = vmatprep.mubr.f32.mxu1 %v9643_v10 }
 0x81f   :  { %6533 = vmatprep.subr.mxu1 %v9035_v49  ;;  %v4897_v21 = vmul.f32 %v9266_v25, %v4891_v22  ;;  %v4886_v59 = vsub.f32 2.0, %v4880_v52  ;;  %v9749_v25 = vld [vmem:[#allocation78_spill] sm:$0xff] }
 0x820   :  { %6534 = vmatpush3.msra.mxu1 %v9042_v24 }
 0x821   :  { %v6751_v34 = vpop.eup %6750  ;;  %6535 = vmatprep.subr.mxu1 %v9049_v33  ;;  %6167 = vmatmul.mubr.msk.f32.gmra.mxu1 %vm781_vm0, %v4897_v21  ;;  %v4892_v37 = vmul.f32 %v6749_v32, %v4886_v59  ;;  %v9754_v21 = vld [vmem:[#allocation18_spill] sm:$0xff] }
 0x822   :  { %6536 = vmatpush3.msra.mxu1 %v9056_v11  ;;  %5017 = vmatprep.mubr.f32.mxu1 %v9643_v10  ;;  %v4881_v61 = vmul.f32 %v6751_v34, %v4863_v1  ;;  %v5568_v1 = vld [vmem:[%s9524_s4 + $0x18] sm:$0xff] }
 0x823   :  { %6537 = vmatprep.subr.mxu1 %v9062_v29  ;;  %v4898_v0 = vmul.f32 %v9270_v28, %v4892_v37  ;;  %v9750_v28 = vld [vmem:[#allocation79_spill] sm:$0xff] }
 0x824   :  { %v6753_v49 = vpop.eup %6752  ;;  %6538 = vmatpush3.msra.mxu1 %v9069_v39  ;;  %v4887_v7 = vsub.f32 2.0, %v4881_v61 }
 0x825   :  { %6539 = vmatprep.subr.mxu1 %v9076_v56  ;;  %6168 = vmatmul.mubr.msk.f32.gmra.mxu1 %vm781_vm0, %v4898_v0  ;;  %v4882_v24 = vmul.f32 %v6753_v49, %v4870_v53  ;;  %v9752_v53 = vld [vmem:[#allocation16_spill] sm:$0xff] }
 0x826   :  { %6540 = vmatpush3.msra.mxu1 %v9083_v23  ;;  %5023 = vmatprep.mubr.f32.mxu1 %v9643_v10  ;;  %v4893_v33 = vmul.f32 %v6751_v34, %v4887_v7  ;;  %v9735_v23 = vld [vmem:[#allocation69_spill] sm:$0xff] }
 0x827   :  { %6541 = vmatprep.subr.mxu1 %v9089_v8  ;;  %v4888_v11 = vsub.f32 2.0, %v4882_v24  ;;  %v9736_v8 = vld [vmem:[#allocation27_spill] sm:$0xff] }
 0x828   :  { %6542 = vmatpush3.msra.mxu1 %v9096_v5  ;;  %v4899_v29 = vmul.f32 %v9274_v31, %v4893_v33  ;;  %v9737_v5 = vld [vmem:[#allocation28_spill] sm:$0xff] }
 0x829   :  { %6543 = vmatprep.subr.mxu1 %v9103_v45  ;;  %v4894_v39 = vmul.f32 %v6753_v49, %v4888_v11  ;;  %v9738_v45 = vld [vmem:[#allocation29_spill] sm:$0xff]  ;;  %v9751_v31 = vld [vmem:[#allocation80_spill] sm:$0xff] }
 0x82a   :  { %6169 = vmatmul.mubr.msk.f32.gmra.mxu1 %vm781_vm0, %v4899_v29  ;;  %v9755_v49 = vld [vmem:[#allocation17_spill] sm:$0xff] }
 0x82b   :  { %6544 = vmatpush3.msra.mxu1 %v9111_v17  ;;  %5029 = vmatprep.mubr.f32.mxu1 %v9643_v10  ;;  %v4900_v56 = vmul.f32 %v9278_v9, %v4894_v39  ;;  %v9739_v17 = vld [vmem:[#allocation30_spill] sm:$0xff]  ;;  %v5580_v9 = vld [vmem:[%s9524_s4 + $0x78] sm:$0xff] }
 0x82c   :  { %6545 = vmatprep.subr.mxu1 %v9117_v42  ;;  %v9740_v42 = vld [vmem:[#allocation32_spill] sm:$0xff]  ;;  %5615 = vmatprep.subr.mxu0 %v5580_v9 }
 0x82d   :  { %6546 = vmatpush3.msra.mxu1 %v9123_v46  ;;  %v9741_v46 = vld [vmem:[#allocation70_spill] sm:$0xff]  ;;  %5616 = vmatpush1.msra.mxu0 %v5579_v13 }
 0x82e   :  { %6547 = vmatprep.subr.mxu1 %v9130_v2  ;;  %6170 = vmatmul.mubr.msk.f32.gmra.mxu1 %vm781_vm0, %v4900_v56  ;;  %v9742_v2 = vld [vmem:[#allocation71_spill] sm:$0xff] }
 0x82f   :  { %6548 = vmatpush3.msra.mxu1 %v9137_v38  ;;  %5402 = vmatprep.mubr.f32.mxu1 %v9735_v23  ;;  %v9743_v38 = vld [vmem:[#allocation72_spill] sm:$0xff]  ;;  %v9756_v56 = vld [vmem:[#allocation19_spill] sm:$0xff] }
 0x830   :  { %6549 = vmatprep.subr.mxu1 %v9143_v6  ;;  %v9744_v6 = vld [vmem:[#allocation73_spill] sm:$0xff]  ;;  %5617 = vmatprep.subr.mxu0 %v5578_v4 }
 0x831   :  { %6550 = vmatpush3.msra.mxu1 %v9150_v27  ;;  %v9745_v27 = vld [vmem:[#allocation74_spill] sm:$0xff]  ;;  %5618 = vmatpush1.msra.mxu0 %v5577_v51 }
 0x832   :  { %6551 = vmatprep.subr.mxu1 %v9157_v63  ;;  %v9746_v63 = vld [vmem:[#allocation75_spill] sm:$0xff]  ;;  %5619 = vmatprep.subr.mxu0 %v5576_v55 }
 0x833   :  { %6552 = vmatpush3.msra.mxu1 %v9163_v14  ;;  %v9747_v14 = vld [vmem:[#allocation76_spill] sm:$0xff]  ;;  %5620 = vmatpush1.msra.mxu0 %v5575_v41 }
 0x834   :  { %6553 = vmatprep.subr.mxu1 %v9169_v44  ;;  %v9748_v44 = vld [vmem:[#allocation77_spill] sm:$0xff]  ;;  %5621 = vmatprep.subr.mxu0 %v5574_v58 }
 0x835   :  { %6554 = vmatpush3.msra.mxu1 %v9736_v8  ;;  %5622 = vmatpush1.msra.mxu0 %v5573_v43 }
 0x836   :  { %6555 = vmatprep.subr.mxu1 %v9737_v5  ;;  %5623 = vmatprep.subr.mxu0 %v5572_v48 }
 0x837   :  { %6556 = vmatpush3.msra.mxu1 %v9738_v45  ;;  %5624 = vmatpush1.msra.mxu0 %v5571_v18 }
 0x838   :  { %6557 = vmatprep.subr.mxu1 %v9739_v17  ;;  %5625 = vmatprep.subr.mxu0 %v5570_v20 }
 0x839   :  { %6558 = vmatpush3.msra.mxu1 %v9740_v42  ;;  %5626 = vmatpush1.msra.mxu0 %v5569_v30 }
 0x83a   :  { %5403 = vmatmul.mubr.f32.vlgmr.msra.gmra.mxu1 %v9741_v46  ;;  %5627 = vmatprep.subr.mxu0 %v5568_v1 }
 0x83b   :  { %5407 = vmatprep.mubr.f32.mxu1 %v9742_v2  ;;  %5628 = vmatpush1.msra.mxu0 %v5567_v57  ;;  %v9757_v2 = vld [vmem:[#allocation22_spill] sm:$0xff] }
 0x83c   :  { %5629 = vmatprep.subr.mxu0 %v5566_v35 }
 0x83d   :  { %5630 = vmatpush1.msra.mxu0 %v5565_v26  ;;  %v9758_v26 = vld [vmem:[#allocation20_spill] sm:$0xff] }
 0x83e   :  { %5408 = vmatmul.mubr.f32.gmra.mxu1 %v9743_v38  ;;  %5998 = vmatprep.subr.mxu0 %v5953_v15 }
 0x83f   :  { %5412 = vmatprep.mubr.f32.mxu1 %v9744_v6 }
 0x842   :  { %5413 = vmatmul.mubr.f32.gmra.mxu1 %v9745_v27 }
 0x843   :  { %5417 = vmatprep.mubr.f32.mxu1 %v9746_v63 }
 0x846   :  { %5418 = vmatmul.mubr.f32.gmra.mxu1 %v9747_v14 }
 0x847   :  { %5422 = vmatprep.mubr.f32.mxu1 %v9748_v44 }
 0x84a   :  { %5423 = vmatmul.mubr.f32.gmra.mxu1 %v9749_v25 }
 0x84b   :  { %5427 = vmatprep.mubr.f32.mxu1 %v9750_v28 }
 0x84e   :  { %5428 = vmatmul.mubr.f32.gmra.mxu1 %v9751_v31 }
 0x8d9   :  { %v5001_v60 = vpop.f32.mrf.mxu1 }
 0x8da   :  { %v5036_v12 = vmul.f32 %v5001_v60, %v9752_v53 }
 0x8db   :  { %v5003_v16 = vpop.f32.mrf.mxu1 }
 0x8dc   :  { %v5048_v36 = vrot.slane %v5036_v12, 4  ;;  %v5037_v50 = vmul.f32 %v5003_v16, %v9753_v3 }
 0x8dd   :  { %v5007_v32 = vpop.f32.mrf.mxu1 }
 0x8de   :  { %v5049_v22 = vadd.f32 %v5048_v36, %v5036_v12  ;;  %v5054_v52 = vrot.slane %v5037_v50, 4  ;;  %v5038_v59 = vmul.f32 %v5007_v32, %v9754_v21 }
 0x8df   :  { %v5009_v34 = vpop.f32.mrf.mxu1 }
 0x8e0   :  { %v5050_v37 = vrot.slane %v5049_v22, 2  ;;  %v5055_v61 = vadd.f32 %v5054_v52, %v5037_v50  ;;  %v5060_v0 = vrot.slane %v5038_v59, 4  ;;  %v5039_v7 = vmul.f32 %v5009_v34, %v9755_v49 }
 0x8e1   :  { %v5013_v24 = vpop.f32.mrf.mxu1 }
 0x8e2   :  { %v5051_v33 = vadd.f32 %v5050_v37, %v5049_v22  ;;  %v5056_v11 = vrot.slane %v5055_v61, 2  ;;  %v5061_v29 = vadd.f32 %v5060_v0, %v5038_v59  ;;  %v5066_v39 = vrot.slane %v5039_v7, 4 }
 0x8e3   :  { %v5040_v23 = vmul.f32 %v5013_v24, %v9756_v56  ;;  %v5015_v8 = vpop.f32.mrf.mxu1 }
 0x8e4   :  { %v5052_v5 = vrot.slane %v5051_v33, 1  ;;  %v5057_v45 = vadd.f32 %v5056_v11, %v5055_v61  ;;  %v5062_v17 = vrot.slane %v5061_v29, 2  ;;  %v5067_v42 = vadd.f32 %v5066_v39, %v5039_v7 }
 0x8e5   :  { %v5072_v46 = vrot.slane %v5040_v23, 4  ;;  %v5041_v38 = vmul.f32 %v5015_v8, %v9757_v2  ;;  %v5019_v6 = vpop.f32.mrf.mxu1 }
 0x8e6   :  { %v5058_v27 = vrot.slane %v5057_v45, 1  ;;  %v5063_v63 = vadd.f32 %v5062_v17, %v5061_v29  ;;  %v5068_v14 = vrot.slane %v5067_v42, 2  ;;  %v5053_v44 = vadd.f32 %v5052_v5, %v5051_v33  ;;  %v9759_v5 = vld [vmem:[#allocation12_spill] sm:$0xff] }
 0x8e7   :  { %v5073_v25 = vadd.f32 %v5072_v46, %v5040_v23  ;;  %v5078_v28 = vrot.slane %v5041_v38, 4  ;;  %v5042_v31 = vmul.f32 %v5019_v6, %v8098_v40  ;;  %v5021_v9 = vpop.f32.mrf.mxu1  ;;  %v9760_v6 = vld [vmem:[#allocation81_spill] sm:$0xff] }
 0x8e8   :  { %v5059_v13 = vadd.f32 %v5058_v27, %v5057_v45  ;;  %v5064_v4 = vrot.slane %v5063_v63, 1  ;;  %v5069_v51 = vadd.f32 %v5068_v14, %v5067_v42  ;;  %v5043_v55 = vmul.f32 %v5021_v9, %v8101_v54 }
 0x8e9   :  { %v5074_v41 = vrot.slane %v5073_v25, 2  ;;  %v5079_v58 = vadd.f32 %v5078_v28, %v5041_v38  ;;  %v5084_v43 = vrot.slane %v5042_v31, 4 }
 0x8ea   :  { %v5132_v48 = vcombine.low %v5053_v44, %v5059_v13  ;;  %v5070_v18 = vrot.slane %v5069_v51, 1  ;;  %v5090_v20 = vrot.slane %v5043_v55, 4  ;;  %v5025_v30 = vpop.f32.mrf.mxu1  ;;  %v5065_v12 = vadd.f32 %v5064_v4, %v5063_v63 }
 0x8eb   :  { %v5075_v1 = vadd.f32 %v5074_v41, %v5073_v25  ;;  %v5080_v57 = vrot.slane %v5079_v58, 2  ;;  %v5085_v35 = vadd.f32 %v5084_v43, %v5042_v31  ;;  %v5044_v15 = vmul.f32 %v5025_v30, %v9758_v26 }
 0x8ec   :  { %v5139_v60 = vrot.slane %v5132_v48, %v8104_v19  ;;  %v5071_v16 = vadd.f32 %v5070_v18, %v5069_v51  ;;  %v5091_v36 = vadd.f32 %v5090_v20, %v5043_v55  ;;  %v5027_v50 = vpop.f32.mrf.mxu1 }
 0x8ed   :  { %v5076_v32 = vrot.slane %v5075_v1, 1  ;;  %v5081_v22 = vadd.f32 %v5080_v57, %v5079_v58  ;;  %v5086_v52 = vrot.slane %v5085_v35, 2  ;;  %v5096_v59 = vrot.slane %v5044_v15, 4 }
 0x8ee   :  { %v5146_v34 = vrot.slane %v5139_v60, %v8104_v19  ;;  %v5147_v37 = vcombine.low %v5065_v12, %v5071_v16  ;;  %v5092_v61 = vrot.slane %v5091_v36, 2  ;;  %v5045_v0 = vmul.f32 %v5027_v50, %v8116_v47  ;;  %v5031_v7 = vpop.f32.mrf.mxu1 }
 0x8ef   :  { %v5077_v24 = vadd.f32 %v5076_v32, %v5075_v1  ;;  %v5082_v33 = vrot.slane %v5081_v22, 1  ;;  %v5087_v11 = vadd.f32 %v5086_v52, %v5085_v35  ;;  %v5097_v29 = vadd.f32 %v5096_v59, %v5044_v15 }
 0x8f0   :  { %5229 = vst.msk [vmem:[#allocation2 + $0x6] ss:$8 sm:$0x3] %vm8107_vm1, %v5146_v34  ;;  %v5154_v39 = vrot.slane %v5147_v37, %v8104_v19  ;;  %v5093_v23 = vadd.f32 %v5092_v61, %v5091_v36  ;;  %v5102_v8 = vrot.slane %v5045_v0, 4  ;;  %v5046_v45 = vmul.f32 %v5031_v7, %v9759_v5  ;;  %v5033_v17 = vpop.f32.mrf.mxu1 }
 0x8f1   :  { %v5083_v42 = vadd.f32 %v5082_v33, %v5081_v22  ;;  %v5088_v46 = vrot.slane %v5087_v11, 1  ;;  %v5098_v38 = vrot.slane %v5097_v29, 2  ;;  %v5047_v27 = vmul.f32 %v5033_v17, %v9760_v6 }
 0x8f2   :  { %v5161_v63 = vrot.slane %v5154_v39, %v8104_v19  ;;  %v5094_v14 = vrot.slane %v5093_v23, 1  ;;  %v5103_v44 = vadd.f32 %v5102_v8, %v5045_v0  ;;  %v5108_v25 = vrot.slane %v5046_v45, 4 }
 0x8f3   :  { %v5162_v28 = vcombine.low %v5077_v24, %v5083_v42  ;;  %v5099_v31 = vadd.f32 %v5098_v38, %v5097_v29  ;;  %v5114_v9 = vrot.slane %v5047_v27, 4  ;;  %v5089_v13 = vadd.f32 %v5088_v46, %v5087_v11 }
 0x8f4   :  { %5232 = vst.msk [vmem:[#allocation2 + $0x16] ss:$8 sm:$0x3] %vm8107_vm1, %v5161_v63  ;;  %v5095_v4 = vadd.f32 %v5094_v14, %v5093_v23  ;;  %v5104_v51 = vrot.slane %v5103_v44, 2  ;;  %v5109_v55 = vadd.f32 %v5108_v25, %v5046_v45 }
 0x8f5   :  { %v5169_v41 = vrot.slane %v5162_v28, %v8104_v19  ;;  %v5115_v58 = vadd.f32 %v5114_v9, %v5047_v27  ;;  %v5100_v48 = vrot.slane %v5099_v31, 1 }
 0x8f6   :  { %v5177_v43 = vcombine.low %v5089_v13, %v5095_v4  ;;  %v5105_v18 = vadd.f32 %v5104_v51, %v5103_v44  ;;  %v5110_v20 = vrot.slane %v5109_v55, 2 }
 0x8f7   :  { %v5176_v30 = vrot.slane %v5169_v41, %v8104_v19  ;;  %v5116_v1 = vrot.slane %v5115_v58, 2  ;;  %v5101_v16 = vadd.f32 %v5100_v48, %v5099_v31 }
 0x8f8   :  { %v5184_v57 = vrot.slane %v5177_v43, %v8104_v19  ;;  %v5106_v35 = vrot.slane %v5105_v18, 1  ;;  %v5111_v15 = vadd.f32 %v5110_v20, %v5109_v55 }
 0x8f9   :  { %5235 = vst.msk [vmem:[#allocation2 + $0x26] ss:$8 sm:$0x3] %vm8107_vm1, %v5176_v30  ;;  %v5117_v60 = vadd.f32 %v5116_v1, %v5115_v58 }
 0x8fa   :  { %v5191_v12 = vrot.slane %v5184_v57, %v8104_v19  ;;  %v5107_v36 = vadd.f32 %v5106_v35, %v5105_v18  ;;  %v5112_v50 = vrot.slane %v5111_v15, 1  ;;  %v6559_v32 = vpop.f32.mrf.mxu1 }
 0x8fb   :  { %v5118_v22 = vrot.slane %v5117_v60, 1 }
 0x8fc   :  { %5238 = vst.msk [vmem:[#allocation2 + $0x36] ss:$8 sm:$0x3] %vm8107_vm1, %v5191_v12  ;;  %v5192_v52 = vcombine.low %v5101_v16, %v5107_v36  ;;  %v6560_v59 = vpop.f32.mrf.mxu1  ;;  %v5113_v34 = vadd.f32 %v5112_v50, %v5111_v15 }
 0x8fd   :  { %v5119_v37 = vadd.f32 %v5118_v22, %v5117_v60  ;;  %v6561_v61 = vadd.f32 %v6560_v59, %v6559_v32 }
 0x8fe   :  { %v5199_v0 = vrot.slane %v5192_v52, %v8104_v19  ;;  %v6562_v7 = vpop.f32.mrf.mxu1 }
 0x8ff   :  { %v5207_v24 = vcombine.low %v5113_v34, %v5119_v37  ;;  %v5433_v33 = vsel %vm781_vm0, %v6561_v61, -inf }
 0x900   :  { %v5206_v11 = vrot.slane %v5199_v0, %v8104_v19  ;;  %v5434_v29 = vrot.slane %v5433_v33, 4  ;;  %v6563_v39 = vpop.f32.mrf.mxu1 }
 0x901   :  { %v5214_v23 = vrot.slane %v5207_v24, %v8104_v19  ;;  %v6564_v8 = vadd.f32 %v6563_v39, %v6562_v7 }
 0x902   :  { %5241 = vst.msk [vmem:[#allocation2 + $0x46] ss:$8 sm:$0x3] %vm8107_vm1, %v5206_v11  ;;  %v5435_v45 = vmax.f32 %v5433_v33, %v5434_v29  ;;  %v6565_v17 = vpop.f32.mrf.mxu1 }
 0x903   :  { %v5221_v42 = vrot.slane %v5214_v23, %v8104_v19  ;;  %v5440_v46 = vsel %vm781_vm0, %v6564_v8, -inf }
 0x904   :  { %v5436_v38 = vrot.slane %v5435_v45, 2  ;;  %v5441_v27 = vrot.slane %v5440_v46, 4  ;;  %v6566_v63 = vpop.f32.mrf.mxu1 }
 0x905   :  { %5244 = vst.msk [vmem:[#allocation2 + $0x56] ss:$8 sm:$0x3] %vm8107_vm1, %v5221_v42  ;;  %v6567_v14 = vadd.f32 %v6566_v63, %v6565_v17 }
 0x906   :  { %v5437_v44 = vmax.f32 %v5435_v45, %v5436_v38  ;;  %v5442_v25 = vmax.f32 %v5440_v46, %v5441_v27  ;;  %v6568_v28 = vpop.f32.mrf.mxu1 }
 0x907   :  { %v5447_v31 = vsel %vm781_vm0, %v6567_v14, -inf }
 0x908   :  { %v5438_v9 = vrot.slane %v5437_v44, 1  ;;  %v5443_v13 = vrot.slane %v5442_v25, 2  ;;  %v5448_v4 = vrot.slane %v5447_v31, 4  ;;  %v6569_v51 = vpop.f32.mrf.mxu1 }
 0x909   :  { %v6570_v55 = vadd.f32 %v6569_v51, %v6568_v28 }
 0x90a   :  { %v5439_v41 = vmax.f32 %v5437_v44, %v5438_v9  ;;  %v5444_v58 = vmax.f32 %v5442_v25, %v5443_v13  ;;  %v5449_v43 = vmax.f32 %v5447_v31, %v5448_v4  ;;  %v6571_v48 = vpop.f32.mrf.mxu1 }
 0x90b   :  { %v5454_v18 = vsel %vm781_vm0, %v6570_v55, -inf }
 0x90c   :  { %v5475_v20 = vsub.f32 %v6561_v61, %v5439_v41  ;;  %v5445_v30 = vrot.slane %v5444_v58, 1  ;;  %v5450_v1 = vrot.slane %v5449_v43, 2  ;;  %v5455_v57 = vrot.slane %v5454_v18, 4  ;;  %v6572_v35 = vpop.f32.mrf.mxu1 }
 0x90d   :  { %v6573_v15 = vadd.f32 %v6572_v35, %v6571_v48 }
 0x90e   :  { %v5481_v60 = vmul.f32 1.442695, %v5475_v20  ;;  %v5446_v12 = vmax.f32 %v5444_v58, %v5445_v30  ;;  %v5451_v16 = vmax.f32 %v5449_v43, %v5450_v1  ;;  %v5456_v36 = vmax.f32 %v5454_v18, %v5455_v57  ;;  %v6574_v50 = vpop.f32.mrf.mxu1 }
 0x90f   :  { %v5461_v32 = vsel %vm781_vm0, %v6573_v15, -inf }
 0x910   :  { %6754 = vpow2.f32 %v5481_v60  ;;  %v5476_v22 = vsub.f32 %v6564_v8, %v5446_v12  ;;  %v5452_v52 = vrot.slane %v5451_v16, 1  ;;  %v5457_v59 = vrot.slane %v5456_v36, 2  ;;  %v6575_v34 = vpop.f32.mrf.mxu1 }
 0x911   :  { %v5462_v37 = vrot.slane %v5461_v32, 4  ;;  %v6576_v0 = vadd.f32 %v6575_v34, %v6574_v50 }
 0x912   :  { %v5483_v61 = vmul.f32 1.442695, %v5476_v22  ;;  %v5453_v7 = vmax.f32 %v5451_v16, %v5452_v52  ;;  %v5458_v24 = vmax.f32 %v5456_v36, %v5457_v59 }
 0x913   :  { %v5463_v33 = vmax.f32 %v5461_v32, %v5462_v37  ;;  %v5468_v11 = vsel %vm781_vm0, %v6576_v0, -inf }
 0x914   :  { %6756 = vpow2.f32 %v5483_v61  ;;  %v5477_v29 = vsub.f32 %v6567_v14, %v5453_v7  ;;  %v5459_v39 = vrot.slane %v5458_v24, 1  ;;  %v5469_v23 = vrot.slane %v5468_v11, 4 }
 0x915   :  { %v5464_v45 = vrot.slane %v5463_v33, 2 }
 0x916   :  { %v5485_v17 = vmul.f32 1.442695, %v5477_v29  ;;  %v5460_v42 = vmax.f32 %v5458_v24, %v5459_v39  ;;  %v5470_v46 = vmax.f32 %v5468_v11, %v5469_v23 }
 0x917   :  { %v5465_v8 = vmax.f32 %v5463_v33, %v5464_v45 }
 0x918   :  { %6758 = vpow2.f32 %v5485_v17  ;;  %v5478_v38 = vsub.f32 %v6570_v55, %v5460_v42  ;;  %v5471_v27 = vrot.slane %v5470_v46, 2 }
 0x919   :  { %v5466_v63 = vrot.slane %v5465_v8, 1 }
 0x91a   :  { %v5487_v44 = vmul.f32 1.442695, %v5478_v38  ;;  %v5472_v25 = vmax.f32 %v5470_v46, %v5471_v27 }
 0x91b   :  { %v5467_v28 = vmax.f32 %v5465_v8, %v5466_v63 }
 0x91c   :  { %6760 = vpow2.f32 %v5487_v44  ;;  %v5473_v31 = vrot.slane %v5472_v25, 1 }
 0x91d   :  { %v9432_v9 = vpop.eup %6754  ;;  %v5479_v13 = vsub.f32 %v6573_v15, %v5467_v28 }
 0x91e   :  { %v5493_v14 = vsel %vm781_vm0, %v9432_v9, 0.0  ;;  %v5474_v4 = vmax.f32 %v5472_v25, %v5473_v31 }
 0x91f   :  { %v5494_v51 = vrot.slane %v5493_v14, 4  ;;  %v5489_v41 = vmul.f32 1.442695, %v5479_v13 }
 0x920   :  { %v5480_v58 = vsub.f32 %v6576_v0, %v5474_v4 }
 0x921   :  { %v9436_v43 = vpop.eup %6756  ;;  %v5495_v55 = vadd.f32 %v5494_v51, %v5493_v14  ;;  %6762 = vpow2.f32 %v5489_v41 }
 0x922   :  { %v5500_v48 = vsel %vm781_vm0, %v9436_v43, 0.0  ;;  %v5491_v18 = vmul.f32 1.442695, %v5480_v58 }
 0x923   :  { %v5496_v20 = vrot.slane %v5495_v55, 2  ;;  %v5501_v30 = vrot.slane %v5500_v48, 4 }
 0x924   :  { %6764 = vpow2.f32 %v5491_v18 }
 0x925   :  { %v9440_v1 = vpop.eup %6758  ;;  %v5497_v57 = vadd.f32 %v5496_v20, %v5495_v55  ;;  %v5502_v35 = vadd.f32 %v5501_v30, %v5500_v48 }
 0x926   :  { %v5507_v15 = vsel %vm781_vm0, %v9440_v1, 0.0 }
 0x927   :  { %v5498_v60 = vrot.slane %v5497_v57, 1  ;;  %v5508_v12 = vrot.slane %v5507_v15, 4  ;;  %v5503_v16 = vrot.slane %v5502_v35, 2 }
 0x929   :  { %v9444_v36 = vpop.eup %6760  ;;  %v5499_v50 = vadd.f32 %v5498_v60, %v5497_v57  ;;  %v5504_v32 = vadd.f32 %v5503_v16, %v5502_v35  ;;  %v5509_v22 = vadd.f32 %v5508_v12, %v5507_v15  ;;  %v5952_v35 = vld [vmem:[#allocation6 + $0xf0] sm:$0xff]  ;;  %v5951_v60 = vld [vmem:[#allocation6 + $0xe8] sm:$0xff] }
 0x92a   :  { %v5514_v52 = vsel %vm781_vm0, %v9444_v36, 0.0 }
 0x92b   :  { %6766 = vrcp.f32 %v5499_v50  ;;  %v5515_v59 = vrot.slane %v5514_v52, 4  ;;  %v5505_v34 = vrot.slane %v5504_v32, 1  ;;  %v5510_v37 = vrot.slane %v5509_v22, 2 }
 0x92d   :  { %v5506_v0 = vadd.f32 %v5505_v34, %v5504_v32  ;;  %v5511_v61 = vadd.f32 %v5510_v37, %v5509_v22  ;;  %v5516_v7 = vadd.f32 %v5515_v59, %v5514_v52  ;;  %v5949_v32 = vld [vmem:[#allocation6 + $0xd8] sm:$0xff]  ;;  %v5948_v59 = vld [vmem:[#allocation6 + $0xd0] sm:$0xff]  ;;  %v5947_v34 = vld [vmem:[#allocation6 + $0xc8] sm:$0xff] }
 0x92e   :  { %v9448_v24 = vpop.eup %6762 }
 0x92f   :  { %v5521_v33 = vsel %vm781_vm0, %v9448_v24, 0.0  ;;  %6768 = vrcp.f32 %v5506_v0  ;;  %v5512_v11 = vrot.slane %v5511_v61, 1  ;;  %v5517_v29 = vrot.slane %v5516_v7, 2 }
 0x930   :  { %v5522_v39 = vrot.slane %v5521_v33, 4 }
 0x931   :  { %v9452_v23 = vpop.eup %6764  ;;  %v5513_v45 = vadd.f32 %v5512_v11, %v5511_v61  ;;  %v5518_v17 = vadd.f32 %v5517_v29, %v5516_v7  ;;  %v5946_v61 = vld [vmem:[#allocation6 + $0xc0] sm:$0xff]  ;;  %v5945_v7 = vld [vmem:[#allocation6 + $0xb8] sm:$0xff]  ;;  %v5943_v29 = vld [vmem:[#allocation6 + $0xa8] sm:$0xff] }
 0x932   :  { %v5528_v42 = vsel %vm781_vm0, %v9452_v23, 0.0  ;;  %v5523_v46 = vadd.f32 %v5522_v39, %v5521_v33 }
 0x933   :  { %v5529_v8 = vrot.slane %v5528_v42, 4  ;;  %6770 = vrcp.f32 %v5513_v45  ;;  %v5519_v38 = vrot.slane %v5518_v17, 1 }
 0x934   :  { %v5524_v27 = vrot.slane %v5523_v46, 2 }
 0x935   :  { %v5520_v63 = vadd.f32 %v5519_v38, %v5518_v17  ;;  %v5530_v44 = vadd.f32 %v5529_v8, %v5528_v42  ;;  %v5942_v17 = vld [vmem:[#allocation6 + $0xa0] sm:$0xff] }
 0x936   :  { %v5525_v25 = vadd.f32 %v5524_v27, %v5523_v46  ;;  %v5941_v46 = vld [vmem:[#allocation6 + $0x98] sm:$0xff] }
 0x937   :  { %6772 = vrcp.f32 %v5520_v63  ;;  %v5531_v28 = vrot.slane %v5530_v44, 2 }
 0x938   :  { %v6767_v31 = vpop.eup %6766  ;;  %v5526_v13 = vrot.slane %v5525_v25, 1 }
 0x939   :  { %v5541_v14 = vmul.f32 %v6767_v31, %v5499_v50  ;;  %v5532_v4 = vadd.f32 %v5531_v28, %v5530_v44  ;;  %v5950_v50 = vld [vmem:[#allocation6 + $0xe0] sm:$0xff] }
 0x93a   :  { %v5527_v51 = vadd.f32 %v5526_v13, %v5525_v25  ;;  %v5938_v25 = vld [vmem:[#allocation6 + $0x80] sm:$0xff] }
 0x93b   :  { %v5547_v41 = vsub.f32 2.0, %v5541_v14  ;;  %v5533_v58 = vrot.slane %v5532_v4, 1  ;;  %v5936_v14 = vld [vmem:[#allocation6 + $0x70] sm:$0xff] }
 0x93c   :  { %v6769_v55 = vpop.eup %6768  ;;  %6774 = vrcp.f32 %v5527_v51 }
 0x93d   :  { %v5553_v48 = vmul.f32 %v6767_v31, %v5547_v41  ;;  %v5542_v18 = vmul.f32 %v6769_v55, %v5506_v0  ;;  %v5534_v20 = vadd.f32 %v5533_v58, %v5532_v4  ;;  %v5937_v31 = vld [vmem:[#allocation6 + $0x78] sm:$0xff]  ;;  %v5934_v41 = vld [vmem:[#allocation6 + $0x60] sm:$0xff] }
 0x93f   :  { %v5559_v30 = vmul.f32 %v9432_v9, %v5553_v48  ;;  %v5548_v57 = vsub.f32 2.0, %v5542_v18  ;;  %6776 = vrcp.f32 %v5534_v20  ;;  %v5932_v48 = vld [vmem:[#allocation6 + $0x50] sm:$0xff]  ;;  %v5931_v18 = vld [vmem:[#allocation6 + $0x48] sm:$0xff] }
 0x940   :  { %v6771_v15 = vpop.eup %6770 }
 0x941   :  { %6171 = vmatmul.mubr.msk.f32.vlgmr.msra.gmra.mxu0 %vm781_vm0, %v5559_v30  ;;  %v5554_v12 = vmul.f32 %v6769_v55, %v5548_v57  ;;  %v5543_v16 = vmul.f32 %v6771_v15, %v5513_v45  ;;  %v5933_v55 = vld [vmem:[#allocation6 + $0x58] sm:$0xff]  ;;  %v5928_v30 = vld [vmem:[#allocation6 + $0x30] sm:$0xff]  ;;  %v5927_v57 = vld [vmem:[#allocation6 + $0x28] sm:$0xff] }
 0x942   :  { %5669 = vmatprep.mubr.f32.mxu0 %v9643_v10  ;;  %5999 = vmatpush1.msra.mxu0 %v5952_v35  ;;  %v5924_v35 = vld [vmem:[#allocation6 + $0x10] sm:$0xff] }
 0x943   :  { %v5560_v22 = vmul.f32 %v9436_v43, %v5554_v12  ;;  %v5549_v52 = vsub.f32 2.0, %v5543_v16  ;;  %6000 = vmatprep.subr.mxu0 %v5951_v60  ;;  %v5944_v43 = vld [vmem:[#allocation6 + $0xb0] sm:$0xff]  ;;  %v5922_v60 = vld [vmem:[#allocation6] sm:$0xff]  ;;  %v5985_v12 = vld [vmem:[#allocation6 + $0x1f8] sm:$0xff] }
 0x944   :  { %v6773_v9 = vpop.eup %6772  ;;  %6001 = vmatpush1.msra.mxu0 %v5950_v50  ;;  %v5984_v16 = vld [vmem:[#allocation6 + $0x1f0] sm:$0xff]  ;;  %v5983_v50 = vld [vmem:[#allocation6 + $0x1e8] sm:$0xff] }
 0x945   :  { %6172 = vmatmul.mubr.msk.f32.gmra.mxu0 %vm781_vm0, %v5560_v22  ;;  %v5555_v37 = vmul.f32 %v6771_v15, %v5549_v52  ;;  %v5544_v0 = vmul.f32 %v6773_v9, %v5520_v63  ;;  %6002 = vmatprep.subr.mxu0 %v5949_v32  ;;  %v5939_v63 = vld [vmem:[#allocation6 + $0x88] sm:$0xff]  ;;  %v5982_v32 = vld [vmem:[#allocation6 + $0x1e0] sm:$0xff]  ;;  %v5981_v22 = vld [vmem:[#allocation6 + $0x1d8] sm:$0xff] }
 0x946   :  { %5675 = vmatprep.mubr.f32.mxu0 %v9643_v10  ;;  %6003 = vmatpush1.msra.mxu0 %v5948_v59  ;;  %v5923_v15 = vld [vmem:[#allocation6 + $0x8] sm:$0xff]  ;;  %v5980_v52 = vld [vmem:[#allocation6 + $0x1d0] sm:$0xff] }
 0x947   :  { %v5561_v33 = vmul.f32 %v9440_v1, %v5555_v37  ;;  %v5550_v11 = vsub.f32 2.0, %v5544_v0  ;;  %6004 = vmatprep.subr.mxu0 %v5947_v34  ;;  %v5940_v1 = vld [vmem:[#allocation6 + $0x90] sm:$0xff]  ;;  %v5979_v59 = vld [vmem:[#allocation6 + $0x1c8] sm:$0xff]  ;;  %v5977_v34 = vld [vmem:[#allocation6 + $0x1b8] sm:$0xff] }
 0x948   :  { %6005 = vmatpush1.msra.mxu0 %v5946_v61  ;;  %v5976_v37 = vld [vmem:[#allocation6 + $0x1b0] sm:$0xff]  ;;  %v5975_v0 = vld [vmem:[#allocation6 + $0x1a8] sm:$0xff]  ;;  %v5974_v61 = vld [vmem:[#allocation6 + $0x1a0] sm:$0xff] }
 0x949   :  { %v6775_v39 = vpop.eup %6774  ;;  %6173 = vmatmul.mubr.msk.f32.gmra.mxu0 %vm781_vm0, %v5561_v33  ;;  %v5556_v45 = vmul.f32 %v6773_v9, %v5550_v11  ;;  %6006 = vmatprep.subr.mxu0 %v5945_v7  ;;  %v5978_v9 = vld [vmem:[#allocation6 + $0x1c0] sm:$0xff]  ;;  %v5973_v7 = vld [vmem:[#allocation6 + $0x198] sm:$0xff]  ;;  %v5972_v33 = vld [vmem:[#allocation6 + $0x190] sm:$0xff] }
 0x94a   :  { %5681 = vmatprep.mubr.f32.mxu0 %v9643_v10  ;;  %v5545_v42 = vmul.f32 %v6775_v39, %v5527_v51  ;;  %6007 = vmatpush1.msra.mxu0 %v5944_v43  ;;  %v5935_v51 = vld [vmem:[#allocation6 + $0x68] sm:$0xff]  ;;  %v5970_v43 = vld [vmem:[#allocation6 + $0x180] sm:$0xff] }
 0x94b   :  { %v5562_v8 = vmul.f32 %v9444_v36, %v5556_v45  ;;  %6008 = vmatprep.subr.mxu0 %v5943_v29  ;;  %v5971_v11 = vld [vmem:[#allocation6 + $0x188] sm:$0xff]  ;;  %v5969_v29 = vld [vmem:[#allocation6 + $0x178] sm:$0xff] }
 0x94c   :  { %v6777_v38 = vpop.eup %6776  ;;  %v5551_v27 = vsub.f32 2.0, %v5545_v42  ;;  %6009 = vmatpush1.msra.mxu0 %v5942_v17  ;;  %v5967_v45 = vld [vmem:[#allocation6 + $0x168] sm:$0xff]  ;;  %v5966_v17 = vld [vmem:[#allocation6 + $0x160] sm:$0xff]  ;;  %v5965_v42 = vld [vmem:[#allocation6 + $0x158] sm:$0xff] }
 0x94d   :  { %6174 = vmatmul.mubr.msk.f32.gmra.mxu0 %vm781_vm0, %v5562_v8  ;;  %v5546_v44 = vmul.f32 %v6777_v38, %v5534_v20  ;;  %6010 = vmatprep.subr.mxu0 %v5941_v46  ;;  %v5929_v20 = vld [vmem:[#allocation6 + $0x38] sm:$0xff]  ;;  %v5964_v46 = vld [vmem:[#allocation6 + $0x150] sm:$0xff]  ;;  %v5963_v8 = vld [vmem:[#allocation6 + $0x148] sm:$0xff] }
 0x94e   :  { %5687 = vmatprep.mubr.f32.mxu0 %v9643_v10  ;;  %v5557_v28 = vmul.f32 %v6775_v39, %v5551_v27  ;;  %6011 = vmatpush1.msra.mxu0 %v5940_v1  ;;  %v5968_v39 = vld [vmem:[#allocation6 + $0x170] sm:$0xff]  ;;  %v5962_v1 = vld [vmem:[#allocation6 + $0x140] sm:$0xff] }
 0x94f   :  { %v5552_v13 = vsub.f32 2.0, %v5546_v44  ;;  %6012 = vmatprep.subr.mxu0 %v5939_v63  ;;  %v5960_v27 = vld [vmem:[#allocation6 + $0x130] sm:$0xff]  ;;  %v5959_v63 = vld [vmem:[#allocation6 + $0x128] sm:$0xff]  ;;  %v5958_v44 = vld [vmem:[#allocation6 + $0x120] sm:$0xff] }
 0x950   :  { %v5563_v36 = vmul.f32 %v9448_v24, %v5557_v28  ;;  %6013 = vmatpush1.msra.mxu0 %v5938_v25  ;;  %v5930_v24 = vld [vmem:[#allocation6 + $0x40] sm:$0xff]  ;;  %v5957_v25 = vld [vmem:[#allocation6 + $0x118] sm:$0xff]  ;;  %v5956_v28 = vld [vmem:[#allocation6 + $0x110] sm:$0xff] }
 0x951   :  { %v5558_v4 = vmul.f32 %v6777_v38, %v5552_v13  ;;  %6014 = vmatprep.subr.mxu0 %v5937_v31  ;;  %v5961_v38 = vld [vmem:[#allocation6 + $0x138] sm:$0xff]  ;;  %v5955_v31 = vld [vmem:[#allocation6 + $0x108] sm:$0xff]  ;;  %v5954_v13 = vld [vmem:[#allocation6 + $0x100] sm:$0xff] }
 0x952   :  { %6175 = vmatmul.mubr.msk.f32.gmra.mxu0 %vm781_vm0, %v5563_v36 }
 0x953   :  { %5693 = vmatprep.mubr.f32.mxu0 %v9643_v10  ;;  %v5564_v58 = vmul.f32 %v9452_v23, %v5558_v4  ;;  %6015 = vmatpush1.msra.mxu0 %v5936_v14  ;;  %v5926_v10 = vld [vmem:[#allocation6 + $0x20] sm:$0xff]  ;;  %v5925_v23 = vld [vmem:[#allocation6 + $0x18] sm:$0xff] }
 0x954   :  { %6016 = vmatprep.subr.mxu0 %v5935_v51 }
 0x955   :  { %6017 = vmatpush1.msra.mxu0 %v5934_v41 }
 0x956   :  { %6176 = vmatmul.mubr.msk.f32.gmra.mxu0 %vm781_vm0, %v5564_v58  ;;  %6018 = vmatprep.subr.mxu0 %v5933_v55 }
 0x957   :  { %6019 = vmatpush1.msra.mxu0 %v5932_v48 }
 0x958   :  { %6020 = vmatprep.subr.mxu0 %v5931_v18 }
 0x959   :  { %6021 = vmatpush1.msra.mxu0 %v5930_v24 }
 0x95a   :  { %6022 = vmatprep.subr.mxu0 %v5929_v20 }
 0x95b   :  { %6023 = vmatpush1.msra.mxu0 %v5928_v30 }
 0x95c   :  { %6024 = vmatprep.subr.mxu0 %v5927_v57 }
 0x95d   :  { %6025 = vmatpush1.msra.mxu0 %v5926_v10 }
 0x95e   :  { %6026 = vmatprep.subr.mxu0 %v5925_v23 }
 0x95f   :  { %6027 = vmatpush1.msra.mxu0 %v5924_v35 }
 0x960   :  { %6028 = vmatprep.subr.mxu0 %v5923_v15 }
 0x961   :  { %6029 = vmatpush1.msra.mxu0 %v5922_v60 }
 0x962   :  { %6030 = vmatprep.subr.mxu0 %v5985_v12 }
 0x963   :  { %6031 = vmatpush2.msra.mxu0 %v5984_v16 }
 0x964   :  { %6032 = vmatprep.subr.mxu0 %v5983_v50 }
 0x965   :  { %6033 = vmatpush2.msra.mxu0 %v5982_v32 }
 0x966   :  { %6034 = vmatprep.subr.mxu0 %v5981_v22 }
 0x967   :  { %6035 = vmatpush2.msra.mxu0 %v5980_v52 }
 0x968   :  { %6036 = vmatprep.subr.mxu0 %v5979_v59 }
 0x969   :  { %6037 = vmatpush2.msra.mxu0 %v5978_v9 }
 0x96a   :  { %6038 = vmatprep.subr.mxu0 %v5977_v34 }
 0x96b   :  { %6039 = vmatpush2.msra.mxu0 %v5976_v37 }
 0x96c   :  { %6040 = vmatprep.subr.mxu0 %v5975_v0 }
 0x96d   :  { %6041 = vmatpush2.msra.mxu0 %v5974_v61 }
 0x96e   :  { %6042 = vmatprep.subr.mxu0 %v5973_v7 }
 0x96f   :  { %6043 = vmatpush2.msra.mxu0 %v5972_v33 }
 0x970   :  { %6044 = vmatprep.subr.mxu0 %v5971_v11 }
 0x971   :  { %6045 = vmatpush2.msra.mxu0 %v5970_v43 }
 0x972   :  { %6046 = vmatprep.subr.mxu0 %v5969_v29 }
 0x973   :  { %6047 = vmatpush2.msra.mxu0 %v5968_v39 }
 0x974   :  { %6048 = vmatprep.subr.mxu0 %v5967_v45 }
 0x975   :  { %6049 = vmatpush2.msra.mxu0 %v5966_v17 }
 0x976   :  { %6050 = vmatprep.subr.mxu0 %v5965_v42 }
 0x977   :  { %6051 = vmatpush2.msra.mxu0 %v5964_v46 }
 0x978   :  { %6052 = vmatprep.subr.mxu0 %v5963_v8 }
 0x979   :  { %6053 = vmatpush2.msra.mxu0 %v5962_v1 }
 0x97a   :  { %6054 = vmatprep.subr.mxu0 %v5961_v38 }
 0x97b   :  { %6055 = vmatpush2.msra.mxu0 %v5960_v27 }
 0x97c   :  { %6056 = vmatprep.subr.mxu0 %v5959_v63 }
 0x97d   :  { %6057 = vmatpush2.msra.mxu0 %v5958_v44 }
 0x97e   :  { %6058 = vmatprep.subr.mxu0 %v5957_v25 }
 0x97f   :  { %6059 = vmatpush2.msra.mxu0 %v5956_v28 }
 0x980   :  { %6060 = vmatprep.subr.mxu0 %v5955_v31 }
 0x981   :  { %6061 = vmatpush2.msra.mxu0 %v5954_v13 }
 0xa01   :  { %v5665_v36 = vpop.f32.mrf.mxu0 }
 0xa02   :  { %v5700_v14 = vmul.f32 %v5665_v36, %v9752_v53 }
 0xa03   :  { %v5667_v4 = vpop.f32.mrf.mxu0 }
 0xa04   :  { %v5712_v51 = vrot.slane %v5700_v14, 4  ;;  %v5701_v41 = vmul.f32 %v5667_v4, %v9753_v3 }
 0xa05   :  { %v5671_v58 = vpop.f32.mrf.mxu0 }
 0xa06   :  { %v5713_v55 = vadd.f32 %v5712_v51, %v5700_v14  ;;  %v5718_v48 = vrot.slane %v5701_v41, 4  ;;  %v5702_v18 = vmul.f32 %v5671_v58, %v9754_v21 }
 0xa07   :  { %v5673_v24 = vpop.f32.mrf.mxu0 }
 0xa08   :  { %v5714_v20 = vrot.slane %v5713_v55, 2  ;;  %v5719_v30 = vadd.f32 %v5718_v48, %v5701_v41  ;;  %v5724_v57 = vrot.slane %v5702_v18, 4  ;;  %v5703_v10 = vmul.f32 %v5673_v24, %v9755_v49 }
 0xa09   :  { %v5677_v23 = vpop.f32.mrf.mxu0 }
 0xa0a   :  { %v5715_v35 = vadd.f32 %v5714_v20, %v5713_v55  ;;  %v5720_v15 = vrot.slane %v5719_v30, 2  ;;  %v5725_v60 = vadd.f32 %v5724_v57, %v5702_v18  ;;  %v5730_v53 = vrot.slane %v5703_v10, 4 }
 0xa0b   :  { %v5704_v12 = vmul.f32 %v5677_v23, %v9756_v56  ;;  %v5679_v16 = vpop.f32.mrf.mxu0 }
 0xa0c   :  { %v5716_v3 = vrot.slane %v5715_v35, 1  ;;  %v5721_v50 = vadd.f32 %v5720_v15, %v5719_v30  ;;  %v5726_v32 = vrot.slane %v5725_v60, 2  ;;  %v5731_v22 = vadd.f32 %v5730_v53, %v5703_v10 }
 0xa0d   :  { %v5736_v52 = vrot.slane %v5704_v12, 4  ;;  %v5705_v21 = vmul.f32 %v5679_v16, %v9757_v2  ;;  %v5683_v59 = vpop.f32.mrf.mxu0 }
 0xa0e   :  { %v5722_v9 = vrot.slane %v5721_v50, 1  ;;  %v5727_v34 = vadd.f32 %v5726_v32, %v5725_v60  ;;  %v5732_v37 = vrot.slane %v5731_v22, 2  ;;  %v5717_v49 = vadd.f32 %v5716_v3, %v5715_v35 }
 0xa0f   :  { %v5737_v0 = vadd.f32 %v5736_v52, %v5704_v12  ;;  %v5742_v61 = vrot.slane %v5705_v21, 4  ;;  %v5706_v7 = vmul.f32 %v5683_v59, %v8098_v40  ;;  %v5685_v33 = vpop.f32.mrf.mxu0 }
 0xa10   :  { %v5723_v11 = vadd.f32 %v5722_v9, %v5721_v50  ;;  %v5728_v56 = vrot.slane %v5727_v34, 1  ;;  %v5733_v43 = vadd.f32 %v5732_v37, %v5731_v22  ;;  %v5707_v29 = vmul.f32 %v5685_v33, %v8101_v54 }
 0xa11   :  { %v5738_v39 = vrot.slane %v5737_v0, 2  ;;  %v5743_v45 = vadd.f32 %v5742_v61, %v5705_v21  ;;  %v5748_v17 = vrot.slane %v5706_v7, 4 }
 0xa12   :  { %v5796_v42 = vcombine.low %v5717_v49, %v5723_v11  ;;  %v5734_v2 = vrot.slane %v5733_v43, 1  ;;  %v5754_v46 = vrot.slane %v5707_v29, 4  ;;  %v5689_v8 = vpop.f32.mrf.mxu0  ;;  %v5729_v44 = vadd.f32 %v5728_v56, %v5727_v34 }
 0xa13   :  { %v5739_v1 = vadd.f32 %v5738_v39, %v5737_v0  ;;  %v5744_v38 = vrot.slane %v5743_v45, 2  ;;  %v5749_v27 = vadd.f32 %v5748_v17, %v5706_v7  ;;  %v5708_v63 = vmul.f32 %v5689_v8, %v9758_v26 }
 0xa14   :  { %v5803_v40 = vrot.slane %v5796_v42, %v8104_v19  ;;  %v5735_v25 = vadd.f32 %v5734_v2, %v5733_v43  ;;  %v5755_v28 = vadd.f32 %v5754_v46, %v5707_v29  ;;  %v5691_v31 = vpop.f32.mrf.mxu0 }
 0xa15   :  { %v5740_v13 = vrot.slane %v5739_v1, 1  ;;  %v5745_v54 = vadd.f32 %v5744_v38, %v5743_v45  ;;  %v5750_v36 = vrot.slane %v5749_v27, 2  ;;  %v5760_v14 = vrot.slane %v5708_v63, 4 }
 0xa16   :  { %v5810_v4 = vrot.slane %v5803_v40, %v8104_v19  ;;  %v5811_v51 = vcombine.low %v5729_v44, %v5735_v25  ;;  %v5756_v41 = vrot.slane %v5755_v28, 2  ;;  %v5709_v58 = vmul.f32 %v5691_v31, %v8116_v47  ;;  %v5695_v55 = vpop.f32.mrf.mxu0 }
 0xa17   :  { %v5741_v48 = vadd.f32 %v5740_v13, %v5739_v1  ;;  %v5746_v18 = vrot.slane %v5745_v54, 1  ;;  %v5751_v26 = vadd.f32 %v5750_v36, %v5749_v27  ;;  %v5761_v24 = vadd.f32 %v5760_v14, %v5708_v63 }
 0xa18   :  { %5893 = vst.msk [vmem:[#allocation2 + $0x7] ss:$8 sm:$0x3] %vm8107_vm1, %v5810_v4  ;;  %v5818_v20 = vrot.slane %v5811_v51, %v8104_v19  ;;  %v5757_v30 = vadd.f32 %v5756_v41, %v5755_v28  ;;  %v5766_v57 = vrot.slane %v5709_v58, 4  ;;  %v5710_v10 = vmul.f32 %v5695_v55, %v9759_v5  ;;  %v5697_v23 = vpop.f32.mrf.mxu0  ;;  %v5986_v55 = vld [vmem:[%s9526_s6] sm:$0x3] }
 0xa19   :  { %v5747_v35 = vadd.f32 %v5746_v18, %v5745_v54  ;;  %v5752_v15 = vrot.slane %v5751_v26, 1  ;;  %v5762_v60 = vrot.slane %v5761_v24, 2  ;;  %v5711_v47 = vmul.f32 %v5697_v23, %v9760_v6  ;;  %v9762_v18 = vld [vmem:[#allocation14_spill] sm:$0xff]  ;;  %s6891_s6 = smov [#allocation8]  }
 0xa1a   :  { %v5825_v53 = vrot.slane %v5818_v20, %v8104_v19  ;;  %v5758_v12 = vrot.slane %v5757_v30, 1  ;;  %v5767_v16 = vadd.f32 %v5766_v57, %v5709_v58  ;;  %v5772_v3 = vrot.slane %v5710_v10, 4  ;;  %s6116_s1 = sshll.u32 %s6891_s6, 4  ;;  %s6117_s1 = int_to_ptr.vmem [resolvable:$true] %s6116_s1 }
 0xa1b   :  { %v5826_v50 = vcombine.low %v5741_v48, %v5747_v35  ;;  %v5763_v32 = vadd.f32 %v5762_v60, %v5761_v24  ;;  %v5778_v22 = vrot.slane %v5711_v47, 4  ;;  %v5753_v52 = vadd.f32 %v5752_v15, %v5751_v26  ;;  %s6857_s5 = scalar_lea.vmem %s6117_s1, 1536  ;;  %p6862_p11 = scmp.lt.s32.totalorder %s6117_s1, %s6117_s1 }
 0xa1c   :  { %5896 = vst.msk [vmem:[#allocation2 + $0x17] ss:$8 sm:$0x3] %vm8107_vm1, %v5825_v53  ;;  %v5759_v21 = vadd.f32 %v5758_v12, %v5757_v30  ;;  %v5768_v5 = vrot.slane %v5767_v16, 2  ;;  %v5773_v59 = vadd.f32 %v5772_v3, %v5710_v10  ;;  %v5995_v26 = vrot.slane %v5986_v55, %v9762_v18  ;;  %p6858_p10 = scmp.ne.s32.totalorder %s6117_s1, %s6857_s5  ;;  %p6863_p12 = scmp.lt.s32.totalorder %s6857_s5, %s6857_s5 }
 0xa1d   :  { %v5833_v9 = vrot.slane %v5826_v50, %v8104_v19  ;;  %v5779_v34 = vadd.f32 %v5778_v22, %v5711_v47  ;;  %v5764_v6 = vrot.slane %v5763_v32, 1 }
 0xa1e   :  { %v5841_v37 = vcombine.low %v5753_v52, %v5759_v21  ;;  %v5769_v49 = vadd.f32 %v5768_v5, %v5767_v16  ;;  %v5774_v0 = vrot.slane %v5773_v59, 2  ;;  %p6864_p13 = por %p6863_p12, %p6862_p11 }
 0xa1f   :  { %v5840_v61 = vrot.slane %v5833_v9, %v8104_v19  ;;  %v5780_v7 = vrot.slane %v5779_v34, 2  ;;  %v5911_v33 = vld [vmem:[#allocation2 + $0x8] sm:$0xff]  ;;  %v5910_v11 = vld [vmem:[#allocation2] sm:$0xff]  ;;  %v5765_v17 = vadd.f32 %v5764_v6, %v5763_v32 }
 0xa20   :  { %v5848_v56 = vrot.slane %v5841_v37, %v8104_v19  ;;  %v5770_v43 = vrot.slane %v5769_v49, 1  ;;  %v5775_v29 = vadd.f32 %v5774_v0, %v5773_v59  ;;  %6062 = vmatprep.mubr.f32.mxu0 %v5911_v33  ;;  %p6865_p0 = pnand %p6864_p13, %p6858_p10 }
 0xa21   :  { %5899 = vst.msk [vmem:[#allocation2 + $0x27] ss:$8 sm:$0x3] %vm8107_vm1, %v5840_v61  ;;  %v5781_v39 = vadd.f32 %v5780_v7, %v5779_v34  ;;  %6063 = vmatmul.mubr.f32.vlgmr.msra.gmra.mxu0 %v5910_v11 }
 0xa22   :  { %v5855_v45 = vrot.slane %v5848_v56, %v8104_v19  ;;  %v5771_v42 = vadd.f32 %v5770_v43, %v5769_v49  ;;  %v5776_v2 = vrot.slane %v5775_v29, 1 }
 0xa23   :  { %v5782_v46 = vrot.slane %v5781_v39, 1  ;;  %v5913_v8 = vld [vmem:[#allocation2 + $0x18] sm:$0xff]  ;;  %v5912_v1 = vld [vmem:[#allocation2 + $0x10] sm:$0xff] }
 0xa24   :  { %5902 = vst.msk [vmem:[#allocation2 + $0x37] ss:$8 sm:$0x3] %vm8107_vm1, %v5855_v45  ;;  %v5856_v38 = vcombine.low %v5765_v17, %v5771_v42  ;;  %6068 = vmatprep.mubr.f32.mxu0 %v5913_v8  ;;  %v5777_v27 = vadd.f32 %v5776_v2, %v5775_v29 }
 0xa25   :  { %v5783_v63 = vadd.f32 %v5782_v46, %v5781_v39  ;;  %6069 = vmatmul.mubr.f32.gmra.mxu0 %v5912_v1 }
 0xa26   :  { %v5863_v40 = vrot.slane %v5856_v38, %v8104_v19 }
 0xa27   :  { %v5871_v44 = vcombine.low %v5777_v27, %v5783_v63 }
 0xa28   :  { %v5870_v25 = vrot.slane %v5863_v40, %v8104_v19  ;;  %v5915_v28 = vld [vmem:[#allocation2 + $0x28] sm:$0xff]  ;;  %v5914_v31 = vld [vmem:[#allocation2 + $0x20] sm:$0xff] }
 0xa29   :  { %v5878_v13 = vrot.slane %v5871_v44, %v8104_v19  ;;  %6074 = vmatprep.mubr.f32.mxu0 %v5915_v28 }
 0xa2a   :  { %5905 = vst.msk [vmem:[#allocation2 + $0x47] ss:$8 sm:$0x3] %vm8107_vm1, %v5870_v25  ;;  %6075 = vmatmul.mubr.f32.gmra.mxu0 %v5914_v31 }
 0xa2b   :  { %v5885_v54 = vrot.slane %v5878_v13, %v8104_v19  ;;  %v5917_v36 = vld [vmem:[#allocation2 + $0x38] sm:$0xff]  ;;  %v5916_v14 = vld [vmem:[#allocation2 + $0x30] sm:$0xff]  ;;  %v9761_v19 = vld [vmem:[#allocation13_spill] sm:$0xff] }
 0xa2c   :  { %6080 = vmatprep.mubr.f32.mxu0 %v5917_v36  ;;  %v5991_v48 = vrot.slane %v5986_v55, %v9761_v19 }
 0xa2d   :  { %5908 = vst.msk [vmem:[#allocation2 + $0x57] ss:$8 sm:$0x3] %vm8107_vm1, %v5885_v54 }
 0xa2e   :  { %6081 = vmatmul.mubr.f32.gmra.mxu0 %v5916_v14 }
 0xa31   :  { %v5919_v4 = vld [vmem:[#allocation2 + $0x48] sm:$0xff]  ;;  %v5918_v51 = vld [vmem:[#allocation2 + $0x40] sm:$0xff] }
 0xa32   :  { %6086 = vmatprep.mubr.f32.mxu0 %v5919_v4 }
 0xa33   :  { %6087 = vmatmul.mubr.f32.gmra.mxu0 %v5918_v51 }
 0xa34   :  { %v5921_v41 = vld [vmem:[#allocation2 + $0x58] sm:$0xff]  ;;  %v5920_v58 = vld [vmem:[#allocation2 + $0x50] sm:$0xff] }
 0xa35   :  { %6092 = vmatprep.mubr.f32.mxu0 %v5921_v41 }
 0xa37   :  { %6093 = vmatmul.mubr.f32.gmra.mxu0 %v5920_v58 }
 0xae1   :  { %v6064_v24 = vpop.f32.mrf.mxu0 }
 0xae2   :  { %v6065_v62 = vadd.f32 %v6064_v24, %v5991_v48 }
 0xae3   :  { %v6066_v20 = vpop.f32.mrf.mxu0 }
 0xae4   :  { %6099 = vst [vmem:[#allocation8] sm:$0xff] %v6065_v62  ;;  %v6067_v30 = vadd.f32 %v6066_v20, %v5995_v26 }
 0xae5   :  { %v6070_v57 = vpop.f32.mrf.mxu0 }
 0xae6   :  { %6100 = vst [vmem:[#allocation8 + $0x8] sm:$0xff] %v6067_v30  ;;  %v6071_v10 = vadd.f32 %v6070_v57, %v5991_v48 }
 0xae7   :  { %v6072_v23 = vpop.f32.mrf.mxu0 }
 0xae8   :  { %6101 = vst [vmem:[#allocation8 + $0x10] sm:$0xff] %v6071_v10  ;;  %v6073_v35 = vadd.f32 %v6072_v23, %v5995_v26 }
 0xaea   :  { %6102 = vst [vmem:[#allocation8 + $0x18] sm:$0xff] %v6073_v35  ;;  %v6076_v15 = vpop.f32.mrf.mxu0 }
 0xaeb   :  { %v6077_v60 = vadd.f32 %v6076_v15, %v5991_v48 }
 0xaec   :  { %v6078_v47 = vpop.f32.mrf.mxu0 }
 0xaed   :  { %6103 = vst [vmem:[#allocation8 + $0x20] sm:$0xff] %v6077_v60  ;;  %v6079_v53 = vadd.f32 %v6078_v47, %v5995_v26 }
 0xaee   :  { %v6082_v12 = vpop.f32.mrf.mxu0 }
 0xaef   :  { %6104 = vst [vmem:[#allocation8 + $0x28] sm:$0xff] %v6079_v53  ;;  %v6083_v16 = vadd.f32 %v6082_v12, %v5991_v48 }
 0xaf0   :  { %v6084_v3 = vpop.f32.mrf.mxu0 }
 0xaf1   :  { %6105 = vst [vmem:[#allocation8 + $0x30] sm:$0xff] %v6083_v16  ;;  %v6085_v50 = vadd.f32 %v6084_v3, %v5995_v26 }
 0xaf3   :  { %6106 = vst [vmem:[#allocation8 + $0x38] sm:$0xff] %v6085_v50  ;;  %v6088_v32 = vpop.f32.mrf.mxu0 }
 0xaf4   :  { %v6089_v22 = vadd.f32 %v6088_v32, %v5991_v48 }
 0xaf5   :  { %v6090_v52 = vpop.f32.mrf.mxu0 }
 0xaf6   :  { %6107 = vst [vmem:[#allocation8 + $0x40] sm:$0xff] %v6089_v22  ;;  %v6091_v21 = vadd.f32 %v6090_v52, %v5995_v26 }
 0xaf7   :  { %v6094_v5 = vpop.f32.mrf.mxu0 }
 0xaf8   :  { %6108 = vst [vmem:[#allocation8 + $0x48] sm:$0xff] %v6091_v21  ;;  %v6095_v59 = vadd.f32 %v6094_v5, %v5991_v48 }
 0xaf9   :  { %v6096_v9 = vpop.f32.mrf.mxu0 }
 0xafa   :  { %6109 = vst [vmem:[#allocation8 + $0x50] sm:$0xff] %v6095_v59  ;;  %v6097_v34 = vadd.f32 %v6096_v9, %v5995_v26 }
 0xafc   :  { %6110 = vst [vmem:[#allocation8 + $0x58] sm:$0xff] %v6097_v34 }
 0xafd   :  { %6868 = shalt.err (!%p6865_p0)
}
 0xafe   :  { %6122 = dma.vmem_to_hbm [thread:$0]  %s6117_s1, 1536, %s9527_s7, [#allocation5], %s6887_s11, %s6887_s11, %s6888_s12  }
 0xaff   :  { %6881 = dma.done.wait [#allocation5], 1536  }
 0xb00   :  { %6882 = vsyncadd [#allocation5], 4294965760 }
 0xb01   :  { %6126 = vsyncpa [#allocation4], 1 }
 0xb02   :  { %6127 = vsyncpa [#allocation7], 1 }
 0xb03   :  { %6128 = vsyncpa [#allocation5], 1 }

</bundles_post_ra>
